<compile_context>
chip_gen: v7x
topology: tpu7x:2x2x1
jax: 0.10.0
libtpu: 0.0.40
codegen_flags: <defaults>
</compile_context>

<pallas_src>
import functools

import numpy as np

import jax
import jax.numpy as jnp
from jax import lax
from jax.experimental import pallas as pl
from jax.experimental.pallas import tpu as pltpu

EPS = 1e-5


# ------------------------------------------------------- static (numpy) data

def _conv_tap_masks(H, W, G):
    """(9, G*H*W) 0/1 validity of tap t=3*dy+dx at every output position."""
    M = H * W
    hh = np.arange(M) // W
    ww = np.arange(M) % W
    m = np.zeros((9, G * M), np.float32)
    for t in range(9):
        dy, dx = t // 3 - 1, t % 3 - 1
        ok = ((hh + dy >= 0) & (hh + dy < H) & (ww + dx >= 0) & (ww + dx < W))
        m[t] = np.tile(ok.astype(np.float32), G)
    return m


def _pool_selection(H, W, G):
    """(L, G*H*W/4) 0/1 matrix picking each 2x2 window's top-left row."""
    M = H * W
    Ho, Wo = H // 2, W // 2
    L = G * M - W - 1
    sel = np.zeros((L, G * Ho * Wo), np.float32)
    for g in range(G):
        for i in range(Ho):
            for j in range(Wo):
                sel[g * M + 2 * i * W + 2 * j, g * Ho * Wo + i * Wo + j] = 1.0
    return sel


# --------------------------------------------------------- in-kernel helpers

def _conv_taps_sum(z, mask9, C, W, Mt):
    """d[c, r] = sum_t z[t*C + c, r + s_t] * mask9[t, r],  s_t = (dy-1)*W+(dx-1).

    z is the stack of per-tap 1x1-conv outputs (9*C, Mt); shifts are lane
    slices of a single lane-aligned zero-padded copy, invalid (zero-padded)
    taps are zeroed by the static 0/1 masks.
    """
    P = max(128, ((W + 1 + 127) // 128) * 128)          # lane-aligned guard
    pad = jnp.zeros((z.shape[0], P), z.dtype)
    zp = jnp.concatenate([pad, z, pad], axis=1)          # (9C, Mt + 2P)
    acc = None
    for t in range(9):
        s = (t // 3 - 1) * W + (t % 3 - 1)
        zt = zp[t * C:(t + 1) * C, P + s:P + s + Mt]     # (C, Mt)
        if t != 4:                                       # centre tap: always valid
            zt = zt * mask9[t:t + 1, :]
        acc = zt if acc is None else acc + zt
    return acc


# ----------------------------------------------------------------- kernel ---

def _dense_model_kernel(*refs, H, W, G, block_count):
    """Whole DenseModel forward for G images, activations in (C, pixels) layout."""
    (x_ref, ws_ref, wo_ref, s1_ref, b1_ref, wzb_ref, bz_ref,
     s3d_ref, b3d_ref, s3x_ref, b3x_ref, wt_ref) = refs[:12]
    mask_refs = refs[12:12 + block_count]
    sel_refs = refs[12 + block_count:12 + 2 * block_count]
    o_ref = refs[12 + 2 * block_count]

    C = wo_ref.shape[0]                  # 2*k growth channels
    Cin = x_ref.shape[1]

    def mxu(w_bf16, a_f32):              # bf16 MXU matmul, f32 accumulation
        return jnp.dot(w_bf16, a_f32.astype(jnp.bfloat16),
                       preferred_element_type=jnp.float32)

    # Gather this step's G images into one (Cin, G*H*W) slab (channels on
    # sublanes, flattened spatial/batch on lanes).
    imgs = [x_ref[g].astype(jnp.float32) for g in range(G)]
    x_in = imgs[0] if G == 1 else jnp.concatenate(imgs, axis=1)

    # start_net: Conv3x3, Cin == 1 — the per-tap K=1 "matmuls" stay on the VPU
    # (broadcast multiply), the tap sum reuses the shared helper.
    mask0 = mask_refs[0][...]
    ws = ws_ref[...]                                        # (9C, Cin) f32
    z0 = ws[:, 0:1] * x_in[0:1, :]
    for i in range(1, Cin):
        z0 = z0 + ws[:, i:i + 1] * x_in[i:i + 1, :]
    x = _conv_taps_sum(z0, mask0, C, W, G * H * W)          # (C, G*H*W)

    cur_h, cur_w = H, W
    for blk in range(block_count):
        Mt = G * cur_h * cur_w
        mask9 = mask0 if blk == 0 else mask_refs[blk][...]

        # dense_block: BN -> ReLU -> [1x1 conv + BN + 3x3 conv, pre-merged]
        a1 = jnp.maximum(x * s1_ref[blk] + b1_ref[blk], 0.0)            # (C, Mt)
        z = mxu(wzb_ref[blk], a1) + bz_ref[blk]                         # (9C, Mt)
        d = _conv_taps_sum(z, mask9, C, cur_w, Mt)                      # (C, Mt)

        # conv_layer on cat([d, x]): BN -> ReLU -> single fused 1x1 conv.
        ad = jnp.maximum(d * s3d_ref[blk] + b3d_ref[blk], 0.0)
        ax = jnp.maximum(x * s3x_ref[blk] + b3x_ref[blk], 0.0)
        cat = jnp.concatenate([ad, ax], axis=0)                         # (2C, Mt)
        t = mxu(wt_ref[blk], cat)                                       # (C, Mt)

        # MaxPool 2x2 / stride 2: 4-way max of lane-shifted slabs + exact
        # 0/1 bf16 selection matmul (precomputed selection matrix).
        L = Mt - cur_w - 1
        m = jnp.maximum(jnp.maximum(t[:, 0:L], t[:, 1:1 + L]),
                        jnp.maximum(t[:, cur_w:cur_w + L],
                                    t[:, cur_w + 1:cur_w + 1 + L]))
        x = jnp.dot(m.astype(jnp.bfloat16), sel_refs[blk][...],
                    preferred_element_type=jnp.float32)                 # (C, Mt/4)
        cur_h, cur_w = cur_h // 2, cur_w // 2

    # output_net: Conv1x1 C -> 1 (VPU multiply + sublane reduction, off MXU).
    out = jnp.sum(x * wo_ref[...], axis=0, keepdims=True)   # (1, G*hf*wf)
    o_ref[0] = out.astype(o_ref.dtype)


# ----------------------------------------------------------------- wrapper --

def _full_spec(a):
    return pl.BlockSpec(a.shape, lambda n, _nd=a.ndim: (0,) * _nd)


def _default_images_per_step(n):
    # v7x has two TensorCores: keep one image per grid step so the "parallel"
    # batch grid is sharded across them.  Single-TC chips (v5e/v6e) prefer the
    # whole batch in one step (bigger matmul N, no per-step grid overhead).
    try:
        kind = jax.devices()[0].device_kind.lower()
    except Exception:
        kind = ""
    if ("v7" in kind or "7x" in kind) and n > 1:
        return 1
    return n


def dense_model_forward(x_nchw, kparams, *, block_count=3, images_per_step=None):
    """Matches DenseModel.forward (eval-mode BN); input NCHW, output 1-D."""
    N, Cin, H, W = x_nchw.shape
    assert H % (1 << block_count) == 0 and W % (1 << block_count) == 0, \
        "spatial dims must be divisible by 2**block_count"
    G = images_per_step if images_per_step is not None else _default_images_per_step(N)
    assert N % G == 0
    C = kparams["w_out"].shape[0]

    # NCHW -> (N, Cin, H*W): already channels-on-sublanes / pixels-on-lanes.
    x3 = x_nchw.reshape(N, Cin, H * W).astype(jnp.float32)

    # Static 0/1 tap-validity masks and pool-selection matrices per pyramid
    # level, precomputed at trace time (never rebuilt inside the kernel).
    masks, sels = [], []
    hh, ww = H, W
    for _ in range(block_count):
        masks.append(jnp.asarray(_conv_tap_masks(hh, ww, G)))
        sels.append(jnp.asarray(_pool_selection(hh, ww, G), dtype=jnp.bfloat16))
        hh //= 2
        ww //= 2
    hf_wf = hh * ww

    weights = [kparams[k] for k in ("w_start", "w_out", "s1", "b1", "wzb", "bz",
                                    "s3d", "b3d", "s3x", "b3x", "wt")]
    operands = [x3] + weights + masks + sels

    # Advisory cost estimate (instruction-bound kernel; helps XLA scheduling).
    flops = 2 * 9 * C * G * H * W
    mt = G * H * W
    for _ in range(block_count):
        flops += 2 * mt * (9 * C * C + 9 * C + 2 * C * C + C * (mt // 4))
        mt //= 4
    bytes_accessed = sum(int(a.size) * a.dtype.itemsize for a in operands)
    bytes_accessed += 4 * N * hf_wf

    out = pl.pallas_call(
        functools.partial(_dense_model_kernel, H=H, W=W, G=G,
                          block_count=block_count),
        out_shape=jax.ShapeDtypeStruct((N // G, 1, G * hf_wf), jnp.float32),
        grid=(N // G,),
        in_specs=[pl.BlockSpec((G, Cin, H * W), lambda n: (n, 0, 0))]
                 + [_full_spec(a) for a in weights + masks + sels],
        out_specs=pl.BlockSpec((1, 1, G * hf_wf), lambda n: (n, 0, 0)),
        compiler_params=pltpu.CompilerParams(
            dimension_semantics=("parallel",)),
        cost_estimate=pl.CostEstimate(flops=int(flops), transcendentals=0,
                                      bytes_accessed=int(bytes_accessed)),
    )(*operands)
    return out.reshape(-1)       # == x.view(-1): out_channel == 1, NCHW order


# ------------------------------------------------------------------ params --

def make_raw_params(key, *, in_channel=1, block_count=3, k=12):
    """Deterministic synthetic PyTorch-layout parameters (kaiming convs, BN stats)."""
    C = 2 * k
    keys = iter(jax.random.split(key, 64))

    def conv_w(cout, cin, kh, kw):
        std = (2.0 / (cin * kh * kw)) ** 0.5
        return std * jax.random.normal(next(keys), (cout, cin, kh, kw), jnp.float32)

    def bn(c):
        gamma = 1.0 + 0.1 * jax.random.normal(next(keys), (c,), jnp.float32)
        beta = 0.1 * jax.random.normal(next(keys), (c,), jnp.float32)
        mean = 0.1 * jax.random.normal(next(keys), (c,), jnp.float32)
        var = 1.0 + 0.1 * jax.random.uniform(next(keys), (c,), jnp.float32)
        return (gamma, beta, mean, var)

    raw = dict(w_start=conv_w(C, in_channel, 3, 3), w_out=conv_w(1, C, 1, 1),
               bn1=[], w1=[], bn2=[], w3=[], bn3=[], wt=[])
    for _ in range(block_count):
        raw["bn1"].append(bn(C))
        raw["w1"].append(conv_w(4 * C, C, 1, 1))
        raw["bn2"].append(bn(4 * C))
        raw["w3"].append(conv_w(C, 4 * C, 3, 3))
        raw["bn3"].append(bn(2 * C))
        raw["wt"].append(conv_w(C, 2 * C, 1, 1))
    return raw


def prepare_kernel_params(raw, *, block_count=3):
    """Fold eval-mode BN and merge 1x1-conv + BN + 3x3-conv into one weight."""
    C = raw["w_start"].shape[0]

    def fold(bn):
        g, b, m, v = bn
        s = g * lax.rsqrt(v + EPS)
        return s, b - m * s

    def tap_stack(w):        # (Cout, Cin, 3, 3) -> (9*Cout, Cin), rows = [t, cout]
        return jnp.transpose(w, (2, 3, 0, 1)).reshape(9 * w.shape[0], w.shape[1])

    s1, b1, wzb, bz = [], [], [], []
    s3d, b3d, s3x, b3x, wt = [], [], [], [], []
    for blk in range(block_count):
        _s1, _b1 = fold(raw["bn1"][blk])
        _s2, _b2 = fold(raw["bn2"][blk])
        w1 = raw["w1"][blk][:, :, 0, 0]                 # (4C, C)
        w3s = tap_stack(raw["w3"][blk])                 # (9C, 4C)
        w1eff = _s2[:, None] * w1                       # BN2 scale folded (exact)
        s1.append(_s1[:, None]); b1.append(_b1[:, None])
        wzb.append((w3s @ w1eff).astype(jnp.bfloat16))  # merged (9C, C) weight
        bz.append(w3s @ _b2[:, None])                   # merged (9C, 1) bias, f32
        _s3, _b3 = fold(raw["bn3"][blk])
        s3d.append(_s3[:C, None]); b3d.append(_b3[:C, None])
        s3x.append(_s3[C:, None]); b3x.append(_b3[C:, None])
        wt.append(raw["wt"][blk][:, :, 0, 0].astype(jnp.bfloat16))   # (C, 2C)

    return dict(
        w_start=tap_stack(raw["w_start"]),              # (9C, Cin) f32 (VPU path)
        w_out=raw["w_out"][0, :, 0, 0][:, None],        # (C, 1) f32
        s1=jnp.stack(s1), b1=jnp.stack(b1),
        wzb=jnp.stack(wzb), bz=jnp.stack(bz),
        s3d=jnp.stack(s3d), b3d=jnp.stack(b3d),
        s3x=jnp.stack(s3x), b3x=jnp.stack(b3x),
        wt=jnp.stack(wt),
    )


# --------------------------------------------------------------- reference --

def _reference_forward(x_nchw, raw, *, block_count=3):
    """Plain-JAX f32 reference of the (eval-mode) PyTorch forward pass."""
    x = jnp.transpose(x_nchw, (0, 2, 3, 1)).astype(jnp.float32)    # NHWC
    dn = ("NHWC", "HWIO", "NHWC")

    def bn(z, p):
        g, b, m, v = p
        return (z - m) * (g * lax.rsqrt(v + EPS)) + b

    def conv(z, w_oihw):
        w = jnp.transpose(w_oihw, (2, 3, 1, 0))                    # HWIO
        return lax.conv_general_dilated(z, w, (1, 1), "SAME",
                                        dimension_numbers=dn)

    x = conv(x, raw["w_start"])
    for b in range(block_count):
        h = jnp.maximum(bn(x, raw["bn1"][b]), 0.0)
        h = conv(h, raw["w1"][b])
        h = bn(h, raw["bn2"][b])
        d = conv(h, raw["w3"][b])
        cat = jnp.concatenate([d, x], axis=-1)
        cat = jnp.maximum(bn(cat, raw["bn3"][b]), 0.0)
        t = conv(cat, raw["wt"][b])
        x = lax.reduce_window(t, -jnp.inf, lax.max,
                              (1, 2, 2, 1), (1, 2, 2, 1), "VALID")
    out = conv(x, raw["w_out"])                                    # (N, hf, wf, 1)
    return jnp.transpose(out, (0, 3, 1, 2)).reshape(-1)


# ----------------------------------------------------------------- main -----

if __name__ == "__main__":
    key = jax.random.PRNGKey(0)
    pkey, xkey = jax.random.split(key)

    # Small shapes: batch=2, in_channel=1, image_size=16 (halved 3x -> 2x2).
    raw = make_raw_params(pkey, in_channel=1, block_count=3, k=12)
    kparams = prepare_kernel_params(raw, block_count=3)
    x = jax.random.normal(xkey, (2, 1, 16, 16), jnp.float32)    # NCHW, like PyTorch

    fwd = jax.jit(functools.partial(dense_model_forward, block_count=3))
    out = jax.block_until_ready(fwd(x, kparams))

    assert out.shape == (2 * 2 * 2,), out.shape                 # (N * hf * wf,)
    assert bool(jnp.all(jnp.isfinite(out)))

    # Numerical self-check against a plain-JAX f32 reference built from the raw
    # (un-folded, un-merged) parameters.  Tolerance covers the bf16 MXU
    # operands inside the kernel (weights, activations, pool selection).
    ref = _reference_forward(x, raw, block_count=3)
    rel = jnp.linalg.norm(out - ref) / (jnp.linalg.norm(ref) + 1e-6)
    assert bool(rel < 5e-2), float(rel)

    print("KERNEL_OK")
</pallas_src>

<mosaic_0001>
module attributes {stable_mosaic.version = 11 : i64} {
  func.func @_dense_model_kernel(%arg0: i32, %arg1: memref<2x1x256xf32, #tpu.memory_space<vmem>>, %arg2: memref<216x1xf32, #tpu.memory_space<vmem>>, %arg3: memref<24x1xf32, #tpu.memory_space<vmem>>, %arg4: memref<3x24x1xf32, #tpu.memory_space<vmem>>, %arg5: memref<3x24x1xf32, #tpu.memory_space<vmem>>, %arg6: memref<3x216x24xbf16, #tpu.memory_space<vmem>>, %arg7: memref<3x216x1xf32, #tpu.memory_space<vmem>>, %arg8: memref<3x24x1xf32, #tpu.memory_space<vmem>>, %arg9: memref<3x24x1xf32, #tpu.memory_space<vmem>>, %arg10: memref<3x24x1xf32, #tpu.memory_space<vmem>>, %arg11: memref<3x24x1xf32, #tpu.memory_space<vmem>>, %arg12: memref<3x24x48xbf16, #tpu.memory_space<vmem>>, %arg13: memref<9x512xf32, #tpu.memory_space<vmem>>, %arg14: memref<9x128xf32, #tpu.memory_space<vmem>>, %arg15: memref<9x32xf32, #tpu.memory_space<vmem>>, %arg16: memref<495x128xbf16, #tpu.memory_space<vmem>>, %arg17: memref<119x32xbf16, #tpu.memory_space<vmem>>, %arg18: memref<27x8xbf16, #tpu.memory_space<vmem>>, %arg19: memref<1x1x8xf32, #tpu.memory_space<vmem>>) attributes {dimension_semantics = [#tpu.dimension_semantics<parallel>], iteration_bounds = array<i64: 1>, scalar_prefetch = 0 : i64, scratch_operands = 0 : i64, tpu.core_type = #tpu.core_type<tc>, window_params = [{transform_indices = @transform_0, window_bounds = array<i64: 2, 1, 256>}, {pipeline_mode = #tpu.pipeline_mode<synchronous>, transform_indices = @transform_1, window_bounds = array<i64: 216, 1>}, {pipeline_mode = #tpu.pipeline_mode<synchronous>, transform_indices = @transform_2, window_bounds = array<i64: 24, 1>}, {pipeline_mode = #tpu.pipeline_mode<synchronous>, transform_indices = @transform_3, window_bounds = array<i64: 3, 24, 1>}, {pipeline_mode = #tpu.pipeline_mode<synchronous>, transform_indices = @transform_4, window_bounds = array<i64: 3, 24, 1>}, {pipeline_mode = #tpu.pipeline_mode<synchronous>, transform_indices = @transform_5, window_bounds = array<i64: 3, 216, 24>}, {pipeline_mode = #tpu.pipeline_mode<synchronous>, transform_indices = @transform_6, window_bounds = array<i64: 3, 216, 1>}, {pipeline_mode = #tpu.pipeline_mode<synchronous>, transform_indices = @transform_7, window_bounds = array<i64: 3, 24, 1>}, {pipeline_mode = #tpu.pipeline_mode<synchronous>, transform_indices = @transform_8, window_bounds = array<i64: 3, 24, 1>}, {pipeline_mode = #tpu.pipeline_mode<synchronous>, transform_indices = @transform_9, window_bounds = array<i64: 3, 24, 1>}, {pipeline_mode = #tpu.pipeline_mode<synchronous>, transform_indices = @transform_10, window_bounds = array<i64: 3, 24, 1>}, {pipeline_mode = #tpu.pipeline_mode<synchronous>, transform_indices = @transform_11, window_bounds = array<i64: 3, 24, 48>}, {pipeline_mode = #tpu.pipeline_mode<synchronous>, transform_indices = @transform_12, window_bounds = array<i64: 9, 512>}, {pipeline_mode = #tpu.pipeline_mode<synchronous>, transform_indices = @transform_13, window_bounds = array<i64: 9, 128>}, {pipeline_mode = #tpu.pipeline_mode<synchronous>, transform_indices = @transform_14, window_bounds = array<i64: 9, 32>}, {pipeline_mode = #tpu.pipeline_mode<synchronous>, transform_indices = @transform_15, window_bounds = array<i64: 495, 128>}, {pipeline_mode = #tpu.pipeline_mode<synchronous>, transform_indices = @transform_16, window_bounds = array<i64: 119, 32>}, {pipeline_mode = #tpu.pipeline_mode<synchronous>, transform_indices = @transform_17, window_bounds = array<i64: 27, 8>}, {transform_indices = @transform_18, window_bounds = array<i64: 1, 1, 8>}]} {
    %c0 = arith.constant 0 : index
    %c0_0 = arith.constant 0 : index
    %c0_1 = arith.constant 0 : index
    %0 = vector.load %arg1[%c0, %c0_0, %c0_1] : memref<2x1x256xf32, #tpu.memory_space<vmem>>, vector<1x1x256xf32>
    %1 = vector.shape_cast %0 : vector<1x1x256xf32> to vector<1x256xf32>
    %c1 = arith.constant 1 : index
    %c0_2 = arith.constant 0 : index
    %c0_3 = arith.constant 0 : index
    %2 = vector.load %arg1[%c1, %c0_2, %c0_3] : memref<2x1x256xf32, #tpu.memory_space<vmem>>, vector<1x1x256xf32>
    %3 = vector.shape_cast %2 : vector<1x1x256xf32> to vector<1x256xf32>
    %4 = tpu.concatenate %1, %3 in 1 : vector<1x256xf32>, vector<1x256xf32> -> vector<1x512xf32>
    %c0_4 = arith.constant 0 : index
    %c0_5 = arith.constant 0 : index
    %5 = vector.load %arg13[%c0_4, %c0_5] : memref<9x512xf32, #tpu.memory_space<vmem>>, vector<9x512xf32>
    %c0_6 = arith.constant 0 : index
    %c0_7 = arith.constant 0 : index
    %6 = vector.load %arg2[%c0_6, %c0_7] : memref<216x1xf32, #tpu.memory_space<vmem>>, vector<216x1xf32>
    %7 = vector.broadcast %6 : vector<216x1xf32> to vector<216x512xf32>
    %8 = vector.broadcast %4 : vector<1x512xf32> to vector<216x512xf32>
    %9 = arith.mulf %7, %8 : vector<216x512xf32>
    %cst = arith.constant 0.000000e+00 : f32
    %10 = vector.broadcast %cst : f32 to vector<216x128xf32>
    %11 = tpu.concatenate %10, %9, %10 in 1 : vector<216x128xf32>, vector<216x512xf32>, vector<216x128xf32> -> vector<216x768xf32>
    %12 = vector.extract_strided_slice %11 {offsets = [0, 111], sizes = [24, 512], strides = [1, 1]} : vector<216x768xf32> to vector<24x512xf32>
    %13 = vector.extract_strided_slice %5 {offsets = [0, 0], sizes = [1, 512], strides = [1, 1]} : vector<9x512xf32> to vector<1x512xf32>
    %14 = vector.broadcast %13 : vector<1x512xf32> to vector<24x512xf32>
    %15 = arith.mulf %12, %14 : vector<24x512xf32>
    %16 = vector.extract_strided_slice %11 {offsets = [24, 112], sizes = [24, 512], strides = [1, 1]} : vector<216x768xf32> to vector<24x512xf32>
    %17 = vector.extract_strided_slice %5 {offsets = [1, 0], sizes = [1, 512], strides = [1, 1]} : vector<9x512xf32> to vector<1x512xf32>
    %18 = vector.broadcast %17 : vector<1x512xf32> to vector<24x512xf32>
    %19 = arith.mulf %16, %18 : vector<24x512xf32>
    %20 = arith.addf %15, %19 : vector<24x512xf32>
    %21 = vector.extract_strided_slice %11 {offsets = [48, 113], sizes = [24, 512], strides = [1, 1]} : vector<216x768xf32> to vector<24x512xf32>
    %22 = vector.extract_strided_slice %5 {offsets = [2, 0], sizes = [1, 512], strides = [1, 1]} : vector<9x512xf32> to vector<1x512xf32>
    %23 = vector.broadcast %22 : vector<1x512xf32> to vector<24x512xf32>
    %24 = arith.mulf %21, %23 : vector<24x512xf32>
    %25 = arith.addf %20, %24 : vector<24x512xf32>
    %26 = vector.extract_strided_slice %11 {offsets = [72, 127], sizes = [24, 512], strides = [1, 1]} : vector<216x768xf32> to vector<24x512xf32>
    %27 = vector.extract_strided_slice %5 {offsets = [3, 0], sizes = [1, 512], strides = [1, 1]} : vector<9x512xf32> to vector<1x512xf32>
    %28 = vector.broadcast %27 : vector<1x512xf32> to vector<24x512xf32>
    %29 = arith.mulf %26, %28 : vector<24x512xf32>
    %30 = arith.addf %25, %29 : vector<24x512xf32>
    %31 = vector.extract_strided_slice %11 {offsets = [96, 128], sizes = [24, 512], strides = [1, 1]} : vector<216x768xf32> to vector<24x512xf32>
    %32 = arith.addf %30, %31 : vector<24x512xf32>
    %33 = vector.extract_strided_slice %11 {offsets = [120, 129], sizes = [24, 512], strides = [1, 1]} : vector<216x768xf32> to vector<24x512xf32>
    %34 = vector.extract_strided_slice %5 {offsets = [5, 0], sizes = [1, 512], strides = [1, 1]} : vector<9x512xf32> to vector<1x512xf32>
    %35 = vector.broadcast %34 : vector<1x512xf32> to vector<24x512xf32>
    %36 = arith.mulf %33, %35 : vector<24x512xf32>
    %37 = arith.addf %32, %36 : vector<24x512xf32>
    %38 = vector.extract_strided_slice %11 {offsets = [144, 143], sizes = [24, 512], strides = [1, 1]} : vector<216x768xf32> to vector<24x512xf32>
    %39 = vector.extract_strided_slice %5 {offsets = [6, 0], sizes = [1, 512], strides = [1, 1]} : vector<9x512xf32> to vector<1x512xf32>
    %40 = vector.broadcast %39 : vector<1x512xf32> to vector<24x512xf32>
    %41 = arith.mulf %38, %40 : vector<24x512xf32>
    %42 = arith.addf %37, %41 : vector<24x512xf32>
    %43 = vector.extract_strided_slice %11 {offsets = [168, 144], sizes = [24, 512], strides = [1, 1]} : vector<216x768xf32> to vector<24x512xf32>
    %44 = vector.extract_strided_slice %5 {offsets = [7, 0], sizes = [1, 512], strides = [1, 1]} : vector<9x512xf32> to vector<1x512xf32>
    %45 = vector.broadcast %44 : vector<1x512xf32> to vector<24x512xf32>
    %46 = arith.mulf %43, %45 : vector<24x512xf32>
    %47 = arith.addf %42, %46 : vector<24x512xf32>
    %48 = vector.extract_strided_slice %11 {offsets = [192, 145], sizes = [24, 512], strides = [1, 1]} : vector<216x768xf32> to vector<24x512xf32>
    %49 = vector.extract_strided_slice %5 {offsets = [8, 0], sizes = [1, 512], strides = [1, 1]} : vector<9x512xf32> to vector<1x512xf32>
    %50 = vector.broadcast %49 : vector<1x512xf32> to vector<24x512xf32>
    %51 = arith.mulf %48, %50 : vector<24x512xf32>
    %52 = arith.addf %47, %51 : vector<24x512xf32>
    %c0_8 = arith.constant 0 : index
    %c0_9 = arith.constant 0 : index
    %c0_10 = arith.constant 0 : index
    %53 = vector.load %arg4[%c0_8, %c0_9, %c0_10] : memref<3x24x1xf32, #tpu.memory_space<vmem>>, vector<1x24x1xf32>
    %54 = vector.shape_cast %53 : vector<1x24x1xf32> to vector<24x1xf32>
    %55 = vector.broadcast %54 : vector<24x1xf32> to vector<24x512xf32>
    %56 = arith.mulf %52, %55 : vector<24x512xf32>
    %c0_11 = arith.constant 0 : index
    %c0_12 = arith.constant 0 : index
    %c0_13 = arith.constant 0 : index
    %57 = vector.load %arg5[%c0_11, %c0_12, %c0_13] : memref<3x24x1xf32, #tpu.memory_space<vmem>>, vector<1x24x1xf32>
    %58 = vector.shape_cast %57 : vector<1x24x1xf32> to vector<24x1xf32>
    %59 = vector.broadcast %58 : vector<24x1xf32> to vector<24x512xf32>
    %60 = arith.addf %56, %59 : vector<24x512xf32>
    %cst_14 = arith.constant 0.000000e+00 : f32
    %61 = vector.broadcast %cst_14 : f32 to vector<24x512xf32>
    %62 = arith.maximumf %60, %61 : vector<24x512xf32>
    %c0_15 = arith.constant 0 : index
    %c0_16 = arith.constant 0 : index
    %c0_17 = arith.constant 0 : index
    %63 = vector.load %arg6[%c0_15, %c0_16, %c0_17] : memref<3x216x24xbf16, #tpu.memory_space<vmem>>, vector<1x216x24xbf16>
    %64 = vector.shape_cast %63 : vector<1x216x24xbf16> to vector<216x24xbf16>
    %65 = arith.truncf %62 : vector<24x512xf32> to vector<24x512xbf16>
    %cst_18 = arith.constant dense<0.000000e+00> : vector<216x512xf32>
    %66 = tpu.matmul %64, %65, %cst_18 {dimension_numbers = #tpu.dot_dimension_numbers<[1], [0], [0], [1], [0, 0, 1, 1], [], []>} : vector<216x24xbf16>, vector<24x512xbf16>, vector<216x512xf32> -> vector<216x512xf32>
    %c0_19 = arith.constant 0 : index
    %c0_20 = arith.constant 0 : index
    %c0_21 = arith.constant 0 : index
    %67 = vector.load %arg7[%c0_19, %c0_20, %c0_21] : memref<3x216x1xf32, #tpu.memory_space<vmem>>, vector<1x216x1xf32>
    %68 = vector.shape_cast %67 : vector<1x216x1xf32> to vector<216x1xf32>
    %69 = vector.broadcast %68 : vector<216x1xf32> to vector<216x512xf32>
    %70 = arith.addf %66, %69 : vector<216x512xf32>
    %cst_22 = arith.constant 0.000000e+00 : f32
    %71 = vector.broadcast %cst_22 : f32 to vector<216x128xf32>
    %72 = tpu.concatenate %71, %70, %71 in 1 : vector<216x128xf32>, vector<216x512xf32>, vector<216x128xf32> -> vector<216x768xf32>
    %73 = vector.extract_strided_slice %72 {offsets = [0, 111], sizes = [24, 512], strides = [1, 1]} : vector<216x768xf32> to vector<24x512xf32>
    %74 = vector.extract_strided_slice %5 {offsets = [0, 0], sizes = [1, 512], strides = [1, 1]} : vector<9x512xf32> to vector<1x512xf32>
    %75 = vector.broadcast %74 : vector<1x512xf32> to vector<24x512xf32>
    %76 = arith.mulf %73, %75 : vector<24x512xf32>
    %77 = vector.extract_strided_slice %72 {offsets = [24, 112], sizes = [24, 512], strides = [1, 1]} : vector<216x768xf32> to vector<24x512xf32>
    %78 = vector.extract_strided_slice %5 {offsets = [1, 0], sizes = [1, 512], strides = [1, 1]} : vector<9x512xf32> to vector<1x512xf32>
    %79 = vector.broadcast %78 : vector<1x512xf32> to vector<24x512xf32>
    %80 = arith.mulf %77, %79 : vector<24x512xf32>
    %81 = arith.addf %76, %80 : vector<24x512xf32>
    %82 = vector.extract_strided_slice %72 {offsets = [48, 113], sizes = [24, 512], strides = [1, 1]} : vector<216x768xf32> to vector<24x512xf32>
    %83 = vector.extract_strided_slice %5 {offsets = [2, 0], sizes = [1, 512], strides = [1, 1]} : vector<9x512xf32> to vector<1x512xf32>
    %84 = vector.broadcast %83 : vector<1x512xf32> to vector<24x512xf32>
    %85 = arith.mulf %82, %84 : vector<24x512xf32>
    %86 = arith.addf %81, %85 : vector<24x512xf32>
    %87 = vector.extract_strided_slice %72 {offsets = [72, 127], sizes = [24, 512], strides = [1, 1]} : vector<216x768xf32> to vector<24x512xf32>
    %88 = vector.extract_strided_slice %5 {offsets = [3, 0], sizes = [1, 512], strides = [1, 1]} : vector<9x512xf32> to vector<1x512xf32>
    %89 = vector.broadcast %88 : vector<1x512xf32> to vector<24x512xf32>
    %90 = arith.mulf %87, %89 : vector<24x512xf32>
    %91 = arith.addf %86, %90 : vector<24x512xf32>
    %92 = vector.extract_strided_slice %72 {offsets = [96, 128], sizes = [24, 512], strides = [1, 1]} : vector<216x768xf32> to vector<24x512xf32>
    %93 = arith.addf %91, %92 : vector<24x512xf32>
    %94 = vector.extract_strided_slice %72 {offsets = [120, 129], sizes = [24, 512], strides = [1, 1]} : vector<216x768xf32> to vector<24x512xf32>
    %95 = vector.extract_strided_slice %5 {offsets = [5, 0], sizes = [1, 512], strides = [1, 1]} : vector<9x512xf32> to vector<1x512xf32>
    %96 = vector.broadcast %95 : vector<1x512xf32> to vector<24x512xf32>
    %97 = arith.mulf %94, %96 : vector<24x512xf32>
    %98 = arith.addf %93, %97 : vector<24x512xf32>
    %99 = vector.extract_strided_slice %72 {offsets = [144, 143], sizes = [24, 512], strides = [1, 1]} : vector<216x768xf32> to vector<24x512xf32>
    %100 = vector.extract_strided_slice %5 {offsets = [6, 0], sizes = [1, 512], strides = [1, 1]} : vector<9x512xf32> to vector<1x512xf32>
    %101 = vector.broadcast %100 : vector<1x512xf32> to vector<24x512xf32>
    %102 = arith.mulf %99, %101 : vector<24x512xf32>
    %103 = arith.addf %98, %102 : vector<24x512xf32>
    %104 = vector.extract_strided_slice %72 {offsets = [168, 144], sizes = [24, 512], strides = [1, 1]} : vector<216x768xf32> to vector<24x512xf32>
    %105 = vector.extract_strided_slice %5 {offsets = [7, 0], sizes = [1, 512], strides = [1, 1]} : vector<9x512xf32> to vector<1x512xf32>
    %106 = vector.broadcast %105 : vector<1x512xf32> to vector<24x512xf32>
    %107 = arith.mulf %104, %106 : vector<24x512xf32>
    %108 = arith.addf %103, %107 : vector<24x512xf32>
    %109 = vector.extract_strided_slice %72 {offsets = [192, 145], sizes = [24, 512], strides = [1, 1]} : vector<216x768xf32> to vector<24x512xf32>
    %110 = vector.extract_strided_slice %5 {offsets = [8, 0], sizes = [1, 512], strides = [1, 1]} : vector<9x512xf32> to vector<1x512xf32>
    %111 = vector.broadcast %110 : vector<1x512xf32> to vector<24x512xf32>
    %112 = arith.mulf %109, %111 : vector<24x512xf32>
    %113 = arith.addf %108, %112 : vector<24x512xf32>
    %c0_23 = arith.constant 0 : index
    %c0_24 = arith.constant 0 : index
    %c0_25 = arith.constant 0 : index
    %114 = vector.load %arg8[%c0_23, %c0_24, %c0_25] : memref<3x24x1xf32, #tpu.memory_space<vmem>>, vector<1x24x1xf32>
    %115 = vector.shape_cast %114 : vector<1x24x1xf32> to vector<24x1xf32>
    %116 = vector.broadcast %115 : vector<24x1xf32> to vector<24x512xf32>
    %117 = arith.mulf %113, %116 : vector<24x512xf32>
    %c0_26 = arith.constant 0 : index
    %c0_27 = arith.constant 0 : index
    %c0_28 = arith.constant 0 : index
    %118 = vector.load %arg9[%c0_26, %c0_27, %c0_28] : memref<3x24x1xf32, #tpu.memory_space<vmem>>, vector<1x24x1xf32>
    %119 = vector.shape_cast %118 : vector<1x24x1xf32> to vector<24x1xf32>
    %120 = vector.broadcast %119 : vector<24x1xf32> to vector<24x512xf32>
    %121 = arith.addf %117, %120 : vector<24x512xf32>
    %cst_29 = arith.constant 0.000000e+00 : f32
    %122 = vector.broadcast %cst_29 : f32 to vector<24x512xf32>
    %123 = arith.maximumf %121, %122 : vector<24x512xf32>
    %c0_30 = arith.constant 0 : index
    %c0_31 = arith.constant 0 : index
    %c0_32 = arith.constant 0 : index
    %124 = vector.load %arg10[%c0_30, %c0_31, %c0_32] : memref<3x24x1xf32, #tpu.memory_space<vmem>>, vector<1x24x1xf32>
    %125 = vector.shape_cast %124 : vector<1x24x1xf32> to vector<24x1xf32>
    %126 = vector.broadcast %125 : vector<24x1xf32> to vector<24x512xf32>
    %127 = arith.mulf %52, %126 : vector<24x512xf32>
    %c0_33 = arith.constant 0 : index
    %c0_34 = arith.constant 0 : index
    %c0_35 = arith.constant 0 : index
    %128 = vector.load %arg11[%c0_33, %c0_34, %c0_35] : memref<3x24x1xf32, #tpu.memory_space<vmem>>, vector<1x24x1xf32>
    %129 = vector.shape_cast %128 : vector<1x24x1xf32> to vector<24x1xf32>
    %130 = vector.broadcast %129 : vector<24x1xf32> to vector<24x512xf32>
    %131 = arith.addf %127, %130 : vector<24x512xf32>
    %cst_36 = arith.constant 0.000000e+00 : f32
    %132 = vector.broadcast %cst_36 : f32 to vector<24x512xf32>
    %133 = arith.maximumf %131, %132 : vector<24x512xf32>
    %134 = tpu.concatenate %123, %133 in 0 : vector<24x512xf32>, vector<24x512xf32> -> vector<48x512xf32>
    %c0_37 = arith.constant 0 : index
    %c0_38 = arith.constant 0 : index
    %c0_39 = arith.constant 0 : index
    %135 = vector.load %arg12[%c0_37, %c0_38, %c0_39] : memref<3x24x48xbf16, #tpu.memory_space<vmem>>, vector<1x24x48xbf16>
    %136 = vector.shape_cast %135 : vector<1x24x48xbf16> to vector<24x48xbf16>
    %137 = arith.truncf %134 : vector<48x512xf32> to vector<48x512xbf16>
    %cst_40 = arith.constant dense<0.000000e+00> : vector<24x512xf32>
    %138 = tpu.matmul %136, %137, %cst_40 {dimension_numbers = #tpu.dot_dimension_numbers<[1], [0], [0], [1], [0, 0, 1, 1], [], []>} : vector<24x48xbf16>, vector<48x512xbf16>, vector<24x512xf32> -> vector<24x512xf32>
    %139 = vector.extract_strided_slice %138 {offsets = [0, 0], sizes = [24, 495], strides = [1, 1]} : vector<24x512xf32> to vector<24x495xf32>
    %140 = vector.extract_strided_slice %138 {offsets = [0, 1], sizes = [24, 495], strides = [1, 1]} : vector<24x512xf32> to vector<24x495xf32>
    %141 = arith.maximumf %139, %140 : vector<24x495xf32>
    %142 = vector.extract_strided_slice %138 {offsets = [0, 16], sizes = [24, 495], strides = [1, 1]} : vector<24x512xf32> to vector<24x495xf32>
    %143 = vector.extract_strided_slice %138 {offsets = [0, 17], sizes = [24, 495], strides = [1, 1]} : vector<24x512xf32> to vector<24x495xf32>
    %144 = arith.maximumf %142, %143 : vector<24x495xf32>
    %145 = arith.maximumf %141, %144 : vector<24x495xf32>
    %146 = arith.truncf %145 : vector<24x495xf32> to vector<24x495xbf16>
    %c0_41 = arith.constant 0 : index
    %c0_42 = arith.constant 0 : index
    %147 = vector.load %arg16[%c0_41, %c0_42] : memref<495x128xbf16, #tpu.memory_space<vmem>>, vector<495x128xbf16>
    %cst_43 = arith.constant dense<0.000000e+00> : vector<24x128xf32>
    %148 = tpu.matmul %146, %147, %cst_43 {dimension_numbers = #tpu.dot_dimension_numbers<[1], [0], [0], [1], [0, 0, 1, 1], [], []>} : vector<24x495xbf16>, vector<495x128xbf16>, vector<24x128xf32> -> vector<24x128xf32>
    %c0_44 = arith.constant 0 : index
    %c0_45 = arith.constant 0 : index
    %149 = vector.load %arg14[%c0_44, %c0_45] : memref<9x128xf32, #tpu.memory_space<vmem>>, vector<9x128xf32>
    %c1_46 = arith.constant 1 : index
    %c0_47 = arith.constant 0 : index
    %c0_48 = arith.constant 0 : index
    %150 = vector.load %arg4[%c1_46, %c0_47, %c0_48] : memref<3x24x1xf32, #tpu.memory_space<vmem>>, vector<1x24x1xf32>
    %151 = vector.shape_cast %150 : vector<1x24x1xf32> to vector<24x1xf32>
    %152 = vector.broadcast %151 : vector<24x1xf32> to vector<24x128xf32>
    %153 = arith.mulf %148, %152 : vector<24x128xf32>
    %c1_49 = arith.constant 1 : index
    %c0_50 = arith.constant 0 : index
    %c0_51 = arith.constant 0 : index
    %154 = vector.load %arg5[%c1_49, %c0_50, %c0_51] : memref<3x24x1xf32, #tpu.memory_space<vmem>>, vector<1x24x1xf32>
    %155 = vector.shape_cast %154 : vector<1x24x1xf32> to vector<24x1xf32>
    %156 = vector.broadcast %155 : vector<24x1xf32> to vector<24x128xf32>
    %157 = arith.addf %153, %156 : vector<24x128xf32>
    %cst_52 = arith.constant 0.000000e+00 : f32
    %158 = vector.broadcast %cst_52 : f32 to vector<24x128xf32>
    %159 = arith.maximumf %157, %158 : vector<24x128xf32>
    %c1_53 = arith.constant 1 : index
    %c0_54 = arith.constant 0 : index
    %c0_55 = arith.constant 0 : index
    %160 = vector.load %arg6[%c1_53, %c0_54, %c0_55] : memref<3x216x24xbf16, #tpu.memory_space<vmem>>, vector<1x216x24xbf16>
    %161 = vector.shape_cast %160 : vector<1x216x24xbf16> to vector<216x24xbf16>
    %162 = arith.truncf %159 : vector<24x128xf32> to vector<24x128xbf16>
    %cst_56 = arith.constant dense<0.000000e+00> : vector<216x128xf32>
    %163 = tpu.matmul %161, %162, %cst_56 {dimension_numbers = #tpu.dot_dimension_numbers<[1], [0], [0], [1], [0, 0, 1, 1], [], []>} : vector<216x24xbf16>, vector<24x128xbf16>, vector<216x128xf32> -> vector<216x128xf32>
    %c1_57 = arith.constant 1 : index
    %c0_58 = arith.constant 0 : index
    %c0_59 = arith.constant 0 : index
    %164 = vector.load %arg7[%c1_57, %c0_58, %c0_59] : memref<3x216x1xf32, #tpu.memory_space<vmem>>, vector<1x216x1xf32>
    %165 = vector.shape_cast %164 : vector<1x216x1xf32> to vector<216x1xf32>
    %166 = vector.broadcast %165 : vector<216x1xf32> to vector<216x128xf32>
    %167 = arith.addf %163, %166 : vector<216x128xf32>
    %cst_60 = arith.constant 0.000000e+00 : f32
    %168 = vector.broadcast %cst_60 : f32 to vector<216x128xf32>
    %169 = tpu.concatenate %168, %167, %168 in 1 : vector<216x128xf32>, vector<216x128xf32>, vector<216x128xf32> -> vector<216x384xf32>
    %170 = vector.extract_strided_slice %169 {offsets = [0, 119], sizes = [24, 128], strides = [1, 1]} : vector<216x384xf32> to vector<24x128xf32>
    %171 = vector.extract_strided_slice %149 {offsets = [0, 0], sizes = [1, 128], strides = [1, 1]} : vector<9x128xf32> to vector<1x128xf32>
    %172 = vector.broadcast %171 : vector<1x128xf32> to vector<24x128xf32>
    %173 = arith.mulf %170, %172 : vector<24x128xf32>
    %174 = vector.extract_strided_slice %169 {offsets = [24, 120], sizes = [24, 128], strides = [1, 1]} : vector<216x384xf32> to vector<24x128xf32>
    %175 = vector.extract_strided_slice %149 {offsets = [1, 0], sizes = [1, 128], strides = [1, 1]} : vector<9x128xf32> to vector<1x128xf32>
    %176 = vector.broadcast %175 : vector<1x128xf32> to vector<24x128xf32>
    %177 = arith.mulf %174, %176 : vector<24x128xf32>
    %178 = arith.addf %173, %177 : vector<24x128xf32>
    %179 = vector.extract_strided_slice %169 {offsets = [48, 121], sizes = [24, 128], strides = [1, 1]} : vector<216x384xf32> to vector<24x128xf32>
    %180 = vector.extract_strided_slice %149 {offsets = [2, 0], sizes = [1, 128], strides = [1, 1]} : vector<9x128xf32> to vector<1x128xf32>
    %181 = vector.broadcast %180 : vector<1x128xf32> to vector<24x128xf32>
    %182 = arith.mulf %179, %181 : vector<24x128xf32>
    %183 = arith.addf %178, %182 : vector<24x128xf32>
    %184 = vector.extract_strided_slice %169 {offsets = [72, 127], sizes = [24, 128], strides = [1, 1]} : vector<216x384xf32> to vector<24x128xf32>
    %185 = vector.extract_strided_slice %149 {offsets = [3, 0], sizes = [1, 128], strides = [1, 1]} : vector<9x128xf32> to vector<1x128xf32>
    %186 = vector.broadcast %185 : vector<1x128xf32> to vector<24x128xf32>
    %187 = arith.mulf %184, %186 : vector<24x128xf32>
    %188 = arith.addf %183, %187 : vector<24x128xf32>
    %189 = vector.extract_strided_slice %169 {offsets = [96, 128], sizes = [24, 128], strides = [1, 1]} : vector<216x384xf32> to vector<24x128xf32>
    %190 = arith.addf %188, %189 : vector<24x128xf32>
    %191 = vector.extract_strided_slice %169 {offsets = [120, 129], sizes = [24, 128], strides = [1, 1]} : vector<216x384xf32> to vector<24x128xf32>
    %192 = vector.extract_strided_slice %149 {offsets = [5, 0], sizes = [1, 128], strides = [1, 1]} : vector<9x128xf32> to vector<1x128xf32>
    %193 = vector.broadcast %192 : vector<1x128xf32> to vector<24x128xf32>
    %194 = arith.mulf %191, %193 : vector<24x128xf32>
    %195 = arith.addf %190, %194 : vector<24x128xf32>
    %196 = vector.extract_strided_slice %169 {offsets = [144, 135], sizes = [24, 128], strides = [1, 1]} : vector<216x384xf32> to vector<24x128xf32>
    %197 = vector.extract_strided_slice %149 {offsets = [6, 0], sizes = [1, 128], strides = [1, 1]} : vector<9x128xf32> to vector<1x128xf32>
    %198 = vector.broadcast %197 : vector<1x128xf32> to vector<24x128xf32>
    %199 = arith.mulf %196, %198 : vector<24x128xf32>
    %200 = arith.addf %195, %199 : vector<24x128xf32>
    %201 = vector.extract_strided_slice %169 {offsets = [168, 136], sizes = [24, 128], strides = [1, 1]} : vector<216x384xf32> to vector<24x128xf32>
    %202 = vector.extract_strided_slice %149 {offsets = [7, 0], sizes = [1, 128], strides = [1, 1]} : vector<9x128xf32> to vector<1x128xf32>
    %203 = vector.broadcast %202 : vector<1x128xf32> to vector<24x128xf32>
    %204 = arith.mulf %201, %203 : vector<24x128xf32>
    %205 = arith.addf %200, %204 : vector<24x128xf32>
    %206 = vector.extract_strided_slice %169 {offsets = [192, 137], sizes = [24, 128], strides = [1, 1]} : vector<216x384xf32> to vector<24x128xf32>
    %207 = vector.extract_strided_slice %149 {offsets = [8, 0], sizes = [1, 128], strides = [1, 1]} : vector<9x128xf32> to vector<1x128xf32>
    %208 = vector.broadcast %207 : vector<1x128xf32> to vector<24x128xf32>
    %209 = arith.mulf %206, %208 : vector<24x128xf32>
    %210 = arith.addf %205, %209 : vector<24x128xf32>
    %c1_61 = arith.constant 1 : index
    %c0_62 = arith.constant 0 : index
    %c0_63 = arith.constant 0 : index
    %211 = vector.load %arg8[%c1_61, %c0_62, %c0_63] : memref<3x24x1xf32, #tpu.memory_space<vmem>>, vector<1x24x1xf32>
    %212 = vector.shape_cast %211 : vector<1x24x1xf32> to vector<24x1xf32>
    %213 = vector.broadcast %212 : vector<24x1xf32> to vector<24x128xf32>
    %214 = arith.mulf %210, %213 : vector<24x128xf32>
    %c1_64 = arith.constant 1 : index
    %c0_65 = arith.constant 0 : index
    %c0_66 = arith.constant 0 : index
    %215 = vector.load %arg9[%c1_64, %c0_65, %c0_66] : memref<3x24x1xf32, #tpu.memory_space<vmem>>, vector<1x24x1xf32>
    %216 = vector.shape_cast %215 : vector<1x24x1xf32> to vector<24x1xf32>
    %217 = vector.broadcast %216 : vector<24x1xf32> to vector<24x128xf32>
    %218 = arith.addf %214, %217 : vector<24x128xf32>
    %cst_67 = arith.constant 0.000000e+00 : f32
    %219 = vector.broadcast %cst_67 : f32 to vector<24x128xf32>
    %220 = arith.maximumf %218, %219 : vector<24x128xf32>
    %c1_68 = arith.constant 1 : index
    %c0_69 = arith.constant 0 : index
    %c0_70 = arith.constant 0 : index
    %221 = vector.load %arg10[%c1_68, %c0_69, %c0_70] : memref<3x24x1xf32, #tpu.memory_space<vmem>>, vector<1x24x1xf32>
    %222 = vector.shape_cast %221 : vector<1x24x1xf32> to vector<24x1xf32>
    %223 = vector.broadcast %222 : vector<24x1xf32> to vector<24x128xf32>
    %224 = arith.mulf %148, %223 : vector<24x128xf32>
    %c1_71 = arith.constant 1 : index
    %c0_72 = arith.constant 0 : index
    %c0_73 = arith.constant 0 : index
    %225 = vector.load %arg11[%c1_71, %c0_72, %c0_73] : memref<3x24x1xf32, #tpu.memory_space<vmem>>, vector<1x24x1xf32>
    %226 = vector.shape_cast %225 : vector<1x24x1xf32> to vector<24x1xf32>
    %227 = vector.broadcast %226 : vector<24x1xf32> to vector<24x128xf32>
    %228 = arith.addf %224, %227 : vector<24x128xf32>
    %cst_74 = arith.constant 0.000000e+00 : f32
    %229 = vector.broadcast %cst_74 : f32 to vector<24x128xf32>
    %230 = arith.maximumf %228, %229 : vector<24x128xf32>
    %231 = tpu.concatenate %220, %230 in 0 : vector<24x128xf32>, vector<24x128xf32> -> vector<48x128xf32>
    %c1_75 = arith.constant 1 : index
    %c0_76 = arith.constant 0 : index
    %c0_77 = arith.constant 0 : index
    %232 = vector.load %arg12[%c1_75, %c0_76, %c0_77] : memref<3x24x48xbf16, #tpu.memory_space<vmem>>, vector<1x24x48xbf16>
    %233 = vector.shape_cast %232 : vector<1x24x48xbf16> to vector<24x48xbf16>
    %234 = arith.truncf %231 : vector<48x128xf32> to vector<48x128xbf16>
    %cst_78 = arith.constant dense<0.000000e+00> : vector<24x128xf32>
    %235 = tpu.matmul %233, %234, %cst_78 {dimension_numbers = #tpu.dot_dimension_numbers<[1], [0], [0], [1], [0, 0, 1, 1], [], []>} : vector<24x48xbf16>, vector<48x128xbf16>, vector<24x128xf32> -> vector<24x128xf32>
    %236 = vector.extract_strided_slice %235 {offsets = [0, 0], sizes = [24, 119], strides = [1, 1]} : vector<24x128xf32> to vector<24x119xf32>
    %237 = vector.extract_strided_slice %235 {offsets = [0, 1], sizes = [24, 119], strides = [1, 1]} : vector<24x128xf32> to vector<24x119xf32>
    %238 = arith.maximumf %236, %237 : vector<24x119xf32>
    %239 = vector.extract_strided_slice %235 {offsets = [0, 8], sizes = [24, 119], strides = [1, 1]} : vector<24x128xf32> to vector<24x119xf32>
    %240 = vector.extract_strided_slice %235 {offsets = [0, 9], sizes = [24, 119], strides = [1, 1]} : vector<24x128xf32> to vector<24x119xf32>
    %241 = arith.maximumf %239, %240 : vector<24x119xf32>
    %242 = arith.maximumf %238, %241 : vector<24x119xf32>
    %243 = arith.truncf %242 : vector<24x119xf32> to vector<24x119xbf16>
    %c0_79 = arith.constant 0 : index
    %c0_80 = arith.constant 0 : index
    %244 = vector.load %arg17[%c0_79, %c0_80] : memref<119x32xbf16, #tpu.memory_space<vmem>>, vector<119x32xbf16>
    %cst_81 = arith.constant dense<0.000000e+00> : vector<24x32xf32>
    %245 = tpu.matmul %243, %244, %cst_81 {dimension_numbers = #tpu.dot_dimension_numbers<[1], [0], [0], [1], [0, 0, 1, 1], [], []>} : vector<24x119xbf16>, vector<119x32xbf16>, vector<24x32xf32> -> vector<24x32xf32>
    %c0_82 = arith.constant 0 : index
    %c0_83 = arith.constant 0 : index
    %246 = vector.load %arg15[%c0_82, %c0_83] : memref<9x32xf32, #tpu.memory_space<vmem>>, vector<9x32xf32>
    %c2 = arith.constant 2 : index
    %c0_84 = arith.constant 0 : index
    %c0_85 = arith.constant 0 : index
    %247 = vector.load %arg4[%c2, %c0_84, %c0_85] : memref<3x24x1xf32, #tpu.memory_space<vmem>>, vector<1x24x1xf32>
    %248 = vector.shape_cast %247 : vector<1x24x1xf32> to vector<24x1xf32>
    %249 = vector.broadcast %248 : vector<24x1xf32> to vector<24x32xf32>
    %250 = arith.mulf %245, %249 : vector<24x32xf32>
    %c2_86 = arith.constant 2 : index
    %c0_87 = arith.constant 0 : index
    %c0_88 = arith.constant 0 : index
    %251 = vector.load %arg5[%c2_86, %c0_87, %c0_88] : memref<3x24x1xf32, #tpu.memory_space<vmem>>, vector<1x24x1xf32>
    %252 = vector.shape_cast %251 : vector<1x24x1xf32> to vector<24x1xf32>
    %253 = vector.broadcast %252 : vector<24x1xf32> to vector<24x32xf32>
    %254 = arith.addf %250, %253 : vector<24x32xf32>
    %cst_89 = arith.constant 0.000000e+00 : f32
    %255 = vector.broadcast %cst_89 : f32 to vector<24x32xf32>
    %256 = arith.maximumf %254, %255 : vector<24x32xf32>
    %c2_90 = arith.constant 2 : index
    %c0_91 = arith.constant 0 : index
    %c0_92 = arith.constant 0 : index
    %257 = vector.load %arg6[%c2_90, %c0_91, %c0_92] : memref<3x216x24xbf16, #tpu.memory_space<vmem>>, vector<1x216x24xbf16>
    %258 = vector.shape_cast %257 : vector<1x216x24xbf16> to vector<216x24xbf16>
    %259 = arith.truncf %256 : vector<24x32xf32> to vector<24x32xbf16>
    %cst_93 = arith.constant dense<0.000000e+00> : vector<216x32xf32>
    %260 = tpu.matmul %258, %259, %cst_93 {dimension_numbers = #tpu.dot_dimension_numbers<[1], [0], [0], [1], [0, 0, 1, 1], [], []>} : vector<216x24xbf16>, vector<24x32xbf16>, vector<216x32xf32> -> vector<216x32xf32>
    %c2_94 = arith.constant 2 : index
    %c0_95 = arith.constant 0 : index
    %c0_96 = arith.constant 0 : index
    %261 = vector.load %arg7[%c2_94, %c0_95, %c0_96] : memref<3x216x1xf32, #tpu.memory_space<vmem>>, vector<1x216x1xf32>
    %262 = vector.shape_cast %261 : vector<1x216x1xf32> to vector<216x1xf32>
    %263 = vector.broadcast %262 : vector<216x1xf32> to vector<216x32xf32>
    %264 = arith.addf %260, %263 : vector<216x32xf32>
    %cst_97 = arith.constant 0.000000e+00 : f32
    %265 = vector.broadcast %cst_97 : f32 to vector<216x128xf32>
    %266 = tpu.concatenate %265, %264, %265 in 1 : vector<216x128xf32>, vector<216x32xf32>, vector<216x128xf32> -> vector<216x288xf32>
    %267 = vector.extract_strided_slice %266 {offsets = [0, 123], sizes = [24, 32], strides = [1, 1]} : vector<216x288xf32> to vector<24x32xf32>
    %268 = vector.extract_strided_slice %246 {offsets = [0, 0], sizes = [1, 32], strides = [1, 1]} : vector<9x32xf32> to vector<1x32xf32>
    %269 = vector.broadcast %268 : vector<1x32xf32> to vector<24x32xf32>
    %270 = arith.mulf %267, %269 : vector<24x32xf32>
    %271 = vector.extract_strided_slice %266 {offsets = [24, 124], sizes = [24, 32], strides = [1, 1]} : vector<216x288xf32> to vector<24x32xf32>
    %272 = vector.extract_strided_slice %246 {offsets = [1, 0], sizes = [1, 32], strides = [1, 1]} : vector<9x32xf32> to vector<1x32xf32>
    %273 = vector.broadcast %272 : vector<1x32xf32> to vector<24x32xf32>
    %274 = arith.mulf %271, %273 : vector<24x32xf32>
    %275 = arith.addf %270, %274 : vector<24x32xf32>
    %276 = vector.extract_strided_slice %266 {offsets = [48, 125], sizes = [24, 32], strides = [1, 1]} : vector<216x288xf32> to vector<24x32xf32>
    %277 = vector.extract_strided_slice %246 {offsets = [2, 0], sizes = [1, 32], strides = [1, 1]} : vector<9x32xf32> to vector<1x32xf32>
    %278 = vector.broadcast %277 : vector<1x32xf32> to vector<24x32xf32>
    %279 = arith.mulf %276, %278 : vector<24x32xf32>
    %280 = arith.addf %275, %279 : vector<24x32xf32>
    %281 = vector.extract_strided_slice %266 {offsets = [72, 127], sizes = [24, 32], strides = [1, 1]} : vector<216x288xf32> to vector<24x32xf32>
    %282 = vector.extract_strided_slice %246 {offsets = [3, 0], sizes = [1, 32], strides = [1, 1]} : vector<9x32xf32> to vector<1x32xf32>
    %283 = vector.broadcast %282 : vector<1x32xf32> to vector<24x32xf32>
    %284 = arith.mulf %281, %283 : vector<24x32xf32>
    %285 = arith.addf %280, %284 : vector<24x32xf32>
    %286 = vector.extract_strided_slice %266 {offsets = [96, 128], sizes = [24, 32], strides = [1, 1]} : vector<216x288xf32> to vector<24x32xf32>
    %287 = arith.addf %285, %286 : vector<24x32xf32>
    %288 = vector.extract_strided_slice %266 {offsets = [120, 129], sizes = [24, 32], strides = [1, 1]} : vector<216x288xf32> to vector<24x32xf32>
    %289 = vector.extract_strided_slice %246 {offsets = [5, 0], sizes = [1, 32], strides = [1, 1]} : vector<9x32xf32> to vector<1x32xf32>
    %290 = vector.broadcast %289 : vector<1x32xf32> to vector<24x32xf32>
    %291 = arith.mulf %288, %290 : vector<24x32xf32>
    %292 = arith.addf %287, %291 : vector<24x32xf32>
    %293 = vector.extract_strided_slice %266 {offsets = [144, 131], sizes = [24, 32], strides = [1, 1]} : vector<216x288xf32> to vector<24x32xf32>
    %294 = vector.extract_strided_slice %246 {offsets = [6, 0], sizes = [1, 32], strides = [1, 1]} : vector<9x32xf32> to vector<1x32xf32>
    %295 = vector.broadcast %294 : vector<1x32xf32> to vector<24x32xf32>
    %296 = arith.mulf %293, %295 : vector<24x32xf32>
    %297 = arith.addf %292, %296 : vector<24x32xf32>
    %298 = vector.extract_strided_slice %266 {offsets = [168, 132], sizes = [24, 32], strides = [1, 1]} : vector<216x288xf32> to vector<24x32xf32>
    %299 = vector.extract_strided_slice %246 {offsets = [7, 0], sizes = [1, 32], strides = [1, 1]} : vector<9x32xf32> to vector<1x32xf32>
    %300 = vector.broadcast %299 : vector<1x32xf32> to vector<24x32xf32>
    %301 = arith.mulf %298, %300 : vector<24x32xf32>
    %302 = arith.addf %297, %301 : vector<24x32xf32>
    %303 = vector.extract_strided_slice %266 {offsets = [192, 133], sizes = [24, 32], strides = [1, 1]} : vector<216x288xf32> to vector<24x32xf32>
    %304 = vector.extract_strided_slice %246 {offsets = [8, 0], sizes = [1, 32], strides = [1, 1]} : vector<9x32xf32> to vector<1x32xf32>
    %305 = vector.broadcast %304 : vector<1x32xf32> to vector<24x32xf32>
    %306 = arith.mulf %303, %305 : vector<24x32xf32>
    %307 = arith.addf %302, %306 : vector<24x32xf32>
    %c2_98 = arith.constant 2 : index
    %c0_99 = arith.constant 0 : index
    %c0_100 = arith.constant 0 : index
    %308 = vector.load %arg8[%c2_98, %c0_99, %c0_100] : memref<3x24x1xf32, #tpu.memory_space<vmem>>, vector<1x24x1xf32>
    %309 = vector.shape_cast %308 : vector<1x24x1xf32> to vector<24x1xf32>
    %310 = vector.broadcast %309 : vector<24x1xf32> to vector<24x32xf32>
    %311 = arith.mulf %307, %310 : vector<24x32xf32>
    %c2_101 = arith.constant 2 : index
    %c0_102 = arith.constant 0 : index
    %c0_103 = arith.constant 0 : index
    %312 = vector.load %arg9[%c2_101, %c0_102, %c0_103] : memref<3x24x1xf32, #tpu.memory_space<vmem>>, vector<1x24x1xf32>
    %313 = vector.shape_cast %312 : vector<1x24x1xf32> to vector<24x1xf32>
    %314 = vector.broadcast %313 : vector<24x1xf32> to vector<24x32xf32>
    %315 = arith.addf %311, %314 : vector<24x32xf32>
    %cst_104 = arith.constant 0.000000e+00 : f32
    %316 = vector.broadcast %cst_104 : f32 to vector<24x32xf32>
    %317 = arith.maximumf %315, %316 : vector<24x32xf32>
    %c2_105 = arith.constant 2 : index
    %c0_106 = arith.constant 0 : index
    %c0_107 = arith.constant 0 : index
    %318 = vector.load %arg10[%c2_105, %c0_106, %c0_107] : memref<3x24x1xf32, #tpu.memory_space<vmem>>, vector<1x24x1xf32>
    %319 = vector.shape_cast %318 : vector<1x24x1xf32> to vector<24x1xf32>
    %320 = vector.broadcast %319 : vector<24x1xf32> to vector<24x32xf32>
    %321 = arith.mulf %245, %320 : vector<24x32xf32>
    %c2_108 = arith.constant 2 : index
    %c0_109 = arith.constant 0 : index
    %c0_110 = arith.constant 0 : index
    %322 = vector.load %arg11[%c2_108, %c0_109, %c0_110] : memref<3x24x1xf32, #tpu.memory_space<vmem>>, vector<1x24x1xf32>
    %323 = vector.shape_cast %322 : vector<1x24x1xf32> to vector<24x1xf32>
    %324 = vector.broadcast %323 : vector<24x1xf32> to vector<24x32xf32>
    %325 = arith.addf %321, %324 : vector<24x32xf32>
    %cst_111 = arith.constant 0.000000e+00 : f32
    %326 = vector.broadcast %cst_111 : f32 to vector<24x32xf32>
    %327 = arith.maximumf %325, %326 : vector<24x32xf32>
    %328 = tpu.concatenate %317, %327 in 0 : vector<24x32xf32>, vector<24x32xf32> -> vector<48x32xf32>
    %c2_112 = arith.constant 2 : index
    %c0_113 = arith.constant 0 : index
    %c0_114 = arith.constant 0 : index
    %329 = vector.load %arg12[%c2_112, %c0_113, %c0_114] : memref<3x24x48xbf16, #tpu.memory_space<vmem>>, vector<1x24x48xbf16>
    %330 = vector.shape_cast %329 : vector<1x24x48xbf16> to vector<24x48xbf16>
    %331 = arith.truncf %328 : vector<48x32xf32> to vector<48x32xbf16>
    %cst_115 = arith.constant dense<0.000000e+00> : vector<24x32xf32>
    %332 = tpu.matmul %330, %331, %cst_115 {dimension_numbers = #tpu.dot_dimension_numbers<[1], [0], [0], [1], [0, 0, 1, 1], [], []>} : vector<24x48xbf16>, vector<48x32xbf16>, vector<24x32xf32> -> vector<24x32xf32>
    %333 = vector.extract_strided_slice %332 {offsets = [0, 0], sizes = [24, 27], strides = [1, 1]} : vector<24x32xf32> to vector<24x27xf32>
    %334 = vector.extract_strided_slice %332 {offsets = [0, 1], sizes = [24, 27], strides = [1, 1]} : vector<24x32xf32> to vector<24x27xf32>
    %335 = arith.maximumf %333, %334 : vector<24x27xf32>
    %336 = vector.extract_strided_slice %332 {offsets = [0, 4], sizes = [24, 27], strides = [1, 1]} : vector<24x32xf32> to vector<24x27xf32>
    %337 = vector.extract_strided_slice %332 {offsets = [0, 5], sizes = [24, 27], strides = [1, 1]} : vector<24x32xf32> to vector<24x27xf32>
    %338 = arith.maximumf %336, %337 : vector<24x27xf32>
    %339 = arith.maximumf %335, %338 : vector<24x27xf32>
    %340 = arith.truncf %339 : vector<24x27xf32> to vector<24x27xbf16>
    %c0_116 = arith.constant 0 : index
    %c0_117 = arith.constant 0 : index
    %341 = vector.load %arg18[%c0_116, %c0_117] : memref<27x8xbf16, #tpu.memory_space<vmem>>, vector<27x8xbf16>
    %cst_118 = arith.constant dense<0.000000e+00> : vector<24x8xf32>
    %342 = tpu.matmul %340, %341, %cst_118 {dimension_numbers = #tpu.dot_dimension_numbers<[1], [0], [0], [1], [0, 0, 1, 1], [], []>} : vector<24x27xbf16>, vector<27x8xbf16>, vector<24x8xf32> -> vector<24x8xf32>
    %c0_119 = arith.constant 0 : index
    %c0_120 = arith.constant 0 : index
    %343 = vector.load %arg3[%c0_119, %c0_120] : memref<24x1xf32, #tpu.memory_space<vmem>>, vector<24x1xf32>
    %344 = vector.broadcast %343 : vector<24x1xf32> to vector<24x8xf32>
    %345 = arith.mulf %342, %344 : vector<24x8xf32>
    %cst_121 = arith.constant dense<0.000000e+00> : vector<8xf32>
    %346 = vector.multi_reduction <add>, %345, %cst_121 [0] : vector<24x8xf32> to vector<8xf32>
    %347 = vector.shape_cast %346 : vector<8xf32> to vector<1x8xf32>
    %c0_122 = arith.constant 0 : index
    %c0_123 = arith.constant 0 : index
    %c0_124 = arith.constant 0 : index
    %348 = vector.load %arg19[%c0_122, %c0_123, %c0_124] : memref<1x1x8xf32, #tpu.memory_space<vmem>>, vector<1x1x8xf32>
    %349 = vector.shape_cast %348 : vector<1x1x8xf32> to vector<1x8xf32>
    %350 = vector.shape_cast %347 : vector<1x8xf32> to vector<1x1x8xf32>
    tpu.vector_store %arg19[%c0_122, %c0_123, %c0_124], %350 {strides = array<i32>} : memref<1x1x8xf32, #tpu.memory_space<vmem>>, vector<1x1x8xf32>,
    return
  }
  func.func @transform_0(%arg0: i32) -> (i32, i32, i32) {
    %c0_i32 = arith.constant 0 : i32
    %c0_i32_0 = arith.constant 0 : i32
    %c0_i32_1 = arith.constant 0 : i32
    return %arg0, %c0_i32, %c0_i32_0 : i32, i32, i32
  }
  func.func @transform_1(%arg0: i32) -> (i32, i32) {
    %c0_i32 = arith.constant 0 : i32
    %c0_i32_0 = arith.constant 0 : i32
    %c0_i32_1 = arith.constant 0 : i32
    return %c0_i32, %c0_i32_0 : i32, i32
  }
  func.func @transform_2(%arg0: i32) -> (i32, i32) {
    %c0_i32 = arith.constant 0 : i32
    %c0_i32_0 = arith.constant 0 : i32
    %c0_i32_1 = arith.constant 0 : i32
    return %c0_i32, %c0_i32_0 : i32, i32
  }
  func.func @transform_3(%arg0: i32) -> (i32, i32, i32) {
    %c0_i32 = arith.constant 0 : i32
    %c0_i32_0 = arith.constant 0 : i32
    %c0_i32_1 = arith.constant 0 : i32
    %c0_i32_2 = arith.constant 0 : i32
    return %c0_i32, %c0_i32_0, %c0_i32_1 : i32, i32, i32
  }
  func.func @transform_4(%arg0: i32) -> (i32, i32, i32) {
    %c0_i32 = arith.constant 0 : i32
    %c0_i32_0 = arith.constant 0 : i32
    %c0_i32_1 = arith.constant 0 : i32
    %c0_i32_2 = arith.constant 0 : i32
    return %c0_i32, %c0_i32_0, %c0_i32_1 : i32, i32, i32
  }
  func.func @transform_5(%arg0: i32) -> (i32, i32, i32) {
    %c0_i32 = arith.constant 0 : i32
    %c0_i32_0 = arith.constant 0 : i32
    %c0_i32_1 = arith.constant 0 : i32
    %c0_i32_2 = arith.constant 0 : i32
    return %c0_i32, %c0_i32_0, %c0_i32_1 : i32, i32, i32
  }
  func.func @transform_6(%arg0: i32) -> (i32, i32, i32) {
    %c0_i32 = arith.constant 0 : i32
    %c0_i32_0 = arith.constant 0 : i32
    %c0_i32_1 = arith.constant 0 : i32
    %c0_i32_2 = arith.constant 0 : i32
    return %c0_i32, %c0_i32_0, %c0_i32_1 : i32, i32, i32
  }
  func.func @transform_7(%arg0: i32) -> (i32, i32, i32) {
    %c0_i32 = arith.constant 0 : i32
    %c0_i32_0 = arith.constant 0 : i32
    %c0_i32_1 = arith.constant 0 : i32
    %c0_i32_2 = arith.constant 0 : i32
    return %c0_i32, %c0_i32_0, %c0_i32_1 : i32, i32, i32
  }
  func.func @transform_8(%arg0: i32) -> (i32, i32, i32) {
    %c0_i32 = arith.constant 0 : i32
    %c0_i32_0 = arith.constant 0 : i32
    %c0_i32_1 = arith.constant 0 : i32
    %c0_i32_2 = arith.constant 0 : i32
    return %c0_i32, %c0_i32_0, %c0_i32_1 : i32, i32, i32
  }
  func.func @transform_9(%arg0: i32) -> (i32, i32, i32) {
    %c0_i32 = arith.constant 0 : i32
    %c0_i32_0 = arith.constant 0 : i32
    %c0_i32_1 = arith.constant 0 : i32
    %c0_i32_2 = arith.constant 0 : i32
    return %c0_i32, %c0_i32_0, %c0_i32_1 : i32, i32, i32
  }
  func.func @transform_10(%arg0: i32) -> (i32, i32, i32) {
    %c0_i32 = arith.constant 0 : i32
    %c0_i32_0 = arith.constant 0 : i32
    %c0_i32_1 = arith.constant 0 : i32
    %c0_i32_2 = arith.constant 0 : i32
    return %c0_i32, %c0_i32_0, %c0_i32_1 : i32, i32, i32
  }
  func.func @transform_11(%arg0: i32) -> (i32, i32, i32) {
    %c0_i32 = arith.constant 0 : i32
    %c0_i32_0 = arith.constant 0 : i32
    %c0_i32_1 = arith.constant 0 : i32
    %c0_i32_2 = arith.constant 0 : i32
    return %c0_i32, %c0_i32_0, %c0_i32_1 : i32, i32, i32
  }
  func.func @transform_12(%arg0: i32) -> (i32, i32) {
    %c0_i32 = arith.constant 0 : i32
    %c0_i32_0 = arith.constant 0 : i32
    %c0_i32_1 = arith.constant 0 : i32
    return %c0_i32, %c0_i32_0 : i32, i32
  }
  func.func @transform_13(%arg0: i32) -> (i32, i32) {
    %c0_i32 = arith.constant 0 : i32
    %c0_i32_0 = arith.constant 0 : i32
    %c0_i32_1 = arith.constant 0 : i32
    return %c0_i32, %c0_i32_0 : i32, i32
  }
  func.func @transform_14(%arg0: i32) -> (i32, i32) {
    %c0_i32 = arith.constant 0 : i32
    %c0_i32_0 = arith.constant 0 : i32
    %c0_i32_1 = arith.constant 0 : i32
    return %c0_i32, %c0_i32_0 : i32, i32
  }
  func.func @transform_15(%arg0: i32) -> (i32, i32) {
    %c0_i32 = arith.constant 0 : i32
    %c0_i32_0 = arith.constant 0 : i32
    %c0_i32_1 = arith.constant 0 : i32
    return %c0_i32, %c0_i32_0 : i32, i32
  }
  func.func @transform_16(%arg0: i32) -> (i32, i32) {
    %c0_i32 = arith.constant 0 : i32
    %c0_i32_0 = arith.constant 0 : i32
    %c0_i32_1 = arith.constant 0 : i32
    return %c0_i32, %c0_i32_0 : i32, i32
  }
  func.func @transform_17(%arg0: i32) -> (i32, i32) {
    %c0_i32 = arith.constant 0 : i32
    %c0_i32_0 = arith.constant 0 : i32
    %c0_i32_1 = arith.constant 0 : i32
    return %c0_i32, %c0_i32_0 : i32, i32
  }
  func.func @transform_18(%arg0: i32) -> (i32, i32, i32) {
    %c0_i32 = arith.constant 0 : i32
    %c0_i32_0 = arith.constant 0 : i32
    %c0_i32_1 = arith.constant 0 : i32
    return %arg0, %c0_i32, %c0_i32_0 : i32, i32, i32
  }
}

</mosaic_0001>

<bundles_post_ra>
// kernel: dense_model_forward.1
= control target key start
LH: loop header
LB: loop body
LE: loop exit
PB: predicated region body
PF: predicated region fallthrough
CT: control target
= control target key end

     0   :  { %s11142_s0 = inlined_call_operand.vmem [shape: f32[2,1,256], index: 0, kind: input, shape index: {}]   ;;  %s11143_s1 = inlined_call_operand.vmem [shape: f32[216,1], index: 1, kind: input, shape index: {}]   ;;  %s11144_s2 = inlined_call_operand.vmem [shape: f32[24,1], index: 2, kind: input, shape index: {}]   ;;  %s11145_s3 = inlined_call_operand.vmem [shape: f32[3,24,1], index: 3, kind: input, shape index: {}]   ;;  %s11146_s4 = inlined_call_operand.vmem [shape: f32[3,24,1], index: 4, kind: input, shape index: {}]   ;;  %s11147_s5 = inlined_call_operand.vmem [shape: bf16[3,216,24], index: 5, kind: input, shape index: {}]   ;;  %s11148_s6 = inlined_call_operand.vmem [shape: f32[3,216,1], index: 6, kind: input, shape index: {}]   ;;  %s11149_s7 = inlined_call_operand.vmem [shape: f32[3,24,1], index: 7, kind: input, shape index: {}]   ;;  %s11150_s8 = inlined_call_operand.vmem [shape: f32[3,24,1], index: 8, kind: input, shape index: {}]   ;;  %s11151_s9 = inlined_call_operand.vmem [shape: f32[3,24,1], index: 9, kind: input, shape index: {}]   ;;  %s11152_s10 = inlined_call_operand.vmem [shape: f32[3,24,1], index: 10, kind: input, shape index: {}]   ;;  %s11153_s11 = inlined_call_operand.vmem [shape: bf16[3,24,48], index: 11, kind: input, shape index: {}]   ;;  %s11154_s12 = inlined_call_operand.vmem [shape: f32[9,512], index: 12, kind: input, shape index: {}]   ;;  %s11155_s13 = inlined_call_operand.vmem [shape: f32[9,128], index: 13, kind: input, shape index: {}]   ;;  %s11156_s14 = inlined_call_operand.vmem [shape: f32[9,32], index: 14, kind: input, shape index: {}]   ;;  %s11157_s15 = inlined_call_operand.vmem [shape: bf16[495,128], index: 15, kind: input, shape index: {}]   ;;  %s11158_s16 = inlined_call_operand.vmem [shape: bf16[119,32], index: 16, kind: input, shape index: {}]   ;;  %s11159_s17 = inlined_call_operand.vmem [shape: bf16[27,8], index: 17, kind: input, shape index: {}]   ;;  %s11160_s18 = inlined_call_operand.hbm [shape: f32[1,1,8], index: 18, kind: output, shape index: {}]  }
   0x1   :  { %11375 = sst [smem:[#allocation98_spill]] %s11142_s0 }
   0x2   :  { %11376 = sst [smem:[#allocation99_spill]] %s11143_s1 }
   0x3   :  { %11377 = sst [smem:[#allocation100_spill]] %s11144_s2 }
   0x4   :  { %s11378_s29 = sld [smem:[#allocation99_spill]]  ;;  %v11164_v2 = vmov 0   ;;  %v65_v5 = vlaneseq  ;;  %v7040_v16 = vld [vmem:[%s11154_s12] sm:$0xff]  ;;  %v7048_v18 = vld [vmem:[%s11154_s12 + $0x8] sm:$0xff]  ;;  %v7053_v19 = vld [vmem:[%s11154_s12 + $0x10] sm:$0xff]  ;;  %s6868_s20 = smov 112  }
   0x5   :  { %6668 = vset.pattern.permute.xlu1 %v11164_v2  ;;  %6667 = vset.pattern.permute.xlu0 %v11164_v2  ;;  %v7060_v21 = vld [vmem:[%s11154_s12 + $0x18] sm:$0xff]  ;;  %s6869_s24 = smov 113   ;;  %s6870_s21 = smov 127  }
   0x6   :  { %1906 = vmatprep.mubr.bf16.mxu0 %v11164_v2  ;;  %2077 = vmatprep.mubr.bf16.mxu1 %v11164_v2  ;;  %v7014_v8 = vshrl.u32 %v65_v5, 7  ;;  %s11283_s30 = smov 1  }
   0x8   :  { %v7029_v13 = vsub.s32 1, %v7014_v8  ;;  %v7075_v26 = vsub.s32 2, %v7014_v8  ;;  %v7093_v33 = vsub.s32 3, %v7014_v8  ;;  %v7119_v42 = vsub.s32 5, %v7014_v8 }
   0xa   :  { %v100_v0 = vld [vmem:[%s11378_s29 + $0x30] sm:$0xff]  ;;  %v97_v1 = vld [vmem:[%s11378_s29 + $0x18] sm:$0xff]  ;;  %v98_v4 = vld [vmem:[%s11378_s29 + $0x20] sm:$0xff]  ;;  %11379 = vst [vmem:[#allocation5_spill] sm:$0xff] %v7029_v13  ;;  %v433_v20 = vrot.slane %v7040_v16, %v7029_v13  ;;  %v437_v22 = vrot.slane %v7048_v18, %v7029_v13  ;;  %v441_v23 = vrot.slane %v7053_v19, %v7029_v13  ;;  %v445_v25 = vrot.slane %v7060_v21, %v7029_v13 }
   0xb   :  { %153 = vperm.xlu1 %6668, %v100_v0   ;;  %138 = vperm.xlu0 %6667, %v97_v1   ;;  %v101_v3 = vld [vmem:[%s11378_s29 + $0x38] sm:$0xff]  ;;  %v103_v6 = vld [vmem:[%s11378_s29 + $0x48] sm:$0xff]  ;;  %v102_v9 = vld [vmem:[%s11378_s29 + $0x40] sm:$0xff]  ;;  %11380 = vst [vmem:[#allocation6_spill] sm:$0xff] %v7075_v26  ;;  %v565_v28 = vrot.slane %v7040_v16, %v7075_v26  ;;  %v569_v29 = vrot.slane %v7048_v18, %v7075_v26 }
   0xc   :  { %v99_v7 = vld [vmem:[%s11378_s29 + $0x28] sm:$0xff]  ;;  %v104_v10 = vld [vmem:[%s11378_s29 + $0x50] sm:$0xff]  ;;  %v106_v11 = vld [vmem:[%s11378_s29 + $0x60] sm:$0xff]  ;;  %v573_v30 = vrot.slane %v7053_v19, %v7075_v26  ;;  %v577_v32 = vrot.slane %v7060_v21, %v7075_v26  ;;  %11381 = vst [vmem:[#allocation7_spill] sm:$0xff] %v7093_v33  ;;  %v697_v37 = vrot.slane %v7040_v16, %v7093_v33  ;;  %v701_v38 = vrot.slane %v7048_v18, %v7093_v33 }
   0xd   :  { %v105_v12 = vld [vmem:[%s11378_s29 + $0x58] sm:$0xff]  ;;  %v107_v15 = vld [vmem:[%s11378_s29 + $0x68] sm:$0xff]  ;;  %v110_v17 = vld [vmem:[%s11378_s29 + $0x80] sm:$0xff]  ;;  %v705_v39 = vrot.slane %v7053_v19, %v7093_v33  ;;  %v709_v41 = vrot.slane %v7060_v21, %v7093_v33  ;;  %11382 = vst [vmem:[#allocation8_spill] sm:$0xff] %v7119_v42  ;;  %v902_v46 = vrot.slane %v7040_v16, %v7119_v42  ;;  %v906_v47 = vrot.slane %v7048_v18, %v7119_v42 }
   0xe   :  { %v109_v14 = vld [vmem:[%s11378_s29 + $0x78] sm:$0xff]  ;;  %v112_v24 = vld [vmem:[%s11378_s29 + $0x90] sm:$0xff]  ;;  %v111_v34 = vld [vmem:[%s11378_s29 + $0x88] sm:$0xff]  ;;  %v910_v48 = vrot.slane %v7053_v19, %v7119_v42 }
   0xf   :  { %158 = vperm.xlu1 %6668, %v101_v3   ;;  %143 = vperm.xlu0 %6667, %v98_v4   ;;  %v113_v27 = vld [vmem:[%s11378_s29 + $0x98] sm:$0xff]  ;;  %v108_v31 = vld [vmem:[%s11378_s29 + $0x70] sm:$0xff]  ;;  %v115_v35 = vld [vmem:[%s11378_s29 + $0xa8] sm:$0xff] }
  0x10   :  { %v116_v36 = vld [vmem:[%s11378_s29 + $0xb0] sm:$0xff]  ;;  %v114_v40 = vld [vmem:[%s11378_s29 + $0xa0] sm:$0xff]  ;;  %v119_v44 = vld [vmem:[%s11378_s29 + $0xc8] sm:$0xff] }
  0x11   :  { %v118_v43 = vld [vmem:[%s11378_s29 + $0xc0] sm:$0xff]  ;;  %v117_v45 = vld [vmem:[%s11378_s29 + $0xb8] sm:$0xff] }
  0x13   :  { %168 = vperm.xlu1 %6668, %v103_v6   ;;  %148 = vperm.xlu0 %6667, %v99_v7  }
  0x17   :  { %163 = vperm.xlu1 %6668, %v102_v9   ;;  %173 = vperm.xlu0 %6667, %v104_v10  }
  0x1b   :  { %183 = vperm.xlu1 %6668, %v106_v11   ;;  %178 = vperm.xlu0 %6667, %v105_v12  }
  0x1f   :  { %198 = vperm.xlu1 %6668, %v109_v14   ;;  %188 = vperm.xlu0 %6667, %v107_v15  }
  0x23   :  { %203 = vperm.xlu0 %6667, %v110_v17   ;;  %450 = vrot.lane.b32.xlu1 %v433_v20, %s6868_s20 }
  0x27   :  { %452 = vrot.lane.b32.xlu0 %v437_v22, %s6868_s20  ;;  %454 = vrot.lane.b32.xlu1 %v441_v23, %s6868_s20 }
  0x2b   :  { %456 = vrot.lane.b32.xlu0 %v445_v25, %s6868_s20  ;;  %213 = vperm.xlu1 %6668, %v112_v24  }
  0x2f   :  { %218 = vperm.xlu0 %6667, %v113_v27   ;;  %582 = vrot.lane.b32.xlu1 %v565_v28, %s6869_s24 }
  0x33   :  { %584 = vrot.lane.b32.xlu0 %v569_v29, %s6869_s24  ;;  %586 = vrot.lane.b32.xlu1 %v573_v30, %s6869_s24 }
  0x37   :  { %588 = vrot.lane.b32.xlu0 %v577_v32, %s6869_s24  ;;  %193 = vperm.xlu1 %6668, %v108_v31  }
  0x3b   :  { %208 = vperm.xlu0 %6667, %v111_v34   ;;  %228 = vperm.xlu1 %6668, %v115_v35  }
  0x3f   :  { %233 = vperm.xlu0 %6667, %v116_v36   ;;  %714 = vrot.lane.b32.xlu1 %v697_v37, %s6870_s21 }
  0x43   :  { %716 = vrot.lane.b32.xlu0 %v701_v38, %s6870_s21  ;;  %718 = vrot.lane.b32.xlu1 %v705_v39, %s6870_s21 }
  0x47   :  { %720 = vrot.lane.b32.xlu0 %v709_v41, %s6870_s21  ;;  %223 = vperm.xlu1 %6668, %v114_v40  }
  0x4b   :  { %243 = vperm.xlu0 %6667, %v118_v43   ;;  %248 = vperm.xlu1 %6668, %v119_v44  }
  0x4f   :  { %238 = vperm.xlu0 %6667, %v117_v45   ;;  %919 = vrot.lane.b32.xlu1 %v902_v46, %s11283_s30 }
  0x50   :  { %23 = vsyncpa [#allocation3], 0  ;;  %v914_v49 = vrot.slane %v7060_v21, %v7119_v42  ;;  %v7143_v50 = vsub.s32 6, %v7014_v8  ;;  %v120_v51 = vld [vmem:[%s11378_s29 + $0xd0] sm:$0xff]  ;;  %s6872_s1 = smov 15   ;;  %v7158_v56 = vsub.s32 7, %v7014_v8 }
  0x51   :  { %s6873_s22 = smov 16   ;;  %v6122_v61 = vld [vmem:[%s11154_s12 + $0x20] ss:$0 sm:$0xff]  ;;  %v6123_v62 = vld [vmem:[%s11154_s12 + $0x28] ss:$0 sm:$0xff]  ;;  %s11289_s26 = smov 17  }
  0x52   :  { %11383 = vst [vmem:[#allocation9_spill] sm:$0xff] %v7143_v50  ;;  %v1034_v52 = vrot.slane %v7040_v16, %v7143_v50  ;;  %v1038_v53 = vrot.slane %v7048_v18, %v7143_v50  ;;  %v1042_v54 = vrot.slane %v7053_v19, %v7143_v50  ;;  %v1046_v55 = vrot.slane %v7060_v21, %v7143_v50  ;;  %v6124_v63 = vld [vmem:[%s11154_s12 + $0x30] ss:$0 sm:$0xff]  ;;  %v6125_v0 = vld [vmem:[%s11154_s12 + $0x38] ss:$0 sm:$0xff]  ;;  %v94_v3 = vld [vmem:[%s11378_s29] sm:$0xff] }
  0x53   :  { %921 = vrot.lane.b32.xlu0 %v906_v47, %s11283_s30  ;;  %923 = vrot.lane.b32.xlu1 %v910_v48, %s11283_s30  ;;  %11384 = vst [vmem:[#allocation10_spill] sm:$0xff] %v7158_v56  ;;  %v1166_v57 = vrot.slane %v7040_v16, %v7158_v56  ;;  %v1170_v58 = vrot.slane %v7048_v18, %v7158_v56  ;;  %v7183_v1 = vsub.s32 0, %v7014_v8  ;;  %v95_v4 = vld [vmem:[%s11378_s29 + $0x8] sm:$0xff]  ;;  %v96_v6 = vld [vmem:[%s11378_s29 + $0x10] sm:$0xff]  ;;  %s6875_s25 = smov 111   ;;  %s11386_s28 = sld [smem:[#allocation98_spill]] }
  0x54   :  { %v1174_v59 = vrot.slane %v7053_v19, %v7158_v56  ;;  %v1178_v60 = vrot.slane %v7060_v21, %v7158_v56  ;;  %vm458_vm0 = vcmask 916480   ;;  %vm590_vm1 = vcmask 924672   ;;  %s6878_s2 = smov 96   ;;  %s11287_s27 = smov 95  }
  0x55   :  { %11385 = vst [vmem:[#allocation11_spill] sm:$0xff] %v7183_v1  ;;  %v383_v5 = vrot.slane %v7040_v16, %v7183_v1  ;;  %v387_v7 = vrot.slane %v7048_v18, %v7183_v1  ;;  %v391_v8 = vrot.slane %v7053_v19, %v7183_v1  ;;  %v395_v9 = vrot.slane %v7060_v21, %v7183_v1  ;;  %s11285_s12 = smov 94   ;;  %s11574_s24 = smov 95  }
  0x56   :  { %vm519_vm2 = vcmask 1039360   ;;  %vm927_vm3 = vcmask 7168   ;;  %vm1059_vm4 = vcmask 121856   ;;  %vm1191_vm5 = vcmask 130048   ;;  %s6883_s0 = smov 121   ;;  %s6884_s29 = smov 7  }
  0x57   :  { %925 = vrot.lane.b32.xlu0 %v914_v49, %s11283_s30  ;;  %253 = vperm.xlu1 %6668, %v120_v51   ;;  %vm1323_vm6 = vcmask 138240   ;;  %vm408_vm7 = vcmask 908288   ;;  %vm651_vm8 = vcmask 1031168   ;;  %vm988_vm9 = vcmask 900096   ;;  %s6885_s30 = smov 8   ;;  %s6894_s23 = smov 123  }
  0x58   :  { %vm1120_vm10 = vcmask 785408   ;;  %vm1252_vm11 = vcmask 777216   ;;  %vm1384_vm12 = vcmask 769024   ;;  %vm1861_vm13 = vcmask 1043456  }
  0x59   :  { %v61_v21 = vld [vmem:[%s11386_s28] sm:$0x3]  ;;  %v6121_v27 = vld [vmem:[%s11386_s28 + $0x2] sm:$0x3]  ;;  %vm1818_vm14 = vcmask 195584   ;;  %vm3190_vm15 = vcmask 392192  }
  0x5a   :  { %v68_v22 = vrot.slane %v61_v21, %v7183_v1  ;;  %v72_v23 = vrot.slane %v61_v21, %v7029_v13  ;;  %v83_v28 = vrot.slane %v6121_v27, %v7029_v13  ;;  %v79_v34 = vrot.slane %v6121_v27, %v7183_v1 }
  0x5b   :  { %1051 = vrot.lane.b32.xlu0 %v1034_v52, %s6872_s1  ;;  %1053 = vrot.lane.b32.xlu1 %v1038_v53, %s6872_s1 }
  0x5c   :  { %v7238_v29 = vrot.slane %v68_v22, %v7183_v1  ;;  %v7241_v30 = vrot.slane %v72_v23, %v7183_v1  ;;  %v7247_v36 = vrot.slane %v83_v28, %v7183_v1  ;;  %v7253_v41 = vrot.slane %v79_v34, %v7183_v1 }
  0x5f   :  { %1055 = vrot.lane.b32.xlu0 %v1042_v54, %s6872_s1  ;;  %1057 = vrot.lane.b32.xlu1 %v1046_v55, %s6872_s1  ;;  %s6876_s1 = smov 126  }
  0x63   :  { %1183 = vrot.lane.b32.xlu0 %v1166_v57, %s6873_s22  ;;  %1185 = vrot.lane.b32.xlu1 %v1170_v58, %s6873_s22 }
  0x67   :  { %1187 = vrot.lane.b32.xlu0 %v1174_v59, %s6873_s22  ;;  %1189 = vrot.lane.b32.xlu1 %v1178_v60, %s6873_s22  ;;  %s6877_s22 = smov 110  }
  0x6b   :  { %1315 = vrot.lane.b32.xlu0 %v6122_v61, %s11289_s26  ;;  %1317 = vrot.lane.b32.xlu1 %v6123_v62, %s11289_s26 }
  0x6f   :  { %1319 = vrot.lane.b32.xlu0 %v6124_v63, %s11289_s26  ;;  %1321 = vrot.lane.b32.xlu1 %v6125_v0, %s11289_s26 }
  0x73   :  { %123 = vperm.xlu0 %6667, %v94_v3   ;;  %128 = vperm.xlu1 %6668, %v95_v4  }
  0x77   :  { %133 = vperm.xlu0 %6667, %v96_v6   ;;  %400 = vrot.lane.b32.xlu1 %v383_v5, %s6875_s25 }
  0x7b   :  { %402 = vrot.lane.b32.xlu0 %v387_v7, %s6875_s25  ;;  %404 = vrot.lane.b32.xlu1 %v391_v8, %s6875_s25 }
  0x7f   :  { %406 = vrot.lane.b32.xlu0 %v395_v9, %s6875_s25 }
  0x8a   :  { %v7208_v10 = vpop.permute.xlu1 %153  ;;  %v139_v11 = vpop.permute.xlu0 %138 }
  0x8b   :  { %v285_v39 = vmul.f32 %v7241_v30, %v139_v11  ;;  %v284_v40 = vmul.f32 %v7238_v29, %v139_v11  ;;  %v287_v49 = vmul.f32 %v7247_v36, %v139_v11  ;;  %v286_v51 = vmul.f32 %v7253_v41, %v139_v11 }
  0x8c   :  { %v296_v11 = vmul.f32 %v7238_v29, %v7208_v10  ;;  %v299_v34 = vmul.f32 %v7247_v36, %v7208_v10 }
  0x8e   :  { %v7210_v12 = vpop.permute.xlu1 %158  ;;  %v144_v14 = vpop.permute.xlu0 %143 }
  0x8f   :  { %v289_v58 = vmul.f32 %v7241_v30, %v144_v14  ;;  %v288_v59 = vmul.f32 %v7238_v29, %v144_v14  ;;  %v291_v0 = vmul.f32 %v7247_v36, %v144_v14  ;;  %v290_v3 = vmul.f32 %v7253_v41, %v144_v14 }
  0x90   :  { %v297_v14 = vmul.f32 %v7241_v30, %v7208_v10 }
  0x92   :  { %v7212_v15 = vpop.permute.xlu1 %168  ;;  %v7214_v16 = vpop.permute.xlu0 %148 }
  0x96   :  { %v7216_v17 = vpop.permute.xlu1 %163  ;;  %v7218_v18 = vpop.permute.xlu0 %173 }
  0x9a   :  { %v7220_v19 = vpop.permute.xlu1 %183  ;;  %v7222_v20 = vpop.permute.xlu0 %178 }
  0x9e   :  { %v7229_v24 = vpop.permute.xlu1 %198  ;;  %v7231_v25 = vpop.permute.xlu0 %188 }
  0xa2   :  { %v7243_v31 = vpop.permute.xlu0 %203  ;;  %v451_v32 = vpop.permute.xlu1 %450 }
  0xa3   :  { %v467_v35 = vmul.f32 0.0, %v451_v32 }
  0xa5   :  { %493 = vrot.lane.b32.xlu1 %v467_v35, %s6870_s21 }
  0xa6   :  { %v453_v37 = vpop.permute.xlu0 %452  ;;  %v455_v38 = vpop.permute.xlu1 %454 }
  0xa7   :  { %v7256_v43 = vsel %vm458_vm0, %v451_v32, %v453_v37  ;;  %v7259_v44 = vsel %vm458_vm0, %v453_v37, %v455_v38  ;;  %v298_v32 = vmul.f32 %v7253_v41, %v7208_v10 }
  0xa8   :  { %11387 = vst [vmem:[#allocation12_spill] sm:$0xff] %v7256_v43  ;;  %11388 = vst [vmem:[#allocation13_spill] sm:$0xff] %v7259_v44  ;;  %v469_v45 = vmul.f32 %v7259_v44, %v285_v39  ;;  %v468_v46 = vmul.f32 %v7256_v43, %v284_v40  ;;  %v473_v60 = vmul.f32 %v7259_v44, %v289_v58 }
  0xa9   :  { %v472_v61 = vmul.f32 %v7256_v43, %v288_v59  ;;  %v300_v40 = vmul.f32 %v7238_v29, %v7210_v12 }
  0xaa   :  { %v7263_v47 = vpop.permute.xlu0 %456  ;;  %v7265_v48 = vpop.permute.xlu1 %213  ;;  %497 = vrot.lane.b32.xlu0 %v469_v45, %s6870_s21  ;;  %495 = vrot.lane.b32.xlu1 %v468_v46, %s6870_s21  ;;  %v301_v45 = vmul.f32 %v7241_v30, %v7210_v12 }
  0xab   :  { %11389 = vst [vmem:[#allocation14_spill] sm:$0xff] %v7263_v47  ;;  %v471_v52 = vmul.f32 %v7263_v47, %v287_v49  ;;  %v7274_v53 = vsel %vm458_vm0, %v455_v38, %v7263_v47  ;;  %v475_v4 = vmul.f32 %v7263_v47, %v291_v0 }
  0xac   :  { %11390 = vst [vmem:[#allocation15_spill] sm:$0xff] %v7274_v53  ;;  %v470_v54 = vmul.f32 %v7274_v53, %v286_v51  ;;  %v474_v6 = vmul.f32 %v7274_v53, %v290_v3 }
  0xae   :  { %v7277_v55 = vpop.permute.xlu0 %218  ;;  %v583_v57 = vpop.permute.xlu1 %582  ;;  %501 = vrot.lane.b32.xlu0 %v471_v52, %s6870_s21  ;;  %499 = vrot.lane.b32.xlu1 %v470_v54, %s6870_s21  ;;  %v302_v52 = vmul.f32 %v7253_v41, %v7210_v12  ;;  %v303_v54 = vmul.f32 %v7247_v36, %v7210_v12  ;;  %v293_v12 = vmul.f32 %v7241_v30, %v7214_v16 }
  0xb2   :  { %v585_v62 = vpop.permute.xlu0 %584  ;;  %v587_v63 = vpop.permute.xlu1 %586  ;;  %505 = vrot.lane.b32.xlu0 %v473_v60, %s6870_s21  ;;  %503 = vrot.lane.b32.xlu1 %v472_v61, %s6870_s21 }
  0xb3   :  { %v7291_v5 = vsel %vm590_vm1, %v583_v57, %v585_v62  ;;  %v7295_v7 = vsel %vm590_vm1, %v585_v62, %v587_v63  ;;  %v292_v62 = vmul.f32 %v7238_v29, %v7214_v16 }
  0xb4   :  { %11391 = vst [vmem:[#allocation16_spill] sm:$0xff] %v7291_v5  ;;  %11392 = vst [vmem:[#allocation17_spill] sm:$0xff] %v7295_v7  ;;  %v600_v21 = vmul.f32 %v7291_v5, %v296_v11  ;;  %v601_v22 = vmul.f32 %v7295_v7, %v297_v14  ;;  %v604_v10 = vmul.f32 %v7291_v5, %v300_v40 }
  0xb5   :  { %v605_v46 = vmul.f32 %v7295_v7, %v301_v45  ;;  %v476_v0 = vmul.f32 %v7256_v43, %v292_v62  ;;  %v477_v11 = vmul.f32 %v7259_v44, %v293_v12 }
  0xb6   :  { %v7297_v8 = vpop.permute.xlu0 %588  ;;  %v7299_v9 = vpop.permute.xlu1 %193  ;;  %509 = vrot.lane.b32.xlu0 %v475_v4, %s6870_s21  ;;  %507 = vrot.lane.b32.xlu1 %v474_v6, %s6870_s21  ;;  %v294_v4 = vmul.f32 %v7253_v41, %v7214_v16 }
  0xb7   :  { %11393 = vst [vmem:[#allocation18_spill] sm:$0xff] %v7297_v8  ;;  %v7311_v23 = vsel %vm590_vm1, %v587_v63, %v7297_v8  ;;  %v603_v37 = vmul.f32 %v7297_v8, %v299_v34  ;;  %v607_v59 = vmul.f32 %v7297_v8, %v303_v54  ;;  %v599_v63 = vmul.f32 0.0, %v583_v57 }
  0xb8   :  { %11394 = vst [vmem:[#allocation19_spill] sm:$0xff] %v7311_v23  ;;  %v602_v35 = vmul.f32 %v7311_v23, %v298_v32  ;;  %v606_v58 = vmul.f32 %v7311_v23, %v302_v52  ;;  %v478_v57 = vmul.f32 %v7274_v53, %v294_v4  ;;  %v311_v54 = vmul.f32 %v7247_v36, %v7212_v15 }
  0xb9   :  { %vm3698_vm1 = vcmask 1046528  }
  0xba   :  { %v7313_v27 = vpop.permute.xlu0 %208  ;;  %v7315_v28 = vpop.permute.xlu1 %228  ;;  %627 = vrot.lane.b32.xlu0 %v600_v21, %s6876_s1  ;;  %629 = vrot.lane.b32.xlu1 %v601_v22, %s6876_s1  ;;  %v295_v21 = vmul.f32 %v7247_v36, %v7214_v16  ;;  %v308_v22 = vmul.f32 %v7238_v29, %v7212_v15  ;;  %v309_v16 = vmul.f32 %v7241_v30, %v7212_v15 }
  0xbc   :  { %v479_v34 = vmul.f32 %v7263_v47, %v295_v21 }
  0xbe   :  { %v7325_v38 = vpop.permute.xlu0 %233  ;;  %v7327_v39 = vpop.permute.xlu1 %714  ;;  %631 = vrot.lane.b32.xlu0 %v602_v35, %s6876_s1  ;;  %633 = vrot.lane.b32.xlu1 %v603_v37, %s6876_s1 }
  0xc2   :  { %v717_v49 = vpop.permute.xlu0 %716  ;;  %v719_v51 = vpop.permute.xlu1 %718  ;;  %635 = vrot.lane.b32.xlu0 %v604_v10, %s6876_s1  ;;  %637 = vrot.lane.b32.xlu1 %v605_v46, %s6876_s1  ;;  %v310_v10 = vmul.f32 %v7253_v41, %v7212_v15  ;;  %v314_v15 = vmul.f32 %v7253_v41, %v7218_v18 }
  0xc3   :  { %v7368_v14 = vsel %vm519_vm2, %v7327_v39, %v717_v49  ;;  %v7380_v35 = vsel %vm519_vm2, %v717_v49, %v719_v51 }
  0xc4   :  { %11396 = vst [vmem:[#allocation21_spill] sm:$0xff] %v7368_v14  ;;  %11397 = vst [vmem:[#allocation22_spill] sm:$0xff] %v7380_v35  ;;  %v731_v37 = vmul.f32 %v7368_v14, %v308_v22  ;;  %v732_v46 = vmul.f32 %v7380_v35, %v309_v16  ;;  %v730_v22 = vmul.f32 0.0, %v7327_v39  ;;  %v305_v16 = vmul.f32 %v7241_v30, %v7216_v17 }
  0xc5   :  { %v306_v39 = vmul.f32 %v7253_v41, %v7216_v17 }
  0xc6   :  { %v7345_v60 = vpop.permute.xlu0 %720  ;;  %v7347_v61 = vpop.permute.xlu1 %223  ;;  %639 = vrot.lane.b32.xlu0 %v606_v58, %s6876_s1  ;;  %641 = vrot.lane.b32.xlu1 %v607_v59, %s6876_s1 }
  0xc7   :  { %11395 = vst [vmem:[#allocation20_spill] sm:$0xff] %v7345_v60  ;;  %v7390_v45 = vsel %vm519_vm2, %v719_v51, %v7345_v60  ;;  %v312_v51 = vmul.f32 %v7238_v29, %v7218_v18  ;;  %v734_v59 = vmul.f32 %v7345_v60, %v311_v54  ;;  %v353_v44 = vmul.f32 %v7241_v30, %v7347_v61 }
  0xc8   :  { %11399 = vst [vmem:[#allocation24_spill] sm:$0xff] %v7390_v45  ;;  %v733_v49 = vmul.f32 %v7390_v45, %v310_v10  ;;  %v737_v4 = vmul.f32 %v7390_v45, %v314_v15  ;;  %v321_v15 = vmul.f32 %v7241_v30, %v7220_v19 }
  0xc9   :  { %v735_v62 = vmul.f32 %v7368_v14, %v312_v51  ;;  %v610_v51 = vmul.f32 %v7311_v23, %v306_v39 }
  0xca   :  { %v7354_v3 = vpop.permute.xlu0 %243  ;;  %625 = vrot.lane.b32.xlu0 %v599_v63, %s6876_s1  ;;  %511 = vrot.lane.b32.xlu1 %v476_v0, %s6870_s21  ;;  %v7362_v6 = vpop.permute.xlu1 %248  ;;  %v313_v63 = vmul.f32 %v7241_v30, %v7218_v18 }
  0xcc   :  { %v736_v12 = vmul.f32 %v7380_v35, %v313_v63  ;;  %v320_v63 = vmul.f32 %v7238_v29, %v7220_v19 }
  0xce   :  { %513 = vrot.lane.b32.xlu0 %v477_v11, %s6870_s21  ;;  %515 = vrot.lane.b32.xlu1 %v478_v57, %s6870_s21  ;;  %v7376_v32 = vpop.permute.xlu0 %238  ;;  %v7383_v40 = vpop.permute.xlu1 %919  ;;  %v315_v57 = vmul.f32 %v7247_v36, %v7218_v18 }
  0xcf   :  { %11398 = vst [vmem:[#allocation23_spill] sm:$0xff] %v7383_v40 }
  0xd0   :  { %v738_v21 = vmul.f32 %v7345_v60, %v315_v57  ;;  %v323_v57 = vmul.f32 %v7247_v36, %v7220_v19 }
  0xd2   :  { %517 = vrot.lane.b32.xlu0 %v479_v34, %s6870_s21  ;;  %758 = vrot.lane.b32.xlu1 %v731_v37, %s6868_s20  ;;  %v7397_v52 = vpop.permute.xlu0 %921  ;;  %v7405_v58 = vpop.permute.xlu1 %923  ;;  %v304_v37 = vmul.f32 %v7238_v29, %v7216_v17 }
  0xd4   :  { %v608_v18 = vmul.f32 %v7291_v5, %v304_v37  ;;  %v325_v37 = vmul.f32 %v7241_v30, %v7231_v25 }
  0xd6   :  { %760 = vrot.lane.b32.xlu0 %v732_v46, %s6868_s20  ;;  %762 = vrot.lane.b32.xlu1 %v733_v49, %s6868_s20  ;;  %v7415_v0 = vpop.permute.xlu0 %925  ;;  %v7419_v11 = vpop.permute.xlu1 %253  ;;  %v609_v46 = vmul.f32 %v7295_v7, %v305_v16  ;;  %v307_v49 = vmul.f32 %v7247_v36, %v7216_v17 }
  0xda   :  { %764 = vrot.lane.b32.xlu0 %v734_v59, %s6868_s20  ;;  %766 = vrot.lane.b32.xlu1 %v735_v62, %s6868_s20  ;;  %v7427_v34 = vpop.permute.xlu0 %1051  ;;  %v7435_v10 = vpop.permute.xlu1 %1053  ;;  %v611_v59 = vmul.f32 %v7297_v8, %v307_v49  ;;  %v317_v49 = vmul.f32 %v7241_v30, %v7222_v20  ;;  %v342_v8 = vmul.f32 %v7253_v41, %v7313_v27 }
  0xdb   :  { %11400 = vst [vmem:[#allocation25_spill] sm:$0xff] %v7427_v34  ;;  %v7591_v1 = vsel %vm1059_vm4, %v7427_v34, %v7435_v10 }
  0xdc   :  { %11408 = vst [vmem:[#allocation33_spill] sm:$0xff] %v7591_v1  ;;  %v1078_v43 = vmul.f32 %v7591_v1, %v353_v44 }
  0xde   :  { %768 = vrot.lane.b32.xlu0 %v736_v12, %s6868_s20  ;;  %770 = vrot.lane.b32.xlu1 %v737_v4, %s6868_s20  ;;  %v7445_v54 = vpop.permute.xlu0 %1055  ;;  %v7449_v62 = vpop.permute.xlu1 %1057  ;;  %v322_v4 = vmul.f32 %v7253_v41, %v7220_v19  ;;  %v326_v19 = vmul.f32 %v7253_v41, %v7231_v25 }
  0xdf   :  { %v7611_v42 = vsel %vm1059_vm4, %v7445_v54, %v7449_v62  ;;  %v1072_v26 = vmul.f32 0.0, %v7449_v62 }
  0xe0   :  { %11410 = vst [vmem:[#allocation35_spill] sm:$0xff] %v7611_v42 }
  0xe2   :  { %772 = vrot.lane.b32.xlu0 %v738_v21, %s6868_s20  ;;  %756 = vrot.lane.b32.xlu1 %v730_v22, %s6868_s20  ;;  %v7457_v12 = vpop.permute.xlu0 %1183  ;;  %v7461_v17 = vpop.permute.xlu1 %1185  ;;  %v324_v22 = vmul.f32 %v7238_v29, %v7231_v25 }
  0xe3   :  { %11401 = vst [vmem:[#allocation26_spill] sm:$0xff] %v7457_v12 }
  0xe6   :  { %643 = vrot.lane.b32.xlu0 %v608_v18, %s6876_s1  ;;  %645 = vrot.lane.b32.xlu1 %v609_v46, %s6876_s1  ;;  %v7469_v21 = vpop.permute.xlu0 %1187  ;;  %v7475_v16 = vpop.permute.xlu1 %1189  ;;  %v327_v18 = vmul.f32 %v7247_v36, %v7231_v25  ;;  %v316_v46 = vmul.f32 %v7238_v29, %v7222_v20  ;;  %v318_v25 = vmul.f32 %v7253_v41, %v7222_v20 }
  0xea   :  { %647 = vrot.lane.b32.xlu0 %v610_v51, %s6876_s1  ;;  %649 = vrot.lane.b32.xlu1 %v611_v59, %s6876_s1  ;;  %v7485_v39 = vpop.permute.xlu0 %1315  ;;  %v7491_v51 = vpop.permute.xlu1 %1317  ;;  %v739_v59 = vmul.f32 %v7368_v14, %v316_v46 }
  0xeb   :  { %11402 = vst [vmem:[#allocation27_spill] sm:$0xff] %v7485_v39  ;;  %v7791_v44 = vsel %vm1323_vm6, %v7485_v39, %v7491_v51 }
  0xec   :  { %11418 = vst [vmem:[#allocation43_spill] sm:$0xff] %v7791_v44 }
  0xee   :  { %836 = vrot.lane.b32.xlu0 %v320_v63, %s6875_s25  ;;  %838 = vrot.lane.b32.xlu1 %v321_v15, %s6875_s25  ;;  %v740_v63 = vmul.f32 %v7380_v35, %v317_v49  ;;  %v319_v15 = vmul.f32 %v7247_v36, %v7222_v20  ;;  %v333_v20 = vmul.f32 %v7241_v30, %v7229_v24 }
  0xef   :  { %v7520_v49 = vsel %vm927_vm3, %v7397_v52, %v7405_v58 }
  0xf0   :  { %11404 = vst [vmem:[#allocation29_spill] sm:$0xff] %v7520_v49  ;;  %v947_v23 = vmul.f32 %v7520_v49, %v342_v8 }
  0xf2   :  { %840 = vrot.lane.b32.xlu0 %v322_v4, %s6875_s25  ;;  %842 = vrot.lane.b32.xlu1 %v323_v57, %s6875_s25  ;;  %v7501_v4 = vpop.permute.xlu0 %1319  ;;  %v741_v57 = vmul.f32 %v7390_v45, %v318_v25  ;;  %v7527_v25 = vsel %vm927_vm3, %v7405_v58, %v7415_v0  ;;  %v336_v58 = vmul.f32 %v7238_v29, %v7243_v31 }
  0xf3   :  { %11405 = vst [vmem:[#allocation30_spill] sm:$0xff] %v7527_v25 }
  0xf6   :  { %844 = vrot.lane.b32.xlu0 %v324_v22, %s6875_s25  ;;  %846 = vrot.lane.b32.xlu1 %v325_v37, %s6875_s25  ;;  %v742_v22 = vmul.f32 %v7345_v60, %v319_v15  ;;  %v332_v37 = vmul.f32 %v7238_v29, %v7229_v24  ;;  %v7529_v15 = vpop.permute.xlu0 %123 }
  0xf8   :  { %v936_v46 = vmul.f32 %v7383_v40, %v332_v37 }
  0xfa   :  { %848 = vrot.lane.b32.xlu0 %v326_v19, %s6875_s25  ;;  %850 = vrot.lane.b32.xlu1 %v327_v18, %s6875_s25  ;;  %v7509_v19 = vsel %vm927_vm3, %v7383_v40, %v7397_v52  ;;  %v7511_v18 = vpop.permute.xlu1 %1321  ;;  %vm3699_vm3 = vcmask 1047552  }
  0xfb   :  { %11403 = vst [vmem:[#allocation28_spill] sm:$0xff] %v7509_v19 }
  0xfe   :  { %774 = vrot.lane.b32.xlu0 %v739_v59, %s6868_s20  ;;  %776 = vrot.lane.b32.xlu1 %v740_v63, %s6868_s20  ;;  %v937_v59 = vmul.f32 %v7509_v19, %v333_v20  ;;  %v334_v63 = vmul.f32 %v7253_v41, %v7229_v24  ;;  %v7535_v52 = vpop.permute.xlu1 %128  ;;  %v940_v20 = vmul.f32 0.0, %v7415_v0 }
 0x102   :  { %778 = vrot.lane.b32.xlu0 %v741_v57, %s6868_s20  ;;  %780 = vrot.lane.b32.xlu1 %v742_v22, %s6868_s20  ;;  %v335_v57 = vmul.f32 %v7247_v36, %v7229_v24  ;;  %v938_v22 = vmul.f32 %v7520_v49, %v334_v63  ;;  %v941_v24 = vmul.f32 %v7383_v40, %v336_v58  ;;  %v7549_v2 = vpop.permute.xlu1 %400 }
 0x103   :  { %v338_v63 = vmul.f32 %v7253_v41, %v7243_v31 }
 0x104   :  { %v939_v37 = vmul.f32 %v7527_v25, %v335_v57 }
 0x105   :  { %v943_v0 = vmul.f32 %v7520_v49, %v338_v63  ;;  %v329_v63 = vmul.f32 %v7241_v30, %v7299_v9 }
 0x106   :  { %962 = vrot.lane.b32.xlu0 %v936_v46, %s6877_s22  ;;  %964 = vrot.lane.b32.xlu1 %v937_v59, %s6877_s22  ;;  %v7544_v46 = vpop.permute.xlu0 %133  ;;  %v337_v59 = vmul.f32 %v7241_v30, %v7243_v31  ;;  %v7563_v58 = vpop.permute.xlu1 %404 }
 0x108   :  { %v942_v57 = vmul.f32 %v7509_v19, %v337_v59 }
 0x10a   :  { %966 = vrot.lane.b32.xlu0 %v938_v22, %s6877_s22  ;;  %968 = vrot.lane.b32.xlu1 %v939_v37, %s6877_s22  ;;  %v339_v22 = vmul.f32 %v7247_v36, %v7243_v31  ;;  %v7559_v37 = vpop.permute.xlu0 %402 }
 0x10e   :  { %970 = vrot.lane.b32.xlu0 %v940_v20, %s6877_s22  ;;  %972 = vrot.lane.b32.xlu1 %v941_v24, %s6877_s22  ;;  %v944_v20 = vmul.f32 %v7527_v25, %v339_v22  ;;  %v328_v24 = vmul.f32 %v7238_v29, %v7299_v9  ;;  %v7570_v59 = vpop.permute.xlu0 %406 }
 0x10f   :  { %11406 = vst [vmem:[#allocation31_spill] sm:$0xff] %v7570_v59 }
 0x112   :  { %974 = vrot.lane.b32.xlu0 %v942_v57, %s6877_s22  ;;  %976 = vrot.lane.b32.xlu1 %v943_v0, %s6877_s22  ;;  %v330_v57 = vmul.f32 %v7253_v41, %v7299_v9  ;;  %v344_v0 = vmul.f32 %v7238_v29, %v7265_v48 }
 0x114   :  { %v1068_v56 = vmul.f32 %v7427_v34, %v344_v0 }
 0x116   :  { %978 = vrot.lane.b32.xlu0 %v944_v20, %s6877_s22  ;;  %852 = vrot.lane.b32.xlu1 %v328_v24, %s6875_s25  ;;  %v331_v24 = vmul.f32 %v7247_v36, %v7299_v9  ;;  %v346_v9 = vmul.f32 %v7253_v41, %v7265_v48 }
 0x117   :  { %v7572_v31 = vpop.permute.xlu1 %493 }
 0x118   :  { %11407 = vst [vmem:[#allocation32_spill] sm:$0xff] %v7572_v31 }
 0x11a   :  { %854 = vrot.lane.b32.xlu0 %v329_v63, %s6875_s25  ;;  %856 = vrot.lane.b32.xlu1 %v330_v57, %s6875_s25  ;;  %v345_v63 = vmul.f32 %v7241_v30, %v7265_v48  ;;  %v7599_v57 = vsel %vm1059_vm4, %v7435_v10, %v7445_v54  ;;  %v348_v54 = vmul.f32 %v7238_v29, %v7277_v55  ;;  %vm4414_vm4 = vcmask 982016  }
 0x11b   :  { %11409 = vst [vmem:[#allocation34_spill] sm:$0xff] %v7599_v57  ;;  %v1070_v10 = vmul.f32 %v7599_v57, %v346_v9 }
 0x11c   :  { %v7582_v22 = vpop.permute.xlu0 %497  ;;  %v7584_v20 = vpop.permute.xlu1 %495  ;;  %v1069_v0 = vmul.f32 %v7591_v1, %v345_v63 }
 0x11e   :  { %858 = vrot.lane.b32.xlu0 %v331_v24, %s6875_s25  ;;  %1094 = vrot.lane.b32.xlu1 %v1068_v56, %s6878_s2  ;;  %v347_v24 = vmul.f32 %v7247_v36, %v7265_v48  ;;  %v349_v48 = vmul.f32 %v7241_v30, %v7277_v55 }
 0x120   :  { %v7605_v50 = vpop.permute.xlu0 %501  ;;  %v7613_v33 = vpop.permute.xlu1 %499  ;;  %v1071_v63 = vmul.f32 %v7611_v42, %v347_v24  ;;  %v1074_v62 = vmul.f32 %v7591_v1, %v349_v48  ;;  %v350_v24 = vmul.f32 %v7253_v41, %v7277_v55  ;;  %v1427_v48 = vld [vmem:[%s11145_s3] sm:$0xff] }
 0x122   :  { %1096 = vrot.lane.b32.xlu0 %v1069_v0, %s6878_s2  ;;  %1098 = vrot.lane.b32.xlu1 %v1070_v10, %s6878_s2  ;;  %v1073_v0 = vmul.f32 %v7427_v34, %v348_v54 }
 0x124   :  { %v7620_v56 = vpop.permute.xlu0 %505  ;;  %v7624_v13 = vpop.permute.xlu1 %503 }
 0x126   :  { %1100 = vrot.lane.b32.xlu0 %v1071_v63, %s6878_s2  ;;  %1102 = vrot.lane.b32.xlu1 %v1072_v26, %s6878_s2  ;;  %v351_v63 = vmul.f32 %v7247_v36, %v7277_v55  ;;  %v1075_v26 = vmul.f32 %v7599_v57, %v350_v24  ;;  %v1428_v55 = vld [vmem:[%s11145_s3 + $0x8] sm:$0xff]  ;;  %v340_v24 = vmul.f32 %v7238_v29, %v7313_v27 }
 0x128   :  { %v7632_v9 = vpop.permute.xlu0 %509  ;;  %v7635_v10 = vpop.permute.xlu1 %507  ;;  %v1076_v54 = vmul.f32 %v7611_v42, %v351_v63  ;;  %v341_v63 = vmul.f32 %v7241_v30, %v7313_v27 }
 0x12a   :  { %1104 = vrot.lane.b32.xlu0 %v1073_v0, %s6878_s2  ;;  %1106 = vrot.lane.b32.xlu1 %v1074_v62, %s6878_s2  ;;  %v946_v14 = vmul.f32 %v7509_v19, %v341_v63  ;;  %v356_v63 = vmul.f32 %v7238_v29, %v7315_v28 }
 0x12c   :  { %v7644_v60 = vpop.permute.xlu0 %627  ;;  %v7647_v45 = vpop.permute.xlu1 %629 }
 0x12e   :  { %1108 = vrot.lane.b32.xlu0 %v1075_v26, %s6878_s2  ;;  %1110 = vrot.lane.b32.xlu1 %v1076_v54, %s6878_s2  ;;  %v945_v54 = vmul.f32 %v7383_v40, %v340_v24 }
 0x130   :  { %v7655_v0 = vpop.permute.xlu0 %631  ;;  %v7660_v62 = vpop.permute.xlu1 %633 }
 0x132   :  { %1432 = vperm.xlu0 %6667, %v1427_v48   ;;  %1437 = vperm.xlu1 %6668, %v1428_v55   ;;  %v343_v48 = vmul.f32 %v7247_v36, %v7313_v27  ;;  %v357_v27 = vmul.f32 %v7241_v30, %v7315_v28 }
 0x134   :  { %v7666_v26 = vpop.permute.xlu0 %635  ;;  %v7669_v35 = vpop.permute.xlu1 %637  ;;  %v948_v40 = vmul.f32 %v7527_v25, %v343_v48  ;;  %v7701_v48 = vsel %vm1191_vm5, %v7461_v17, %v7469_v21 }
 0x135   :  { %11413 = vst [vmem:[#allocation38_spill] sm:$0xff] %v7701_v48 }
 0x136   :  { %980 = vrot.lane.b32.xlu0 %v945_v54, %s6877_s22  ;;  %982 = vrot.lane.b32.xlu1 %v946_v14, %s6877_s22  ;;  %v7689_v54 = vsel %vm1191_vm5, %v7457_v12, %v7461_v17  ;;  %v1200_v14 = vmul.f32 %v7457_v12, %v356_v63  ;;  %v359_v63 = vmul.f32 %v7247_v36, %v7315_v28 }
 0x137   :  { %11411 = vst [vmem:[#allocation36_spill] sm:$0xff] %v7689_v54  ;;  %v1201_v49 = vmul.f32 %v7689_v54, %v357_v27 }
 0x138   :  { %v7678_v55 = vpop.permute.xlu0 %639  ;;  %v7681_v24 = vpop.permute.xlu1 %641 }
 0x13a   :  { %984 = vrot.lane.b32.xlu0 %v947_v23, %s6877_s22  ;;  %986 = vrot.lane.b32.xlu1 %v948_v40, %s6877_s22  ;;  %v358_v23 = vmul.f32 %v7253_v41, %v7315_v28  ;;  %v7711_v40 = vsel %vm1191_vm5, %v7469_v21, %v7475_v16  ;;  %v360_v21 = vmul.f32 %v7238_v29, %v7325_v38  ;;  %vm4472_vm5 = vcmask 965632  }
 0x13b   :  { %11414 = vst [vmem:[#allocation39_spill] sm:$0xff] %v7711_v40  ;;  %v1203_v7 = vmul.f32 %v7711_v40, %v359_v63  ;;  %v362_v63 = vmul.f32 %v7253_v41, %v7325_v38 }
 0x13c   :  { %v7695_v8 = vpop.permute.xlu0 %625  ;;  %v7703_v25 = vpop.permute.xlu1 %511  ;;  %v1202_v27 = vmul.f32 %v7701_v48, %v358_v23  ;;  %v1205_v5 = vmul.f32 %v7457_v12, %v360_v21  ;;  %v361_v23 = vmul.f32 %v7241_v30, %v7325_v38  ;;  %v363_v21 = vmul.f32 %v7247_v36, %v7325_v38 }
 0x13d   :  { %11412 = vst [vmem:[#allocation37_spill] sm:$0xff] %v7695_v8  ;;  %v1207_v47 = vmul.f32 %v7701_v48, %v362_v63  ;;  %v352_v63 = vmul.f32 %v7238_v29, %v7347_v61 }
 0x13e   :  { %1226 = vrot.lane.b32.xlu0 %v1200_v14, %s11287_s27  ;;  %1228 = vrot.lane.b32.xlu1 %v1201_v49, %s11287_s27  ;;  %v1204_v14 = vmul.f32 0.0, %v7475_v16  ;;  %v1208_v53 = vmul.f32 %v7711_v40, %v363_v21 }
 0x13f   :  { %v1077_v21 = vmul.f32 %v7427_v34, %v352_v63  ;;  %v355_v63 = vmul.f32 %v7247_v36, %v7347_v61 }
 0x140   :  { %v7717_v17 = vpop.permute.xlu0 %513  ;;  %v7720_v19 = vpop.permute.xlu1 %515 }
 0x141   :  { %v1080_v34 = vmul.f32 %v7611_v42, %v355_v63  ;;  %v370_v63 = vmul.f32 %v7253_v41, %v7354_v3 }
 0x142   :  { %1230 = vrot.lane.b32.xlu0 %v1202_v27, %s11287_s27  ;;  %1232 = vrot.lane.b32.xlu1 %v1203_v7, %s11287_s27  ;;  %v1206_v7 = vmul.f32 %v7689_v54, %v361_v23 }
 0x144   :  { %v7728_v28 = vpop.permute.xlu0 %517  ;;  %v7730_v49 = vpop.permute.xlu1 %758 }
 0x146   :  { %1234 = vrot.lane.b32.xlu0 %v1204_v14, %s11287_s27  ;;  %1236 = vrot.lane.b32.xlu1 %v1205_v5, %s11287_s27  ;;  %v1460_v5 = vld [vmem:[%s11146_s4] sm:$0xff] }
 0x148   :  { %v7739_v27 = vpop.permute.xlu0 %760  ;;  %v7742_v16 = vpop.permute.xlu1 %762 }
 0x14a   :  { %1238 = vrot.lane.b32.xlu0 %v1206_v7, %s11287_s27  ;;  %1240 = vrot.lane.b32.xlu1 %v1207_v47, %s11287_s27  ;;  %v1461_v47 = vld [vmem:[%s11146_s4 + $0x8] sm:$0xff] }
 0x14c   :  { %v7749_v14 = vpop.permute.xlu0 %764  ;;  %v7755_v23 = vpop.permute.xlu1 %766 }
 0x14d   :  { %11415 = vst [vmem:[#allocation40_spill] sm:$0xff] %v7755_v23 }
 0x14e   :  { %1242 = vrot.lane.b32.xlu0 %v1208_v53, %s11287_s27  ;;  %1465 = vperm.xlu1 %6668, %v1460_v5   ;;  %v354_v53 = vmul.f32 %v7253_v41, %v7347_v61 }
 0x150   :  { %v7763_v38 = vpop.permute.xlu0 %768  ;;  %v7765_v7 = vpop.permute.xlu1 %770 }
 0x151   :  { %11416 = vst [vmem:[#allocation41_spill] sm:$0xff] %v7763_v38  ;;  %v1079_v38 = vmul.f32 %v7599_v57, %v354_v53  ;;  %v7813_v57 = vsel %vm1323_vm6, %v7501_v4, %v7511_v18 }
 0x152   :  { %1470 = vperm.xlu0 %6667, %v1461_v47   ;;  %1112 = vrot.lane.b32.xlu1 %v1077_v21, %s6878_s2  ;;  %v368_v47 = vmul.f32 %v7238_v29, %v7354_v3  ;;  %11422 = vst [vmem:[#allocation47_spill] sm:$0xff] %v7813_v57 }
 0x154   :  { %v7773_v5 = vpop.permute.xlu0 %772  ;;  %v7776_v23 = vpop.permute.xlu1 %756  ;;  %v1332_v61 = vmul.f32 %v7485_v39, %v368_v47 }
 0x155   :  { %11417 = vst [vmem:[#allocation42_spill] sm:$0xff] %v7776_v23 }
 0x156   :  { %1114 = vrot.lane.b32.xlu0 %v1078_v43, %s6878_s2  ;;  %1116 = vrot.lane.b32.xlu1 %v1079_v38, %s6878_s2  ;;  %v369_v43 = vmul.f32 %v7241_v30, %v7354_v3  ;;  %v7801_v38 = vsel %vm1323_vm6, %v7491_v51, %v7501_v4  ;;  %v372_v4 = vmul.f32 %v7238_v29, %v7362_v6 }
 0x157   :  { %11420 = vst [vmem:[#allocation45_spill] sm:$0xff] %v7801_v38  ;;  %v1334_v51 = vmul.f32 %v7801_v38, %v370_v63 }
 0x158   :  { %v7785_v21 = vpop.permute.xlu0 %643  ;;  %v7793_v53 = vpop.permute.xlu1 %645  ;;  %v1333_v47 = vmul.f32 %v7791_v44, %v369_v43 }
 0x159   :  { %11419 = vst [vmem:[#allocation44_spill] sm:$0xff] %v7793_v53 }
 0x15a   :  { %1118 = vrot.lane.b32.xlu0 %v1080_v34, %s6878_s2  ;;  %1358 = vrot.lane.b32.xlu1 %v1332_v61, %s11285_s12  ;;  %v371_v34 = vmul.f32 %v7247_v36, %v7354_v3  ;;  %v373_v3 = vmul.f32 %v7241_v30, %v7362_v6 }
 0x15c   :  { %v7807_v42 = vpop.permute.xlu0 %647  ;;  %v7815_v1 = vpop.permute.xlu1 %649  ;;  %v1335_v43 = vmul.f32 %v7813_v57, %v371_v34  ;;  %v374_v34 = vmul.f32 %v7253_v41, %v7362_v6 }
 0x15d   :  { %11421 = vst [vmem:[#allocation46_spill] sm:$0xff] %v7807_v42  ;;  %v1336_v42 = vmul.f32 0.0, %v7511_v18  ;;  %v1338_v18 = vmul.f32 %v7791_v44, %v373_v3  ;;  %v364_v3 = vmul.f32 %v7238_v29, %v7376_v32 }
 0x15e   :  { %1360 = vrot.lane.b32.xlu0 %v1333_v47, %s11285_s12  ;;  %1362 = vrot.lane.b32.xlu1 %v1334_v51, %s11285_s12  ;;  %v1337_v47 = vmul.f32 %v7485_v39, %v372_v4 }
 0x160   :  { %v7822_v61 = vpop.permute.xlu0 %836  ;;  %v7826_v53 = vpop.permute.xlu1 %838 }
 0x161   :  { %11423 = vst [vmem:[#allocation48_spill] sm:$0xff] %v7822_v61 }
 0x162   :  { %1364 = vrot.lane.b32.xlu0 %v1335_v43, %s11285_s12  ;;  %1366 = vrot.lane.b32.xlu1 %v1336_v42, %s11285_s12  ;;  %v375_v43 = vmul.f32 %v7247_v36, %v7362_v6  ;;  %v1339_v42 = vmul.f32 %v7801_v38, %v374_v34  ;;  %v1429_v6 = vld [vmem:[%s11145_s3 + $0x10] sm:$0xff]  ;;  %v1209_v34 = vmul.f32 %v7457_v12, %v364_v3 }
 0x163   :  { %v367_v3 = vmul.f32 %v7247_v36, %v7376_v32 }
 0x164   :  { %v7834_v63 = vpop.permute.xlu0 %840  ;;  %v7837_v51 = vpop.permute.xlu1 %842  ;;  %v1340_v4 = vmul.f32 %v7813_v57, %v375_v43  ;;  %v365_v43 = vmul.f32 %v7241_v30, %v7376_v32 }
 0x165   :  { %11424 = vst [vmem:[#allocation49_spill] sm:$0xff] %v7834_v63  ;;  %v1212_v12 = vmul.f32 %v7711_v40, %v367_v3 }
 0x166   :  { %1368 = vrot.lane.b32.xlu0 %v1337_v47, %s11285_s12  ;;  %1370 = vrot.lane.b32.xlu1 %v1338_v18, %s11285_s12 }
 0x168   :  { %v7846_v61 = vpop.permute.xlu0 %844  ;;  %v7849_v63 = vpop.permute.xlu1 %846 }
 0x169   :  { %11425 = vst [vmem:[#allocation50_spill] sm:$0xff] %v7846_v61  ;;  %11426 = vst [vmem:[#allocation51_spill] sm:$0xff] %v7849_v63  ;;  %v1210_v61 = vmul.f32 %v7689_v54, %v365_v43 }
 0x16a   :  { %1372 = vrot.lane.b32.xlu0 %v1339_v42, %s11285_s12  ;;  %1374 = vrot.lane.b32.xlu1 %v1340_v4, %s11285_s12  ;;  %v366_v42 = vmul.f32 %v7253_v41, %v7376_v32  ;;  %v377_v32 = vmul.f32 %v7241_v30, %v7419_v11 }
 0x16c   :  { %v7859_v47 = vpop.permute.xlu0 %848  ;;  %v7861_v18 = vpop.permute.xlu1 %850  ;;  %v1342_v40 = vmul.f32 %v7791_v44, %v377_v32 }
 0x16d   :  { %11427 = vst [vmem:[#allocation52_spill] sm:$0xff] %v7859_v47  ;;  %v1211_v47 = vmul.f32 %v7701_v48, %v366_v42  ;;  %v376_v42 = vmul.f32 %v7238_v29, %v7419_v11  ;;  %v378_v48 = vmul.f32 %v7253_v41, %v7419_v11 }
 0x16e   :  { %1442 = vperm.xlu0 %6667, %v1429_v6   ;;  %1244 = vrot.lane.b32.xlu1 %v1209_v34, %s11287_s27  ;;  %v1462_v34 = vld [vmem:[%s11146_s4 + $0x10] sm:$0xff] }
 0x170   :  { %v7869_v4 = vpop.permute.xlu0 %774  ;;  %v7872_v63 = vpop.permute.xlu1 %776 }
 0x172   :  { %1246 = vrot.lane.b32.xlu0 %v1210_v61, %s11287_s27  ;;  %1248 = vrot.lane.b32.xlu1 %v1211_v47, %s11287_s27  ;;  %v1341_v47 = vmul.f32 %v7485_v39, %v376_v42 }
 0x174   :  { %v7879_v6 = vpop.permute.xlu0 %778  ;;  %v7885_v43 = vpop.permute.xlu1 %780 }
 0x175   :  { %11428 = vst [vmem:[#allocation53_spill] sm:$0xff] %v7885_v43 }
 0x176   :  { %1250 = vrot.lane.b32.xlu0 %v1212_v12, %s11287_s27  ;;  %1475 = vperm.xlu1 %6668, %v1462_v34   ;;  %v379_v12 = vmul.f32 %v7247_v36, %v7419_v11  ;;  %v1343_v34 = vmul.f32 %v7801_v38, %v378_v48  ;;  %s6892_s27 = smov 3  }
 0x178   :  { %v7892_v61 = vpop.permute.xlu0 %962  ;;  %v7895_v3 = vpop.permute.xlu1 %964  ;;  %v1344_v42 = vmul.f32 %v7813_v57, %v379_v12 }
 0x179   :  { %11429 = vst [vmem:[#allocation54_spill] sm:$0xff] %v7892_v61  ;;  %11430 = vst [vmem:[#allocation55_spill] sm:$0xff] %v7895_v3 }
 0x17a   :  { %1376 = vrot.lane.b32.xlu0 %v1341_v47, %s11285_s12  ;;  %1378 = vrot.lane.b32.xlu1 %v1342_v40, %s11285_s12 }
 0x17c   :  { %v7904_v54 = vpop.permute.xlu0 %966  ;;  %v7907_v43 = vpop.permute.xlu1 %968 }
 0x17d   :  { %11431 = vst [vmem:[#allocation56_spill] sm:$0xff] %v7904_v54  ;;  %11432 = vst [vmem:[#allocation57_spill] sm:$0xff] %v7907_v43  ;;  %v7999_v54 = vsel %vm408_vm7, %v7563_v58, %v7570_v59 }
 0x17e   :  { %1380 = vrot.lane.b32.xlu0 %v1343_v34, %s11285_s12  ;;  %1382 = vrot.lane.b32.xlu1 %v1344_v42, %s11285_s12  ;;  %11460 = vst [vmem:[#allocation85_spill] sm:$0xff] %v7999_v54  ;;  %s11703_s12 = smov 17  }
 0x180   :  { %v7912_v32 = vpop.permute.xlu0 %970  ;;  %v7914_v47 = vpop.permute.xlu1 %972 }
 0x181   :  { %11433 = vst [vmem:[#allocation58_spill] sm:$0xff] %v7912_v32  ;;  %11434 = vst [vmem:[#allocation59_spill] sm:$0xff] %v7914_v47  ;;  %v282_v32 = vmul.f32 %v7253_v41, %v7544_v46 }
 0x184   :  { %v7916_v44 = vpop.permute.xlu0 %974  ;;  %v7918_v11 = vpop.permute.xlu1 %976 }
 0x185   :  { %11435 = vst [vmem:[#allocation60_spill] sm:$0xff] %v7916_v44  ;;  %11436 = vst [vmem:[#allocation61_spill] sm:$0xff] %v7918_v11 }
 0x188   :  { %v7920_v40 = vpop.permute.xlu0 %978  ;;  %v7922_v39 = vpop.permute.xlu1 %852 }
 0x189   :  { %11437 = vst [vmem:[#allocation62_spill] sm:$0xff] %v7920_v40  ;;  %11438 = vst [vmem:[#allocation63_spill] sm:$0xff] %v7922_v39 }
 0x18c   :  { %v7924_v48 = vpop.permute.xlu0 %854  ;;  %v7926_v38 = vpop.permute.xlu1 %856 }
 0x18d   :  { %11439 = vst [vmem:[#allocation64_spill] sm:$0xff] %v7924_v48  ;;  %11440 = vst [vmem:[#allocation65_spill] sm:$0xff] %v7926_v38 }
 0x190   :  { %v7928_v12 = vpop.permute.xlu0 %858  ;;  %v7930_v34 = vpop.permute.xlu1 %1094 }
 0x191   :  { %11441 = vst [vmem:[#allocation66_spill] sm:$0xff] %v7928_v12  ;;  %11442 = vst [vmem:[#allocation67_spill] sm:$0xff] %v7930_v34 }
 0x194   :  { %v7932_v42 = vpop.permute.xlu0 %1096  ;;  %v7934_v57 = vpop.permute.xlu1 %1098 }
 0x195   :  { %11443 = vst [vmem:[#allocation68_spill] sm:$0xff] %v7932_v42  ;;  %11444 = vst [vmem:[#allocation69_spill] sm:$0xff] %v7934_v57  ;;  %v7987_v57 = vmul.f32 0.0, %v7549_v2 }
 0x197   :  { %11459 = vst [vmem:[#allocation84_spill] sm:$0xff] %v7987_v57 }
 0x198   :  { %v7936_v47 = vpop.permute.xlu0 %1100  ;;  %v7938_v44 = vpop.permute.xlu1 %1102 }
 0x199   :  { %11445 = vst [vmem:[#allocation70_spill] sm:$0xff] %v7936_v47  ;;  %11446 = vst [vmem:[#allocation71_spill] sm:$0xff] %v7938_v44  ;;  %v272_v44 = vmul.f32 %v7238_v29, %v7529_v15  ;;  %v277_v47 = vmul.f32 %v7241_v30, %v7535_v52 }
 0x19c   :  { %v7940_v11 = vpop.permute.xlu0 %1104  ;;  %v7942_v40 = vpop.permute.xlu1 %1106 }
 0x19d   :  { %11447 = vst [vmem:[#allocation72_spill] sm:$0xff] %v7940_v11  ;;  %11448 = vst [vmem:[#allocation73_spill] sm:$0xff] %v7942_v40  ;;  %v275_v11 = vmul.f32 %v7247_v36, %v7529_v15 }
 0x1a0   :  { %v7944_v39 = vpop.permute.xlu0 %1108  ;;  %v7946_v48 = vpop.permute.xlu1 %1110 }
 0x1a1   :  { %11449 = vst [vmem:[#allocation74_spill] sm:$0xff] %v7944_v39  ;;  %11450 = vst [vmem:[#allocation75_spill] sm:$0xff] %v7946_v48  ;;  %v279_v39 = vmul.f32 %v7247_v36, %v7535_v52 }
 0x1b1   :  { %v7948_v38 = vpop.permute.xlu0 %1432  ;;  %v7950_v12 = vpop.permute.xlu1 %1437 }
 0x1b2   :  { %11451 = vst [vmem:[#allocation76_spill] sm:$0xff] %v7948_v38  ;;  %11452 = vst [vmem:[#allocation77_spill] sm:$0xff] %v7950_v12  ;;  %v7965_v38 = vsel %vm408_vm7, %v7549_v2, %v7559_v37  ;;  %v274_v12 = vmul.f32 %v7253_v41, %v7529_v15  ;;  %v283_v2 = vmul.f32 %v7247_v36, %v7544_v46 }
 0x1b3   :  { %11456 = vst [vmem:[#allocation81_spill] sm:$0xff] %v7965_v38  ;;  %v418_v43 = vmul.f32 %v7965_v38, %v272_v44  ;;  %v521_v36 = vsel %vm519_vm2, %v7584_v20, %v7582_v22 }
 0x1b5   :  { %v7952_v34 = vpop.permute.xlu0 %980  ;;  %v7954_v42 = vpop.permute.xlu1 %982 }
 0x1b6   :  { %11453 = vst [vmem:[#allocation78_spill] sm:$0xff] %v7952_v34  ;;  %11454 = vst [vmem:[#allocation79_spill] sm:$0xff] %v7954_v42  ;;  %v7970_v34 = vsel %vm408_vm7, %v7559_v37, %v7563_v58  ;;  %v273_v42 = vmul.f32 %v7241_v30, %v7529_v15  ;;  %v278_v37 = vmul.f32 %v7253_v41, %v7535_v52 }
 0x1b7   :  { %11457 = vst [vmem:[#allocation82_spill] sm:$0xff] %v7970_v34  ;;  %v280_v15 = vmul.f32 %v7238_v29, %v7544_v46  ;;  %v520_v58 = vsel %vm519_vm2, %v7572_v31, %v7584_v20  ;;  %v524_v20 = vsel %vm519_vm2, %v7572_v31, %v7624_v13 }
 0x1b9   :  { %v7960_v40 = vpop.permute.xlu0 %984  ;;  %v7976_v48 = vpop.permute.xlu1 %986  ;;  %v426_v41 = vmul.f32 %v7965_v38, %v280_v15  ;;  %v429_v15 = vmul.f32 %v7570_v59, %v283_v2  ;;  %v526_v2 = vsel %vm519_vm2, %v7620_v56, %v7635_v10 }
 0x1ba   :  { %11455 = vst [vmem:[#allocation80_spill] sm:$0xff] %v7960_v40  ;;  %11458 = vst [vmem:[#allocation83_spill] sm:$0xff] %v7976_v48  ;;  %v276_v40 = vmul.f32 %v7238_v29, %v7535_v52  ;;  %v281_v48 = vmul.f32 %v7241_v30, %v7544_v46  ;;  %v419_v52 = vmul.f32 %v7970_v34, %v273_v42 }
 0x1bb   :  { %v423_v30 = vmul.f32 %v7970_v34, %v277_v47  ;;  %v421_v46 = vmul.f32 %v7570_v59, %v275_v11  ;;  %v420_v47 = vmul.f32 %v7999_v54, %v274_v12  ;;  %v424_v42 = vmul.f32 %v7999_v54, %v278_v37 }
 0x1bc   :  { %v422_v29 = vmul.f32 %v7965_v38, %v276_v40  ;;  %v427_v44 = vmul.f32 %v7970_v34, %v281_v48  ;;  %v425_v40 = vmul.f32 %v7570_v59, %v279_v39  ;;  %v522_v48 = vsel %vm519_vm2, %v7582_v22, %v7613_v33 }
 0x1bd   :  { %v8004_v61 = vpop.permute.xlu0 %1226  ;;  %v8010_v3 = vpop.permute.xlu1 %1228  ;;  %v523_v34 = vsel %vm519_vm2, %v7613_v33, %v7605_v50  ;;  %v525_v39 = vsel %vm519_vm2, %v7624_v13, %v7620_v56  ;;  %v428_v11 = vmul.f32 %v7999_v54, %v282_v32  ;;  %v547_v22 = vadd.f32 %v520_v58, %v7987_v57 }
 0x1be   :  { %v548_v37 = vadd.f32 %v521_v36, %v418_v43  ;;  %v527_v33 = vsel %vm519_vm2, %v7635_v10, %v7632_v9  ;;  %v551_v38 = vadd.f32 %v7605_v50, %v421_v46  ;;  %v549_v13 = vadd.f32 %v522_v48, %v419_v52 }
 0x1bf   :  { %v653_v32 = vsel %vm651_vm8, %v7644_v60, %v7647_v45  ;;  %v654_v43 = vsel %vm651_vm8, %v7647_v45, %v7655_v0  ;;  %v550_v58 = vadd.f32 %v523_v34, %v420_v47  ;;  %v552_v56 = vadd.f32 %v524_v20, %v7987_v57 }
 0x1c0   :  { %v553_v36 = vadd.f32 %v525_v39, %v422_v29  ;;  %v655_v10 = vsel %vm651_vm8, %v7655_v0, %v7660_v62  ;;  %v556_v54 = vadd.f32 %v7632_v9, %v425_v40  ;;  %v554_v50 = vadd.f32 %v526_v2, %v423_v30 }
 0x1c1   :  { %v8036_v12 = vpop.permute.xlu0 %1230  ;;  %v8045_v59 = vpop.permute.xlu1 %1232  ;;  %v555_v52 = vadd.f32 %v527_v33, %v424_v42  ;;  %v657_v46 = vsel %vm651_vm8, %v7666_v26, %v7669_v35  ;;  %v681_v45 = vadd.f32 %v654_v43, %v549_v13  ;;  %v683_v34 = vadd.f32 %v7660_v62, %v551_v38 }
 0x1c2   :  { %11461 = vst [vmem:[#allocation86_spill] sm:$0xff] %v8045_v59  ;;  %v680_v59 = vadd.f32 %v653_v32, %v548_v37  ;;  %v658_v29 = vsel %vm651_vm8, %v7669_v35, %v7678_v55  ;;  %v682_v0 = vadd.f32 %v655_v10, %v550_v58  ;;  %v659_v9 = vsel %vm651_vm8, %v7678_v55, %v7681_v24  ;;  %v11464_v10 = vld [vmem:[#allocation40_spill] sm:$0xff] }
 0x1c3   :  { %v652_v30 = vsel %vm651_vm8, %v7695_v8, %v7644_v60  ;;  %v656_v40 = vsel %vm651_vm8, %v7695_v8, %v7666_v26  ;;  %v685_v62 = vadd.f32 %v657_v46, %v553_v36  ;;  %v528_v35 = vsel %vm519_vm2, %v7572_v31, %v7703_v25  ;;  %v11463_v36 = vld [vmem:[#allocation41_spill] sm:$0xff]  ;;  %v11466_v46 = vld [vmem:[#allocation46_spill] sm:$0xff] }
 0x1c4   :  { %v529_v38 = vsel %vm519_vm2, %v7703_v25, %v7717_v17  ;;  %v530_v55 = vsel %vm519_vm2, %v7717_v17, %v7720_v19  ;;  %v686_v42 = vadd.f32 %v658_v29, %v554_v50  ;;  %v688_v60 = vadd.f32 %v7681_v24, %v556_v54 }
 0x1c5   :  { %v8062_v48 = vpop.permute.xlu0 %1234  ;;  %v8068_v47 = vpop.permute.xlu1 %1236  ;;  %v531_v26 = vsel %vm519_vm2, %v7720_v19, %v7728_v28  ;;  %v783_v20 = vsel %vm458_vm0, %v7730_v49, %v7739_v27  ;;  %v687_v37 = vadd.f32 %v659_v9, %v555_v52  ;;  %v784_v25 = vsel %vm458_vm0, %v7739_v27, %v7742_v16 }
 0x1c6   :  { %11462 = vst [vmem:[#allocation87_spill] sm:$0xff] %v8062_v48  ;;  %v679_v2 = vadd.f32 %v652_v30, %v547_v22  ;;  %v684_v17 = vadd.f32 %v656_v40, %v552_v56  ;;  %v557_v24 = vadd.f32 %v528_v35, %v7987_v57  ;;  %v558_v54 = vadd.f32 %v529_v38, %v426_v41  ;;  %v11467_v35 = vld [vmem:[#allocation48_spill] sm:$0xff] }
 0x1c7   :  { %v559_v13 = vadd.f32 %v530_v55, %v427_v44  ;;  %v561_v19 = vadd.f32 %v7728_v28, %v429_v15  ;;  %v560_v32 = vadd.f32 %v531_v26, %v428_v11  ;;  %v810_v43 = vadd.f32 %v783_v20, %v680_v59  ;;  %v11465_v15 = vld [vmem:[#allocation44_spill] sm:$0xff] }
 0x1c8   :  { %v785_v58 = vsel %vm458_vm0, %v7742_v16, %v7749_v14  ;;  %v787_v27 = vsel %vm458_vm0, %v11464_v10, %v11463_v36  ;;  %v811_v22 = vadd.f32 %v784_v25, %v681_v45  ;;  %v788_v56 = vsel %vm458_vm0, %v11463_v36, %v7765_v7  ;;  %v11469_v25 = vld [vmem:[#allocation51_spill] sm:$0xff] }
 0x1c9   :  { %v8095_v39 = vpop.permute.xlu0 %1238  ;;  %v8100_v33 = vpop.permute.xlu1 %1240  ;;  %v789_v28 = vsel %vm458_vm0, %v7765_v7, %v7773_v5  ;;  %v782_v59 = vsel %vm458_vm0, %v7776_v23, %v7730_v49  ;;  %v813_v16 = vadd.f32 %v7749_v14, %v683_v34  ;;  %v660_v44 = vsel %vm651_vm8, %v7695_v8, %v7785_v21 }
 0x1ca   :  { %v661_v11 = vsel %vm651_vm8, %v7785_v21, %v11465_v15  ;;  %v786_v7 = vsel %vm458_vm0, %v7776_v23, %v11464_v10  ;;  %v812_v52 = vadd.f32 %v785_v58, %v682_v0  ;;  %v815_v49 = vadd.f32 %v787_v27, %v685_v62 }
 0x1cb   :  { %v662_v14 = vsel %vm651_vm8, %v11465_v15, %v11466_v46  ;;  %v663_v45 = vsel %vm651_vm8, %v11466_v46, %v7815_v1  ;;  %v816_v34 = vadd.f32 %v788_v56, %v686_v42  ;;  %v817_v29 = vadd.f32 %v789_v28, %v687_v37  ;;  %v11468_v42 = vld [vmem:[#allocation49_spill] sm:$0xff]  ;;  %v11472_v15 = vld [vmem:[#allocation55_spill] sm:$0xff] }
 0x1cc   :  { %v818_v21 = vadd.f32 %v7773_v5, %v688_v60  ;;  %v809_v9 = vadd.f32 %v782_v59, %v679_v2  ;;  %v689_v30 = vadd.f32 %v660_v44, %v557_v24  ;;  %v690_v40 = vadd.f32 %v661_v11, %v558_v54  ;;  %v11470_v2 = vld [vmem:[#allocation50_spill] sm:$0xff]  ;;  %v11471_v24 = vld [vmem:[#allocation52_spill] sm:$0xff]  ;;  %v11475_v46 = vld [vmem:[#allocation57_spill] sm:$0xff] }
 0x1cd   :  { %v8119_v41 = vpop.permute.xlu0 %1242  ;;  %v8131_v50 = vpop.permute.xlu1 %1465  ;;  %v860_v0 = vsel %vm408_vm7, %v11467_v35, %v7826_v53  ;;  %v814_v62 = vadd.f32 %v786_v7, %v684_v17  ;;  %v691_v55 = vadd.f32 %v662_v14, %v559_v13  ;;  %v8145_v26 = vadd.f32 %v663_v45, %v560_v32  ;;  %v11476_v45 = vld [vmem:[#allocation53_spill] sm:$0xff] }
 0x1ce   :  { %v693_v20 = vadd.f32 %v7815_v1, %v561_v19  ;;  %v861_v5 = vsel %vm408_vm7, %v7826_v53, %v11468_v42  ;;  %v862_v37 = vsel %vm408_vm7, %v11468_v42, %v7837_v51  ;;  %v863_v17 = vsel %vm408_vm7, %v11470_v2, %v11469_v25  ;;  %v11481_v42 = vld [vmem:[#allocation68_spill] sm:$0xff] }
 0x1cf   :  { %v864_v54 = vsel %vm408_vm7, %v11469_v25, %v11471_v24  ;;  %v884_v1 = vadd.f32 %v11467_v35, %v809_v9  ;;  %v885_v13 = vadd.f32 %v860_v0, %v810_v43  ;;  %v865_v53 = vsel %vm408_vm7, %v11471_v24, %v7861_v18  ;;  %v11478_v9 = vld [vmem:[#allocation60_spill] sm:$0xff] }
 0x1d0   :  { %v790_v19 = vsel %vm458_vm0, %v7776_v23, %v7869_v4  ;;  %v886_v32 = vadd.f32 %v861_v5, %v811_v22  ;;  %v888_v58 = vadd.f32 %v7837_v51, %v813_v16  ;;  %v791_v36 = vsel %vm458_vm0, %v7869_v4, %v7872_v63  ;;  %v11473_v4 = vld [vmem:[#allocation54_spill] sm:$0xff] }
 0x1d1   :  { %v8143_v38 = vpop.permute.xlu0 %1470  ;;  %v8151_v60 = vpop.permute.xlu1 %1112  ;;  %v792_v10 = vsel %vm458_vm0, %v7872_v63, %v7879_v6  ;;  %v887_v27 = vadd.f32 %v862_v37, %v812_v52  ;;  %v889_v56 = vadd.f32 %v11470_v2, %v814_v62  ;;  %v890_v28 = vadd.f32 %v863_v17, %v815_v49  ;;  %v11474_v52 = vld [vmem:[#allocation56_spill] sm:$0xff]  ;;  %v11483_v17 = vld [vmem:[#allocation62_spill] sm:$0xff] }
 0x1d2   :  { %v891_v59 = vadd.f32 %v864_v54, %v816_v34  ;;  %v892_v22 = vadd.f32 %v865_v53, %v817_v29  ;;  %v893_v51 = vadd.f32 %v7861_v18, %v818_v21  ;;  %v8182_v16 = vadd.f32 %v790_v19, %v689_v30  ;;  %v11477_v29 = vld [vmem:[#allocation58_spill] sm:$0xff]  ;;  %v11479_v30 = vld [vmem:[#allocation59_spill] sm:$0xff] }
 0x1d3   :  { %v989_v11 = vsel %vm988_vm9, %v11473_v4, %v11472_v15  ;;  %v8187_v7 = vadd.f32 %v791_v36, %v690_v40  ;;  %v8189_v63 = vadd.f32 %v792_v10, %v691_v55  ;;  %v990_v49 = vsel %vm988_vm9, %v11472_v15, %v11474_v52  ;;  %v11480_v55 = vld [vmem:[#allocation61_spill] sm:$0xff]  ;;  %v11485_v15 = vld [vmem:[#allocation70_spill] sm:$0xff] }
 0x1d4   :  { %v991_v14 = vsel %vm988_vm9, %v11474_v52, %v11475_v46  ;;  %v8200_v18 = vsel %vm458_vm0, %v7879_v6, %v11476_v45  ;;  %v8203_v34 = vadd.f32 %v11476_v45, %v693_v20  ;;  %v992_v21 = vsel %vm988_vm9, %v11475_v46, %v11477_v29  ;;  %v11482_v20 = vld [vmem:[#allocation67_spill] sm:$0xff] }
 0x1d5   :  { %v8176_v43 = vpop.permute.xlu0 %1114  ;;  %v8179_v44 = vpop.permute.xlu1 %1116  ;;  %v993_v40 = vsel %vm988_vm9, %v11479_v30, %v11478_v9  ;;  %v1016_v0 = vadd.f32 %v11473_v4, %v884_v1  ;;  %v1017_v62 = vadd.f32 %v989_v11, %v885_v13  ;;  %v994_v6 = vsel %vm988_vm9, %v11478_v9, %v11480_v55  ;;  %v11490_v9 = vld [vmem:[#allocation72_spill] sm:$0xff] }
 0x1d6   :  { %v1121_v5 = vsel %vm1120_vm10, %v11482_v20, %v11481_v42  ;;  %v1018_v25 = vadd.f32 %v990_v49, %v886_v32  ;;  %v1019_v2 = vadd.f32 %v991_v14, %v887_v27  ;;  %v995_v24 = vsel %vm988_vm9, %v11480_v55, %v11483_v17  ;;  %v11484_v32 = vld [vmem:[#allocation69_spill] sm:$0xff]  ;;  %v11486_v49 = vld [vmem:[#allocation71_spill] sm:$0xff] }
 0x1d7   :  { %v996_v54 = vsel %vm988_vm9, %v11483_v17, %v11477_v29  ;;  %v1020_v1 = vadd.f32 %v992_v21, %v888_v58  ;;  %v1021_v13 = vadd.f32 %v11479_v30, %v889_v56  ;;  %v1022_v53 = vadd.f32 %v993_v40, %v890_v28  ;;  %v11488_v14 = vld [vmem:[#allocation63_spill] sm:$0xff]  ;;  %v11489_v21 = vld [vmem:[#allocation73_spill] sm:$0xff]  ;;  %v11491_v40 = vld [vmem:[#allocation74_spill] sm:$0xff] }
 0x1d8   :  { %v1253_v19 = vsel %vm1252_vm11, %v8004_v61, %v8010_v3  ;;  %v1023_v36 = vadd.f32 %v994_v6, %v891_v59  ;;  %v1149_v10 = vadd.f32 %v1121_v5, %v1017_v62  ;;  %v1122_v27 = vsel %vm1120_vm10, %v11481_v42, %v11484_v32  ;;  %v11487_v59 = vld [vmem:[#allocation64_spill] sm:$0xff]  ;;  %v11492_v17 = vld [vmem:[#allocation75_spill] sm:$0xff] }
 0x1d9   :  { %v8211_v35 = vpop.permute.xlu0 %1118  ;;  %v1359_v37 = vpop.permute.xlu1 %1358  ;;  %v1123_v4 = vsel %vm1120_vm10, %v11484_v32, %v11485_v15  ;;  %v1024_v52 = vadd.f32 %v995_v24, %v892_v22  ;;  %v1025_v58 = vadd.f32 %v996_v54, %v893_v51  ;;  %v1124_v56 = vsel %vm1120_vm10, %v11485_v15, %v11486_v49  ;;  %v11493_v54 = vld [vmem:[#allocation86_spill] sm:$0xff] }
 0x1da   :  { %v8243_v45 = vsel %vm408_vm7, %v11488_v14, %v11487_v59  ;;  %v1125_v30 = vsel %vm1120_vm10, %v11490_v9, %v11489_v21  ;;  %v1126_v22 = vsel %vm1120_vm10, %v11489_v21, %v11491_v40  ;;  %v1281_v51 = vadd.f32 %v1253_v19, %v1149_v10 }
 0x1db   :  { %v1148_v62 = vadd.f32 %v11482_v20, %v1016_v0  ;;  %v1150_v55 = vadd.f32 %v1122_v27, %v1018_v25  ;;  %v1151_v6 = vadd.f32 %v1123_v4, %v1019_v2  ;;  %v1254_v42 = vsel %vm1252_vm11, %v8010_v3, %v8036_v12 }
 0x1dc   :  { %v1152_v5 = vadd.f32 %v1124_v56, %v1020_v1  ;;  %v1127_v24 = vsel %vm1120_vm10, %v11491_v40, %v11492_v17  ;;  %v1255_v32 = vsel %vm1252_vm11, %v8036_v12, %v11493_v54  ;;  %v1153_v0 = vadd.f32 %v11490_v9, %v1021_v13 }
 0x1dd   :  { %v1361_v11 = vpop.permute.xlu0 %1360  ;;  %v1363_v46 = vpop.permute.xlu1 %1362  ;;  %v1154_v20 = vadd.f32 %v1125_v30, %v1022_v53  ;;  %v1155_v25 = vadd.f32 %v1126_v22, %v1023_v36  ;;  %v1128_v3 = vsel %vm1120_vm10, %v11492_v17, %v11486_v49  ;;  %v1282_v1 = vadd.f32 %v1254_v42, %v1150_v55 }
 0x1de   :  { %v1385_v28 = vsel %vm1384_vm12, %v1359_v37, %v1361_v11  ;;  %v1386_v2 = vsel %vm1384_vm12, %v1361_v11, %v1363_v46  ;;  %v1257_v12 = vsel %vm1252_vm11, %v8068_v47, %v8095_v39  ;;  %v1156_v4 = vadd.f32 %v1127_v24, %v1024_v52 }
 0x1df   :  { %v8261_v15 = vadd.f32 %v1385_v28, %v1281_v51  ;;  %v1280_v13 = vadd.f32 %v8004_v61, %v1148_v62  ;;  %v1283_v53 = vadd.f32 %v1255_v32, %v1151_v6  ;;  %v1256_v36 = vsel %vm1252_vm11, %v11493_v54, %v8062_v48  ;;  %v11496_v28 = vld [vmem:[#allocation76_spill] sm:$0xff] }
 0x1e0   :  { %v1285_v11 = vadd.f32 %v8068_v47, %v1153_v0  ;;  %v1258_v56 = vsel %vm1252_vm11, %v8095_v39, %v8100_v33  ;;  %v8284_v9 = vadd.f32 %v1386_v2, %v1282_v1  ;;  %v1286_v52 = vadd.f32 %v1257_v12, %v1154_v20 }
 0x1e1   :  { %11494 = vst [vmem:[#allocation41_spill] sm:$0xff] %v8261_v15  ;;  %v1365_v19 = vpop.permute.xlu0 %1364  ;;  %v8265_v10 = vpop.permute.xlu1 %1366  ;;  %v1446_v21 = vmul.f32 %v11496_v28, %v8261_v15  ;;  %v1259_v61 = vsel %vm1252_vm11, %v8100_v33, %v8119_v41  ;;  %v1260_v39 = vsel %vm1252_vm11, %v8119_v41, %v8062_v48  ;;  %v8296_v22 = vadd.f32 %v1359_v37, %v1280_v13 }
 0x1e2   :  { %11495 = vst [vmem:[#allocation40_spill] sm:$0xff] %v8265_v10  ;;  %v1387_v27 = vsel %vm1384_vm12, %v1363_v46, %v1365_v19  ;;  %11497 = vst [vmem:[#allocation44_spill] sm:$0xff] %v8284_v9  ;;  %v1388_v47 = vsel %vm1384_vm12, %v1365_v19, %v8265_v10  ;;  %v1284_v62 = vadd.f32 %v1256_v36, %v1152_v5 }
 0x1e3   :  { %v8289_v30 = vadd.f32 %v1387_v27, %v1283_v53  ;;  %11499 = vst [vmem:[#allocation48_spill] sm:$0xff] %v8296_v22  ;;  %v1157_v55 = vadd.f32 %v1128_v3, %v1025_v58  ;;  %v1287_v6 = vadd.f32 %v1258_v56, %v1155_v25  ;;  %v1288_v17 = vadd.f32 %v1259_v61, %v1156_v4  ;;  %v11503_v58 = vld [vmem:[#allocation77_spill] sm:$0xff] }
 0x1e4   :  { %v1479_v24 = vadd.f32 %v8131_v50, %v1446_v21  ;;  %v1447_v54 = vmul.f32 %v11496_v28, %v8284_v9  ;;  %v8306_v19 = vadd.f32 %v1388_v47, %v1284_v62  ;;  %v1445_v25 = vmul.f32 %v11496_v28, %v8296_v22  ;;  %v11507_v62 = vld [vmem:[#allocation65_spill] sm:$0xff] }
 0x1e5   :  { %v1369_v46 = vpop.permute.xlu0 %1368  ;;  %11498 = vst [vmem:[#allocation46_spill] sm:$0xff] %v8289_v30  ;;  %v1371_v40 = vpop.permute.xlu1 %1370  ;;  %v1289_v41 = vadd.f32 %v1260_v39, %v1157_v55  ;;  %v1448_v37 = vmul.f32 %v11496_v28, %v8289_v30  ;;  %v822_v39 = vadd.f32 %v8200_v18, %v8145_v26 }
 0x1e6   :  { %v1389_v51 = vsel %vm1384_vm12, %v1369_v46, %v1371_v40  ;;  %v8299_v42 = vadd.f32 %v1369_v46, %v1285_v11  ;;  %11502 = vst [vmem:[#allocation50_spill] sm:$0xff] %v8306_v19  ;;  %v1494_v53 = vmax.f32 %v1479_v24, 0.0  ;;  %v1480_v36 = vadd.f32 %v8131_v50, %v1447_v54 }
 0x1e7   :  { %v8301_v33 = vadd.f32 %v1389_v51, %v1286_v52  ;;  %v1449_v21 = vmul.f32 %v11496_v28, %v8306_v19  ;;  %v1481_v46 = vadd.f32 %v8131_v50, %v1448_v37  ;;  %v894_v51 = vadd.f32 %v11488_v14, %v8182_v16  ;;  %v11508_v14 = vld [vmem:[#allocation79_spill] sm:$0xff]  ;;  %v11509_v37 = vld [vmem:[#allocation78_spill] sm:$0xff] }
 0x1e8   :  { %11500 = vst [vmem:[#allocation49_spill] sm:$0xff] %v8299_v42  ;;  %v1450_v12 = vmul.f32 %v11503_v58, %v8299_v42  ;;  %v867_v28 = vsel %vm408_vm7, %v11487_v59, %v11507_v62  ;;  %v1495_v26 = vmax.f32 %v1480_v36, 0.0  ;;  %v997_v59 = vsel %vm988_vm9, %v11509_v37, %v11508_v14 }
 0x1e9   :  { %11501 = vst [vmem:[#allocation51_spill] sm:$0xff] %v8301_v33  ;;  %v1373_v32 = vpop.permute.xlu0 %1372  ;;  %v1451_v5 = vmul.f32 %v11503_v58, %v8301_v33  ;;  %v1375_v20 = vpop.permute.xlu1 %1374  ;;  %v1482_v16 = vadd.f32 %v8131_v50, %v1449_v21 }
 0x1ea   :  { %v1390_v0 = vsel %vm1384_vm12, %v1371_v40, %v1373_v32  ;;  %v1391_v3 = vsel %vm1384_vm12, %v1373_v32, %v1375_v20  ;;  %v1392_v1 = vsel %vm1384_vm12, %v1375_v20, %v8265_v10  ;;  %v895_v32 = vadd.f32 %v8243_v45, %v8187_v7 }
 0x1eb   :  { %v8315_v2 = vadd.f32 %v1390_v0, %v1287_v6  ;;  %v1484_v27 = vadd.f32 %v8143_v38, %v1451_v5  ;;  %v8323_v4 = vadd.f32 %v1391_v3, %v1288_v17  ;;  %v8325_v13 = vadd.f32 %v1392_v1, %v1289_v41  ;;  %v11510_v3 = vld [vmem:[#allocation66_spill] sm:$0xff] }
 0x1ec   :  { %v1483_v6 = vadd.f32 %v8143_v38, %v1450_v12  ;;  %v1496_v5 = vmax.f32 %v1481_v46, 0.0  ;;  %v868_v7 = vsel %vm408_vm7, %v11507_v62, %v11510_v3  ;;  %v1026_v12 = vadd.f32 %v11509_v37, %v894_v51 }
 0x1ed   :  { %11504 = vst [vmem:[#allocation52_spill] sm:$0xff] %v8315_v2  ;;  %11505 = vst [vmem:[#allocation55_spill] sm:$0xff] %v8323_v4  ;;  %v1452_v11 = vmul.f32 %v11503_v58, %v8315_v2  ;;  %v8330_v56 = vpop.permute.xlu0 %1442  ;;  %v1499_v52 = vmax.f32 %v1484_v27, 0.0  ;;  %v1453_v61 = vmul.f32 %v11503_v58, %v8323_v4  ;;  %v1454_v40 = vmul.f32 %v11503_v58, %v8325_v13  ;;  %v1245_v47 = vpop.permute.xlu1 %1244 }
 0x1ee   :  { %11506 = vst [vmem:[#allocation54_spill] sm:$0xff] %v8325_v13  ;;  %v1478_v58 = vadd.f32 %v8131_v50, %v1445_v25  ;;  %v1129_v27 = vsel %vm1120_vm10, %v8151_v60, %v8176_v43  ;;  %v1498_v50 = vmax.f32 %v1483_v6, 0.0  ;;  %v1027_v36 = vadd.f32 %v997_v59, %v895_v32 }
 0x1ef   :  { %v1485_v55 = vadd.f32 %v8143_v38, %v1452_v11  ;;  %v1486_v17 = vadd.f32 %v8143_v38, %v1453_v61  ;;  %v1487_v24 = vadd.f32 %v8143_v38, %v1454_v40  ;;  %v1536_v54 = vpack.c.bf16 %v1499_v52, %v1494_v53  ;;  %v11511_v11 = vld [vmem:[#allocation80_spill] sm:$0xff]  ;;  %v11512_v52 = vld [vmem:[#allocation83_spill] sm:$0xff] }
 0x1f0   :  { %v896_v38 = vadd.f32 %v867_v28, %v8189_v63  ;;  %v898_v53 = vadd.f32 %v11510_v3, %v8203_v34  ;;  %v998_v63 = vsel %vm988_vm9, %v11508_v14, %v11511_v11  ;;  %v1497_v46 = vmax.f32 %v1482_v16, 0.0 }
 0x1f1   :  { %v1500_v18 = vmax.f32 %v1485_v55, 0.0  ;;  %v1247_v41 = vpop.permute.xlu0 %1246  ;;  %v1501_v0 = vmax.f32 %v1486_v17, 0.0  ;;  %v1249_v20 = vpop.permute.xlu1 %1248  ;;  %1787 = vrot.lane.b32.xlu0 %v1536_v54, %s11289_s26  ;;  %v1502_v45 = vmax.f32 %v1487_v24, 0.0  ;;  %v999_v61 = vsel %vm988_vm9, %v11511_v11, %v11512_v52 }
 0x1f2   :  { %v1000_v40 = vsel %vm988_vm9, %v11512_v52, %v11477_v29  ;;  %v1158_v51 = vadd.f32 %v8151_v60, %v1026_v12  ;;  %v1493_v34 = vmax.f32 %v1478_v58, 0.0  ;;  %v897_v28 = vadd.f32 %v868_v7, %v822_v39 }
 0x1f3   :  { %v1537_v1 = vpack.c.bf16 %v1500_v18, %v1495_v26  ;;  %v1538_v25 = vpack.c.bf16 %v1501_v0, %v1496_v5  ;;  %v1159_v55 = vadd.f32 %v1129_v27, %v1027_v36  ;;  %v1261_v6 = vsel %vm1252_vm11, %v1245_v47, %v1247_v41 }
 0x1f4   :  { %v1539_v17 = vpack.c.bf16 %v1502_v45, %v1497_v46  ;;  %v1130_v24 = vsel %vm1120_vm10, %v8176_v43, %v8179_v44  ;;  %v1131_v54 = vsel %vm1120_vm10, %v8179_v44, %v8211_v35  ;;  %v1290_v32 = vadd.f32 %v1245_v47, %v1158_v51 }
 0x1f5   :  { %v1251_v21 = vpop.permute.xlu0 %1250  ;;  %1789 = vrot.lane.b32.xlu1 %v1537_v1, %s11289_s26  ;;  %v1476_v62 = vpop.permute.xlu1 %1475  ;;  %1791 = vrot.lane.b32.xlu0 %v1538_v25, %s11289_s26  ;;  %v1535_v26 = vpack.c.bf16 %v1498_v50, %v1493_v34  ;;  %v1028_v60 = vadd.f32 %v998_v63, %v896_v38  ;;  %v1029_v18 = vadd.f32 %v999_v61, %v897_v28 }
 0x1f6   :  { %v1030_v16 = vadd.f32 %v1000_v40, %v898_v53  ;;  %v1132_v39 = vsel %vm1120_vm10, %v8211_v35, %v11486_v49  ;;  %v1291_v37 = vadd.f32 %v1261_v6, %v1159_v55  ;;  %v1262_v59 = vsel %vm1252_vm11, %v1247_v41, %v1249_v20 }
 0x1f7   :  { %v1263_v43 = vsel %vm1252_vm11, %v1249_v20, %v1251_v21  ;;  %v1160_v47 = vadd.f32 %v1130_v24, %v1028_v60  ;;  %v1161_v5 = vadd.f32 %v1131_v54, %v1029_v18  ;;  %v1264_v0 = vsel %vm1252_vm11, %v1251_v21, %v8062_v48 }
 0x1f8   :  { %v1162_v38 = vadd.f32 %v1132_v39, %v1030_v16  ;;  %v1548_v16 = vld [vmem:[%s11148_s6 + $0x18] sm:$0xff]  ;;  %v1551_v39 = vld [vmem:[%s11148_s6 + $0x30] sm:$0xff] }
 0x1f9   :  { %v1377_v14 = vpop.permute.xlu0 %1376  ;;  %1793 = vrot.lane.b32.xlu1 %v1539_v17, %s11289_s26  ;;  %v1379_v44 = vpop.permute.xlu1 %1378  ;;  %1785 = vrot.lane.b32.xlu0 %v1535_v26, %s11289_s26  ;;  %v1292_v41 = vadd.f32 %v1262_v59, %v1160_v47  ;;  %v1293_v20 = vadd.f32 %v1263_v43, %v1161_v5  ;;  %v1554_v59 = vld [vmem:[%s11148_s6 + $0x48] sm:$0xff]  ;;  %v1555_v43 = vld [vmem:[%s11148_s6 + $0x50] sm:$0xff] }
 0x1fa   :  { %v8393_v58 = vadd.f32 %v1377_v14, %v1290_v32  ;;  %v1393_v35 = vsel %vm1384_vm12, %v1377_v14, %v1379_v44  ;;  %v1294_v1 = vadd.f32 %v1264_v0, %v1162_v38  ;;  %v1552_v14 = vld [vmem:[%s11148_s6 + $0x38] sm:$0xff]  ;;  %v1557_v5 = vld [vmem:[%s11148_s6 + $0x60] sm:$0xff]  ;;  %v1558_v0 = vld [vmem:[%s11148_s6 + $0x68] sm:$0xff] }
 0x1fb   :  { %v8401_v7 = vadd.f32 %v1393_v35, %v1291_v37  ;;  %v1550_v37 = vld [vmem:[%s11148_s6 + $0x28] sm:$0xff]  ;;  %v1556_v47 = vld [vmem:[%s11148_s6 + $0x58] sm:$0xff]  ;;  %v1561_v38 = vld [vmem:[%s11148_s6 + $0x80] sm:$0xff] }
 0x1fc   :  { %11513 = vst [vmem:[#allocation56_spill] sm:$0xff] %v8393_v58  ;;  %v1455_v3 = vmul.f32 %v8330_v56, %v8393_v58  ;;  %v1560_v35 = vld [vmem:[%s11148_s6 + $0x78] sm:$0xff] }
 0x1fd   :  { %11514 = vst [vmem:[#allocation57_spill] sm:$0xff] %v8401_v7  ;;  %v1381_v45 = vpop.permute.xlu0 %1380  ;;  %v1456_v27 = vmul.f32 %v8330_v56, %v8401_v7  ;;  %v1383_v25 = vpop.permute.xlu1 %1382 }
 0x1fe   :  { %v1488_v12 = vadd.f32 %v1476_v62, %v1455_v3  ;;  %v1394_v50 = vsel %vm1384_vm12, %v1379_v44, %v1381_v45  ;;  %v1395_v36 = vsel %vm1384_vm12, %v1381_v45, %v1383_v25  ;;  %v1396_v11 = vsel %vm1384_vm12, %v1383_v25, %v8265_v10  ;;  %v1553_v44 = vld [vmem:[%s11148_s6 + $0x40] sm:$0xff]  ;;  %v1563_v3 = vld [vmem:[%s11148_s6 + $0x90] sm:$0xff]  ;;  %v1562_v45 = vld [vmem:[%s11148_s6 + $0x88] sm:$0xff] }
 0x1ff   :  { %v8406_v53 = vadd.f32 %v1394_v50, %v1292_v41  ;;  %v8411_v63 = vadd.f32 %v1395_v36, %v1293_v20  ;;  %v8413_v21 = vadd.f32 %v1396_v11, %v1294_v1  ;;  %v1489_v52 = vadd.f32 %v1476_v62, %v1456_v27  ;;  %v1564_v41 = vld [vmem:[%s11148_s6 + $0x98] sm:$0xff]  ;;  %v1559_v20 = vld [vmem:[%s11148_s6 + $0x70] sm:$0xff]  ;;  %v1566_v1 = vld [vmem:[%s11148_s6 + $0xa8] sm:$0xff] }
 0x200   :  { %v1503_v46 = vmax.f32 %v1488_v12, 0.0  ;;  %v1567_v12 = vld [vmem:[%s11148_s6 + $0xb0] sm:$0xff]  ;;  %v1565_v27 = vld [vmem:[%s11148_s6 + $0xa0] sm:$0xff]  ;;  %v1570_v25 = vld [vmem:[%s11148_s6 + $0xc8] sm:$0xff] }
 0x201   :  { %11515 = vst [vmem:[#allocation53_spill] sm:$0xff] %v8406_v53  ;;  %11516 = vst [vmem:[#allocation60_spill] sm:$0xff] %v8411_v63  ;;  %v1457_v61 = vmul.f32 %v8330_v56, %v8406_v53  ;;  %v1458_v40 = vmul.f32 %v8330_v56, %v8411_v63  ;;  %v1459_v51 = vmul.f32 %v8330_v56, %v8413_v21  ;;  %v1504_v28 = vmax.f32 %v1489_v52, 0.0  ;;  %v1569_v50 = vld [vmem:[%s11148_s6 + $0xc0] sm:$0xff]  ;;  %v1568_v36 = vld [vmem:[%s11148_s6 + $0xb8] sm:$0xff] }
 0x202   :  { %11517 = vst [vmem:[#allocation59_spill] sm:$0xff] %v8413_v21  ;;  %v1540_v34 = vpack.c.bf16 %v1503_v46, %v1503_v46  ;;  %v1571_v11 = vld [vmem:[%s11148_s6 + $0xd0] sm:$0xff]  ;;  %v1545_v46 = vld [vmem:[%s11148_s6] sm:$0xff]  ;;  %v1546_v52 = vld [vmem:[%s11148_s6 + $0x8] sm:$0xff] }
 0x203   :  { %v1490_v55 = vadd.f32 %v1476_v62, %v1457_v61  ;;  %v1541_v6 = vpack.c.bf16 %v1504_v28, %v1504_v28  ;;  %v1491_v17 = vadd.f32 %v1476_v62, %v1458_v40  ;;  %v1492_v24 = vadd.f32 %v1476_v62, %v1459_v51  ;;  %v1549_v62 = vld [vmem:[%s11148_s6 + $0x20] sm:$0xff]  ;;  %v1547_v61 = vld [vmem:[%s11148_s6 + $0x10] sm:$0xff]  ;;  %v2934_v51 = vld [vmem:[%s11149_s7 + $0x8] sm:$0xff] }
 0x204   :  { %1795 = vrot.lane.b32.xlu1 %v1540_v34, %s11289_s26  ;;  %v2933_v40 = vld [vmem:[%s11149_s7] sm:$0xff]  ;;  %v2967_v28 = vld [vmem:[%s11150_s8 + $0x8] sm:$0xff] }
 0x205   :  { %v1505_v54 = vmax.f32 %v1490_v55, 0.0  ;;  %1797 = vrot.lane.b32.xlu0 %v1541_v6, %s11289_s26  ;;  %v1506_v32 = vmax.f32 %v1491_v17, 0.0  ;;  %v1507_v60 = vmax.f32 %v1492_v24, 0.0  ;;  %v2966_v34 = vld [vmem:[%s11150_s8] sm:$0xff]  ;;  %v2935_v55 = vld [vmem:[%s11149_s7 + $0x10] sm:$0xff] }
 0x206   :  { %v3014_v6 = vld [vmem:[%s11151_s9] sm:$0xff]  ;;  %v2968_v17 = vld [vmem:[%s11150_s8 + $0x10] sm:$0xff] }
 0x207   :  { %v1542_v26 = vpack.c.bf16 %v1505_v54, %v1505_v54  ;;  %v1543_v18 = vpack.c.bf16 %v1506_v32, %v1506_v32  ;;  %v1544_v56 = vpack.c.bf16 %v1507_v60, %v1507_v60  ;;  %v3047_v24 = vld [vmem:[%s11152_s10] sm:$0xff]  ;;  %v3015_v54 = vld [vmem:[%s11151_s9 + $0x8] sm:$0xff]  ;;  %v3016_v32 = vld [vmem:[%s11151_s9 + $0x10] sm:$0xff] }
 0x209   :  { %1799 = vrot.lane.b32.xlu1 %v1542_v26, %s11289_s26  ;;  %1801 = vrot.lane.b32.xlu0 %v1543_v18, %s11289_s26 }
 0x20d   :  { %1803 = vrot.lane.b32.xlu1 %v1544_v56, %s11289_s26  ;;  %1589 = vperm.xlu0 %6667, %v1548_v16   ;;  %s11724_s26 = smov 1  }
 0x211   :  { %1594 = vperm.xlu1 %6668, %v1549_v62   ;;  %1604 = vperm.xlu0 %6667, %v1551_v39  }
 0x215   :  { %1609 = vperm.xlu1 %6668, %v1552_v14   ;;  %1599 = vperm.xlu0 %6667, %v1550_v37  }
 0x219   :  { %1619 = vperm.xlu1 %6668, %v1554_v59   ;;  %1624 = vperm.xlu0 %6667, %v1555_v43  }
 0x21d   :  { %1614 = vperm.xlu1 %6668, %v1553_v44   ;;  %1629 = vperm.xlu0 %6667, %v1556_v47  }
 0x221   :  { %1634 = vperm.xlu1 %6668, %v1557_v5   ;;  %1639 = vperm.xlu0 %6667, %v1558_v0  }
 0x225   :  { %1649 = vperm.xlu1 %6668, %v1560_v35   ;;  %1654 = vperm.xlu0 %6667, %v1561_v38   ;;  %v6754_v38 = vld [vmem:[%s11147_s5] sm:$0xff]  }
 0x229   :  { %1664 = vperm.xlu1 %6668, %v1563_v3   ;;  %1669 = vperm.xlu0 %6667, %v1564_v41  }
 0x22d   :  { %1644 = vperm.xlu1 %6668, %v1559_v20   ;;  %1659 = vperm.xlu0 %6667, %v1562_v45  }
 0x231   :  { %1679 = vperm.xlu1 %6668, %v1566_v1   ;;  %1684 = vperm.xlu0 %6667, %v1567_v12   ;;  %v11518_v1 = vmov 0   ;;  %v6755_v12 = vld [vmem:[%s11147_s5 + $0x8] sm:$0xff]  }
 0x235   :  { %1674 = vperm.xlu1 %6668, %v1565_v27   ;;  %1694 = vperm.xlu0 %6667, %v1569_v50   ;;  %v6756_v27 = vld [vmem:[%s11147_s5 + $0x10] sm:$0xff]   ;;  %v6757_v50 = vld [vmem:[%s11147_s5 + $0x18] sm:$0xff]  }
 0x239   :  { %1699 = vperm.xlu1 %6668, %v1570_v25   ;;  %1689 = vperm.xlu0 %6667, %v1568_v36   ;;  %v6758_v25 = vld [vmem:[%s11147_s5 + $0x20] sm:$0xff]   ;;  %v6759_v36 = vld [vmem:[%s11147_s5 + $0x28] sm:$0xff]  }
 0x23d   :  { %1704 = vperm.xlu1 %6668, %v1571_v11   ;;  %1574 = vperm.xlu0 %6667, %v1545_v46   ;;  %v6760_v11 = vld [vmem:[%s11147_s5 + $0x30] sm:$0xff]   ;;  %v6761_v46 = vld [vmem:[%s11147_s5 + $0x38] sm:$0xff]  }
 0x241   :  { %1579 = vperm.xlu1 %6668, %v1546_v52   ;;  %1584 = vperm.xlu0 %6667, %v1547_v61   ;;  %v6762_v52 = vld [vmem:[%s11147_s5 + $0x40] sm:$0xff]   ;;  %v6763_v61 = vld [vmem:[%s11147_s5 + $0x48] sm:$0xff]  }
 0x245   :  { %2938 = vperm.xlu1 %6668, %v2933_v40   ;;  %2943 = vperm.xlu0 %6667, %v2934_v51   ;;  %v6764_v40 = vld [vmem:[%s11147_s5 + $0x50] sm:$0xff]   ;;  %v6765_v51 = vld [vmem:[%s11147_s5 + $0x58] sm:$0xff]  }
 0x249   :  { %2971 = vperm.xlu1 %6668, %v2966_v34   ;;  %2976 = vperm.xlu0 %6667, %v2967_v28   ;;  %v6766_v34 = vld [vmem:[%s11147_s5 + $0x60] sm:$0xff]   ;;  %v6767_v28 = vld [vmem:[%s11147_s5 + $0x68] ss:$0 sps:$4 sm:$0xff]  }
 0x24d   :  { %2948 = vperm.xlu1 %6668, %v2935_v55   ;;  %3019 = vperm.xlu0 %6667, %v3014_v6  }
 0x251   :  { %2981 = vperm.xlu1 %6668, %v2968_v17   ;;  %3052 = vperm.xlu0 %6667, %v3047_v24  }
 0x255   :  { %3024 = vperm.xlu1 %6668, %v3015_v54   ;;  %3029 = vperm.xlu0 %6667, %v3016_v32  }
 0x263   :  { %v1788_v26 = vpop.permute.xlu0 %1787 }
 0x267   :  { %v1790_v60 = vpop.permute.xlu1 %1789  ;;  %v1792_v18 = vpop.permute.xlu0 %1791 }
 0x268   :  { %v1807_v56 = vsel %vm1323_vm6, %v1788_v26, %v1790_v60  ;;  %v1808_v37 = vsel %vm1323_vm6, %v1790_v60, %v1792_v18 }
 0x269   :  { %1874 = vmatprep.subr.bf16.mxu0 %v1807_v56 }
 0x26b   :  { %v1794_v16 = vpop.permute.xlu1 %1793  ;;  %v1786_v62 = vpop.permute.xlu0 %1785 }
 0x26c   :  { %v1809_v39 = vsel %vm1323_vm6, %v1792_v18, %v1794_v16  ;;  %v1806_v14 = vsel %vm1323_vm6, %v1786_v62, %v1788_v26 }
 0x26d   :  { %2045 = vmatprep.subr.bf16.mxu1 %v1809_v39  ;;  %1875 = vmatpush1.bf16.msra.mxu0 %v1806_v14 }
 0x26e   :  { %2046 = vmatpush1.bf16.msra.mxu1 %v1808_v37 }
 0x276   :  { %v1796_v59 = vpop.permute.xlu1 %1795 }
 0x277   :  { %v1798_v43 = vpop.permute.xlu0 %1797 }
 0x278   :  { %v1810_v44 = vsel %vm1323_vm6, %v1796_v59, %v1798_v43 }
 0x279   :  { %v1863_v35 = vsel %vm1861_vm13, %v1810_v44, 0 }
 0x27b   :  { %v1800_v47 = vpop.permute.xlu1 %1799  ;;  %v1802_v5 = vpop.permute.xlu0 %1801 }
 0x27c   :  { %v1811_v0 = vsel %vm1323_vm6, %v1798_v43, %v1800_v47  ;;  %v1812_v3 = vsel %vm1323_vm6, %v1800_v47, %v1802_v5  ;;  %v11530_v43 = vld [vmem:[#allocation12_spill] sm:$0xff] }
 0x27d   :  { %6140 = vmatprep.subr.msk.bf16.mxu0 %vm1861_vm13, %v1811_v0  ;;  %v1869_v45 = vsel %vm1861_vm13, %v1812_v3, 0 }
 0x27e   :  { %1877 = vmatpush1.bf16.msra.mxu0 %v1863_v35 }
 0x27f   :  { %v1804_v41 = vpop.permute.xlu1 %1803 }
 0x280   :  { %v1813_v20 = vsel %vm1323_vm6, %v1802_v5, %v1804_v41  ;;  %v11532_v5 = vld [vmem:[#allocation13_spill] sm:$0xff] }
 0x281   :  { %6141 = vmatmul.mubr.msk.bf16.vlgmr.msra.gmra.mrb[0].mxu0 %vm1818_vm14, %v6754_v38  ;;  %6155 = vmatprep.subr.msk.bf16.mxu1 %vm1861_vm13, %v1813_v20 }
 0x282   :  { %2048 = vmatpush1.bf16.msra.mxu1 %v1869_v45  ;;  %1916 = vmatprep.mubr.bf16.mxu0 %v11518_v1 }
 0x285   :  { %6156 = vmatmul.mubr.msk.bf16.vlgmr.msra.gmra.mrb[0].mxu1 %vm1818_vm14, %v6754_v38 }
 0x286   :  { %2087 = vmatprep.mubr.bf16.mxu1 %v11518_v1 }
 0x289   :  { %6142 = vmatmul.mubr.msk.bf16.gmra.mrb[4].mxu0 %vm1818_vm14, %v6755_v12 }
 0x28a   :  { %1926 = vmatprep.mubr.bf16.mxu0 %v11518_v1 }
 0x28c   :  { %v1590_v16 = vpop.permute.xlu0 %1589 }
 0x28d   :  { %6157 = vmatmul.mubr.msk.bf16.gmra.mrb[4].mxu1 %vm1818_vm14, %v6755_v12  ;;  %v11533_v12 = vld [vmem:[#allocation15_spill] sm:$0xff] }
 0x28e   :  { %2097 = vmatprep.mubr.bf16.mxu1 %v11518_v1 }
 0x290   :  { %v1595_v41 = vpop.permute.xlu1 %1594 }
 0x291   :  { %6143 = vmatmul.mubr.msk.bf16.gmra.mrb[8].mxu0 %vm1818_vm14, %v6756_v27 }
 0x292   :  { %1936 = vmatprep.mubr.bf16.mxu0 %v11518_v1 }
 0x295   :  { %6158 = vmatmul.mubr.msk.bf16.gmra.mrb[8].mxu1 %vm1818_vm14, %v6756_v27 }
 0x296   :  { %2107 = vmatprep.mubr.bf16.mxu1 %v11518_v1 }
 0x299   :  { %6144 = vmatmul.mubr.msk.bf16.gmra.mrb[12].mxu0 %vm1818_vm14, %v6757_v50 }
 0x29a   :  { %1946 = vmatprep.mubr.bf16.mxu0 %v11518_v1 }
 0x29d   :  { %6159 = vmatmul.mubr.msk.bf16.gmra.mrb[12].mxu1 %vm1818_vm14, %v6757_v50 }
 0x29e   :  { %2117 = vmatprep.mubr.bf16.mxu1 %v11518_v1 }
 0x2a1   :  { %6145 = vmatmul.mubr.msk.bf16.gmra.mrb[16].mxu0 %vm1818_vm14, %v6758_v25 }
 0x2a2   :  { %1956 = vmatprep.mubr.bf16.mxu0 %v11518_v1 }
 0x2a5   :  { %6160 = vmatmul.mubr.msk.bf16.gmra.mrb[16].mxu1 %vm1818_vm14, %v6758_v25 }
 0x2a6   :  { %2127 = vmatprep.mubr.bf16.mxu1 %v11518_v1 }
 0x2a9   :  { %6146 = vmatmul.mubr.msk.bf16.gmra.mrb[20].mxu0 %vm1818_vm14, %v6759_v36 }
 0x2aa   :  { %1966 = vmatprep.mubr.bf16.mxu0 %v11518_v1 }
 0x2ad   :  { %6161 = vmatmul.mubr.msk.bf16.gmra.mrb[20].mxu1 %vm1818_vm14, %v6759_v36  ;;  %v1605_v36 = vpop.permute.xlu0 %1604 }
 0x2ae   :  { %2137 = vmatprep.mubr.bf16.mxu1 %v11518_v1 }
 0x2b1   :  { %6147 = vmatmul.mubr.msk.bf16.gmra.mrb[24].mxu0 %vm1818_vm14, %v6760_v11 }
 0x2b2   :  { %1976 = vmatprep.mubr.bf16.mxu0 %v11518_v1 }
 0x2b5   :  { %6162 = vmatmul.mubr.msk.bf16.gmra.mrb[24].mxu1 %vm1818_vm14, %v6760_v11  ;;  %v11534_v11 = vld [vmem:[#allocation14_spill] sm:$0xff] }
 0x2b6   :  { %2147 = vmatprep.mubr.bf16.mxu1 %v11518_v1 }
 0x2b9   :  { %6148 = vmatmul.mubr.msk.bf16.gmra.mrb[28].mxu0 %vm1818_vm14, %v6761_v46 }
 0x2ba   :  { %1986 = vmatprep.mubr.bf16.mxu0 %v11518_v1 }
 0x2bd   :  { %6163 = vmatmul.mubr.msk.bf16.gmra.mrb[28].mxu1 %vm1818_vm14, %v6761_v46 }
 0x2be   :  { %2157 = vmatprep.mubr.bf16.mxu1 %v11518_v1 }
 0x2c1   :  { %6149 = vmatmul.mubr.msk.bf16.gmra.mrb[32].mxu0 %vm1818_vm14, %v6762_v52 }
 0x2c2   :  { %1996 = vmatprep.mubr.bf16.mxu0 %v11518_v1 }
 0x2c5   :  { %6164 = vmatmul.mubr.msk.bf16.gmra.mrb[32].mxu1 %vm1818_vm14, %v6762_v52 }
 0x2c6   :  { %2167 = vmatprep.mubr.bf16.mxu1 %v11518_v1 }
 0x2c9   :  { %6150 = vmatmul.mubr.msk.bf16.gmra.mrb[36].mxu0 %vm1818_vm14, %v6763_v61 }
 0x2ca   :  { %2006 = vmatprep.mubr.bf16.mxu0 %v11518_v1 }
 0x2cd   :  { %6165 = vmatmul.mubr.msk.bf16.gmra.mrb[36].mxu1 %vm1818_vm14, %v6763_v61 }
 0x2ce   :  { %2177 = vmatprep.mubr.bf16.mxu1 %v11518_v1 }
 0x2d1   :  { %6151 = vmatmul.mubr.msk.bf16.gmra.mrb[40].mxu0 %vm1818_vm14, %v6764_v40 }
 0x2d2   :  { %2016 = vmatprep.mubr.bf16.mxu0 %v11518_v1 }
 0x2d5   :  { %6166 = vmatmul.mubr.msk.bf16.gmra.mrb[40].mxu1 %vm1818_vm14, %v6764_v40 }
 0x2d6   :  { %2187 = vmatprep.mubr.bf16.mxu1 %v11518_v1 }
 0x2d9   :  { %6152 = vmatmul.mubr.msk.bf16.gmra.mrb[44].mxu0 %vm1818_vm14, %v6765_v51 }
 0x2da   :  { %2026 = vmatprep.mubr.bf16.mxu0 %v11518_v1 }
 0x2dd   :  { %6167 = vmatmul.mubr.msk.bf16.gmra.mrb[44].mxu1 %vm1818_vm14, %v6765_v51 }
 0x2de   :  { %2197 = vmatprep.mubr.bf16.mxu1 %v11518_v1 }
 0x2e1   :  { %6153 = vmatmul.mubr.msk.bf16.gmra.mrb[48].mxu0 %vm1818_vm14, %v6766_v34 }
 0x2e2   :  { %2036 = vmatprep.mubr.bf16.mxu0 %v11518_v1 }
 0x2e5   :  { %6168 = vmatmul.mubr.msk.bf16.gmra.mrb[48].mxu1 %vm1818_vm14, %v6766_v34 }
 0x2e6   :  { %2207 = vmatprep.mubr.bf16.mxu1 %v11518_v1 }
 0x2e9   :  { %6154 = vmatmul.mubr.msk.bf16.gmra.mrb[52].mxu0 %vm1818_vm14, %v6767_v28 }
 0x2ea   :  { %3229 = vmatprep.mubr.bf16.mxu0 %v11518_v1 }
 0x2ed   :  { %6169 = vmatmul.mubr.msk.bf16.gmra.mrb[52].mxu1 %vm1818_vm14, %v6767_v28 }
 0x2ee   :  { %3280 = vmatprep.mubr.bf16.mxu1 %v11518_v1 }
 0x354   :  { %v8647_v55 = vpop.f32.mrb[0].mxu0 }
 0x355   :  { %11519 = vst [vmem:[#allocation61_spill] sm:$0xff] %v8647_v55  ;;  %v8649_v6 = vpop.f32.mrb[1].mxu0 }
 0x356   :  { %11520 = vst [vmem:[#allocation68_spill] sm:$0xff] %v8649_v6  ;;  %v8651_v17 = vpop.f32.mrb[2].mxu0 }
 0x357   :  { %11521 = vst [vmem:[#allocation67_spill] sm:$0xff] %v8651_v17  ;;  %v8653_v24 = vpop.f32.mrb[3].mxu0 }
 0x358   :  { %11522 = vst [vmem:[#allocation62_spill] sm:$0xff] %v8653_v24  ;;  %v8655_v54 = vpop.f32.mrb[0].mxu1 }
 0x359   :  { %11523 = vst [vmem:[#allocation69_spill] sm:$0xff] %v8655_v54  ;;  %v8657_v32 = vpop.f32.mrb[1].mxu1 }
 0x35a   :  { %11524 = vst [vmem:[#allocation70_spill] sm:$0xff] %v8657_v32  ;;  %v8659_v26 = vpop.f32.mrb[2].mxu1 }
 0x35b   :  { %11525 = vst [vmem:[#allocation64_spill] sm:$0xff] %v8659_v26  ;;  %v8661_v60 = vpop.f32.mrb[3].mxu1 }
 0x35c   :  { %11526 = vst [vmem:[#allocation63_spill] sm:$0xff] %v8661_v60  ;;  %v8663_v18 = vpop.f32.mrb[4].mxu0 }
 0x35d   :  { %11527 = vst [vmem:[#allocation73_spill] sm:$0xff] %v8663_v18  ;;  %v8665_v56 = vpop.f32.mrb[5].mxu0 }
 0x35e   :  { %11528 = vst [vmem:[#allocation72_spill] sm:$0xff] %v8665_v56  ;;  %v1922_v62 = vpop.f32.mrb[6].mxu0 }
 0x35f   :  { %v1923_v39 = vadd.f32 %v1922_v62, %v1590_v16  ;;  %v1924_v14 = vpop.f32.mrb[7].mxu0 }
 0x360   :  { %v1925_v37 = vadd.f32 %v1924_v14, %v1590_v16  ;;  %v8667_v59 = vpop.f32.mrb[4].mxu1 }
 0x361   :  { %11529 = vst [vmem:[#allocation74_spill] sm:$0xff] %v8667_v59  ;;  %v2228_v44 = vmul.f32 %v1923_v39, %v11530_v43  ;;  %v8670_v47 = vpop.f32.mrb[5].mxu1 }
 0x362   :  { %11531 = vst [vmem:[#allocation75_spill] sm:$0xff] %v8670_v47  ;;  %v2229_v0 = vmul.f32 %v1925_v37, %v11532_v5  ;;  %v2093_v35 = vpop.f32.mrb[6].mxu1 }
 0x363   :  { %v2094_v38 = vadd.f32 %v2093_v35, %v1590_v16  ;;  %v2095_v3 = vpop.f32.mrb[7].mxu1  ;;  %2252 = vrot.lane.b32.xlu1 %v2228_v44, %s6870_s21  ;;  %v1600_v44 = vpop.permute.xlu0 %1599 }
 0x364   :  { %v2096_v20 = vadd.f32 %v2095_v3, %v1590_v16  ;;  %v1928_v45 = vpop.f32.mrb[8].mxu0  ;;  %2254 = vrot.lane.b32.xlu0 %v2229_v0, %s6870_s21 }
 0x365   :  { %v2230_v27 = vmul.f32 %v2094_v38, %v11533_v12  ;;  %v1929_v50 = vadd.f32 %v1928_v45, %v1595_v41  ;;  %v1930_v25 = vpop.f32.mrb[9].mxu0 }
 0x366   :  { %v2231_v46 = vmul.f32 %v2096_v20, %v11534_v11  ;;  %v1931_v52 = vadd.f32 %v1930_v25, %v1595_v41  ;;  %v1932_v61 = vpop.f32.mrb[10].mxu0  ;;  %v1610_v25 = vpop.permute.xlu1 %1609 }
 0x367   :  { %v1934_v40 = vpop.f32.mrb[11].mxu0  ;;  %2256 = vrot.lane.b32.xlu1 %v2230_v27, %s6870_s21  ;;  %v2232_v34 = vmul.f32 %v1929_v50, %v11530_v43  ;;  %v1933_v35 = vadd.f32 %v1932_v61, %v1600_v44 }
 0x368   :  { %v2099_v51 = vpop.f32.mrb[8].mxu1  ;;  %2258 = vrot.lane.b32.xlu0 %v2231_v46, %s6870_s21  ;;  %v2233_v62 = vmul.f32 %v1931_v52, %v11532_v5  ;;  %v1935_v20 = vadd.f32 %v1934_v40, %v1600_v44 }
 0x369   :  { %v2100_v28 = vadd.f32 %v2099_v51, %v1595_v41  ;;  %v2101_v16 = vpop.f32.mrb[9].mxu1  ;;  %v2236_v46 = vmul.f32 %v1933_v35, %v11530_v43  ;;  %v11535_v35 = vld [vmem:[#allocation16_spill] sm:$0xff] }
 0x36a   :  { %v2102_v39 = vadd.f32 %v2101_v16, %v1595_v41  ;;  %v2103_v14 = vpop.f32.mrb[10].mxu1  ;;  %v2237_v61 = vmul.f32 %v1935_v20, %v11532_v5 }
 0x36b   :  { %v2105_v37 = vpop.f32.mrb[11].mxu1  ;;  %2260 = vrot.lane.b32.xlu1 %v2232_v34, %s6870_s21  ;;  %v2234_v38 = vmul.f32 %v2100_v28, %v11533_v12  ;;  %v2104_v52 = vadd.f32 %v2103_v14, %v1600_v44  ;;  %v8695_v14 = vpop.permute.xlu1 %1619 }
 0x36c   :  { %v1938_v0 = vpop.f32.mrb[12].mxu0  ;;  %2262 = vrot.lane.b32.xlu0 %v2233_v62, %s6870_s21  ;;  %v2235_v45 = vmul.f32 %v2102_v39, %v11534_v11  ;;  %v2106_v34 = vadd.f32 %v2105_v37, %v1600_v44  ;;  %v8700_v37 = vpop.permute.xlu0 %1624 }
 0x36d   :  { %v1940_v3 = vpop.f32.mrb[13].mxu0  ;;  %v2238_v62 = vmul.f32 %v2104_v52, %v11533_v12  ;;  %v1939_v39 = vadd.f32 %v1938_v0, %v1605_v36 }
 0x36e   :  { %v1942_v27 = vpop.f32.mrb[14].mxu0  ;;  %v1941_v1 = vadd.f32 %v1940_v3, %v1605_v36 }
 0x36f   :  { %v1944_v50 = vpop.f32.mrb[15].mxu0  ;;  %2264 = vrot.lane.b32.xlu1 %v2234_v38, %s6870_s21  ;;  %v2318_v12 = vmul.f32 %v1939_v39, %v11535_v35  ;;  %v1943_v58 = vadd.f32 %v1942_v27, %v1610_v25 }
 0x370   :  { %v2109_v41 = vpop.f32.mrb[12].mxu1  ;;  %2266 = vrot.lane.b32.xlu0 %v2235_v45, %s6870_s21  ;;  %v2239_v45 = vmul.f32 %v2106_v34, %v11534_v11 }
 0x371   :  { %v2111_v51 = vpop.f32.mrb[13].mxu1  ;;  %v2110_v0 = vadd.f32 %v2109_v41, %v1605_v36  ;;  %v8716_v41 = vpop.permute.xlu0 %1629  ;;  %v2322_v27 = vmul.f32 %v1943_v58, %v11535_v35 }
 0x372   :  { %v2113_v28 = vpop.f32.mrb[14].mxu1  ;;  %v2112_v3 = vadd.f32 %v2111_v51, %v1605_v36  ;;  %v11538_v36 = vld [vmem:[#allocation18_spill] sm:$0xff] }
 0x373   :  { %v2115_v16 = vpop.f32.mrb[15].mxu1  ;;  %2268 = vrot.lane.b32.xlu1 %v2236_v46, %s6870_s21  ;;  %v11536_v46 = vld [vmem:[#allocation17_spill] sm:$0xff] }
 0x374   :  { %v1948_v40 = vpop.f32.mrb[16].mxu0  ;;  %2270 = vrot.lane.b32.xlu0 %v2237_v61, %s6870_s21  ;;  %v2319_v11 = vmul.f32 %v1941_v1, %v11536_v46  ;;  %v1945_v1 = vadd.f32 %v1944_v50, %v1610_v25  ;;  %v2321_v51 = vmul.f32 %v2112_v3, %v11538_v36  ;;  %v2116_v50 = vadd.f32 %v2115_v16, %v1610_v25 }
 0x375   :  { %v1950_v38 = vpop.f32.mrb[17].mxu0 }
 0x376   :  { %v8693_v43 = vpop.f32.mrb[18].mxu0  ;;  %v2323_v13 = vmul.f32 %v1945_v1, %v11536_v46 }
 0x377   :  { %v8697_v5 = vpop.f32.mrb[19].mxu0  ;;  %2272 = vrot.lane.b32.xlu1 %v2238_v62, %s6870_s21  ;;  %v1615_v62 = vpop.permute.xlu1 %1614 }
 0x378   :  { %v2119_v44 = vpop.f32.mrb[16].mxu1  ;;  %2274 = vrot.lane.b32.xlu0 %v2239_v45, %s6870_s21  ;;  %v11537_v45 = vld [vmem:[#allocation19_spill] sm:$0xff]  ;;  %v1951_v16 = vadd.f32 %v1950_v38, %v1615_v62 }
 0x379   :  { %v2121_v20 = vpop.f32.mrb[17].mxu1  ;;  %v2320_v42 = vmul.f32 %v2110_v0, %v11537_v45  ;;  %v2114_v0 = vadd.f32 %v2113_v28, %v1610_v25  ;;  %v1949_v28 = vadd.f32 %v1948_v40, %v1615_v62  ;;  %v2325_v25 = vmul.f32 %v2116_v50, %v11538_v36 }
 0x37a   :  { %v8705_v52 = vpop.f32.mrb[18].mxu1  ;;  %v2120_v40 = vadd.f32 %v2119_v44, %v1615_v62  ;;  %v2327_v38 = vmul.f32 %v1951_v16, %v11536_v46  ;;  %v2122_v50 = vadd.f32 %v2121_v20, %v1615_v62  ;;  %v1953_v44 = vadd.f32 %v8693_v43, %v8695_v14 }
 0x37b   :  { %v8707_v61 = vpop.f32.mrb[19].mxu1  ;;  %2342 = vrot.lane.b32.xlu1 %v2318_v12, %s6876_s1  ;;  %v8733_v3 = vpop.permute.xlu1 %1634  ;;  %v2324_v58 = vmul.f32 %v2114_v0, %v11537_v45  ;;  %v1955_v20 = vadd.f32 %v8697_v5, %v8695_v14  ;;  %v2124_v5 = vadd.f32 %v8705_v52, %v8695_v14  ;;  %v11541_v52 = vld [vmem:[#allocation24_spill] sm:$0xff] }
 0x37c   :  { %v8710_v34 = vpop.f32.mrb[20].mxu0  ;;  %2344 = vrot.lane.b32.xlu0 %v2319_v11, %s6876_s1  ;;  %v2329_v46 = vmul.f32 %v2122_v50, %v11538_v36  ;;  %v2126_v23 = vadd.f32 %v8707_v61, %v8695_v14  ;;  %v11542_v61 = vld [vmem:[#allocation20_spill] sm:$0xff] }
 0x37d   :  { %v8714_v39 = vpop.f32.mrb[21].mxu0 }
 0x37e   :  { %v8719_v21 = vpop.f32.mrb[22].mxu0  ;;  %v2411_v29 = vmul.f32 %v2126_v23, %v11542_v61 }
 0x37f   :  { %v8721_v63 = vpop.f32.mrb[23].mxu0  ;;  %2346 = vrot.lane.b32.xlu1 %v2320_v42, %s6876_s1  ;;  %v8738_v42 = vpop.permute.xlu0 %1639 }
 0x380   :  { %v8724_v12 = vpop.f32.mrb[20].mxu1  ;;  %2348 = vrot.lane.b32.xlu0 %v2321_v51, %s6876_s1  ;;  %v8755_v15 = vpop.permute.xlu1 %1649 }
 0x381   :  { %v8728_v11 = vpop.f32.mrb[21].mxu1 }
 0x382   :  { %v8731_v4 = vpop.f32.mrb[22].mxu1 }
 0x383   :  { %v8735_v19 = vpop.f32.mrb[23].mxu1  ;;  %2350 = vrot.lane.b32.xlu1 %v2322_v27, %s6876_s1  ;;  %v8760_v22 = vpop.permute.xlu0 %1654 }
 0x384   :  { %v8740_v30 = vpop.f32.mrb[24].mxu0  ;;  %2352 = vrot.lane.b32.xlu0 %v2323_v13, %s6876_s1  ;;  %v2326_v13 = vmul.f32 %v1949_v28, %v11535_v35  ;;  %v2328_v35 = vmul.f32 %v2120_v40, %v11537_v45  ;;  %v11539_v45 = vld [vmem:[#allocation21_spill] sm:$0xff] }
 0x385   :  { %v8744_v51 = vpop.f32.mrb[25].mxu0  ;;  %v2408_v40 = vmul.f32 %v1953_v44, %v11539_v45 }
 0x386   :  { %v8747_v1 = vpop.f32.mrb[26].mxu0 }
 0x387   :  { %v8749_v9 = vpop.f32.mrb[27].mxu0  ;;  %2354 = vrot.lane.b32.xlu1 %v2324_v58, %s6876_s1 }
 0x388   :  { %v8752_v27 = vpop.f32.mrb[24].mxu1  ;;  %2356 = vrot.lane.b32.xlu0 %v2325_v25, %s6876_s1  ;;  %v8781_v25 = vpop.permute.xlu1 %1664  ;;  %v1975_v6 = vadd.f32 %v8749_v9, %v8738_v42 }
 0x389   :  { %v8758_v0 = vpop.f32.mrb[25].mxu1 }
 0x38a   :  { %v8763_v53 = vpop.f32.mrb[26].mxu1 }
 0x38b   :  { %v8765_v7 = vpop.f32.mrb[27].mxu1  ;;  %2358 = vrot.lane.b32.xlu1 %v2326_v13, %s6876_s1  ;;  %v8786_v13 = vpop.permute.xlu0 %1669 }
 0x38c   :  { %v8768_v58 = vpop.f32.mrb[28].mxu0  ;;  %2360 = vrot.lane.b32.xlu0 %v2327_v38, %s6876_s1  ;;  %v11540_v38 = vld [vmem:[#allocation22_spill] sm:$0xff]  ;;  %v8807_v44 = vpop.permute.xlu1 %1644  ;;  %v2146_v9 = vadd.f32 %v8765_v7, %v8738_v42 }
 0x38d   :  { %v8774_v28 = vpop.f32.mrb[29].mxu0  ;;  %v2409_v50 = vmul.f32 %v1955_v20, %v11540_v38  ;;  %v1959_v20 = vadd.f32 %v8710_v34, %v8700_v37 }
 0x38e   :  { %v8779_v62 = vpop.f32.mrb[30].mxu0  ;;  %v1981_v7 = vadd.f32 %v8774_v28, %v8807_v44 }
 0x38f   :  { %v8783_v16 = vpop.f32.mrb[31].mxu0  ;;  %2362 = vrot.lane.b32.xlu1 %v2328_v35, %s6876_s1  ;;  %v8814_v14 = vpop.permute.xlu0 %1659  ;;  %v2412_v34 = vmul.f32 %v1959_v20, %v11539_v45 }
 0x390   :  { %v8788_v43 = vpop.f32.mrb[28].mxu1  ;;  %2364 = vrot.lane.b32.xlu0 %v2329_v46, %s6876_s1  ;;  %v2410_v46 = vmul.f32 %v2124_v5, %v11541_v52  ;;  %v2130_v5 = vadd.f32 %v8724_v12, %v8700_v37  ;;  %v8837_v59 = vpop.permute.xlu1 %1679  ;;  %v1963_v12 = vadd.f32 %v8719_v21, %v8716_v41  ;;  %v1985_v28 = vadd.f32 %v8783_v16, %v8755_v15 }
 0x391   :  { %v8794_v36 = vpop.f32.mrb[29].mxu1 }
 0x392   :  { %v8799_v10 = vpop.f32.mrb[30].mxu1 }
 0x393   :  { %v8801_v35 = vpop.f32.mrb[31].mxu1  ;;  %2432 = vrot.lane.b32.xlu1 %v2408_v40, %s6868_s20  ;;  %v1961_v40 = vadd.f32 %v8714_v39, %v8700_v37  ;;  %v2132_v39 = vadd.f32 %v8728_v11, %v8700_v37  ;;  %v1965_v11 = vadd.f32 %v8721_v63, %v8716_v41  ;;  %v2154_v16 = vadd.f32 %v8799_v10, %v8755_v15 }
 0x394   :  { %v8804_v48 = vpop.f32.mrb[32].mxu0  ;;  %2434 = vrot.lane.b32.xlu0 %v2409_v50, %s6868_s20  ;;  %v8863_v21 = vpop.permute.xlu1 %1674 }
 0x395   :  { %v8812_v49 = vpop.f32.mrb[33].mxu0  ;;  %v2413_v23 = vmul.f32 %v1961_v40, %v11540_v38  ;;  %v2414_v40 = vmul.f32 %v2130_v5, %v11541_v52  ;;  %v2415_v56 = vmul.f32 %v2132_v39, %v11542_v61  ;;  %v2416_v5 = vmul.f32 %v1963_v12, %v11539_v45 }
 0x396   :  { %v8819_v8 = vpop.f32.mrb[34].mxu0  ;;  %v2417_v60 = vmul.f32 %v1965_v11, %v11540_v38  ;;  %v1989_v10 = vadd.f32 %v8804_v48, %v8760_v22 }
 0x397   :  { %v8821_v57 = vpop.f32.mrb[35].mxu0  ;;  %2436 = vrot.lane.b32.xlu1 %v2410_v46, %s6868_s20 }
 0x398   :  { %v8824_v50 = vpop.f32.mrb[32].mxu1  ;;  %2438 = vrot.lane.b32.xlu0 %v2411_v29, %s6868_s20  ;;  %v8842_v29 = vpop.permute.xlu0 %1684 }
 0x399   :  { %v8830_v31 = vpop.f32.mrb[33].mxu1  ;;  %v8889_v11 = vpop.permute.xlu1 %1699 }
 0x39a   :  { %v8835_v47 = vpop.f32.mrb[34].mxu1  ;;  %11543 = vst [vmem:[#allocation86_spill] sm:$0xff] %v8889_v11  ;;  %v2162_v48 = vadd.f32 %v8830_v31, %v8760_v22 }
 0x39b   :  { %v8839_v46 = vpop.f32.mrb[35].mxu1  ;;  %2440 = vrot.lane.b32.xlu1 %v2412_v34, %s6868_s20 }
 0x39c   :  { %v8844_v20 = vpop.f32.mrb[36].mxu0  ;;  %2442 = vrot.lane.b32.xlu0 %v2413_v23, %s6868_s20  ;;  %v2134_v23 = vadd.f32 %v8731_v4, %v8716_v41  ;;  %v8870_v39 = vpop.permute.xlu0 %1694 }
 0x39d   :  { %v8850_v37 = vpop.f32.mrb[37].mxu0  ;;  %v8913_v32 = vpop.permute.xlu1 %1704 }
 0x39e   :  { %v8855_v18 = vpop.f32.mrb[38].mxu0  ;;  %v2418_v4 = vmul.f32 %v2134_v23, %v11541_v52  ;;  %11544 = vst [vmem:[#allocation76_spill] sm:$0xff] %v8913_v32 }
 0x39f   :  { %v8857_v34 = vpop.f32.mrb[39].mxu0  ;;  %2444 = vrot.lane.b32.xlu1 %v2414_v40, %s6868_s20  ;;  %v2136_v40 = vadd.f32 %v8735_v19, %v8716_v41 }
 0x3a0   :  { %v8860_v2 = vpop.f32.mrb[36].mxu1  ;;  %2446 = vrot.lane.b32.xlu0 %v2415_v56, %s6868_s20  ;;  %v8894_v41 = vpop.permute.xlu0 %1689 }
 0x3a1   :  { %v8868_v63 = vpop.f32.mrb[37].mxu1  ;;  %v2419_v12 = vmul.f32 %v2136_v40, %v11542_v61  ;;  %v1971_v61 = vadd.f32 %v8744_v51, %v8733_v3  ;;  %v2142_v51 = vadd.f32 %v8758_v0, %v8733_v3 }
 0x3a2   :  { %v8875_v33 = vpop.f32.mrb[38].mxu1 }
 0x3a3   :  { %v8877_v26 = vpop.f32.mrb[39].mxu1  ;;  %2448 = vrot.lane.b32.xlu1 %v2416_v5, %s6868_s20 }
 0x3a4   :  { %v8880_v56 = vpop.f32.mrb[40].mxu0  ;;  %2450 = vrot.lane.b32.xlu0 %v2417_v60, %s6868_s20  ;;  %v1969_v60 = vadd.f32 %v8740_v30, %v8733_v3  ;;  %v2140_v30 = vadd.f32 %v8752_v27, %v8733_v3  ;;  %v8919_v54 = vpop.permute.xlu0 %1574  ;;  %v1973_v27 = vadd.f32 %v8747_v1, %v8738_v42  ;;  %v2144_v1 = vadd.f32 %v8763_v53, %v8738_v42 }
 0x3a5   :  { %v8884_v45 = vpop.f32.mrb[41].mxu0  ;;  %11545 = vst [vmem:[#allocation77_spill] sm:$0xff] %v8919_v54  ;;  %v8939_v3 = vpop.permute.xlu1 %1579  ;;  %v1979_v53 = vadd.f32 %v8768_v58, %v8807_v44  ;;  %v1983_v58 = vadd.f32 %v8779_v62, %v8755_v15 }
 0x3a6   :  { %v8887_v38 = vpop.f32.mrb[42].mxu0  ;;  %11546 = vst [vmem:[#allocation65_spill] sm:$0xff] %v8939_v3 }
 0x3a7   :  { %v8891_v19 = vpop.f32.mrb[43].mxu0  ;;  %2452 = vrot.lane.b32.xlu1 %v2418_v4, %s6868_s20 }
 0x3a8   :  { %v8896_v5 = vpop.f32.mrb[40].mxu1  ;;  %2454 = vrot.lane.b32.xlu0 %v2419_v12, %s6868_s20 }
 0x3a9   :  { %v8901_v52 = vpop.f32.mrb[41].mxu1 }
 0x3aa   :  { %v8905_v23 = vpop.f32.mrb[42].mxu1 }
 0x3ab   :  { %v8907_v40 = vpop.f32.mrb[43].mxu1  ;;  %2510 = vrot.lane.b32.xlu1 %v1969_v60, %s6875_s25 }
 0x3ac   :  { %v8910_v4 = vpop.f32.mrb[44].mxu0  ;;  %2512 = vrot.lane.b32.xlu0 %v1971_v61, %s6875_s25 }
 0x3ad   :  { %v8917_v12 = vpop.f32.mrb[45].mxu0 }
 0x3ae   :  { %v8923_v24 = vpop.f32.mrb[46].mxu0 }
 0x3af   :  { %v8925_v17 = vpop.f32.mrb[47].mxu0  ;;  %2514 = vrot.lane.b32.xlu1 %v2140_v30, %s6875_s25  ;;  %v8944_v30 = vpop.permute.xlu0 %1584 }
 0x3b0   :  { %v8928_v60 = vpop.f32.mrb[44].mxu1  ;;  %2516 = vrot.lane.b32.xlu0 %v2142_v51, %s6875_s25  ;;  %11547 = vst [vmem:[#allocation79_spill] sm:$0xff] %v8944_v30  ;;  %v8963_v30 = vpop.permute.xlu1 %2938 }
 0x3b1   :  { %v8933_v61 = vpop.f32.mrb[45].mxu1  ;;  %11549 = vst [vmem:[#allocation66_spill] sm:$0xff] %v8963_v30  ;;  %v2152_v30 = vadd.f32 %v8794_v36, %v8807_v44  ;;  %v11559_v36 = vld [vmem:[#allocation28_spill] sm:$0xff] }
 0x3b2   :  { %v8937_v55 = vpop.f32.mrb[46].mxu1 }
 0x3b3   :  { %v8941_v0 = vpop.f32.mrb[47].mxu1  ;;  %2518 = vrot.lane.b32.xlu1 %v1973_v27, %s6875_s25  ;;  %v8969_v11 = vpop.permute.xlu0 %2943 }
 0x3b4   :  { %v8946_v54 = vpop.f32.mrb[48].mxu0  ;;  %2520 = vrot.lane.b32.xlu0 %v1975_v6, %s6875_s25  ;;  %11550 = vst [vmem:[#allocation80_spill] sm:$0xff] %v8969_v11 }
 0x3b5   :  { %v8951_v51 = vpop.f32.mrb[49].mxu0 }
 0x3b6   :  { %v8955_v32 = vpop.f32.mrb[50].mxu0 }
 0x3b7   :  { %v8957_v3 = vpop.f32.mrb[51].mxu0  ;;  %2522 = vrot.lane.b32.xlu1 %v2144_v1, %s6875_s25 }
 0x3b8   :  { %11548 = vst [vmem:[#allocation78_spill] sm:$0xff] %v8957_v3  ;;  %v8960_v27 = vpop.f32.mrb[48].mxu1  ;;  %2524 = vrot.lane.b32.xlu0 %v2146_v9, %s6875_s25  ;;  %v2150_v9 = vadd.f32 %v8788_v43, %v8807_v44  ;;  %v11557_v43 = vld [vmem:[#allocation23_spill] sm:$0xff]  ;;  %v2574_v44 = vmul.f32 %v1985_v28, %v11559_v36 }
 0x3b9   :  { %v8967_v6 = vpop.f32.mrb[49].mxu1 }
 0x3ba   :  { %v8973_v42 = vpop.f32.mrb[50].mxu1 }
 0x3bb   :  { %11551 = vst [vmem:[#allocation83_spill] sm:$0xff] %v8973_v42  ;;  %v8975_v3 = vpop.f32.mrb[51].mxu1  ;;  %2526 = vrot.lane.b32.xlu1 %v1979_v53, %s6875_s25  ;;  %v8991_v53 = vpop.permute.xlu1 %2971 }
 0x3bc   :  { %11552 = vst [vmem:[#allocation12_spill] sm:$0xff] %v8975_v3  ;;  %v8978_v1 = vpop.f32.mrb[52].mxu0  ;;  %2528 = vrot.lane.b32.xlu0 %v1981_v7, %s6875_s25  ;;  %11555 = vst [vmem:[#allocation14_spill] sm:$0xff] %v8991_v53 }
 0x3bd   :  { %11553 = vst [vmem:[#allocation13_spill] sm:$0xff] %v8978_v1  ;;  %v8985_v11 = vpop.f32.mrb[53].mxu0  ;;  %v8994_v1 = vpop.permute.xlu0 %2976 }
 0x3be   :  { %11554 = vst [vmem:[#allocation15_spill] sm:$0xff] %v8985_v11  ;;  %v2042_v3 = vpop.f32.mrb[54].mxu0  ;;  %11556 = vst [vmem:[#allocation16_spill] sm:$0xff] %v8994_v1  ;;  %v2573_v11 = vmul.f32 %v1983_v58, %v11557_v43 }
 0x3bf   :  { %2530 = vrot.lane.b32.xlu1 %v2150_v9, %s6875_s25  ;;  %v2043_v7 = vpop.f32.mrb[55].mxu0  ;;  %v2156_v3 = vadd.f32 %v8801_v35, %v8755_v15  ;;  %v9009_v1 = vpop.permute.xlu1 %2948  ;;  %v1991_v15 = vadd.f32 %v8812_v49, %v8760_v22  ;;  %v2577_v35 = vmul.f32 %v1989_v10, %v11557_v43  ;;  %v1993_v49 = vadd.f32 %v8819_v8, %v8814_v14 }
 0x3c0   :  { %v8996_v62 = vpop.f32.mrb[52].mxu1  ;;  %2532 = vrot.lane.b32.xlu0 %v2152_v30, %s6875_s25  ;;  %11560 = vst [vmem:[#allocation19_spill] sm:$0xff] %v9009_v1  ;;  %v11561_v30 = vld [vmem:[#allocation29_spill] sm:$0xff] }
 0x3c1   :  { %v9002_v42 = vpop.f32.mrb[53].mxu1  ;;  %v2575_v58 = vmul.f32 %v2154_v16, %v11561_v30  ;;  %v9014_v53 = vpop.permute.xlu0 %3019  ;;  %v2578_v16 = vmul.f32 %v1991_v15, %v11559_v36  ;;  %v1999_v15 = vadd.f32 %v8844_v20, %v8781_v25  ;;  %v11569_v20 = vld [vmem:[#allocation33_spill] sm:$0xff] }
 0x3c2   :  { %11558 = vst [vmem:[#allocation17_spill] sm:$0xff] %v9002_v42  ;;  %v2213_v9 = vpop.f32.mrb[54].mxu1  ;;  %11562 = vst [vmem:[#allocation18_spill] sm:$0xff] %v9014_v53  ;;  %v11563_v42 = vld [vmem:[#allocation30_spill] sm:$0xff] }
 0x3c3   :  { %2597 = vrot.lane.b32.xlu1 %v2573_v11, %s6877_s22  ;;  %v2214_v7 = vpop.f32.mrb[55].mxu1  ;;  %v2576_v28 = vmul.f32 %v2156_v3, %v11563_v42  ;;  %v2160_v11 = vadd.f32 %v8824_v50, %v8760_v22  ;;  %v1995_v50 = vadd.f32 %v8821_v57, %v8814_v14  ;;  %v2581_v22 = vmul.f32 %v1993_v49, %v11557_v43  ;;  %v11570_v49 = vld [vmem:[#allocation34_spill] sm:$0xff] }
 0x3c4   :  { %2599 = vrot.lane.b32.xlu0 %v2574_v44, %s6877_s22  ;;  %v9027_v44 = vpop.permute.xlu1 %2981  ;;  %v2580_v7 = vmul.f32 %v2162_v48, %v11563_v42  ;;  %v2166_v57 = vadd.f32 %v8839_v46, %v8814_v14 }
 0x3c5   :  { %11564 = vst [vmem:[#allocation21_spill] sm:$0xff] %v9027_v44  ;;  %v9030_v3 = vpop.permute.xlu0 %3052  ;;  %v2579_v9 = vmul.f32 %v2160_v11, %v11561_v30  ;;  %v2582_v8 = vmul.f32 %v1995_v50, %v11559_v36 }
 0x3c6   :  { %11565 = vst [vmem:[#allocation22_spill] sm:$0xff] %v9030_v3 }
 0x3c7   :  { %2601 = vrot.lane.b32.xlu1 %v2575_v58, %s6877_s22  ;;  %v2164_v58 = vadd.f32 %v8835_v47, %v8814_v14  ;;  %v2584_v47 = vmul.f32 %v2166_v57, %v11563_v42  ;;  %v11568_v14 = vld [vmem:[#allocation25_spill] sm:$0xff]  ;;  %v2172_v42 = vadd.f32 %v8868_v63, %v8781_v25 }
 0x3c8   :  { %2603 = vrot.lane.b32.xlu0 %v2576_v28, %s6877_s22  ;;  %v9041_v31 = vpop.permute.xlu1 %3024  ;;  %v2663_v46 = vmul.f32 %v1999_v15, %v11568_v14  ;;  %v2009_v15 = vadd.f32 %v8880_v56, %v8863_v21 }
 0x3c9   :  { %11566 = vst [vmem:[#allocation24_spill] sm:$0xff] %v9041_v31  ;;  %v9046_v10 = vpop.permute.xlu0 %3029  ;;  %v2583_v28 = vmul.f32 %v2164_v58, %v11561_v30  ;;  %v2170_v30 = vadd.f32 %v8860_v2, %v8781_v25  ;;  %v2005_v2 = vadd.f32 %v8857_v34, %v8786_v13  ;;  %v2176_v34 = vadd.f32 %v8877_v26, %v8786_v13 }
 0x3ca   :  { %11567 = vst [vmem:[#allocation20_spill] sm:$0xff] %v9046_v10  ;;  %v2671_v26 = vmul.f32 %v2009_v15, %v11568_v14  ;;  %v2021_v15 = vadd.f32 %v8917_v12, %v8842_v29  ;;  %v2023_v12 = vadd.f32 %v8923_v24, %v8894_v41  ;;  %v2194_v24 = vadd.f32 %v8937_v55, %v8894_v41 }
 0x3cb   :  { %2605 = vrot.lane.b32.xlu1 %v2577_v35, %s6877_s22  ;;  %v2001_v35 = vadd.f32 %v8850_v37, %v8781_v25  ;;  %v2003_v37 = vadd.f32 %v8855_v18, %v8786_v13  ;;  %v2174_v18 = vadd.f32 %v8875_v33, %v8786_v13  ;;  %v2180_v13 = vadd.f32 %v8896_v5, %v8863_v21 }
 0x3cc   :  { %2607 = vrot.lane.b32.xlu0 %v2578_v16, %s6877_s22  ;;  %v2015_v5 = vadd.f32 %v8891_v19, %v8837_v59  ;;  %v2186_v19 = vadd.f32 %v8907_v40, %v8837_v59  ;;  %v2190_v40 = vadd.f32 %v8928_v60, %v8842_v29  ;;  %v2025_v60 = vadd.f32 %v8925_v17, %v8894_v41 }
 0x3cd   :  { %v2664_v16 = vmul.f32 %v2001_v35, %v11569_v20  ;;  %v2667_v25 = vmul.f32 %v2003_v37, %v11568_v14  ;;  %v2011_v35 = vadd.f32 %v8884_v45, %v8863_v21  ;;  %v2013_v45 = vadd.f32 %v8887_v38, %v8837_v59 }
 0x3ce   :  { %v2673_v14 = vmul.f32 %v2180_v13, %v11570_v49  ;;  %v2184_v38 = vadd.f32 %v8905_v23, %v8837_v59  ;;  %v11576_v23 = vld [vmem:[#allocation39_spill] sm:$0xff]  ;;  %v2196_v17 = vadd.f32 %v8941_v0, %v8894_v41 }
 0x3cf   :  { %2609 = vrot.lane.b32.xlu1 %v2579_v9, %s6877_s22  ;;  %v2665_v9 = vmul.f32 %v2170_v30, %v11570_v49  ;;  %v2672_v56 = vmul.f32 %v2011_v35, %v11569_v20  ;;  %v11581_v41 = vld [vmem:[#allocation27_spill] sm:$0xff] }
 0x3d0   :  { %2611 = vrot.lane.b32.xlu0 %v2580_v7, %s6877_s22  ;;  %v11571_v7 = vld [vmem:[#allocation35_spill] sm:$0xff]  ;;  %v2764_v55 = vmul.f32 %v2196_v17, %v11576_v23 }
 0x3d1   :  { %v2670_v33 = vmul.f32 %v2176_v34, %v11571_v7 }
 0x3d3   :  { %2613 = vrot.lane.b32.xlu1 %v2581_v22, %s6877_s22  ;;  %v2666_v22 = vmul.f32 %v2172_v42, %v11571_v7 }
 0x3d4   :  { %2615 = vrot.lane.b32.xlu0 %v2582_v8, %s6877_s22  ;;  %v2668_v8 = vmul.f32 %v2005_v2, %v11569_v20 }
 0x3d5   :  { %v9056_v43 = vpop.permute.xlu1 %2252 }
 0x3d6   :  { %v9061_v36 = vpop.permute.xlu0 %2254 }
 0x3d7   :  { %2617 = vrot.lane.b32.xlu1 %v2583_v28, %s6877_s22  ;;  %v2669_v28 = vmul.f32 %v2174_v18, %v11570_v49  ;;  %v11573_v49 = vld [vmem:[#allocation36_spill] sm:$0xff] }
 0x3d8   :  { %2619 = vrot.lane.b32.xlu0 %v2584_v47, %s6877_s22 }
 0x3d9   :  { %v9068_v11 = vpop.permute.xlu1 %2256 }
 0x3da   :  { %v9073_v48 = vpop.permute.xlu0 %2258 }
 0x3db   :  { %2687 = vrot.lane.b32.xlu1 %v2663_v46, %s6878_s2 }
 0x3dc   :  { %2689 = vrot.lane.b32.xlu0 %v2664_v16, %s6878_s2  ;;  %v2182_v16 = vadd.f32 %v8901_v52, %v8863_v21  ;;  %v11572_v21 = vld [vmem:[#allocation26_spill] sm:$0xff] }
 0x3dd   :  { %v9080_v50 = vpop.permute.xlu1 %2260  ;;  %v2753_v52 = vmul.f32 %v2013_v45, %v11572_v21 }
 0x3de   :  { %v9085_v58 = vpop.permute.xlu0 %2262  ;;  %v2674_v20 = vmul.f32 %v2182_v16, %v11571_v7  ;;  %v11575_v7 = vld [vmem:[#allocation38_spill] sm:$0xff] }
 0x3df   :  { %2691 = vrot.lane.b32.xlu1 %v2665_v9, %s6878_s2  ;;  %v2755_v18 = vmul.f32 %v2184_v38, %v11575_v7 }
 0x3e0   :  { %2693 = vrot.lane.b32.xlu0 %v2666_v22, %s6878_s2  ;;  %v2754_v22 = vmul.f32 %v2015_v5, %v11573_v49  ;;  %v2762_v5 = vmul.f32 %v2025_v60, %v11573_v49 }
 0x3e1   :  { %v9092_v63 = vpop.permute.xlu1 %2264 }
 0x3e2   :  { %v9097_v57 = vpop.permute.xlu0 %2266 }
 0x3e3   :  { %2695 = vrot.lane.b32.xlu1 %v2667_v25, %s6878_s2 }
 0x3e4   :  { %2697 = vrot.lane.b32.xlu0 %v2668_v8, %s6878_s2  ;;  %v2019_v8 = vadd.f32 %v8910_v4, %v8842_v29  ;;  %v2758_v4 = vmul.f32 %v2021_v15, %v11573_v49  ;;  %v2031_v49 = vadd.f32 %v8951_v51, %v8870_v39  ;;  %v11584_v51 = vld [vmem:[#allocation86_spill] sm:$0xff]  ;;  %v11585_v15 = vld [vmem:[#allocation45_spill] sm:$0xff] }
 0x3e5   :  { %v9104_v47 = vpop.permute.xlu1 %2268 }
 0x3e6   :  { %v9109_v46 = vpop.permute.xlu0 %2270  ;;  %v2757_v59 = vmul.f32 %v2019_v8, %v11572_v21  ;;  %v2202_v8 = vadd.f32 %v8967_v6, %v8870_v39  ;;  %v11588_v6 = vld [vmem:[#allocation83_spill] sm:$0xff] }
 0x3e7   :  { %2699 = vrot.lane.b32.xlu1 %v2669_v28, %s6878_s2  ;;  %v2756_v28 = vmul.f32 %v2186_v19, %v11576_v23  ;;  %v2200_v19 = vadd.f32 %v8960_v27, %v8870_v39  ;;  %v11586_v27 = vld [vmem:[#allocation78_spill] sm:$0xff] }
 0x3e8   :  { %2701 = vrot.lane.b32.xlu0 %v2670_v33, %s6878_s2 }
 0x3e9   :  { %v9116_v30 = vpop.permute.xlu1 %2272 }
 0x3ea   :  { %v9121_v42 = vpop.permute.xlu0 %2274 }
 0x3eb   :  { %2703 = vrot.lane.b32.xlu1 %v2671_v26, %s6878_s2  ;;  %v2192_v26 = vadd.f32 %v8933_v61, %v8842_v29  ;;  %v2761_v29 = vmul.f32 %v2023_v12, %v11572_v21  ;;  %v2029_v21 = vadd.f32 %v8946_v54, %v8870_v39  ;;  %v11582_v54 = vld [vmem:[#allocation43_spill] sm:$0xff] }
 0x3ec   :  { %2705 = vrot.lane.b32.xlu0 %v2672_v56, %s6878_s2  ;;  %v2759_v56 = vmul.f32 %v2190_v40, %v11575_v7 }
 0x3ed   :  { %v9128_v37 = vpop.permute.xlu1 %2342  ;;  %v2760_v45 = vmul.f32 %v2192_v26, %v11576_v23  ;;  %v2843_v0 = vmul.f32 %v2029_v21, %v11581_v41  ;;  %v11587_v26 = vld [vmem:[#allocation47_spill] sm:$0xff]  ;;  %v11591_v21 = vld [vmem:[#allocation13_spill] sm:$0xff] }
 0x3ee   :  { %v9133_v9 = vpop.permute.xlu0 %2344  ;;  %v2846_v12 = vmul.f32 %v2202_v8, %v11587_v26 }
 0x3ef   :  { %2707 = vrot.lane.b32.xlu1 %v2673_v14, %s6878_s2 }
 0x3f0   :  { %2709 = vrot.lane.b32.xlu0 %v2674_v20, %s6878_s2  ;;  %s11583_s2 = smov 94  }
 0x3f1   :  { %v9140_v2 = vpop.permute.xlu1 %2346 }
 0x3f2   :  { %v9145_v25 = vpop.permute.xlu0 %2348 }
 0x3f3   :  { %2777 = vrot.lane.b32.xlu1 %v2753_v52, %s11574_s24  ;;  %v2763_v52 = vmul.f32 %v2194_v24, %v11575_v7 }
 0x3f4   :  { %2779 = vrot.lane.b32.xlu0 %v2754_v22, %s11574_s24 }
 0x3f5   :  { %v9152_v34 = vpop.permute.xlu1 %2350 }
 0x3f6   :  { %v9157_v33 = vpop.permute.xlu0 %2352 }
 0x3f7   :  { %2781 = vrot.lane.b32.xlu1 %v2755_v18, %s11574_s24  ;;  %v2844_v18 = vmul.f32 %v2031_v49, %v11582_v54 }
 0x3f8   :  { %2783 = vrot.lane.b32.xlu0 %v2756_v28, %s11574_s24  ;;  %v2033_v28 = vadd.f32 %v8955_v32, %v11584_v51  ;;  %v2204_v32 = vadd.f32 %v11588_v6, %v11584_v51 }
 0x3f9   :  { %v9164_v35 = vpop.permute.xlu1 %2354 }
 0x3fa   :  { %v9169_v13 = vpop.permute.xlu0 %2356  ;;  %v2847_v39 = vmul.f32 %v2033_v28, %v11581_v41  ;;  %v2849_v17 = vmul.f32 %v2204_v32, %v11585_v15 }
 0x3fb   :  { %2785 = vrot.lane.b32.xlu1 %v2757_v59, %s11574_s24  ;;  %v2845_v59 = vmul.f32 %v2200_v19, %v11585_v15  ;;  %v11593_v19 = vld [vmem:[#allocation15_spill] sm:$0xff] }
 0x3fc   :  { %2787 = vrot.lane.b32.xlu0 %v2758_v4, %s11574_s24  ;;  %v2035_v4 = vadd.f32 %v11586_v27, %v11584_v51 }
 0x3fd   :  { %v9176_v16 = vpop.permute.xlu1 %2358 }
 0x3fe   :  { %11577 = vst [vmem:[#allocation23_spill] sm:$0xff] %v9176_v16  ;;  %v9181_v14 = vpop.permute.xlu0 %2360 }
 0x3ff   :  { %11578 = vst [vmem:[#allocation28_spill] sm:$0xff] %v9181_v14  ;;  %2789 = vrot.lane.b32.xlu1 %v2759_v56, %s11574_s24  ;;  %v11628_v14 = vld [vmem:[#allocation67_spill] sm:$0xff] }
 0x400   :  { %2791 = vrot.lane.b32.xlu0 %v2760_v45, %s11574_s24  ;;  %v2848_v45 = vmul.f32 %v2035_v4, %v11582_v54  ;;  %v11596_v4 = vld [vmem:[#allocation17_spill] sm:$0xff] }
 0x401   :  { %v9188_v61 = vpop.permute.xlu1 %2362 }
 0x402   :  { %11579 = vst [vmem:[#allocation29_spill] sm:$0xff] %v9188_v61  ;;  %v9193_v20 = vpop.permute.xlu0 %2364  ;;  %v11627_v61 = vld [vmem:[#allocation65_spill] sm:$0xff] }
 0x403   :  { %11580 = vst [vmem:[#allocation30_spill] sm:$0xff] %v9193_v20  ;;  %2793 = vrot.lane.b32.xlu1 %v2761_v29, %s11574_s24  ;;  %v11589_v29 = vld [vmem:[#allocation12_spill] sm:$0xff]  ;;  %v1913_v16 = vadd.f32 %v11628_v14, %v11627_v61  ;;  %v11636_v14 = vld [vmem:[#allocation63_spill] sm:$0xff] }
 0x404   :  { %2795 = vrot.lane.b32.xlu0 %v2762_v5, %s11574_s24  ;;  %v2206_v24 = vadd.f32 %v11589_v29, %v11584_v51 }
 0x405   :  { %v9200_v38 = vpop.permute.xlu1 %2432 }
 0x406   :  { %v9205_v22 = vpop.permute.xlu0 %2434 }
 0x407   :  { %2797 = vrot.lane.b32.xlu1 %v2763_v52, %s11574_s24  ;;  %v11590_v52 = vld [vmem:[#allocation76_spill] sm:$0xff] }
 0x408   :  { %2799 = vrot.lane.b32.xlu0 %v2764_v55, %s11574_s24  ;;  %v2039_v55 = vadd.f32 %v11591_v21, %v11590_v52  ;;  %v2210_v28 = vadd.f32 %v8996_v62, %v11590_v52 }
 0x409   :  { %v9212_v7 = vpop.permute.xlu1 %2436 }
 0x40a   :  { %v9217_v23 = vpop.permute.xlu0 %2438  ;;  %v2851_v51 = vmul.f32 %v2039_v55, %v11581_v41  ;;  %v2853_v6 = vmul.f32 %v2210_v28, %v11585_v15  ;;  %v3049_v15 = vld [vmem:[%s11152_s10 + $0x10] sm:$0xff] }
 0x40b   :  { %2867 = vrot.lane.b32.xlu1 %v2843_v0, %s11583_s2  ;;  %v2850_v0 = vmul.f32 %v2206_v24, %v11587_v26 }
 0x40c   :  { %2869 = vrot.lane.b32.xlu0 %v2844_v18, %s11583_s2  ;;  %v2041_v18 = vadd.f32 %v11593_v19, %v11590_v52 }
 0x40d   :  { %v9224_v40 = vpop.permute.xlu1 %2440 }
 0x40e   :  { %v9229_v56 = vpop.permute.xlu0 %2442  ;;  %v2852_v27 = vmul.f32 %v2041_v18, %v11582_v54  ;;  %v3048_v54 = vld [vmem:[%s11152_s10 + $0x8] sm:$0xff] }
 0x40f   :  { %2871 = vrot.lane.b32.xlu1 %v2845_v59, %s11583_s2 }
 0x410   :  { %2873 = vrot.lane.b32.xlu0 %v2846_v12, %s11583_s2  ;;  %v2212_v12 = vadd.f32 %v11596_v4, %v11590_v52 }
 0x411   :  { %v9236_v60 = vpop.permute.xlu1 %2444 }
 0x412   :  { %v9241_v5 = vpop.permute.xlu0 %2446  ;;  %v2854_v41 = vmul.f32 %v2212_v12, %v11587_v26 }
 0x413   :  { %2875 = vrot.lane.b32.xlu1 %v2847_v39, %s11583_s2 }
 0x414   :  { %2877 = vrot.lane.b32.xlu0 %v2848_v45, %s11583_s2 }
 0x415   :  { %v9248_v49 = vpop.permute.xlu1 %2448 }
 0x416   :  { %11592 = vst [vmem:[#allocation25_spill] sm:$0xff] %v9248_v49  ;;  %v9253_v8 = vpop.permute.xlu0 %2450  ;;  %v11626_v49 = vld [vmem:[#allocation68_spill] sm:$0xff] }
 0x417   :  { %11594 = vst [vmem:[#allocation33_spill] sm:$0xff] %v9253_v8  ;;  %2879 = vrot.lane.b32.xlu1 %v2849_v17, %s11583_s2 }
 0x418   :  { %2881 = vrot.lane.b32.xlu0 %v2850_v0, %s11583_s2 }
 0x419   :  { %v9260_v59 = vpop.permute.xlu1 %2452 }
 0x41a   :  { %11595 = vst [vmem:[#allocation34_spill] sm:$0xff] %v9260_v59  ;;  %v9265_v39 = vpop.permute.xlu0 %2454  ;;  %v11625_v59 = vld [vmem:[#allocation61_spill] sm:$0xff] }
 0x41b   :  { %11597 = vst [vmem:[#allocation35_spill] sm:$0xff] %v9265_v39  ;;  %2883 = vrot.lane.b32.xlu1 %v2851_v51, %s11583_s2  ;;  %v11624_v39 = vld [vmem:[#allocation77_spill] sm:$0xff] }
 0x41c   :  { %2885 = vrot.lane.b32.xlu0 %v2852_v27, %s11583_s2  ;;  %v1909_v8 = vadd.f32 %v11625_v59, %v11624_v39  ;;  %v1911_v20 = vadd.f32 %v11626_v49, %v11624_v39 }
 0x41d   :  { %v9270_v32 = vpop.permute.xlu1 %2510 }
 0x41e   :  { %v9273_v62 = vpop.permute.xlu0 %2512 }
 0x41f   :  { %2887 = vrot.lane.b32.xlu1 %v2853_v6, %s11583_s2 }
 0x420   :  { %2889 = vrot.lane.b32.xlu0 %v2854_v41, %s11583_s2  ;;  %s6882_s2 = smov 120  }
 0x421   :  { %v9280_v45 = vpop.permute.xlu1 %2514 }
 0x422   :  { %v9285_v29 = vpop.permute.xlu0 %2516 }
 0x423   :  { %3057 = vperm.xlu1 %6668, %v3048_v54  }
 0x424   :  { %3062 = vperm.xlu0 %6667, %v3049_v15  }
 0x425   :  { %v9287_v26 = vpop.permute.xlu1 %2518 }
 0x426   :  { %v9289_v24 = vpop.permute.xlu0 %2520 }
 0x429   :  { %v9291_v17 = vpop.permute.xlu1 %2522 }
 0x42a   :  { %v9293_v52 = vpop.permute.xlu0 %2524 }
 0x42d   :  { %v9295_v21 = vpop.permute.xlu1 %2526 }
 0x42e   :  { %11598 = vst [vmem:[#allocation26_spill] sm:$0xff] %v9295_v21  ;;  %v9297_v55 = vpop.permute.xlu0 %2528 }
 0x42f   :  { %11599 = vst [vmem:[#allocation36_spill] sm:$0xff] %v9297_v55 }
 0x431   :  { %v9299_v0 = vpop.permute.xlu1 %2530 }
 0x432   :  { %11600 = vst [vmem:[#allocation38_spill] sm:$0xff] %v9299_v0  ;;  %v9301_v19 = vpop.permute.xlu0 %2532 }
 0x433   :  { %11601 = vst [vmem:[#allocation39_spill] sm:$0xff] %v9301_v19 }
 0x435   :  { %v9303_v18 = vpop.permute.xlu1 %2597 }
 0x436   :  { %11602 = vst [vmem:[#allocation27_spill] sm:$0xff] %v9303_v18  ;;  %v9305_v51 = vpop.permute.xlu0 %2599 }
 0x439   :  { %v9307_v28 = vpop.permute.xlu1 %2601 }
 0x43a   :  { %11603 = vst [vmem:[#allocation43_spill] sm:$0xff] %v9307_v28  ;;  %v9309_v27 = vpop.permute.xlu0 %2603  ;;  %v11648_v28 = vld [vmem:[#allocation31_spill] sm:$0xff] }
 0x43b   :  { %11604 = vst [vmem:[#allocation86_spill] sm:$0xff] %v9309_v27 }
 0x43d   :  { %v9311_v4 = vpop.permute.xlu1 %2605 }
 0x43e   :  { %11605 = vst [vmem:[#allocation45_spill] sm:$0xff] %v9311_v4  ;;  %v9313_v12 = vpop.permute.xlu0 %2607 }
 0x43f   :  { %11606 = vst [vmem:[#allocation78_spill] sm:$0xff] %v9313_v12  ;;  %v11645_v12 = vld [vmem:[#allocation82_spill] sm:$0xff] }
 0x440   :  { %v2217_v27 = vmul.f32 %v1911_v20, %v11645_v12 }
 0x441   :  { %v9315_v6 = vpop.permute.xlu1 %2609 }
 0x442   :  { %11607 = vst [vmem:[#allocation47_spill] sm:$0xff] %v9315_v6  ;;  %v9317_v41 = vpop.permute.xlu0 %2611 }
 0x443   :  { %11608 = vst [vmem:[#allocation83_spill] sm:$0xff] %v9317_v41  ;;  %v2086_v41 = vadd.f32 %v11636_v14, %v11627_v61 }
 0x445   :  { %v9319_v54 = vpop.permute.xlu1 %2613 }
 0x446   :  { %11609 = vst [vmem:[#allocation12_spill] sm:$0xff] %v9319_v54  ;;  %v9321_v15 = vpop.permute.xlu0 %2615 }
 0x447   :  { %11610 = vst [vmem:[#allocation76_spill] sm:$0xff] %v9321_v15 }
 0x449   :  { %v9323_v3 = vpop.permute.xlu1 %2617 }
 0x44a   :  { %11611 = vst [vmem:[#allocation13_spill] sm:$0xff] %v9323_v3  ;;  %v9325_v44 = vpop.permute.xlu0 %2619 }
 0x44b   :  { %11612 = vst [vmem:[#allocation15_spill] sm:$0xff] %v9325_v44 }
 0x44d   :  { %v9327_v53 = vpop.permute.xlu1 %2687 }
 0x44e   :  { %11613 = vst [vmem:[#allocation17_spill] sm:$0xff] %v9327_v53  ;;  %v9329_v1 = vpop.permute.xlu0 %2689  ;;  %v11640_v53 = vld [vmem:[#allocation73_spill] sm:$0xff] }
 0x44f   :  { %11614 = vst [vmem:[#allocation88_spill] sm:$0xff] %v9329_v1  ;;  %v11641_v1 = vld [vmem:[#allocation72_spill] sm:$0xff] }
 0x451   :  { %v9331_v10 = vpop.permute.xlu1 %2691 }
 0x452   :  { %11615 = vst [vmem:[#allocation89_spill] sm:$0xff] %v9331_v10  ;;  %v9333_v19 = vpop.permute.xlu0 %2693  ;;  %v11634_v10 = vld [vmem:[#allocation51_spill] sm:$0xff] }
 0x453   :  { %11616 = vst [vmem:[#allocation90_spill] sm:$0xff] %v9333_v19  ;;  %v11633_v19 = vld [vmem:[#allocation64_spill] sm:$0xff]  ;;  %v9367_v49 = vmul.f32 %v9041_v31, %v11634_v10  ;;  %v11644_v10 = vld [vmem:[#allocation81_spill] sm:$0xff] }
 0x454   :  { %v2084_v59 = vadd.f32 %v11633_v19, %v11627_v61 }
 0x455   :  { %v9335_v0 = vpop.permute.xlu1 %2695  ;;  %11635 = vst [vmem:[#allocation61_spill] sm:$0xff] %v9367_v49  ;;  %v2216_v49 = vmul.f32 %v1909_v8, %v11644_v10  ;;  %v11649_v8 = vld [vmem:[#allocation32_spill] sm:$0xff] }
 0x456   :  { %11617 = vst [vmem:[#allocation91_spill] sm:$0xff] %v9335_v0  ;;  %v9337_v21 = vpop.permute.xlu0 %2697  ;;  %v2276_v20 = vsel %vm519_vm2, %v11649_v8, %v9056_v43 }
 0x457   :  { %11618 = vst [vmem:[#allocation92_spill] sm:$0xff] %v9337_v21 }
 0x459   :  { %v9339_v55 = vpop.permute.xlu1 %2699 }
 0x45a   :  { %11619 = vst [vmem:[#allocation93_spill] sm:$0xff] %v9339_v55  ;;  %v9341_v54 = vpop.permute.xlu0 %2701  ;;  %v11630_v55 = vld [vmem:[#allocation62_spill] sm:$0xff] }
 0x45b   :  { %11620 = vst [vmem:[#allocation94_spill] sm:$0xff] %v9341_v54  ;;  %v1915_v54 = vadd.f32 %v11630_v55, %v11627_v61  ;;  %v11639_v55 = vld [vmem:[#allocation79_spill] sm:$0xff]  ;;  %v2220_v61 = vmul.f32 %v1913_v16, %v11644_v10  ;;  %v2277_v16 = vsel %vm519_vm2, %v9056_v43, %v9061_v36  ;;  %v2280_v43 = vsel %vm519_vm2, %v11649_v8, %v9080_v50 }
 0x45d   :  { %v9343_v15 = vpop.permute.xlu1 %2703 }
 0x45e   :  { %11621 = vst [vmem:[#allocation95_spill] sm:$0xff] %v9343_v15  ;;  %v9345_v3 = vpop.permute.xlu0 %2705  ;;  %v11631_v15 = vld [vmem:[#allocation69_spill] sm:$0xff] }
 0x45f   :  { %11622 = vst [vmem:[#allocation96_spill] sm:$0xff] %v9345_v3  ;;  %v2080_v21 = vadd.f32 %v11631_v15, %v11624_v39  ;;  %v11632_v3 = vld [vmem:[#allocation70_spill] sm:$0xff]  ;;  %v1919_v15 = vadd.f32 %v11640_v53, %v11639_v55  ;;  %v2221_v53 = vmul.f32 %v1915_v54, %v11645_v12  ;;  %v2278_v54 = vsel %vm519_vm2, %v9061_v36, %v9068_v11 }
 0x460   :  { %v2281_v36 = vsel %vm519_vm2, %v9080_v50, %v9085_v58  ;;  %v2284_v50 = vsel %vm519_vm2, %v11649_v8, %v9104_v47  ;;  %v2367_v8 = vsel %vm651_vm8, %v9128_v37, %v9133_v9 }
 0x461   :  { %v9347_v44 = vpop.permute.xlu1 %2707 }
 0x462   :  { %11623 = vst [vmem:[#allocation97_spill] sm:$0xff] %v9347_v44  ;;  %v9355_v0 = vpop.permute.xlu0 %2709  ;;  %v2082_v44 = vadd.f32 %v11632_v3, %v11624_v39  ;;  %v1921_v3 = vadd.f32 %v11641_v1, %v11639_v55  ;;  %v11642_v39 = vld [vmem:[#allocation74_spill] sm:$0xff] }
 0x463   :  { %11629 = vst [vmem:[#allocation77_spill] sm:$0xff] %v9355_v0  ;;  %v11637_v0 = vld [vmem:[#allocation52_spill] sm:$0xff]  ;;  %v2090_v19 = vadd.f32 %v11642_v39, %v11639_v55 }
 0x464   :  { %v9373_v6 = vmul.f32 %v9041_v31, %v11637_v0  ;;  %v11646_v0 = vld [vmem:[#allocation75_spill] sm:$0xff]  ;;  %v2219_v18 = vmul.f32 %v2082_v44, %v11648_v28  ;;  %v2225_v44 = vmul.f32 %v1921_v3, %v11645_v12  ;;  %v2282_v12 = vsel %vm519_vm2, %v9085_v58, %v9092_v63 }
 0x465   :  { %v9381_v4 = vpop.permute.xlu1 %2777  ;;  %v2092_v14 = vadd.f32 %v11646_v0, %v11639_v55  ;;  %v2304_v3 = vadd.f32 %v2277_v16, %v2216_v49  ;;  %v2285_v58 = vsel %vm519_vm2, %v9104_v47, %v9109_v46  ;;  %v2309_v49 = vadd.f32 %v2281_v36, %v2220_v61 }
 0x466   :  { %11638 = vst [vmem:[#allocation68_spill] sm:$0xff] %v9373_v6  ;;  %11643 = vst [vmem:[#allocation65_spill] sm:$0xff] %v9381_v4  ;;  %v9388_v31 = vpop.permute.xlu0 %2779  ;;  %v11647_v6 = vld [vmem:[#allocation85_spill] sm:$0xff]  ;;  %v2223_v4 = vmul.f32 %v2086_v41, %v11648_v28  ;;  %v2279_v41 = vsel %vm519_vm2, %v9068_v11, %v9073_v48  ;;  %v11650_v11 = vld [vmem:[#allocation84_spill] sm:$0xff]  ;;  %v2368_v47 = vsel %vm651_vm8, %v9133_v9, %v9140_v2 }
 0x467   :  { %v2218_v1 = vmul.f32 %v2080_v21, %v11647_v6  ;;  %v2222_v39 = vmul.f32 %v2084_v59, %v11647_v6  ;;  %v2224_v21 = vmul.f32 %v1919_v15, %v11644_v10  ;;  %v9407_v59 = vmul.f32 %v2090_v19, %v11647_v6 }
 0x468   :  { %v9415_v0 = vmul.f32 %v2092_v14, %v11648_v28  ;;  %v9429_v15 = vadd.f32 %v2276_v20, %v11650_v11  ;;  %v2305_v28 = vadd.f32 %v2278_v54, %v2217_v27  ;;  %v2283_v19 = vsel %vm519_vm2, %v9092_v63, %v9097_v57 }
 0x469   :  { %v9412_v55 = vpop.permute.xlu1 %2781  ;;  %v2306_v10 = vadd.f32 %v2279_v41, %v2218_v1  ;;  %v2307_v14 = vadd.f32 %v9073_v48, %v2219_v18  ;;  %v9442_v20 = vadd.f32 %v2280_v43, %v11650_v11  ;;  %v2310_v27 = vadd.f32 %v2282_v12, %v2221_v53 }
 0x46a   :  { %v9426_v6 = vpop.permute.xlu0 %2783  ;;  %v2286_v63 = vsel %vm519_vm2, %v9109_v46, %v9116_v30  ;;  %v2311_v48 = vadd.f32 %v2283_v19, %v2222_v39  ;;  %v2312_v18 = vadd.f32 %v9097_v57, %v2223_v4  ;;  %v9459_v61 = vadd.f32 %v2284_v50, %v11650_v11  ;;  %v11651_v39 = vld [vmem:[#allocation37_spill] sm:$0xff] }
 0x46b   :  { %v9461_v53 = vadd.f32 %v2285_v58, %v2224_v21  ;;  %v2369_v46 = vsel %vm651_vm8, %v9140_v2, %v9145_v25  ;;  %v2371_v57 = vsel %vm651_vm8, %v9152_v34, %v9157_v33  ;;  %v9469_v4 = vadd.f32 %v2286_v63, %v2225_v44 }
 0x46c   :  { %v9474_v9 = vsel %vm519_vm2, %v9116_v30, %v9121_v42  ;;  %v9479_v54 = vsel %vm651_vm8, %v11651_v39, %v9128_v37  ;;  %v2372_v2 = vsel %vm651_vm8, %v9157_v33, %v9164_v35  ;;  %v2394_v21 = vadd.f32 %v2367_v8, %v2304_v3 }
 0x46d   :  { %v9447_v1 = vpop.permute.xlu1 %2785  ;;  %v2395_v41 = vadd.f32 %v2368_v47, %v2305_v28  ;;  %v2373_v44 = vsel %vm651_vm8, %v9164_v35, %v9169_v13  ;;  %v2457_v30 = vsel %vm458_vm0, %v9200_v38, %v9205_v22  ;;  %v2396_v36 = vadd.f32 %v2369_v46, %v2306_v10 }
 0x46e   :  { %v9456_v16 = vpop.permute.xlu0 %2787  ;;  %v2397_v37 = vadd.f32 %v9145_v25, %v2307_v14  ;;  %v2399_v12 = vadd.f32 %v2371_v57, %v2309_v49  ;;  %v2458_v33 = vsel %vm458_vm0, %v9205_v22, %v9212_v7  ;;  %v2400_v3 = vadd.f32 %v2372_v2, %v2310_v27 }
 0x46f   :  { %v2459_v35 = vsel %vm458_vm0, %v9212_v7, %v9217_v23  ;;  %v2461_v28 = vsel %vm458_vm0, %v9224_v40, %v9229_v56  ;;  %v2462_v25 = vsel %vm458_vm0, %v9229_v56, %v9236_v60  ;;  %v2401_v19 = vadd.f32 %v2373_v44, %v2311_v48 }
 0x470   :  { %v2402_v10 = vadd.f32 %v9169_v13, %v2312_v18  ;;  %v2484_v14 = vadd.f32 %v2457_v30, %v2394_v21  ;;  %v2463_v22 = vsel %vm458_vm0, %v9236_v60, %v9241_v5  ;;  %v2485_v50 = vadd.f32 %v2458_v33, %v2395_v41  ;;  %v11653_v41 = vld [vmem:[#allocation43_spill] sm:$0xff]  ;;  %v11654_v30 = vld [vmem:[#allocation86_spill] sm:$0xff] }
 0x471   :  { %v9490_v43 = vpop.permute.xlu1 %2789  ;;  %v2487_v58 = vadd.f32 %v9217_v23, %v2397_v37  ;;  %v2534_v7 = vsel %vm408_vm7, %v9270_v32, %v9273_v62  ;;  %v2535_v49 = vsel %vm408_vm7, %v9273_v62, %v9280_v45  ;;  %v2486_v27 = vadd.f32 %v2459_v35, %v2396_v36  ;;  %v11655_v33 = vld [vmem:[#allocation58_spill] sm:$0xff] }
 0x472   :  { %v9496_v11 = vpop.permute.xlu0 %2791  ;;  %v2489_v13 = vadd.f32 %v2461_v28, %v2399_v12  ;;  %v2490_v63 = vadd.f32 %v2462_v25, %v2400_v3  ;;  %v2536_v60 = vsel %vm408_vm7, %v9280_v45, %v9285_v29  ;;  %v2491_v23 = vadd.f32 %v2463_v22, %v2401_v19  ;;  %v11652_v45 = vld [vmem:[#allocation27_spill] sm:$0xff]  ;;  %v11656_v25 = vld [vmem:[#allocation78_spill] sm:$0xff] }
 0x473   :  { %v2492_v18 = vadd.f32 %v9241_v5, %v2402_v10  ;;  %v2537_v8 = vsel %vm408_vm7, %v9287_v26, %v9289_v24  ;;  %v2538_v62 = vsel %vm408_vm7, %v9289_v24, %v9291_v17  ;;  %v2559_v47 = vadd.f32 %v2534_v7, %v2484_v14  ;;  %v11658_v10 = vld [vmem:[#allocation88_spill] sm:$0xff]  ;;  %v11659_v14 = vld [vmem:[#allocation17_spill] sm:$0xff]  ;;  %v11660_v7 = vld [vmem:[#allocation47_spill] sm:$0xff] }
 0x474   :  { %v2560_v46 = vadd.f32 %v2535_v49, %v2485_v50  ;;  %v2539_v57 = vsel %vm408_vm7, %v9291_v17, %v9293_v52  ;;  %v2621_v2 = vsel %vm988_vm9, %v11652_v45, %v9305_v51  ;;  %v2561_v21 = vadd.f32 %v2536_v60, %v2486_v27  ;;  %v11661_v49 = vld [vmem:[#allocation83_spill] sm:$0xff]  ;;  %v11662_v60 = vld [vmem:[#allocation89_spill] sm:$0xff] }
 0x475   :  { %v9518_v56 = vpop.permute.xlu1 %2793  ;;  %v2562_v5 = vadd.f32 %v9285_v29, %v2487_v58  ;;  %v2622_v44 = vsel %vm988_vm9, %v9305_v51, %v11653_v41  ;;  %v2623_v24 = vsel %vm988_vm9, %v11653_v41, %v11654_v30  ;;  %v2564_v37 = vadd.f32 %v2537_v8, %v2489_v13  ;;  %v11657_v51 = vld [vmem:[#allocation45_spill] sm:$0xff] }
 0x476   :  { %v9523_v48 = vpop.permute.xlu0 %2795  ;;  %v2565_v12 = vadd.f32 %v2538_v62, %v2490_v63  ;;  %v2567_v17 = vadd.f32 %v9293_v52, %v2492_v18  ;;  %v2624_v3 = vsel %vm988_vm9, %v11654_v30, %v11655_v33  ;;  %v2566_v29 = vadd.f32 %v2539_v57, %v2491_v23  ;;  %v11663_v18 = vld [vmem:[#allocation65_spill] sm:$0xff]  ;;  %v11664_v57 = vld [vmem:[#allocation90_spill] sm:$0xff] }
 0x477   :  { %v2649_v28 = vadd.f32 %v2621_v2, %v2559_v47  ;;  %v2625_v19 = vsel %vm988_vm9, %v11657_v51, %v11656_v25  ;;  %v2711_v22 = vsel %vm1120_vm10, %v11659_v14, %v11658_v10  ;;  %v2650_v50 = vadd.f32 %v2622_v44, %v2560_v46 }
 0x478   :  { %v2651_v58 = vadd.f32 %v2623_v24, %v2561_v21  ;;  %v2626_v52 = vsel %vm988_vm9, %v11656_v25, %v11660_v7  ;;  %v2627_v27 = vsel %vm988_vm9, %v11660_v7, %v11661_v49  ;;  %v2652_v13 = vadd.f32 %v2624_v3, %v2562_v5  ;;  %v11665_v21 = vld [vmem:[#allocation71_spill] sm:$0xff]  ;;  %v11666_v24 = vld [vmem:[#allocation92_spill] sm:$0xff] }
 0x479   :  { %v9545_v36 = vpop.permute.xlu1 %2797  ;;  %v2628_v63 = vsel %vm988_vm9, %v11661_v49, %v11655_v33  ;;  %v2712_v23 = vsel %vm1120_vm10, %v11658_v10, %v11662_v60  ;;  %v2801_v8 = vsel %vm1252_vm11, %v11663_v18, %v9388_v31  ;;  %v2654_v47 = vadd.f32 %v2625_v19, %v2564_v37  ;;  %v11667_v3 = vld [vmem:[#allocation91_spill] sm:$0xff]  ;;  %v11668_v19 = vld [vmem:[#allocation93_spill] sm:$0xff] }
 0x47a   :  { %v9551_v35 = vpop.permute.xlu0 %2799  ;;  %v2739_v46 = vadd.f32 %v2711_v22, %v2649_v28  ;;  %v2713_v2 = vsel %vm1120_vm10, %v11662_v60, %v11664_v57  ;;  %v2714_v5 = vsel %vm1120_vm10, %v11664_v57, %v11665_v21  ;;  %v2655_v44 = vadd.f32 %v2626_v52, %v2565_v12  ;;  %v11669_v57 = vld [vmem:[#allocation87_spill] sm:$0xff] }
 0x47b   :  { %v2656_v30 = vadd.f32 %v2627_v27, %v2566_v29  ;;  %v2715_v25 = vsel %vm1120_vm10, %v11667_v3, %v11666_v24  ;;  %v2657_v37 = vadd.f32 %v2628_v63, %v2567_v17  ;;  %v2740_v28 = vadd.f32 %v2712_v23, %v2650_v50  ;;  %v11670_v23 = vld [vmem:[#allocation94_spill] sm:$0xff] }
 0x47c   :  { %v2716_v22 = vsel %vm1120_vm10, %v11666_v24, %v11668_v19  ;;  %v2829_v7 = vadd.f32 %v2801_v8, %v2739_v46  ;;  %v2741_v49 = vadd.f32 %v2713_v2, %v2651_v58  ;;  %v2742_v60 = vadd.f32 %v2714_v5, %v2652_v13  ;;  %v11671_v2 = vld [vmem:[#allocation40_spill] sm:$0xff] }
 0x47d   :  { %v9574_v62 = vpop.permute.xlu1 %2867  ;;  %v2802_v12 = vsel %vm1252_vm11, %v9388_v31, %v9412_v55  ;;  %v2803_v29 = vsel %vm1252_vm11, %v9412_v55, %v9426_v6  ;;  %v2744_v27 = vadd.f32 %v2715_v25, %v2654_v47  ;;  %v2804_v17 = vsel %vm1252_vm11, %v9426_v6, %v11669_v57 }
 0x47e   :  { %v2870_v41 = vpop.permute.xlu0 %2869  ;;  %v2805_v50 = vsel %vm1252_vm11, %v9447_v1, %v9456_v16  ;;  %v2745_v63 = vadd.f32 %v2716_v22, %v2655_v44  ;;  %v2717_v31 = vsel %vm1120_vm10, %v11668_v19, %v11670_v23  ;;  %v2718_v47 = vsel %vm1120_vm10, %v11670_v23, %v11665_v21  ;;  %v11672_v19 = vld [vmem:[#allocation66_spill] sm:$0xff] }
 0x47f   :  { %v2891_v10 = vsel %vm1384_vm12, %v9574_v62, %v2870_v41  ;;  %v2830_v6 = vadd.f32 %v2802_v12, %v2740_v28  ;;  %v2831_v46 = vadd.f32 %v2803_v29, %v2741_v49  ;;  %v2832_v24 = vadd.f32 %v2804_v17, %v2742_v60  ;;  %v11673_v23 = vld [vmem:[#allocation14_spill] sm:$0xff] }
 0x480   :  { %v2919_v58 = vadd.f32 %v2891_v10, %v2829_v7  ;;  %v2834_v25 = vadd.f32 %v2805_v50, %v2744_v27  ;;  %v2806_v44 = vsel %vm1252_vm11, %v9456_v16, %v9490_v43  ;;  %v2808_v28 = vsel %vm1252_vm11, %v9496_v11, %v11669_v57 }
 0x481   :  { %v2872_v52 = vpop.permute.xlu1 %2871  ;;  %v2746_v12 = vadd.f32 %v2717_v31, %v2656_v30  ;;  %v2747_v29 = vadd.f32 %v2718_v47, %v2657_v37  ;;  %v2317_v27 = vadd.f32 %v9121_v42, %v9415_v0  ;;  %v2370_v50 = vsel %vm651_vm8, %v11651_v39, %v9152_v34  ;;  %v11675_v47 = vld [vmem:[#allocation16_spill] sm:$0xff] }
 0x482   :  { %v2874_v13 = vpop.permute.xlu0 %2873  ;;  %v2892_v8 = vsel %vm1384_vm12, %v2870_v41, %v2872_v52  ;;  %v2807_v41 = vsel %vm1252_vm11, %v9490_v43, %v9496_v11  ;;  %v2952_v22 = vmul.f32 %v11672_v19, %v2919_v58  ;;  %v2316_v43 = vadd.f32 %v9474_v9, %v9407_v59  ;;  %v11674_v9 = vld [vmem:[#allocation80_spill] sm:$0xff] }
 0x483   :  { %v2893_v55 = vsel %vm1384_vm12, %v2872_v52, %v2874_v13  ;;  %v2894_v5 = vsel %vm1384_vm12, %v2874_v13, %v11671_v2  ;;  %v2920_v7 = vadd.f32 %v2892_v8, %v2830_v6  ;;  %v2393_v11 = vadd.f32 %v9479_v54, %v9429_v15 }
 0x484   :  { %v2921_v49 = vadd.f32 %v2893_v55, %v2831_v46  ;;  %v2922_v52 = vadd.f32 %v2894_v5, %v2832_v24  ;;  %v2835_v30 = vadd.f32 %v2806_v44, %v2745_v63  ;;  %v2836_v37 = vadd.f32 %v2807_v41, %v2746_v12  ;;  %v11676_v24 = vld [vmem:[#allocation23_spill] sm:$0xff]  ;;  %v11677_v44 = vld [vmem:[#allocation28_spill] sm:$0xff] }
 0x485   :  { %v9618_v10 = vpop.permute.xlu1 %2875  ;;  %v2837_v58 = vadd.f32 %v2808_v28, %v2747_v29  ;;  %v2985_v31 = vadd.f32 %v11673_v23, %v2952_v22  ;;  %v2953_v8 = vmul.f32 %v11672_v19, %v2920_v7  ;;  %v2398_v63 = vadd.f32 %v2370_v50, %v9442_v20  ;;  %v11678_v28 = vld [vmem:[#allocation42_spill] sm:$0xff] }
 0x486   :  { %v2878_v60 = vpop.permute.xlu0 %2877  ;;  %v2954_v59 = vmul.f32 %v11672_v19, %v2921_v49  ;;  %v2955_v15 = vmul.f32 %v11672_v19, %v2922_v52  ;;  %v2375_v41 = vsel %vm651_vm8, %v11676_v24, %v11677_v44  ;;  %v2460_v22 = vsel %vm458_vm0, %v11678_v28, %v9224_v40 }
 0x487   :  { %v2895_v16 = vsel %vm1384_vm12, %v9618_v10, %v2878_v60  ;;  %v3000_v49 = vmax.f32 %v2985_v31, 0.0  ;;  %v2986_v29 = vadd.f32 %v11673_v23, %v2953_v8  ;;  %v2488_v50 = vadd.f32 %v2460_v22, %v2398_v63  ;;  %v11679_v8 = vld [vmem:[#allocation29_spill] sm:$0xff] }
 0x488   :  { %v2924_v17 = vadd.f32 %v2895_v16, %v2834_v25  ;;  %v2374_v25 = vsel %vm651_vm8, %v11651_v39, %v11676_v24  ;;  %v2987_v52 = vadd.f32 %v11673_v23, %v2954_v59  ;;  %v2988_v39 = vadd.f32 %v11673_v23, %v2955_v15 }
 0x489   :  { %v2880_v13 = vpop.permute.xlu1 %2879  ;;  %v2376_v59 = vsel %vm651_vm8, %v11677_v44, %v11679_v8  ;;  %v3001_v15 = vmax.f32 %v2986_v29, 0.0 }
 0x48a   :  { %v2957_v42 = vmul.f32 %v11674_v9, %v2924_v17  ;;  %v2882_v0 = vpop.permute.xlu0 %2881  ;;  %v2896_v54 = vsel %vm1384_vm12, %v2878_v60, %v2880_v13  ;;  %v2403_v17 = vadd.f32 %v2374_v25, %v9459_v61  ;;  %v2563_v61 = vadd.f32 %v9287_v26, %v2488_v50 }
 0x48b   :  { %v2897_v55 = vsel %vm1384_vm12, %v2880_v13, %v2882_v0  ;;  %v2898_v34 = vsel %vm1384_vm12, %v2882_v0, %v11671_v2  ;;  %v2925_v46 = vadd.f32 %v2896_v54, %v2835_v30  ;;  %v3002_v54 = vmax.f32 %v2987_v52, 0.0 }
 0x48c   :  { %v2990_v6 = vadd.f32 %v11675_v47, %v2957_v42  ;;  %v2926_v5 = vadd.f32 %v2897_v55, %v2836_v37  ;;  %v2927_v7 = vadd.f32 %v2898_v34, %v2837_v58  ;;  %v2404_v37 = vadd.f32 %v2375_v41, %v9461_v53  ;;  %v11680_v34 = vld [vmem:[#allocation30_spill] sm:$0xff] }
 0x48d   :  { %v2958_v20 = vmul.f32 %v11674_v9, %v2925_v46  ;;  %v2456_v58 = vsel %vm458_vm0, %v11678_v28, %v9200_v38  ;;  %v3003_v55 = vmax.f32 %v2988_v39, 0.0  ;;  %v2377_v38 = vsel %vm651_vm8, %v11679_v8, %v11680_v34  ;;  %v11685_v39 = vld [vmem:[#allocation36_spill] sm:$0xff] }
 0x48e   :  { %v3005_v60 = vmax.f32 %v2990_v6, 0.0  ;;  %v2959_v12 = vmul.f32 %v11674_v9, %v2926_v5  ;;  %v2960_v16 = vmul.f32 %v11674_v9, %v2927_v7  ;;  %v2483_v63 = vadd.f32 %v2456_v58, %v2393_v11  ;;  %v11681_v6 = vld [vmem:[#allocation25_spill] sm:$0xff]  ;;  %v11683_v7 = vld [vmem:[#allocation34_spill] sm:$0xff] }
 0x48f   :  { %v2991_v40 = vadd.f32 %v11675_v47, %v2958_v20  ;;  %v2464_v46 = vsel %vm458_vm0, %v11678_v28, %v11681_v6  ;;  %v11682_v5 = vld [vmem:[#allocation33_spill] sm:$0xff]  ;;  %v2653_v26 = vadd.f32 %v11657_v51, %v2563_v61  ;;  %v2405_v22 = vadd.f32 %v2376_v59, %v9469_v4  ;;  %v11689_v59 = vld [vmem:[#allocation76_spill] sm:$0xff] }
 0x490   :  { %v2992_v30 = vadd.f32 %v11675_v47, %v2959_v12  ;;  %v2993_v13 = vadd.f32 %v11675_v47, %v2960_v16  ;;  %v9669_v31 = vpack.c.bf16 %v3005_v60, %v3000_v49  ;;  %v2465_v24 = vsel %vm458_vm0, %v11681_v6, %v11682_v5  ;;  %v11684_v12 = vld [vmem:[#allocation35_spill] sm:$0xff]  ;;  %v11686_v16 = vld [vmem:[#allocation26_spill] sm:$0xff]  ;;  %v11690_v61 = vld [vmem:[#allocation12_spill] sm:$0xff] }
 0x491   :  { %v3006_v42 = vmax.f32 %v2991_v40, 0.0  ;;  %v2407_v11 = vadd.f32 %v11680_v34, %v2317_v27  ;;  %v2466_v28 = vsel %vm458_vm0, %v11682_v5, %v11683_v7  ;;  %v2558_v49 = vadd.f32 %v9270_v32, %v2483_v63  ;;  %v11687_v27 = vld [vmem:[#allocation38_spill] sm:$0xff]  ;;  %v2884_v32 = vpop.permute.xlu1 %2883 }
 0x492   :  { %v3007_v0 = vmax.f32 %v2992_v30, 0.0  ;;  %v3008_v53 = vmax.f32 %v2993_v13, 0.0  ;;  %v2406_v60 = vadd.f32 %v2377_v38, %v2316_v43  ;;  %v2493_v20 = vadd.f32 %v2464_v46, %v2403_v17  ;;  %v11688_v30 = vld [vmem:[#allocation39_spill] sm:$0xff] }
 0x493   :  { %v9685_v25 = vpack.c.bf16 %v3006_v42, %v3001_v15  ;;  %v2467_v51 = vsel %vm458_vm0, %v11683_v7, %v11684_v12  ;;  %v2743_v29 = vadd.f32 %v11667_v3, %v2653_v26  ;;  %v2494_v52 = vadd.f32 %v2465_v24, %v2404_v37  ;;  %v2886_v37 = vpop.permute.xlu0 %2885  ;;  %v11692_v46 = vld [vmem:[#allocation15_spill] sm:$0xff]  ;;  %v11693_v24 = vld [vmem:[#allocation96_spill] sm:$0xff]  ;;  %v11695_v7 = vld [vmem:[#allocation97_spill] sm:$0xff] }
 0x494   :  { %v9687_v44 = vpack.c.bf16 %v3008_v53, %v3003_v55  ;;  %v9689_v41 = vpack.c.bf16 %v3007_v0, %v3002_v54  ;;  %v2540_v4 = vsel %vm408_vm7, %v11686_v16, %v11685_v39  ;;  %v2541_v50 = vsel %vm408_vm7, %v11685_v39, %v11687_v27  ;;  %v11691_v54 = vld [vmem:[#allocation13_spill] sm:$0xff]  ;;  %v11694_v26 = vld [vmem:[#allocation95_spill] sm:$0xff]  ;;  %v11698_v39 = vld [vmem:[#allocation20_spill] sm:$0xff] }
 0x495   :  { %v2648_v40 = vadd.f32 %v11652_v45, %v2558_v49  ;;  %v2495_v43 = vadd.f32 %v2466_v28, %v2405_v22  ;;  %v2497_v17 = vadd.f32 %v11684_v12, %v2407_v11  ;;  %v2542_v58 = vsel %vm408_vm7, %v11687_v27, %v11688_v30  ;;  %v2888_v49 = vpop.permute.xlu1 %2887 }
 0x496   :  { %v2833_v3 = vadd.f32 %v9447_v1, %v2743_v29  ;;  %v2496_v13 = vadd.f32 %v2467_v51, %v2406_v60  ;;  %v2568_v8 = vadd.f32 %v11686_v16, %v2493_v20  ;;  %v2629_v42 = vsel %vm988_vm9, %v11690_v61, %v11689_v59  ;;  %v11696_v60 = vld [vmem:[#allocation77_spill] sm:$0xff] }
 0x497   :  { %v2738_v45 = vadd.f32 %v11659_v14, %v2648_v40  ;;  %v2569_v0 = vadd.f32 %v2540_v4, %v2494_v52  ;;  %v2570_v15 = vadd.f32 %v2541_v50, %v2495_v43  ;;  %v2630_v55 = vsel %vm988_vm9, %v11689_v59, %v11691_v54  ;;  %v2890_v29 = vpop.permute.xlu0 %2889  ;;  %v11697_v52 = vld [vmem:[#allocation57_spill] sm:$0xff] }
 0x498   :  { %v2923_v53 = vadd.f32 %v9618_v10, %v2833_v3  ;;  %v2571_v34 = vadd.f32 %v2542_v58, %v2496_v13  ;;  %v2572_v1 = vadd.f32 %v11688_v30, %v2497_v17  ;;  %v2658_v38 = vadd.f32 %v11690_v61, %v2568_v8  ;;  %v11699_v50 = vld [vmem:[#allocation53_spill] sm:$0xff] }
 0x499   :  { %v2828_v63 = vadd.f32 %v11663_v18, %v2738_v45  ;;  %v2659_v6 = vadd.f32 %v2629_v42, %v2569_v0  ;;  %v2631_v14 = vsel %vm988_vm9, %v11691_v54, %v11692_v46  ;;  %v2632_v5 = vsel %vm988_vm9, %v11692_v46, %v11655_v33  ;;  %v11700_v42 = vld [vmem:[#allocation68_spill] sm:$0xff]  ;;  %v11702_v46 = vld [vmem:[#allocation19_spill] sm:$0xff] }
 0x49a   :  { %v2719_v10 = vsel %vm1120_vm10, %v11694_v26, %v11693_v24  ;;  %v2660_v22 = vadd.f32 %v2630_v55, %v2570_v15  ;;  %v2748_v11 = vadd.f32 %v11694_v26, %v2658_v38  ;;  %v2720_v18 = vsel %vm1120_vm10, %v11693_v24, %v11695_v7 }
 0x49b   :  { %v2918_v28 = vadd.f32 %v9574_v62, %v2828_v63  ;;  %v2721_v20 = vsel %vm1120_vm10, %v11695_v7, %v11696_v60  ;;  %v2722_v33 = vsel %vm1120_vm10, %v11696_v60, %v11665_v21  ;;  %v2809_v12 = vsel %vm1252_vm11, %v9518_v56, %v9523_v48  ;;  %v11706_v60 = vld [vmem:[#allocation21_spill] sm:$0xff] }
 0x49c   :  { %v2956_v51 = vmul.f32 %v11674_v9, %v2923_v53  ;;  %v3043_v16 = vmul.f32 %v11698_v39, %v11697_v52  ;;  %v2661_v62 = vadd.f32 %v2631_v14, %v2571_v34  ;;  %v2662_v4 = vadd.f32 %v2632_v5, %v2572_v1 }
 0x49d   :  { %v2749_v27 = vadd.f32 %v2719_v10, %v2659_v6  ;;  %v3044_v40 = vmul.f32 %v11698_v39, %v11699_v50  ;;  %v2750_v43 = vadd.f32 %v2720_v18, %v2660_v22  ;;  %v2838_v17 = vadd.f32 %v9518_v56, %v2748_v11  ;;  %v11701_v56 = vld [vmem:[#allocation61_spill] sm:$0xff] }
 0x49e   :  { %v2810_v21 = vsel %vm1252_vm11, %v9523_v48, %v9545_v36  ;;  %v2751_v30 = vadd.f32 %v2721_v20, %v2661_v62  ;;  %v2752_v58 = vadd.f32 %v2722_v33, %v2662_v4  ;;  %v2951_v3 = vmul.f32 %v11672_v19, %v2918_v28  ;;  %v11709_v4 = vld [vmem:[#allocation44_spill] sm:$0xff] }
 0x49f   :  { %v2839_v9 = vadd.f32 %v2809_v12, %v2749_v27  ;;  %v2989_v8 = vadd.f32 %v11675_v47, %v2956_v51  ;;  %v2928_v59 = vadd.f32 %v2884_v32, %v2838_v17  ;;  %v2840_v15 = vadd.f32 %v2810_v21, %v2750_v43  ;;  %v11707_v12 = vld [vmem:[#allocation22_spill] sm:$0xff] }
 0x4a0   :  { %v2899_v48 = vsel %vm1384_vm12, %v2884_v32, %v2886_v37  ;;  %v2811_v47 = vsel %vm1252_vm11, %v9545_v36, %v9551_v35  ;;  %v2900_v55 = vsel %vm1384_vm12, %v2886_v37, %v2888_v49  ;;  %v2812_v1 = vsel %vm1252_vm11, %v9551_v35, %v11669_v57  ;;  %v11704_v35 = vld [vmem:[#allocation48_spill] sm:$0xff]  ;;  %v11705_v57 = vld [vmem:[#allocation18_spill] sm:$0xff] }
 0x4a1   :  { %v2984_v38 = vadd.f32 %v11673_v23, %v2951_v3  ;;  %v3004_v6 = vmax.f32 %v2989_v8, 0.0  ;;  %v2961_v14 = vmul.f32 %v11702_v46, %v2928_v59  ;;  %v2929_v5 = vadd.f32 %v2899_v48, %v2839_v9  ;;  %v11711_v9 = vld [vmem:[#allocation50_spill] sm:$0xff] }
 0x4a2   :  { %v9758_v13 = vpop.permute.xlu1 %3057  ;;  %v2901_v24 = vsel %vm1384_vm12, %v2888_v49, %v2890_v29  ;;  %v2930_v26 = vadd.f32 %v2900_v55, %v2840_v15  ;;  %v2902_v36 = vsel %vm1384_vm12, %v2890_v29, %v11671_v2  ;;  %v2841_v22 = vadd.f32 %v2811_v47, %v2751_v30  ;;  %v11708_v29 = vld [vmem:[#allocation41_spill] sm:$0xff]  ;;  %v11710_v30 = vld [vmem:[#allocation46_spill] sm:$0xff]  ;;  %v11715_v47 = vld [vmem:[#allocation60_spill] sm:$0xff] }
 0x4a3   :  { %v9761_v61 = vpop.permute.xlu0 %3062  ;;  %v3072_v45 = vadd.f32 %v9758_v13, %v11700_v42  ;;  %v3071_v0 = vadd.f32 %v9758_v13, %v11701_v56  ;;  %v2842_v11 = vadd.f32 %v2812_v1, %v2752_v58  ;;  %v2999_v7 = vmax.f32 %v2984_v38, 0.0  ;;  %v11712_v56 = vld [vmem:[#allocation55_spill] sm:$0xff]  ;;  %v11714_v15 = vld [vmem:[#allocation54_spill] sm:$0xff] }
 0x4a4   :  { %v3077_v54 = vadd.f32 %v9761_v61, %v3044_v40  ;;  %v3076_v19 = vadd.f32 %v9761_v61, %v3043_v16  ;;  %v3032_v23 = vmul.f32 %v11705_v57, %v11704_v35  ;;  %v2931_v18 = vadd.f32 %v2901_v24, %v2841_v22 }
 0x4a5   :  { %v3087_v53 = vmax.f32 %v3072_v45, 0.0  ;;  %v3086_v34 = vmax.f32 %v3071_v0, 0.0  ;;  %v2932_v28 = vadd.f32 %v2902_v36, %v2842_v11  ;;  %v2994_v49 = vadd.f32 %v11706_v60, %v2961_v14 }
 0x4a6   :  { %v3092_v63 = vmax.f32 %v3077_v54, 0.0  ;;  %v3091_v32 = vmax.f32 %v3076_v19, 0.0  ;;  %v2962_v20 = vmul.f32 %v11702_v46, %v2929_v5  ;;  %v2963_v2 = vmul.f32 %v11702_v46, %v2930_v26 }
 0x4a7   :  { %v3098_v33 = vpack.c.bf16 %v3004_v6, %v2999_v7  ;;  %v3065_v51 = vadd.f32 %v11707_v12, %v3032_v23  ;;  %v3033_v52 = vmul.f32 %v11705_v57, %v11708_v29  ;;  %v2964_v16 = vmul.f32 %v11702_v46, %v2931_v18 }
 0x4a8   :  { %v3110_v37 = vpack.c.bf16 %v3092_v63, %v3087_v53  ;;  %v3109_v10 = vpack.c.bf16 %v3091_v32, %v3086_v34  ;;  %v2965_v62 = vmul.f32 %v11702_v46, %v2932_v28  ;;  %v3034_v27 = vmul.f32 %v11705_v57, %v11709_v4  ;;  %v11716_v53 = vld [vmem:[#allocation59_spill] sm:$0xff] }
 0x4a9   :  { %v3009_v50 = vmax.f32 %v2994_v49, 0.0  ;;  %v2995_v40 = vadd.f32 %v11706_v60, %v2962_v20  ;;  %v2996_v43 = vadd.f32 %v11706_v60, %v2963_v2  ;;  %v3066_v17 = vadd.f32 %v11707_v12, %v3033_v52 }
 0x4aa   :  { %3160 = vrot.lane.b32.xlu0 %v3110_v37, %s11703_s12  ;;  %3158 = vrot.lane.b32.xlu1 %v3109_v10, %s11703_s12  ;;  %v3067_v21 = vadd.f32 %v11707_v12, %v3034_v27  ;;  %v3035_v58 = vmul.f32 %v11705_v57, %v11710_v30  ;;  %v3036_v3 = vmul.f32 %v11705_v57, %v11711_v9  ;;  %v11717_v10 = vld [vmem:[#allocation49_spill] sm:$0xff]  ;;  %vm5606_vm10 = vcmask 1014784  }
 0x4ab   :  { %v2997_v8 = vadd.f32 %v11706_v60, %v2964_v16  ;;  %v2998_v59 = vadd.f32 %v11706_v60, %v2965_v62  ;;  %v3010_v42 = vmax.f32 %v2995_v40, 0.0  ;;  %v3045_v55 = vmul.f32 %v11698_v39, %v11715_v47 }
 0x4ac   :  { %v3068_v54 = vadd.f32 %v11707_v12, %v3035_v58  ;;  %v3069_v19 = vadd.f32 %v11707_v12, %v3036_v3  ;;  %v3046_v34 = vmul.f32 %v11698_v39, %v11716_v53  ;;  %v3081_v1 = vmax.f32 %v3066_v17, 0.0 }
 0x4ad   :  { %v3082_v38 = vmax.f32 %v3067_v21, 0.0  ;;  %v3012_v63 = vmax.f32 %v2997_v8, 0.0  ;;  %v3013_v32 = vmax.f32 %v2998_v59, 0.0  ;;  %v3078_v26 = vadd.f32 %v9761_v61, %v3045_v55 }
 0x4ae   :  { %3140 = vrot.lane.b32.xlu0 %v9685_v25, %s11703_s12  ;;  %3136 = vrot.lane.b32.xlu1 %v3098_v33, %s11703_s12  ;;  %v3080_v25 = vmax.f32 %v3065_v51, 0.0  ;;  %v3104_v14 = vpack.c.bf16 %v3081_v1, %v3010_v42  ;;  %v3079_v24 = vadd.f32 %v9761_v61, %v3046_v34  ;;  %v3083_v36 = vmax.f32 %v3068_v54, 0.0  ;;  %v6769_v54 = vld [vmem:[%s11153_s11 + $0x8] ss:$0 sps:$4 sm:$0xff]  }
 0x4af   :  { %v3084_v37 = vmax.f32 %v3069_v19, 0.0  ;;  %v3093_v28 = vmax.f32 %v3078_v26, 0.0  ;;  %vm6018_vm11 = vcmask 1045504   ;;  %vm6010_vm12 = vcmask 220160  }
 0x4b0   :  { %v3103_v45 = vpack.c.bf16 %v3080_v25, %v3009_v50  ;;  %v3106_v7 = vpack.c.bf16 %v3083_v36, %v3012_v63  ;;  %v3094_v18 = vmax.f32 %v3079_v24, 0.0 }
 0x4b1   :  { %v3107_v35 = vpack.c.bf16 %v3084_v37, %v3013_v32 }
 0x4b2   :  { %3144 = vrot.lane.b32.xlu0 %v9687_v44, %s11703_s12  ;;  %3138 = vrot.lane.b32.xlu1 %v9669_v31, %s11703_s12  ;;  %v3011_v44 = vmax.f32 %v2996_v43, 0.0  ;;  %v11713_v31 = vld [vmem:[#allocation24_spill] sm:$0xff] }
 0x4b3   :  { %v3040_v0 = vmul.f32 %v11713_v31, %v11712_v56  ;;  %v3041_v48 = vmul.f32 %v11713_v31, %v11714_v15  ;;  %v3037_v22 = vmul.f32 %v11713_v31, %v11717_v10  ;;  %v6768_v31 = vld [vmem:[%s11153_s11] sm:$0xff]   ;;  %v11719_v15 = vmov 0  }
 0x4b4   :  { %v3105_v5 = vpack.c.bf16 %v3082_v38, %v3011_v44 }
 0x4b5   :  { %v3074_v6 = vadd.f32 %v9758_v13, %v3041_v48  ;;  %v3073_v46 = vadd.f32 %v9758_v13, %v3040_v0  ;;  %v3070_v60 = vadd.f32 %v9758_v13, %v3037_v22 }
 0x4b6   :  { %3146 = vrot.lane.b32.xlu0 %v3103_v45, %s11703_s12  ;;  %3142 = vrot.lane.b32.xlu1 %v9689_v41, %s11703_s12  ;;  %v11718_v41 = vld [vmem:[#allocation56_spill] sm:$0xff] }
 0x4b7   :  { %v3042_v11 = vmul.f32 %v11698_v39, %v11718_v41  ;;  %v3089_v57 = vmax.f32 %v3074_v6, 0.0  ;;  %v3088_v23 = vmax.f32 %v3073_v46, 0.0  ;;  %v3085_v2 = vmax.f32 %v3070_v60, 0.0  ;;  %v6775_v60 = vld [vmem:[%s11157_s15 + $0xa8] sm:$0xff]  }
 0x4b9   :  { %v3075_v49 = vadd.f32 %v9761_v61, %v3042_v11  ;;  %v3112_v20 = vpack.c.bf16 %v3094_v18, %v3089_v57  ;;  %v3111_v39 = vpack.c.bf16 %v3093_v28, %v3088_v23  ;;  %v6771_v57 = vld [vmem:[%s11157_s15 + $0x88] sm:$0xff]   ;;  %v6772_v23 = vld [vmem:[%s11157_s15 + $0x90] sm:$0xff]   ;;  %v6773_v18 = vld [vmem:[%s11157_s15 + $0x98] sm:$0xff]  }
 0x4ba   :  { %3148 = vrot.lane.b32.xlu0 %v3104_v14, %s11703_s12  ;;  %3150 = vrot.lane.b32.xlu1 %v3105_v5, %s11703_s12  ;;  %v6774_v28 = vld [vmem:[%s11157_s15 + $0xa0] sm:$0xff]  }
 0x4bb   :  { %v3090_v33 = vmax.f32 %v3075_v49, 0.0  ;;  %v6776_v49 = vld [vmem:[%s11157_s15 + $0xb0] sm:$0xff]  }
 0x4bd   :  { %v3108_v12 = vpack.c.bf16 %v3090_v33, %v3085_v2  ;;  %v6779_v2 = vld [vmem:[%s11157_s15 + $0xb8] sm:$0xff]   ;;  %v6780_v33 = vld [vmem:[%s11157_s15 + $0x48] sm:$0xff]  }
 0x4be   :  { %3152 = vrot.lane.b32.xlu0 %v3106_v7, %s11703_s12  ;;  %3154 = vrot.lane.b32.xlu1 %v3107_v35, %s11703_s12  ;;  %v6770_v35 = vld [vmem:[%s11157_s15 + $0x80] sm:$0xff]  }
 0x4c2   :  { %3164 = vrot.lane.b32.xlu0 %v3112_v20, %s11703_s12  ;;  %3162 = vrot.lane.b32.xlu1 %v3111_v39, %s11703_s12  ;;  %v6777_v20 = vld [vmem:[%s11157_s15 + $0x40] sm:$0xff]  }
 0x4c3   :  { %v6778_v39 = vld [vmem:[%s11157_s15] sm:$0xff]  }
 0x4c6   :  { %3156 = vrot.lane.b32.xlu1 %v3108_v12, %s11703_s12  ;;  %v6781_v12 = vld [vmem:[%s11157_s15 + $0x8] sm:$0xff]   ;;  %s6886_s12 = smov 9  }
 0x51c   :  { %v3161_v51 = vpop.permute.xlu0 %3160  ;;  %v3159_v29 = vpop.permute.xlu1 %3158 }
 0x51d   :  { %v3175_v58 = vsel %vm1323_vm6, %v3159_v29, %v3161_v51 }
 0x520   :  { %v3141_v13 = vpop.permute.xlu0 %3140  ;;  %v3137_v52 = vpop.permute.xlu1 %3136 }
 0x524   :  { %v3145_v61 = vpop.permute.xlu0 %3144  ;;  %v3139_v16 = vpop.permute.xlu1 %3138 }
 0x525   :  { %v3167_v62 = vsel %vm1323_vm6, %v3139_v16, %v3141_v13  ;;  %v3166_v4 = vsel %vm1323_vm6, %v3137_v52, %v3139_v16  ;;  %v6785_v52 = vld [vmem:[%s11157_s15 + $0xc8] sm:$0xff]   ;;  %v6787_v16 = vld [vmem:[%s11157_s15 + $0x18] sm:$0xff]  }
 0x526   :  { %3197 = vmatprep.subr.bf16.mxu0 %v3167_v62  ;;  %v6789_v62 = vld [vmem:[%s11157_s15 + $0x60] sm:$0xff]  }
 0x527   :  { %3198 = vmatpush1.bf16.msra.mxu0 %v3166_v4  ;;  %v6788_v4 = vld [vmem:[%s11157_s15 + $0xd0] sm:$0xff]  }
 0x528   :  { %v3147_v27 = vpop.permute.xlu0 %3146  ;;  %v3143_v50 = vpop.permute.xlu1 %3142 }
 0x529   :  { %v3169_v40 = vsel %vm1323_vm6, %v3143_v50, %v3145_v61  ;;  %v3168_v43 = vsel %vm1323_vm6, %v3141_v13, %v3143_v50  ;;  %v6784_v13 = vld [vmem:[%s11157_s15 + $0x10] sm:$0xff]   ;;  %v6786_v61 = vld [vmem:[%s11157_s15 + $0x58] sm:$0xff]   ;;  %v6792_v50 = vld [vmem:[%s11157_s15 + $0x68] sm:$0xff]  }
 0x52a   :  { %3248 = vmatprep.subr.bf16.mxu1 %v3169_v40  ;;  %v6791_v40 = vld [vmem:[%s11157_s15 + $0xd8] sm:$0xff]  }
 0x52b   :  { %3249 = vmatpush1.bf16.msra.mxu1 %v3168_v43  ;;  %v6793_v43 = vld [vmem:[%s11157_s15 + $0x28] sm:$0xff]  }
 0x52c   :  { %v3149_v25 = vpop.permute.xlu0 %3148  ;;  %v3151_v17 = vpop.permute.xlu1 %3150 }
 0x52d   :  { %v3171_v21 = vsel %vm1323_vm6, %v3149_v25, %v3151_v17  ;;  %v3170_v30 = vsel %vm1323_vm6, %v3147_v27, %v3149_v25  ;;  %v6790_v27 = vld [vmem:[%s11157_s15 + $0x20] sm:$0xff]  }
 0x52e   :  { %3199 = vmatprep.subr.bf16.mxu0 %v3171_v21  ;;  %v6794_v25 = vld [vmem:[%s11157_s15 + $0xe0] sm:$0xff]  }
 0x52f   :  { %3200 = vmatpush1.bf16.msra.mxu0 %v3170_v30 }
 0x530   :  { %v3153_v9 = vpop.permute.xlu0 %3152  ;;  %3201 = vmatprep.subr.bf16.mxu0 %v3175_v58  ;;  %v3155_v3 = vpop.permute.xlu1 %3154 }
 0x531   :  { %v3173_v8 = vsel %vm1323_vm6, %v3153_v9, %v3155_v3  ;;  %v3172_v59 = vsel %vm1323_vm6, %v3151_v17, %v3153_v9  ;;  %v6795_v17 = vld [vmem:[%s11157_s15 + $0x70] sm:$0xff]  }
 0x532   :  { %3250 = vmatprep.subr.bf16.mxu1 %v3173_v8 }
 0x533   :  { %3251 = vmatpush1.bf16.msra.mxu1 %v3172_v59  ;;  %v6796_v59 = vld [vmem:[%s11157_s15 + $0x30] sm:$0xff]  }
 0x534   :  { %v3165_v42 = vpop.permute.xlu0 %3164  ;;  %v3163_v44 = vpop.permute.xlu1 %3162 }
 0x535   :  { %v3177_v45 = vsel %vm1323_vm6, %v3163_v44, %v3165_v42  ;;  %v3176_v56 = vsel %vm1323_vm6, %v3161_v51, %v3163_v44  ;;  %v6782_v51 = vld [vmem:[%s11157_s15 + $0xc0] sm:$0xff]  }
 0x536   :  { %3252 = vmatprep.subr.bf16.mxu1 %v3177_v45 }
 0x537   :  { %3253 = vmatpush1.bf16.msra.mxu1 %v3176_v56 }
 0x538   :  { %v3157_v0 = vpop.permute.xlu1 %3156  ;;  %3753 = vmatprep.subr.bf16.mxu1 %v11719_v15 }
 0x539   :  { %v3174_v48 = vsel %vm1323_vm6, %v3157_v0, %v3159_v29  ;;  %v6783_v29 = vld [vmem:[%s11157_s15 + $0x50] sm:$0xff]   ;;  %v6797_v0 = vld [vmem:[%s11157_s15 + $0xe8] sm:$0xff]   ;;  %vm4911_vm6 = vcmask 1042432  }
 0x53a   :  { %3202 = vmatpush1.bf16.msra.mxu0 %v3174_v48  ;;  %6174 = vmatmul.mubr.msk.bf16.vlgmr.msra.gmra.mrb[56].mxu1 %vm3190_vm15, %v6768_v31 }
 0x53b   :  { %3290 = vmatprep.mubr.bf16.mxu1 %v11719_v15  ;;  %3754 = vmatpush1.bf16.msra.mxu1 %v6770_v35 }
 0x53c   :  { %3755 = vmatprep.subr.bf16.mxu1 %v11719_v15  ;;  %6439 = vmatprep.subr.bf16.mxu0 %v6777_v20  ;;  %v6800_v20 = vld [vmem:[%s11157_s15 + $0xf0] sm:$0xff]  }
 0x53d   :  { %6172 = vmatmul.mubr.msk.bf16.vlgmr.msra.gmra.mrb[56].mxu0 %vm3190_vm15, %v6768_v31 }
 0x53e   :  { %3239 = vmatprep.mubr.bf16.mxu0 %v11719_v15  ;;  %6440 = vmatpush3.bf16.msra.mxu0 %v6778_v39  ;;  %v11373_v39 = vmov 65535  }
 0x53f   :  { %3756 = vmatpush1.bf16.msra.mxu1 %v6771_v57  ;;  %6441 = vmatprep.subr.bf16.mxu0 %v6780_v33 }
 0x540   :  { %3757 = vmatprep.subr.bf16.mxu1 %v11719_v15 }
 0x542   :  { %6175 = vmatmul.mubr.msk.bf16.gmra.mrb[60].mxu1 %vm3190_vm15, %v6769_v54  ;;  %6442 = vmatpush3.bf16.msra.mxu0 %v6781_v12 }
 0x543   :  { %3758 = vmatpush1.bf16.msra.mxu1 %v6772_v23  ;;  %6443 = vmatprep.subr.bf16.mxu0 %v6783_v29 }
 0x544   :  { %3759 = vmatprep.subr.bf16.mxu1 %v11719_v15 }
 0x545   :  { %6173 = vmatmul.mubr.msk.bf16.gmra.mrb[60].mxu0 %vm3190_vm15, %v6769_v54 }
 0x546   :  { %6444 = vmatpush3.bf16.msra.mxu0 %v6784_v13 }
 0x547   :  { %3760 = vmatpush1.bf16.msra.mxu1 %v6773_v18  ;;  %6445 = vmatprep.subr.bf16.mxu0 %v6786_v61 }
 0x548   :  { %3761 = vmatprep.subr.bf16.mxu1 %v11719_v15 }
 0x54a   :  { %6446 = vmatpush3.bf16.msra.mxu0 %v6787_v16  ;;  %v6209_v16 = vld [vmem:[%s11145_s3 + $0x18] sm:$0xff] }
 0x54b   :  { %3762 = vmatpush1.bf16.msra.mxu1 %v6774_v28  ;;  %6447 = vmatprep.subr.bf16.mxu0 %v6789_v62  ;;  %v6212_v62 = vld [vmem:[%s11146_s4 + $0x18] sm:$0xff] }
 0x54c   :  { %3763 = vmatprep.subr.bf16.mxu1 %v11719_v15 }
 0x54e   :  { %6448 = vmatpush3.bf16.msra.mxu0 %v6790_v27  ;;  %v6214_v27 = vld [vmem:[%s11146_s4 + $0x28] sm:$0xff] }
 0x54f   :  { %3764 = vmatpush1.bf16.msra.mxu1 %v6775_v60  ;;  %6449 = vmatprep.subr.bf16.mxu0 %v6792_v50  ;;  %v6245_v50 = vld [vmem:[%s11148_s6 + $0xf0] sm:$0xff] }
 0x550   :  { %3765 = vmatprep.subr.bf16.mxu1 %v11719_v15 }
 0x552   :  { %6450 = vmatpush3.bf16.msra.mxu0 %v6793_v43  ;;  %v6248_v43 = vld [vmem:[%s11148_s6 + $0x108] sm:$0xff] }
 0x553   :  { %3766 = vmatpush1.bf16.msra.mxu1 %v6776_v49  ;;  %6451 = vmatprep.subr.bf16.mxu0 %v6795_v17  ;;  %v6247_v17 = vld [vmem:[%s11148_s6 + $0x100] sm:$0xff] }
 0x554   :  { %3767 = vmatprep.subr.bf16.mxu1 %v11719_v15 }
 0x556   :  { %6452 = vmatpush3.bf16.msra.mxu0 %v6796_v59  ;;  %v6254_v59 = vld [vmem:[%s11148_s6 + $0x138] sm:$0xff] }
 0x557   :  { %3768 = vmatpush1.bf16.msra.mxu1 %v6779_v2  ;;  %v3700_v2 = vsel %vm3698_vm1, 4294967295, %v11373_v39 }
 0x558   :  { %3769 = vmatprep.subr.bf16.mxu1 %v11719_v15  ;;  %v3701_v29 = vsel %vm3699_vm3, %v3700_v2, 0  ;;  %v6297_v2 = vld [vmem:[%s11155_s13 + $0x8] ss:$0 sm:$0xff] }
 0x55b   :  { %3770 = vmatpush1.bf16.msra.mxu1 %v6782_v51 }
 0x55c   :  { %3771 = vmatprep.subr.bf16.mxu1 %v11719_v15 }
 0x55f   :  { %3772 = vmatpush1.bf16.msra.mxu1 %v6785_v52  ;;  %v3703_v52 = vand.u32 %v6800_v20, %v3701_v29  ;;  %v6306_v29 = vld [vmem:[%s11151_s9 + $0x28] sm:$0xff] }
 0x560   :  { %3773 = vmatprep.subr.bf16.mxu1 %v11719_v15 }
 0x563   :  { %3774 = vmatpush1.bf16.msra.mxu1 %v6788_v4  ;;  %v6211_v4 = vld [vmem:[%s11145_s3 + $0x28] sm:$0xff] }
 0x564   :  { %3775 = vmatprep.subr.bf16.mxu1 %v11719_v15 }
 0x567   :  { %3776 = vmatpush1.bf16.msra.mxu1 %v6791_v40  ;;  %v6246_v40 = vld [vmem:[%s11148_s6 + $0xf8] sm:$0xff] }
 0x568   :  { %3777 = vmatprep.subr.bf16.mxu1 %v11719_v15 }
 0x56b   :  { %3778 = vmatpush1.bf16.msra.mxu1 %v6794_v25  ;;  %v6249_v25 = vld [vmem:[%s11148_s6 + $0x110] sm:$0xff] }
 0x56c   :  { %3779 = vmatprep.subr.bf16.mxu1 %v11719_v15 }
 0x56f   :  { %3780 = vmatpush1.bf16.msra.mxu1 %v6797_v0  ;;  %v6261_v0 = vld [vmem:[%s11148_s6 + $0x170] sm:$0xff] }
 0x570   :  { %3781 = vmatprep.subr.bf16.mxu1 %v11719_v15 }
 0x573   :  { %3782 = vmatpush1.bf16.msra.mxu1 %v3703_v52  ;;  %v6309_v52 = vld [vmem:[%s11152_s10 + $0x28] sm:$0xff] }
 0x60d   :  { %v9868_v19 = vpop.f32.mrb[56].mxu1 }
 0x60e   :  { %v9870_v47 = vpop.f32.mrb[57].mxu1 }
 0x60f   :  { %v9872_v55 = vpop.f32.mrb[58].mxu1 }
 0x610   :  { %v9874_v53 = vpop.f32.mrb[56].mxu0  ;;  %v9876_v34 = vpop.f32.mrb[59].mxu1 }
 0x611   :  { %v9878_v1 = vpop.f32.mrb[57].mxu0  ;;  %v6679_v38 = vpack.i.bf16 %v9876_v34, %v9872_v55 }
 0x612   :  { %v6669_v63 = vpack.i.bf16 %v9868_v19, %v9878_v1  ;;  %v9884_v32 = vpop.f32.mrb[58].mxu0 }
 0x613   :  { %v6684_v6 = vpack.i.bf16 %v9884_v32, %v9874_v53  ;;  %v9888_v46 = vpop.f32.mrb[59].mxu0 }
 0x614   :  { %v6674_v14 = vpack.i.bf16 %v9888_v46, %v9870_v47  ;;  %6670 = vrot.lane.b32.xlu0 %v6669_v63, %s6870_s21  ;;  %v6798_v63 = vld [vmem:[%s11157_s15 + $0x78] sm:$0xff]  }
 0x615   :  { %v9893_v5 = vpop.f32.mrb[60].mxu1  ;;  %6453 = vmatprep.subr.bf16.mxu0 %v6798_v63 }
 0x616   :  { %6675 = vrot.lane.b32.xlu1 %v6674_v14, %s6870_s21  ;;  %v9896_v24 = vpop.f32.mrb[61].mxu1 }
 0x617   :  { %v3296_v26 = vpop.f32.mrb[62].mxu1 }
 0x618   :  { %6680 = vrot.lane.b32.xlu0 %v6679_v38, %s6870_s21  ;;  %v9899_v36 = vpop.f32.mrb[60].mxu0  ;;  %v3297_v37 = vpop.f32.mrb[63].mxu1 }
 0x619   :  { %v9901_v10 = vpop.f32.mrb[61].mxu0  ;;  %v6694_v22 = vpack.i.bf16 %v9899_v36, %v9896_v24 }
 0x61a   :  { %v6689_v41 = vpack.i.bf16 %v9893_v5, %v9901_v10  ;;  %6685 = vrot.lane.b32.xlu1 %v6684_v6, %s6870_s21  ;;  %v3245_v11 = vpop.f32.mrb[62].mxu0 }
 0x61b   :  { %v3246_v7 = vpop.f32.mrb[63].mxu0 }
 0x61c   :  { %6690 = vrot.lane.b32.xlu0 %v6689_v41, %s6870_s21 }
 0x61e   :  { %6695 = vrot.lane.b32.xlu1 %v6694_v22, %s6870_s21 }
 0x686   :  { %v6671_v21 = vpop.permute.xlu0 %6670 }
 0x687   :  { %v6673_v30 = vunpack.i.h.bf16 %v6671_v21  ;;  %v6672_v58 = vunpack.i.l.bf16 %v6671_v21  ;;  %v6251_v21 = vld [vmem:[%s11148_s6 + $0x120] sm:$0xff] }
 0x688   :  { %v6676_v9 = vpop.permute.xlu1 %6675 }
 0x689   :  { %v3336_v3 = vsel %vm519_vm2, %v6672_v58, %v6673_v30  ;;  %v6677_v8 = vunpack.i.l.bf16 %v6676_v9  ;;  %v6678_v44 = vunpack.i.h.bf16 %v6676_v9  ;;  %v6253_v9 = vld [vmem:[%s11148_s6 + $0x130] sm:$0xff] }
 0x68a   :  { %v6681_v42 = vpop.permute.xlu0 %6680  ;;  %v10010_v48 = vmax.f32 %v9878_v1, %v3336_v3  ;;  %v6799_v1 = vld [vmem:[%s11157_s15 + $0x38] sm:$0xff]   ;;  %v6257_v3 = vld [vmem:[%s11148_s6 + $0x150] sm:$0xff] }
 0x68b   :  { %v3337_v45 = vsel %vm519_vm2, %v6673_v30, %v6677_v8  ;;  %v6683_v56 = vunpack.i.h.bf16 %v6681_v42  ;;  %v6682_v31 = vunpack.i.l.bf16 %v6681_v42  ;;  %6454 = vmatpush3.bf16.msra.mxu0 %v6799_v1  ;;  %v6252_v30 = vld [vmem:[%s11148_s6 + $0x128] sm:$0xff]  ;;  %v10140_v42 = vld [vmem:[%s11155_s13] sm:$0xff] }
 0x68c   :  { %v10013_v54 = vmax.f32 %v9868_v19, %v3337_v45  ;;  %v6686_v38 = vpop.permute.xlu1 %6685  ;;  %v11720_v45 = vld [vmem:[#allocation5_spill] sm:$0xff]  ;;  %v6256_v1 = vld [vmem:[%s11148_s6 + $0x148] sm:$0xff] }
 0x68d   :  { %v3339_v6 = vsel %vm519_vm2, %v6678_v44, %v6682_v31  ;;  %v3340_v14 = vsel %vm519_vm2, %v6682_v31, %v6683_v56  ;;  %v6688_v26 = vunpack.i.h.bf16 %v6686_v38  ;;  %v6687_v22 = vunpack.i.l.bf16 %v6686_v38  ;;  %v6260_v31 = vld [vmem:[%s11148_s6 + $0x168] sm:$0xff]  ;;  %v11721_v38 = vld [vmem:[#allocation6_spill] sm:$0xff] }
 0x68e   :  { %v10024_v37 = vmax.f32 %v9888_v46, %v3339_v6  ;;  %v10027_v19 = vmax.f32 %v9872_v55, %v3340_v14  ;;  %v6691_v41 = vpop.permute.xlu0 %6690  ;;  %v6699_v11 = vpack.i.bf16 %v10013_v54, %v10010_v48  ;;  %v10033_v7 = vmax.f32 %v9876_v34, %v6683_v56  ;;  %v6259_v6 = vld [vmem:[%s11148_s6 + $0x160] sm:$0xff] }
 0x68f   :  { %v3338_v35 = vsel %vm519_vm2, %v6688_v26, %v6678_v44  ;;  %v6693_v57 = vunpack.i.h.bf16 %v6691_v41  ;;  %v6692_v23 = vunpack.i.l.bf16 %v6691_v41  ;;  %v3335_v46 = vsel %vm519_vm2, %v6687_v22, %v6672_v58  ;;  %v6250_v58 = vld [vmem:[%s11148_s6 + $0x118] sm:$0xff]  ;;  %v6255_v44 = vld [vmem:[%s11148_s6 + $0x140] sm:$0xff]  ;;  %v6264_v26 = vld [vmem:[%s11148_s6 + $0x188] sm:$0xff] }
 0x690   :  { %v10038_v55 = vmax.f32 %v9884_v32, %v3338_v35  ;;  %v6696_v18 = vpop.permute.xlu1 %6695  ;;  %6700 = vrot.lane.b32.xlu0 %v6699_v11, %s6868_s20  ;;  %v6704_v28 = vpack.i.bf16 %v10027_v19, %v10024_v37  ;;  %v10044_v15 = vmax.f32 %v9874_v53, %v3335_v46  ;;  %v10051_v32 = vmax.f32 %v9870_v47, %v6677_v8  ;;  %v6258_v8 = vld [vmem:[%s11148_s6 + $0x158] sm:$0xff]  ;;  %v6263_v14 = vld [vmem:[%s11148_s6 + $0x180] sm:$0xff]  ;;  %v11723_v46 = vld [vmem:[#allocation8_spill] sm:$0xff] }
 0x691   :  { %v3342_v34 = vsel %vm519_vm2, %v6692_v23, %v6693_v57  ;;  %v6698_v60 = vunpack.i.h.bf16 %v6696_v18  ;;  %v6697_v49 = vunpack.i.l.bf16 %v6696_v18  ;;  %v4315_v56 = vrot.slane %v10140_v42, %v11720_v45  ;;  %v11722_v22 = vld [vmem:[#allocation7_spill] sm:$0xff]  ;;  %v6262_v11 = vld [vmem:[%s11148_s6 + $0x178] sm:$0xff] }
 0x692   :  { %6705 = vrot.lane.b32.xlu1 %v6704_v28, %s6868_s20  ;;  %v6709_v33 = vpack.i.bf16 %v10038_v55, %v10044_v15  ;;  %v10060_v12 = vmax.f32 %v9901_v10, %v3342_v34  ;;  %v6714_v47 = vpack.i.bf16 %v10033_v7, %v10051_v32  ;;  %v4354_v63 = vrot.slane %v10140_v42, %v11721_v38  ;;  %v6266_v35 = vld [vmem:[%s11148_s6 + $0x198] sm:$0xff]  ;;  %v6268_v28 = vld [vmem:[%s11148_s6 + $0x1a8] sm:$0xff] }
 0x693   :  { %v3343_v53 = vsel %vm519_vm2, %v6693_v57, %v6697_v49  ;;  %v3341_v13 = vsel %vm519_vm2, %v6698_v60, %v6692_v23  ;;  %v4393_v41 = vrot.slane %v10140_v42, %v11722_v22  ;;  %v6267_v57 = vld [vmem:[%s11148_s6 + $0x1a0] sm:$0xff]  ;;  %v6265_v23 = vld [vmem:[%s11148_s6 + $0x190] sm:$0xff]  ;;  %v4451_v18 = vrot.slane %v10140_v42, %v11723_v46 }
 0x694   :  { %v10063_v51 = vmax.f32 %v9893_v5, %v3343_v53  ;;  %6710 = vrot.lane.b32.xlu0 %v6709_v33, %s6868_s20  ;;  %v10073_v10 = vmax.f32 %v9899_v36, %v3341_v13  ;;  %v10079_v5 = vmax.f32 %v9896_v24, %v6697_v49  ;;  %v6210_v36 = vld [vmem:[%s11145_s3 + $0x20] sm:$0xff]  ;;  %v11725_v34 = vld [vmem:[#allocation9_spill] sm:$0xff] }
 0x695   :  { %v6213_v24 = vld [vmem:[%s11146_s4 + $0x20] sm:$0xff]  ;;  %v4491_v60 = vrot.slane %v10140_v42, %v11725_v34  ;;  %v6304_v53 = vld [vmem:[%s11151_s9 + $0x18] sm:$0xff] }
 0x696   :  { %6715 = vrot.lane.b32.xlu1 %v6714_v47, %s6868_s20  ;;  %v6719_v61 = vpack.i.bf16 %v10063_v51, %v10060_v12  ;;  %v11726_v49 = vld [vmem:[#allocation10_spill] sm:$0xff] }
 0x697   :  { %v4530_v20 = vrot.slane %v10140_v42, %v11726_v49  ;;  %v6307_v33 = vld [vmem:[%s11152_s10 + $0x18] sm:$0xff]  ;;  %v6305_v47 = vld [vmem:[%s11151_s9 + $0x20] sm:$0xff] }
 0x698   :  { %6720 = vrot.lane.b32.xlu0 %v6719_v61, %s6868_s20  ;;  %v6308_v13 = vld [vmem:[%s11152_s10 + $0x20] sm:$0xff]  ;;  %v6242_v61 = vld [vmem:[%s11148_s6 + $0xd8] sm:$0xff] }
 0x69a   :  { %3396 = vrot.lane.b32.xlu1 %v10073_v10, %s6868_s20 }
 0x69c   :  { %3402 = vrot.lane.b32.xlu0 %v10079_v5, %s6868_s20 }
 0x69e   :  { %3809 = vperm.xlu1 %6668, %v6209_v16   ;;  %v6243_v16 = vld [vmem:[%s11148_s6 + $0xe0] sm:$0xff] }
 0x6a0   :  { %3814 = vperm.xlu0 %6667, %v6210_v36   ;;  %v6244_v36 = vld [vmem:[%s11148_s6 + $0xe8] sm:$0xff] }
 0x6a2   :  { %3831 = vperm.xlu1 %6668, %v6212_v62   ;;  %v11727_v62 = vld [vmem:[#allocation11_spill] sm:$0xff] }
 0x6a4   :  { %3836 = vperm.xlu0 %6667, %v6213_v24   ;;  %v4303_v24 = vrot.slane %v10140_v42, %v11727_v62 }
 0x6a6   :  { %3819 = vperm.xlu1 %6668, %v6211_v4  }
 0x6a8   :  { %3841 = vperm.xlu0 %6667, %v6214_v27  }
 0x6aa   :  { %3925 = vperm.xlu1 %6668, %v6245_v50  }
 0x6ac   :  { %3930 = vperm.xlu0 %6667, %v6246_v40  }
 0x6ae   :  { %3940 = vperm.xlu1 %6668, %v6248_v43  }
 0x6b0   :  { %3945 = vperm.xlu0 %6667, %v6249_v25  }
 0x6b2   :  { %3935 = vperm.xlu1 %6668, %v6247_v17  }
 0x6b4   :  { %3955 = vperm.xlu0 %6667, %v6251_v21  }
 0x6b6   :  { %3960 = vperm.xlu1 %6668, %v6252_v30  }
 0x6b8   :  { %3950 = vperm.xlu0 %6667, %v6250_v58  }
 0x6ba   :  { %3965 = vperm.xlu1 %6668, %v6253_v9  }
 0x6bc   :  { %3985 = vperm.xlu0 %6667, %v6257_v3  }
 0x6be   :  { %3990 = vperm.xlu1 %6668, %v6258_v8  }
 0x6c0   :  { %3970 = vperm.xlu0 %6667, %v6254_v59  }
 0x6c2   :  { %3975 = vperm.xlu1 %6668, %v6255_v44  }
 0x6c4   :  { %4317 = vrot.lane.b32.xlu0 %v4315_v56, %s6882_s2 }
 0x6c6   :  { %4000 = vperm.xlu1 %6668, %v6260_v31  }
 0x6c8   :  { %4005 = vperm.xlu0 %6667, %v6261_v0  }
 0x6ca   :  { %4356 = vrot.lane.b32.xlu1 %v4354_v63, %s6883_s0  ;;  %s6887_s0 = smov 119  }
 0x6cc   :  { %3995 = vperm.xlu0 %6667, %v6259_v6  }
 0x6ce   :  { %4015 = vperm.xlu1 %6668, %v6263_v14  }
 0x6d0   :  { %4020 = vperm.xlu0 %6667, %v6264_v26  }
 0x6d2   :  { %3980 = vperm.xlu1 %6668, %v6256_v1  }
 0x6d4   :  { %4395 = vrot.lane.b32.xlu0 %v4393_v41, %s6870_s21 }
 0x6d6   :  { %4010 = vperm.xlu1 %6668, %v6262_v11  }
 0x6d8   :  { %4030 = vperm.xlu0 %6667, %v6266_v35  }
 0x6da   :  { %4035 = vperm.xlu1 %6668, %v6267_v57  }
 0x6dc   :  { %4025 = vperm.xlu0 %6667, %v6265_v23  }
 0x6de   :  { %4453 = vrot.lane.b32.xlu1 %v4451_v18, %s11724_s26 }
 0x6e0   :  { %4040 = vperm.xlu0 %6667, %v6268_v28  }
 0x6e2   :  { %4493 = vrot.lane.b32.xlu1 %v4491_v60, %s6884_s29  ;;  %s11734_s29 = sld [smem:[#allocation100_spill]] }
 0x6e4   :  { %4532 = vrot.lane.b32.xlu0 %v4530_v20, %s6885_s30  ;;  %s6888_s30 = smov 118  }
 0x6e6   :  { %4571 = vrot.lane.b32.xlu1 %v6297_v2, %s6886_s12 }
 0x6e8   :  { %4667 = vperm.xlu0 %6667, %v6304_v53  }
 0x6ea   :  { %4689 = vperm.xlu1 %6668, %v6307_v33  }
 0x6ec   :  { %4672 = vperm.xlu0 %6667, %v6305_v47  }
 0x6ee   :  { %4677 = vperm.xlu1 %6668, %v6306_v29  }
 0x6f0   :  { %4694 = vperm.xlu0 %6667, %v6308_v13  }
 0x6f2   :  { %4699 = vperm.xlu1 %6668, %v6309_v52  }
 0x6f4   :  { %3910 = vperm.xlu0 %6667, %v6242_v61  }
 0x6f6   :  { %3915 = vperm.xlu1 %6668, %v6243_v16  }
 0x6f8   :  { %3920 = vperm.xlu0 %6667, %v6244_v36  }
 0x6fa   :  { %4305 = vrot.lane.b32.xlu1 %v4303_v24, %s6887_s0 }
 0x702   :  { %v6701_v4 = vpop.permute.xlu0 %6700 }
 0x703   :  { %v6703_v27 = vunpack.i.h.bf16 %v6701_v4  ;;  %v6702_v50 = vunpack.i.l.bf16 %v6701_v4 }
 0x704   :  { %v6706_v40 = vpop.permute.xlu1 %6705 }
 0x705   :  { %v6708_v43 = vunpack.i.h.bf16 %v6706_v40  ;;  %v6707_v25 = vunpack.i.l.bf16 %v6706_v40  ;;  %v3405_v17 = vsel %vm458_vm0, %v6702_v50, %v6703_v27 }
 0x706   :  { %v6711_v21 = vpop.permute.xlu0 %6710  ;;  %v3426_v8 = vmax.f32 %v10010_v48, %v3405_v17 }
 0x707   :  { %v3408_v30 = vsel %vm458_vm0, %v6707_v25, %v6708_v43  ;;  %v6713_v58 = vunpack.i.h.bf16 %v6711_v21  ;;  %v6712_v9 = vunpack.i.l.bf16 %v6711_v21 }
 0x708   :  { %v6716_v3 = vpop.permute.xlu1 %6715  ;;  %v3430_v59 = vmax.f32 %v10024_v37, %v3408_v30 }
 0x709   :  { %v6718_v42 = vunpack.i.h.bf16 %v6716_v3  ;;  %v6717_v44 = vunpack.i.l.bf16 %v6716_v3  ;;  %v3407_v56 = vsel %vm458_vm0, %v6713_v58, %v6707_v25  ;;  %v3404_v31 = vsel %vm458_vm0, %v6712_v9, %v6702_v50 }
 0x70a   :  { %v3438_v0 = vpack.c.bf16 %v3430_v59, %v3426_v8  ;;  %v3429_v63 = vmax.f32 %v10038_v55, %v3407_v56  ;;  %v3425_v6 = vmax.f32 %v10044_v15, %v3404_v31  ;;  %v6721_v1 = vpop.permute.xlu0 %6720 }
 0x70b   :  { %v3432_v14 = vmax.f32 %v10033_v7, %v6718_v42  ;;  %v3406_v26 = vsel %vm458_vm0, %v6703_v27, %v6717_v44  ;;  %v3409_v48 = vsel %vm458_vm0, %v6708_v43, %v6718_v42  ;;  %v3428_v41 = vmax.f32 %v10051_v32, %v6717_v44 }
 0x70c   :  { %v3427_v37 = vmax.f32 %v10013_v54, %v3406_v26  ;;  %v6723_v11 = vunpack.i.h.bf16 %v6721_v1  ;;  %3737 = vmatprep.mubr.bf16.mxu0 %v3438_v0  ;;  %v3397_v35 = vpop.permute.xlu1 %3396  ;;  %v3437_v57 = vpack.c.bf16 %v3429_v63, %v3425_v6  ;;  %v3431_v23 = vmax.f32 %v10027_v19, %v3409_v48 }
 0x70d   :  { %v6722_v55 = vunpack.i.l.bf16 %v6721_v1  ;;  %v3440_v18 = vpack.c.bf16 %v3432_v14, %v3428_v41 }
 0x70e   :  { %v3439_v15 = vpack.c.bf16 %v3431_v23, %v3427_v37  ;;  %3738 = vmatmul.mubr.bf16.vlgmr.msra.gmra.mrb[64].mxu0 %v3437_v57  ;;  %v3403_v28 = vpop.permute.xlu0 %3402  ;;  %v6299_v57 = vld [vmem:[%s11149_s7 + $0x20] sm:$0xff] }
 0x70f   :  { %v3410_v7 = vsel %vm458_vm0, %v3397_v35, %v6722_v55  ;;  %v3411_v60 = vsel %vm458_vm0, %v6722_v55, %v6723_v11  ;;  %v3412_v20 = vsel %vm458_vm0, %v6723_v11, %v3403_v28  ;;  %v3436_v54 = vmax.f32 %v10079_v5, %v3403_v28  ;;  %6207 = vmatprep.mubr.msk.bf16.mxu1 %vm408_vm7, %v3440_v18  ;;  %v6302_v28 = vld [vmem:[%s11150_s8 + $0x20] sm:$0xff] }
 0x710   :  { %v3434_v32 = vmax.f32 %v10060_v12, %v3411_v60  ;;  %v3433_v2 = vmax.f32 %v10073_v10, %v3410_v7  ;;  %3786 = vmatmul.mubr.bf16.vlgmr.msra.gmra.mrb[64].mxu1 %v3439_v15  ;;  %v3435_v33 = vmax.f32 %v10063_v51, %v3412_v20  ;;  %v6298_v15 = vld [vmem:[%s11149_s7 + $0x18] sm:$0xff] }
 0x711   :  { %v3444_v19 = vpack.c.bf16 %v3436_v54, %v3436_v54  ;;  %v6301_v7 = vld [vmem:[%s11150_s8 + $0x18] sm:$0xff]  ;;  %v6300_v54 = vld [vmem:[%s11149_s7 + $0x28] sm:$0xff] }
 0x712   :  { %v3442_v53 = vpack.c.bf16 %v3434_v32, %v3434_v32  ;;  %v3441_v47 = vpack.c.bf16 %v3433_v2, %v3433_v2  ;;  %v3443_v29 = vpack.c.bf16 %v3435_v33, %v3435_v33  ;;  %v6801_v32 = vld [vmem:[%s11147_s5 + $0x6c] sm:$0xff]  }
 0x713   :  { %6208 = vmatprep.mubr.msk.bf16.mxu1 %vm408_vm7, %v3444_v19 }
 0x714   :  { %3745 = vmatprep.mubr.bf16.mxu0 %v3442_v53 }
 0x716   :  { %3746 = vmatmul.mubr.bf16.gmra.mrb[68].mxu0 %v3441_v47 }
 0x717   :  { %6527 = vmatprep.mubr.msk.bf16.mxu0 %vm1818_vm14, %v6801_v32 }
 0x718   :  { %3794 = vmatmul.mubr.bf16.gmra.mrb[68].mxu1 %v3443_v29 }
 0x71d   :  { %v10250_v13 = vpop.permute.xlu1 %3809 }
 0x71f   :  { %v10252_v5 = vpop.permute.xlu0 %3814 }
 0x721   :  { %v10254_v52 = vpop.permute.xlu1 %3831 }
 0x723   :  { %v10256_v12 = vpop.permute.xlu0 %3836 }
 0x725   :  { %v10258_v10 = vpop.permute.xlu1 %3819 }
 0x727   :  { %v10260_v61 = vpop.permute.xlu0 %3841 }
 0x729   :  { %v10262_v51 = vpop.permute.xlu1 %3925 }
 0x72b   :  { %v10264_v16 = vpop.permute.xlu0 %3930 }
 0x72d   :  { %v10266_v36 = vpop.permute.xlu1 %3940 }
 0x72f   :  { %v10268_v24 = vpop.permute.xlu0 %3945 }
 0x731   :  { %v10270_v4 = vpop.permute.xlu1 %3935 }
 0x733   :  { %v10272_v27 = vpop.permute.xlu0 %3955 }
 0x735   :  { %v10274_v50 = vpop.permute.xlu1 %3960 }
 0x737   :  { %v10276_v40 = vpop.permute.xlu0 %3950 }
 0x739   :  { %v10278_v43 = vpop.permute.xlu1 %3965 }
 0x73b   :  { %v10280_v25 = vpop.permute.xlu0 %3985 }
 0x73d   :  { %v10282_v17 = vpop.permute.xlu1 %3990 }
 0x73f   :  { %v10284_v21 = vpop.permute.xlu0 %3970 }
 0x741   :  { %v10286_v30 = vpop.permute.xlu1 %3975 }
 0x743   :  { %v10288_v58 = vpop.permute.xlu0 %4317 }
 0x744   :  { %v4320_v3 = vmul.f32 0.0, %v10288_v58 }
 0x745   :  { %v10290_v9 = vpop.permute.xlu1 %4000 }
 0x746   :  { %4328 = vrot.lane.b32.xlu0 %v4320_v3, %s6870_s21 }
 0x747   :  { %v10294_v8 = vpop.permute.xlu0 %4005 }
 0x749   :  { %v10296_v59 = vpop.permute.xlu1 %4356 }
 0x74a   :  { %v4359_v42 = vmul.f32 0.0, %v10296_v59 }
 0x74b   :  { %v10299_v44 = vpop.permute.xlu0 %3995 }
 0x74c   :  { %4367 = vrot.lane.b32.xlu1 %v4359_v42, %s6876_s1 }
 0x74d   :  { %v10302_v56 = vpop.permute.xlu1 %4015 }
 0x74f   :  { %v10304_v31 = vpop.permute.xlu0 %4020 }
 0x751   :  { %v10306_v0 = vpop.permute.xlu1 %3980 }
 0x753   :  { %v10308_v63 = vpop.permute.xlu0 %4395 }
 0x754   :  { %v4398_v14 = vmul.f32 0.0, %v10308_v63 }
 0x755   :  { %v10310_v6 = vpop.permute.xlu1 %4010 }
 0x756   :  { %4406 = vrot.lane.b32.xlu1 %v4398_v14, %s6882_s2 }
 0x757   :  { %v10314_v26 = vpop.permute.xlu0 %4030 }
 0x759   :  { %v10316_v1 = vpop.permute.xlu1 %4035 }
 0x75b   :  { %v10318_v48 = vpop.permute.xlu0 %4025 }
 0x75d   :  { %v10320_v37 = vpop.permute.xlu1 %4453 }
 0x75e   :  { %v4457_v41 = vmul.f32 0.0, %v10320_v37 }
 0x75f   :  { %v10323_v11 = vpop.permute.xlu0 %4040 }
 0x760   :  { %4466 = vrot.lane.b32.xlu1 %v4457_v41, %s6888_s30 }
 0x761   :  { %v10326_v35 = vpop.permute.xlu1 %4493 }
 0x762   :  { %v4497_v23 = vmul.f32 0.0, %v10326_v35 }
 0x763   :  { %v10332_v55 = vpop.permute.xlu0 %4532 }
 0x764   :  { %4616 = vperm.xlu1 %6668, %v6299_v57   ;;  %4506 = vrot.lane.b32.xlu0 %v4497_v23, %s6868_s20  ;;  %v4536_v18 = vmul.f32 0.0, %v10332_v55 }
 0x765   :  { %v10346_v60 = vpop.permute.xlu1 %4571 }
 0x766   :  { %v4575_v20 = vmul.f32 0.0, %v10346_v60 }
 0x767   :  { %v10357_v19 = vpop.permute.xlu0 %4667 }
 0x768   :  { %4545 = vrot.lane.b32.xlu1 %v4536_v18, %s6875_s25  ;;  %4611 = vperm.xlu0 %6667, %v6298_v15  }
 0x769   :  { %v10359_v14 = vpop.permute.xlu1 %4689 }
 0x76c   :  { %4636 = vperm.xlu1 %6668, %v6301_v7   ;;  %4641 = vperm.xlu0 %6667, %v6302_v28   ;;  %v4673_v28 = vpop.permute.xlu0 %4672 }
 0x770   :  { %4584 = vrot.lane.b32.xlu1 %v4575_v20, %s6877_s22  ;;  %v4695_v49 = vpop.permute.xlu0 %4694 }
 0x774   :  { %4621 = vperm.xlu1 %6668, %v6300_v54  }
 0x7e1   :  { %v6455_v2 = vpop.f32.mrb[64].mxu0 }
 0x7e2   :  { %v6456_v53 = vpop.f32.mrb[65].mxu0 }
 0x7e3   :  { %v6457_v33 = vadd.f32 %v6456_v53, %v6455_v2  ;;  %v3787_v47 = vpop.f32.mrb[64].mxu1  ;;  %v6458_v29 = vpop.f32.mrb[66].mxu0 }
 0x7e4   :  { %v6459_v3 = vpop.f32.mrb[67].mxu0  ;;  %v3789_v42 = vpop.f32.mrb[65].mxu1 }
 0x7e5   :  { %v10361_v41 = vadd.f32 %v6457_v33, %v3787_v47  ;;  %v6460_v57 = vadd.f32 %v6459_v3, %v6458_v29  ;;  %v3790_v23 = vpop.f32.mrb[66].mxu1  ;;  %v4678_v53 = vpop.permute.xlu1 %4677 }
 0x7e6   :  { %v3792_v18 = vpop.f32.mrb[67].mxu1 }
 0x7e7   :  { %v3822_v15 = vmul.f32 %v10250_v13, %v10361_v41  ;;  %v3791_v7 = vadd.f32 %v6460_v57, %v3790_v23 }
 0x7e9   :  { %v3844_v20 = vadd.f32 %v10254_v52, %v3822_v15  ;;  %v3823_v54 = vmul.f32 %v10252_v5, %v3791_v7  ;;  %v6461_v32 = vpop.f32.mrb[68].mxu0  ;;  %v4681_v33 = vmul.f32 %v4673_v28, %v3791_v7  ;;  %v4700_v38 = vpop.permute.xlu1 %4699 }
 0x7ea   :  { %v6462_v2 = vpop.f32.mrb[69].mxu0 }
 0x7eb   :  { %v3845_v42 = vadd.f32 %v10256_v12, %v3823_v54  ;;  %v3795_v39 = vpop.f32.mrb[68].mxu1  ;;  %v6463_v47 = vadd.f32 %v6462_v2, %v6461_v32  ;;  %v6464_v29 = vpop.f32.mrb[70].mxu0  ;;  %v3847_v18 = vmax.f32 %v3844_v20, 0.0  ;;  %v4703_v15 = vadd.f32 %v4695_v49, %v4681_v33  ;;  %v6802_v49 = vld [vmem:[%s11147_s5 + $0x74] sm:$0xff]   ;;  %v6808_v2 = vld [vmem:[%s11147_s5 + $0xa4] sm:$0xff]   ;;  %v6811_v33 = vld [vmem:[%s11147_s5 + $0xbc] sm:$0xff]  }
 0x7ec   :  { %v3797_v3 = vpop.f32.mrb[69].mxu1  ;;  %v6465_v34 = vpop.f32.mrb[71].mxu0  ;;  %v6813_v29 = vld [vmem:[%s11147_s5 + $0xcc] sm:$0xff]  }
 0x7ed   :  { %v3848_v62 = vmax.f32 %v3845_v42, 0.0  ;;  %v3798_v13 = vpop.f32.mrb[70].mxu1  ;;  %v3796_v57 = vadd.f32 %v6463_v47, %v3795_v39  ;;  %v4706_v28 = vmax.f32 %v4703_v15, 0.0  ;;  %v6810_v42 = vld [vmem:[%s11147_s5 + $0xb4] sm:$0xff]   ;;  %v6812_v47 = vld [vmem:[%s11147_s5 + $0xc4] sm:$0xff]  }
 0x7ee   :  { %v3799_v23 = vpop.f32.mrb[71].mxu1  ;;  %v6814_v3 = vld [vmem:[%s11147_s5 + $0xd4] ss:$0 sps:$4 sm:$0xff]  }
 0x7ef   :  { %v3878_v52 = vpack.c.bf16 %v3848_v62, %v3847_v18  ;;  %v3824_v5 = vmul.f32 %v10258_v10, %v3796_v57  ;;  %v4682_v46 = vmul.f32 %v4678_v53, %v3796_v57  ;;  %v6805_v62 = vld [vmem:[%s11147_s5 + $0x8c] sm:$0xff]   ;;  %v6806_v10 = vld [vmem:[%s11147_s5 + $0x94] sm:$0xff]  }
 0x7f0   :  { %v6809_v53 = vld [vmem:[%s11147_s5 + $0xac] sm:$0xff]  }
 0x7f1   :  { %6523 = vmatprep.subr.bf16.mxu0 %v3878_v52  ;;  %v3846_v12 = vadd.f32 %v10260_v61, %v3824_v5  ;;  %v4704_v7 = vadd.f32 %v4700_v38, %v4682_v46  ;;  %v6803_v38 = vld [vmem:[%s11147_s5 + $0x7c] sm:$0xff]   ;;  %v6804_v46 = vld [vmem:[%s11147_s5 + $0x84] sm:$0xff]  }
 0x7f2   :  { %6524 = vmatpush3.bf16.msra.mxu0 %v3878_v52  ;;  %v6807_v61 = vld [vmem:[%s11147_s5 + $0x9c] sm:$0xff]  }
 0x7f3   :  { %v3849_v54 = vmax.f32 %v3846_v12, 0.0  ;;  %v4707_v20 = vmax.f32 %v4704_v7, 0.0 }
 0x7f5   :  { %v3879_v32 = vpack.c.bf16 %v3849_v54, %v3849_v54  ;;  %v10370_v34 = vpack.i.bf16 %v4707_v20, %v4706_v28 }
 0x7f7   :  { %6635 = vmatprep.subr.msk.bf16.mxu0 %vm1861_vm13, %v3879_v32  ;;  %v4154_v39 = vsel %vm1861_vm13, %v3879_v32, 0 }
 0x7f8   :  { %6526 = vmatpush3.bf16.msra.mxu0 %v4154_v39 }
 0x7fb   :  { %6528 = vmatmul.mubr.msk.bf16.vlgmr.msra.gmra.mrb[72].mxu0 %vm1818_vm14, %v6802_v49 }
 0x7fc   :  { %6531 = vmatprep.mubr.msk.bf16.mxu0 %vm1818_vm14, %v6803_v38 }
 0x803   :  { %6532 = vmatmul.mubr.msk.bf16.gmra.mrb[76].mxu0 %vm1818_vm14, %v6804_v46 }
 0x804   :  { %6535 = vmatprep.mubr.msk.bf16.mxu0 %vm1818_vm14, %v6805_v62 }
 0x80b   :  { %6536 = vmatmul.mubr.msk.bf16.gmra.mrb[80].mxu0 %vm1818_vm14, %v6806_v10 }
 0x80c   :  { %6539 = vmatprep.mubr.msk.bf16.mxu0 %vm1818_vm14, %v6807_v61 }
 0x813   :  { %6540 = vmatmul.mubr.msk.bf16.gmra.mrb[84].mxu0 %vm1818_vm14, %v6808_v2 }
 0x814   :  { %6543 = vmatprep.mubr.msk.bf16.mxu0 %vm1818_vm14, %v6809_v53 }
 0x81b   :  { %6544 = vmatmul.mubr.msk.bf16.gmra.mrb[88].mxu0 %vm1818_vm14, %v6810_v42 }
 0x81c   :  { %6547 = vmatprep.mubr.msk.bf16.mxu0 %vm1818_vm14, %v6811_v33 }
 0x823   :  { %6548 = vmatmul.mubr.msk.bf16.gmra.mrb[92].mxu0 %vm1818_vm14, %v6812_v47 }
 0x824   :  { %6551 = vmatprep.mubr.msk.bf16.mxu0 %vm1818_vm14, %v6813_v29 }
 0x82b   :  { %6552 = vmatmul.mubr.msk.bf16.gmra.mrb[96].mxu0 %vm1818_vm14, %v6814_v3 }
 0x8ce   :  { %v10426_v18 = vpop.f32.mrb[72].mxu0 }
 0x8cf   :  { %v10428_v13 = vpop.f32.mrb[73].mxu0 }
 0x8d0   :  { %v6530_v57 = vpop.f32.mrb[74].mxu0 }
 0x8d1   :  { %v4202_v23 = vadd.f32 %v6530_v57, %v10262_v51  ;;  %v10431_v52 = vpop.f32.mrb[75].mxu0 }
 0x8d3   :  { %v4321_v15 = vmul.f32 %v10288_v58, %v4202_v23 }
 0x8d5   :  { %4330 = vrot.lane.b32.xlu1 %v4321_v15, %s6870_s21 }
 0x8d6   :  { %v6533_v5 = vpop.f32.mrb[76].mxu0 }
 0x8d7   :  { %v4215_v12 = vadd.f32 %v6533_v5, %v10266_v36  ;;  %v4206_v7 = vpop.f32.mrb[77].mxu0 }
 0x8d8   :  { %v6534_v28 = vpop.f32.mrb[78].mxu0  ;;  %v4207_v20 = vadd.f32 %v4206_v7, %v10264_v16 }
 0x8d9   :  { %v4360_v54 = vmul.f32 %v10296_v59, %v4215_v12  ;;  %v4218_v32 = vadd.f32 %v6534_v28, %v10268_v24  ;;  %v4209_v39 = vpop.f32.mrb[79].mxu0 }
 0x8da   :  { %v4322_v49 = vmul.f32 %v10288_v58, %v4207_v20  ;;  %v4210_v38 = vadd.f32 %v4209_v39, %v10270_v4 }
 0x8db   :  { %v4361_v51 = vmul.f32 %v10296_v59, %v4218_v32  ;;  %4369 = vrot.lane.b32.xlu0 %v4360_v54, %s6876_s1 }
 0x8dc   :  { %v4323_v24 = vmul.f32 %v10288_v58, %v4210_v38 }
 0x8dd   :  { %4371 = vrot.lane.b32.xlu1 %v4361_v51, %s6876_s1 }
 0x8de   :  { %v6537_v36 = vpop.f32.mrb[80].mxu0 }
 0x8df   :  { %v4231_v46 = vadd.f32 %v6537_v36, %v10274_v50  ;;  %v4222_v62 = vpop.f32.mrb[81].mxu0  ;;  %4332 = vrot.lane.b32.xlu0 %v4322_v49, %s6870_s21 }
 0x8e0   :  { %v6538_v16 = vpop.f32.mrb[82].mxu0  ;;  %v4223_v61 = vadd.f32 %v4222_v62, %v10276_v40 }
 0x8e1   :  { %v4400_v10 = vmul.f32 %v10308_v63, %v4231_v46  ;;  %v4234_v2 = vadd.f32 %v6538_v16, %v10278_v43  ;;  %v4225_v53 = vpop.f32.mrb[83].mxu0 }
 0x8e2   :  { %v4362_v4 = vmul.f32 %v10296_v59, %v4223_v61  ;;  %v4226_v42 = vadd.f32 %v4225_v53, %v10272_v27 }
 0x8e3   :  { %4410 = vrot.lane.b32.xlu1 %v4400_v10, %s6882_s2  ;;  %4334 = vrot.lane.b32.xlu0 %v4323_v24, %s6870_s21  ;;  %v4401_v50 = vmul.f32 %v10308_v63, %v4234_v2 }
 0x8e4   :  { %v4399_v47 = vmul.f32 %v10308_v63, %v4226_v42 }
 0x8e6   :  { %v6541_v33 = vpop.f32.mrb[84].mxu0 }
 0x8e7   :  { %4412 = vrot.lane.b32.xlu1 %v4401_v50, %s6882_s2  ;;  %v4238_v58 = vpop.f32.mrb[85].mxu0  ;;  %4373 = vrot.lane.b32.xlu0 %v4362_v4, %s6876_s1  ;;  %v4247_v59 = vadd.f32 %v6541_v33, %v10306_v0 }
 0x8e8   :  { %v4239_v40 = vadd.f32 %v4238_v58, %v10284_v21  ;;  %v6542_v43 = vpop.f32.mrb[86].mxu0 }
 0x8e9   :  { %v4241_v29 = vpop.f32.mrb[87].mxu0  ;;  %v4250_v15 = vadd.f32 %v6542_v43, %v10280_v25 }
 0x8ea   :  { %v4242_v21 = vadd.f32 %v4241_v29, %v10286_v30 }
 0x8eb   :  { %4433 = vrot.lane.b32.xlu1 %v4239_v40, %s6887_s0  ;;  %4408 = vrot.lane.b32.xlu0 %v4399_v47, %s6882_s2  ;;  %v4456_v0 = vmul.f32 %v10320_v37, %v4250_v15 }
 0x8ee   :  { %v6545_v3 = vpop.f32.mrb[88].mxu0 }
 0x8ef   :  { %v4263_v27 = vadd.f32 %v6545_v3, %v10290_v9  ;;  %v4254_v57 = vpop.f32.mrb[89].mxu0  ;;  %4437 = vrot.lane.b32.xlu0 %v4247_v59, %s6887_s0 }
 0x8f0   :  { %v6546_v23 = vpop.f32.mrb[90].mxu0  ;;  %v4255_v9 = vadd.f32 %v4254_v57, %v10282_v17 }
 0x8f1   :  { %v4496_v63 = vmul.f32 %v10326_v35, %v4263_v27  ;;  %v4266_v5 = vadd.f32 %v6546_v23, %v10294_v8  ;;  %v4257_v12 = vpop.f32.mrb[91].mxu0 }
 0x8f2   :  { %v4258_v28 = vadd.f32 %v4257_v12, %v10299_v44  ;;  %v4458_v8 = vmul.f32 %v10320_v37, %v4255_v9  ;;  %v4680_v44 = vmul.f32 %v10357_v19, %v10361_v41 }
 0x8f3   :  { %4504 = vrot.lane.b32.xlu1 %v4496_v63, %s6868_s20  ;;  %4435 = vrot.lane.b32.xlu0 %v4242_v21, %s6887_s0  ;;  %v4498_v7 = vmul.f32 %v10326_v35, %v4266_v5 }
 0x8f4   :  { %v4459_v20 = vmul.f32 %v10320_v37, %v4258_v28  ;;  %v4702_v46 = vadd.f32 %v10359_v14, %v4680_v44 }
 0x8f6   :  { %v6549_v25 = vpop.f32.mrb[92].mxu0 }
 0x8f7   :  { %v4270_v54 = vpop.f32.mrb[93].mxu0  ;;  %4508 = vrot.lane.b32.xlu1 %v4498_v7, %s6868_s20  ;;  %4464 = vrot.lane.b32.xlu0 %v4456_v0, %s6888_s30  ;;  %v4279_v32 = vadd.f32 %v6549_v25, %v10304_v31 }
 0x8f8   :  { %v6550_v30 = vpop.f32.mrb[94].mxu0  ;;  %v4271_v39 = vadd.f32 %v4270_v54, %v10310_v6  ;;  %v6303_v6 = vld [vmem:[%s11150_s8 + $0x28] sm:$0xff] }
 0x8f9   :  { %v4273_v17 = vpop.f32.mrb[95].mxu0  ;;  %v4537_v51 = vmul.f32 %v10332_v55, %v4279_v32  ;;  %v4282_v38 = vadd.f32 %v6550_v30, %v10318_v48  ;;  %v4705_v48 = vmax.f32 %v4702_v46, 0.0 }
 0x8fa   :  { %v4499_v49 = vmul.f32 %v10326_v35, %v4271_v39  ;;  %v4274_v41 = vadd.f32 %v4273_v17, %v10302_v56 }
 0x8fb   :  { %4470 = vrot.lane.b32.xlu1 %v4459_v20, %s6888_s30  ;;  %4468 = vrot.lane.b32.xlu0 %v4458_v8, %s6888_s30  ;;  %v4538_v19 = vmul.f32 %v10332_v55, %v4282_v38 }
 0x8fc   :  { %v4535_v62 = vmul.f32 %v10332_v55, %v4274_v41 }
 0x8fe   :  { %v6553_v36 = vpop.f32.mrb[96].mxu0 }
 0x8ff   :  { %v4286_v37 = vpop.f32.mrb[97].mxu0  ;;  %4510 = vrot.lane.b32.xlu1 %v4499_v49, %s6868_s20  ;;  %4547 = vrot.lane.b32.xlu0 %v4537_v51, %s6875_s25  ;;  %v4295_v56 = vadd.f32 %v6553_v36, %v10323_v11  ;;  %s6891_s20 = smov 4  }
 0x900   :  { %v6554_v31 = vpop.f32.mrb[98].mxu0  ;;  %v4287_v16 = vadd.f32 %v4286_v37, %v10314_v26  ;;  %v3916_v26 = vpop.permute.xlu1 %3915 }
 0x901   :  { %v4289_v35 = vpop.f32.mrb[99].mxu0  ;;  %v4577_v55 = vmul.f32 %v10346_v60, %v4295_v56  ;;  %v4194_v9 = vadd.f32 %v10431_v52, %v3916_v26 }
 0x902   :  { %v4574_v24 = vmul.f32 %v10346_v60, %v4287_v16  ;;  %v4290_v14 = vadd.f32 %v4289_v35, %v10316_v1  ;;  %v3911_v1 = vpop.permute.xlu0 %3910 }
 0x903   :  { %4646 = vperm.xlu1 %6668, %v6303_v6   ;;  %4549 = vrot.lane.b32.xlu0 %v4538_v19, %s6875_s25  ;;  %v4191_v0 = vadd.f32 %v10428_v13, %v3911_v1 }
 0x904   :  { %v4576_v10 = vmul.f32 %v10346_v60, %v4290_v14  ;;  %v4306_v61 = vpop.permute.xlu1 %4305 }
 0x905   :  { %v4308_v30 = vmul.f32 0.0, %v4306_v61  ;;  %v4309_v8 = vmul.f32 %v4306_v61, %v4191_v0  ;;  %v4310_v20 = vmul.f32 %v4306_v61, %v4194_v9 }
 0x906   :  { %v3921_v11 = vpop.permute.xlu0 %3920 }
 0x907   :  { %4711 = vrot.lane.b32.xlu1 %v4705_v48, %s6887_s0  ;;  %4543 = vrot.lane.b32.xlu0 %v4535_v62, %s6875_s25  ;;  %v4199_v31 = vadd.f32 %v10426_v18, %v3921_v11  ;;  %s6890_s25 = smov 125  }
 0x908   :  { %v4368_v2 = vpop.permute.xlu1 %4367 }
 0x909   :  { %v4311_v18 = vmul.f32 %v4306_v61, %v4199_v31 }
 0x90a   :  { %v4329_v50 = vpop.permute.xlu0 %4328 }
 0x90b   :  { %4582 = vrot.lane.b32.xlu0 %v4574_v24, %s6877_s22 }
 0x90c   :  { %v10510_v53 = vpop.permute.xlu1 %4406 }
 0x90e   :  { %v10516_v33 = vpop.permute.xlu0 %4506 }
 0x90f   :  { %4586 = vrot.lane.b32.xlu0 %v4576_v10, %s6877_s22 }
 0x910   :  { %v10512_v4 = vpop.permute.xlu1 %4466 }
 0x912   :  { %v10520_v58 = vpop.permute.xlu0 %4611 }
 0x913   :  { %4588 = vrot.lane.b32.xlu0 %v4577_v55, %s6877_s22  ;;  %s6889_s22 = smov 124  }
 0x914   :  { %v10514_v42 = vpop.permute.xlu1 %4616 }
 0x917   :  { %6725 = vrot.lane.b32.xlu0 %v10370_v34, %s6887_s0  ;;  %v10524_v34 = vpop.permute.xlu0 %4641 }
 0x918   :  { %v10518_v60 = vpop.permute.xlu1 %4545 }
 0x91c   :  { %v10522_v40 = vpop.permute.xlu1 %4636 }
 0x920   :  { %v10526_v43 = vpop.permute.xlu1 %4584 }
 0x924   :  { %v10528_v29 = vpop.permute.xlu1 %4621 }
 0x947   :  { %v4331_v3 = vpop.permute.xlu1 %4330 }
 0x948   :  { %v4336_v28 = vsel %vm519_vm2, %v4329_v50, %v4331_v3  ;;  %v4346_v51 = vadd.f32 %v4331_v3, %v4309_v8 }
 0x949   :  { %v4345_v17 = vadd.f32 %v4336_v28, %v4308_v30 }
 0x94d   :  { %v4370_v47 = vpop.permute.xlu0 %4369 }
 0x94e   :  { %v4375_v32 = vsel %vm651_vm8, %v4368_v2, %v4370_v47  ;;  %v4385_v36 = vadd.f32 %v4370_v47, %v4346_v51 }
 0x94f   :  { %v4372_v57 = vpop.permute.xlu1 %4371  ;;  %v4384_v38 = vadd.f32 %v4375_v32, %v4345_v17 }
 0x950   :  { %v4376_v37 = vsel %vm651_vm8, %v4368_v2, %v4372_v57 }
 0x951   :  { %v4333_v59 = vpop.permute.xlu0 %4332 }
 0x952   :  { %v4337_v25 = vsel %vm519_vm2, %v4329_v50, %v4333_v59  ;;  %v4348_v49 = vadd.f32 %v4333_v59, %v4310_v20 }
 0x953   :  { %v4347_v44 = vadd.f32 %v4337_v25, %v4308_v30 }
 0x954   :  { %v4387_v19 = vadd.f32 %v4372_v57, %v4348_v49 }
 0x955   :  { %v4335_v27 = vpop.permute.xlu0 %4334  ;;  %v4411_v15 = vpop.permute.xlu1 %4410  ;;  %v4386_v6 = vadd.f32 %v4376_v37, %v4347_v44 }
 0x956   :  { %v4416_v41 = vsel %vm4414_vm4, %v10510_v53, %v4411_v15  ;;  %v4338_v16 = vsel %vm519_vm2, %v4329_v50, %v4335_v27  ;;  %v4427_v55 = vadd.f32 %v4411_v15, %v4387_v19  ;;  %v4350_v57 = vadd.f32 %v4335_v27, %v4311_v18 }
 0x957   :  { %v4426_v24 = vadd.f32 %v4416_v41, %v4386_v6  ;;  %v4349_v26 = vadd.f32 %v4338_v16, %v4308_v30 }
 0x959   :  { %v4374_v23 = vpop.permute.xlu0 %4373  ;;  %v10530_v63 = vpop.permute.xlu1 %4412 }
 0x95a   :  { %v4377_v14 = vsel %vm651_vm8, %v4368_v2, %v4374_v23  ;;  %v4389_v28 = vadd.f32 %v4374_v23, %v4350_v57  ;;  %v4417_v61 = vsel %vm4414_vm4, %v10510_v53, %v10530_v63 }
 0x95c   :  { %v4429_v32 = vadd.f32 %v10530_v63, %v4389_v28  ;;  %v6815_v28 = vld [vmem:[%s11153_s11 + $0xc] sm:$0xff]  }
 0x95d   :  { %v4409_v21 = vpop.permute.xlu0 %4408  ;;  %v4434_v7 = vpop.permute.xlu1 %4433  ;;  %6561 = vmatprep.mubr.msk.bf16.mxu1 %vm3190_vm15, %v6815_v28 }
 0x95e   :  { %v4415_v13 = vsel %vm4414_vm4, %v10510_v53, %v4409_v21  ;;  %v4425_v35 = vadd.f32 %v4409_v21, %v4385_v36  ;;  %v4388_v21 = vadd.f32 %v4377_v14, %v4349_v26 }
 0x95f   :  { %v4424_v46 = vadd.f32 %v4415_v13, %v4384_v38 }
 0x960   :  { %v4443_v1 = vadd.f32 %v4434_v7, %v4425_v35  ;;  %v4428_v27 = vadd.f32 %v4417_v61, %v4388_v21 }
 0x961   :  { %v10532_v5 = vpop.permute.xlu0 %4437  ;;  %v4442_v56 = vadd.f32 %v4434_v7, %v4424_v46 }
 0x962   :  { %v4446_v17 = vadd.f32 %v10532_v5, %v4428_v27  ;;  %v4447_v36 = vadd.f32 %v10532_v5, %v4429_v32 }
 0x965   :  { %v4436_v12 = vpop.permute.xlu0 %4435  ;;  %v4505_v39 = vpop.permute.xlu1 %4504 }
 0x966   :  { %v4444_v47 = vadd.f32 %v4436_v12, %v4426_v24  ;;  %v4445_v50 = vadd.f32 %v4436_v12, %v4427_v55  ;;  %v4512_v15 = vsel %vm458_vm0, %v4505_v39, %v10516_v33 }
 0x969   :  { %v4465_v54 = vpop.permute.xlu0 %4464  ;;  %v4509_v48 = vpop.permute.xlu1 %4508 }
 0x96a   :  { %v4473_v10 = vsel %vm4472_vm5, %v4465_v54, %v10512_v4  ;;  %v4482_v59 = vadd.f32 %v4465_v54, %v4442_v56  ;;  %v4513_v12 = vsel %vm458_vm0, %v4509_v48, %v10516_v33 }
 0x96b   :  { %v4483_v0 = vadd.f32 %v4473_v10, %v4443_v1 }
 0x96c   :  { %v4521_v7 = vadd.f32 %v4505_v39, %v4482_v59 }
 0x96d   :  { %v4469_v52 = vpop.permute.xlu0 %4468  ;;  %v4471_v9 = vpop.permute.xlu1 %4470  ;;  %v4522_v30 = vadd.f32 %v4512_v15, %v4483_v0 }
 0x96e   :  { %v4474_v3 = vsel %vm4472_vm5, %v4469_v52, %v10512_v4  ;;  %v4484_v2 = vadd.f32 %v4469_v52, %v4444_v47  ;;  %v4475_v39 = vsel %vm4472_vm5, %v4471_v9, %v10512_v4  ;;  %v4486_v63 = vadd.f32 %v4471_v9, %v4446_v17 }
 0x96f   :  { %v4485_v25 = vadd.f32 %v4474_v3, %v4445_v50  ;;  %v4487_v19 = vadd.f32 %v4475_v39, %v4447_v36  ;;  %v6817_v36 = vld [vmem:[%s11158_s16] sm:$0xff]  }
 0x970   :  { %v4523_v20 = vadd.f32 %v4509_v48, %v4484_v2  ;;  %6565 = vmatprep.subr.bf16.mxu0 %v6817_v36 }
 0x971   :  { %v4548_v62 = vpop.permute.xlu0 %4547  ;;  %v4511_v44 = vpop.permute.xlu1 %4510  ;;  %v4524_v53 = vadd.f32 %v4513_v12, %v4485_v25  ;;  %6566 = vmatpush3.bf16.msra.mxu0 %v6817_v36  ;;  %v6415_v36 = vld [vmem:[%s11156_s14 + $0x8] ss:$0 sm:$0xff] }
 0x972   :  { %v4552_v13 = vsel %vm408_vm7, %v4548_v62, %v10518_v60  ;;  %v4514_v31 = vsel %vm458_vm0, %v4511_v44, %v10516_v33  ;;  %v4562_v6 = vadd.f32 %v4548_v62, %v4523_v20  ;;  %v4525_v48 = vadd.f32 %v4511_v44, %v4486_v63  ;;  %v6819_v63 = vld [vmem:[%s11158_s16 + $0x10] sm:$0xff]  }
 0x973   :  { %v4563_v41 = vadd.f32 %v4552_v13, %v4524_v53  ;;  %v4526_v14 = vadd.f32 %v4514_v31, %v4487_v19  ;;  %vm4752_vm0 = vcmask 72704   ;;  %v6820_v31 = vld [vmem:[%s11158_s16 + $0x18] sm:$0xff]   ;;  %v6823_v19 = vld [vmem:[%s11158_s16 + $0x30] sm:$0xff]  }
 0x975   :  { %v4550_v11 = vpop.permute.xlu0 %4549 }
 0x976   :  { %v4553_v16 = vsel %vm408_vm7, %v4550_v11, %v10518_v60  ;;  %v4564_v10 = vadd.f32 %v4550_v11, %v4525_v48 }
 0x977   :  { %v4565_v18 = vadd.f32 %v4553_v16, %v4526_v14  ;;  %v6328_v14 = vld [vmem:[%s11145_s3 + $0x38] sm:$0xff] }
 0x979   :  { %v4544_v8 = vpop.permute.xlu0 %4543 }
 0x97a   :  { %v4551_v54 = vsel %vm408_vm7, %v4544_v8, %v10518_v60  ;;  %v4560_v23 = vadd.f32 %v4544_v8, %v4521_v7  ;;  %vm4904_vm7 = vcmask 973824  }
 0x97b   :  { %v4561_v51 = vadd.f32 %v4551_v54, %v4522_v30 }
 0x97d   :  { %v4583_v49 = vpop.permute.xlu0 %4582 }
 0x97e   :  { %v4590_v52 = vsel %vm988_vm9, %v4583_v49, %v10526_v43  ;;  %v4599_v38 = vadd.f32 %v4583_v49, %v4560_v23 }
 0x97f   :  { %v4600_v37 = vadd.f32 %v4590_v52, %v4561_v51  ;;  %v6816_v51 = vld [vmem:[%s11153_s11 + $0x14] ss:$0 sps:$4 sm:$0xff]  }
 0x980   :  { %v4624_v46 = vmul.f32 %v10520_v58, %v4599_v38 }
 0x981   :  { %v4625_v4 = vmul.f32 %v10520_v58, %v4600_v37  ;;  %v4587_v35 = vpop.permute.xlu0 %4586  ;;  %v6818_v37 = vld [vmem:[%s11158_s16 + $0x8] sm:$0xff]  }
 0x982   :  { %v4591_v5 = vsel %vm988_vm9, %v4587_v35, %v10526_v43  ;;  %v4601_v24 = vadd.f32 %v4587_v35, %v4562_v6  ;;  %v4649_v33 = vadd.f32 %v10522_v40, %v4624_v46  ;;  %v4647_v3 = vpop.permute.xlu1 %4646  ;;  %6567 = vmatprep.subr.bf16.mxu0 %v6818_v37  ;;  %v6821_v6 = vld [vmem:[%s11158_s16 + $0x20] sm:$0xff]   ;;  %v6822_v46 = vld [vmem:[%s11158_s16 + $0x28] sm:$0xff]   ;;  %v11728_v35 = vmov 65535  }
 0x983   :  { %v4602_v56 = vadd.f32 %v4591_v5, %v4563_v41  ;;  %v4650_v55 = vadd.f32 %v10522_v40, %v4625_v4  ;;  %6568 = vmatpush3.bf16.msra.mxu0 %v6818_v37  ;;  %v6824_v4 = vld [vmem:[%s11158_s16 + $0x38] ss:$0 sps:$4 sm:$0xff]   ;;  %v4912_v48 = vsel %vm4911_vm6, 4294967295, %v11728_v35  ;;  %s6893_s16 = smov 5   ;;  %v6360_v37 = vld [vmem:[%s11148_s6 + $0x1b0] sm:$0xff] }
 0x984   :  { %v4626_v62 = vmul.f32 %v10514_v42, %v4601_v24  ;;  %v4655_v57 = vmax.f32 %v4649_v33, 0.0  ;;  %6569 = vmatprep.subr.bf16.mxu0 %v6819_v63  ;;  %v4913_v5 = vsel %vm1861_vm13, %v4912_v48, 0 }
 0x985   :  { %v4627_v58 = vmul.f32 %v10514_v42, %v4602_v56  ;;  %v4589_v26 = vpop.permute.xlu0 %4588  ;;  %v4656_v0 = vmax.f32 %v4650_v55, 0.0  ;;  %v4915_v24 = vand.u32 %v6824_v4, %v4913_v5  ;;  %v6331_v55 = vld [vmem:[%s11146_s4 + $0x38] sm:$0xff] }
 0x986   :  { %v4651_v1 = vadd.f32 %v10524_v34, %v4626_v62  ;;  %v4592_v60 = vsel %vm988_vm9, %v4589_v26, %v10526_v43  ;;  %v4603_v47 = vadd.f32 %v4589_v26, %v4564_v10  ;;  %v4712_v61 = vpop.permute.xlu1 %4711  ;;  %v6332_v26 = vld [vmem:[%s11146_s4 + $0x40] sm:$0xff]  ;;  %vm5464_vm9 = vcmask 261120  }
 0x987   :  { %v4652_v59 = vadd.f32 %v10524_v34, %v4627_v58  ;;  %v4604_v11 = vadd.f32 %v4592_v60, %v4565_v18  ;;  %6570 = vmatpush3.bf16.msra.mxu0 %v6819_v63  ;;  %v6364_v60 = vld [vmem:[%s11148_s6 + $0x1d0] sm:$0xff] }
 0x988   :  { %v4657_v21 = vmax.f32 %v4651_v1, 0.0  ;;  %v4628_v50 = vmul.f32 %v10528_v29, %v4603_v47  ;;  %6571 = vmatprep.subr.bf16.mxu0 %v6820_v31  ;;  %v6327_v1 = vld [vmem:[%s11145_s3 + $0x30] sm:$0xff] }
 0x989   :  { %v4658_v9 = vmax.f32 %v4652_v59, 0.0  ;;  %v4629_v40 = vmul.f32 %v10528_v29, %v4604_v11  ;;  %v6726_v25 = vpop.permute.xlu0 %6725  ;;  %v6330_v47 = vld [vmem:[%s11146_s4 + $0x30] sm:$0xff]  ;;  %v6367_v59 = vld [vmem:[%s11148_s6 + $0x1e8] sm:$0xff]  ;;  %v6369_v11 = vld [vmem:[%s11148_s6 + $0x1f8] sm:$0xff] }
 0x98a   :  { %v4653_v42 = vadd.f32 %v4647_v3, %v4628_v50  ;;  %v4724_v2 = vpack.c.bf16 %v4657_v21, %v4655_v57  ;;  %v6728_v29 = vunpack.i.h.bf16 %v6726_v25  ;;  %v6727_v54 = vunpack.i.l.bf16 %v6726_v25  ;;  %v6363_v57 = vld [vmem:[%s11148_s6 + $0x1c8] sm:$0xff]  ;;  %v6368_v21 = vld [vmem:[%s11148_s6 + $0x1f0] sm:$0xff]  ;;  %v6366_v50 = vld [vmem:[%s11148_s6 + $0x1e0] sm:$0xff] }
 0x98b   :  { %v4654_v43 = vadd.f32 %v4647_v3, %v4629_v40  ;;  %v4725_v8 = vpack.c.bf16 %v4658_v9, %v4656_v0  ;;  %6572 = vmatpush3.bf16.msra.mxu0 %v6820_v31  ;;  %v6329_v3 = vld [vmem:[%s11145_s3 + $0x40] sm:$0xff]  ;;  %v6372_v0 = vld [vmem:[%s11148_s6 + $0x210] sm:$0xff]  ;;  %v6365_v9 = vld [vmem:[%s11148_s6 + $0x1d8] sm:$0xff] }
 0x98c   :  { %v4659_v34 = vmax.f32 %v4653_v42, 0.0  ;;  %4742 = vrot.lane.b32.xlu1 %v4724_v2, %s6886_s12  ;;  %v4728_v30 = vpack.c.bf16 %v6728_v29, %v6727_v54  ;;  %6573 = vmatprep.subr.bf16.mxu0 %v6821_v6  ;;  %v6375_v40 = vld [vmem:[%s11148_s6 + $0x228] sm:$0xff]  ;;  %v10687_v42 = vld [vmem:[%s11156_s14] sm:$0xff]  ;;  %v6425_v63 = vld [vmem:[%s11152_s10 + $0x30] sm:$0xff] }
 0x98d   :  { %v4660_v15 = vmax.f32 %v4654_v43, 0.0  ;;  %4744 = vrot.lane.b32.xlu0 %v4725_v8, %s6886_s12  ;;  %v6370_v2 = vld [vmem:[%s11148_s6 + $0x200] sm:$0xff]  ;;  %v5507_v28 = vrot.slane %v10687_v42, %v11720_v45  ;;  %v6371_v43 = vld [vmem:[%s11148_s6 + $0x208] sm:$0xff]  ;;  %v6373_v8 = vld [vmem:[%s11148_s6 + $0x218] sm:$0xff] }
 0x98e   :  { %v4726_v7 = vpack.c.bf16 %v4712_v61, %v4659_v34  ;;  %v6379_v25 = vld [vmem:[%s11148_s6 + $0x248] sm:$0xff]  ;;  %v6374_v45 = vld [vmem:[%s11148_s6 + $0x220] sm:$0xff]  ;;  %v6376_v34 = vld [vmem:[%s11148_s6 + $0x230] sm:$0xff] }
 0x98f   :  { %v4727_v27 = vpack.c.bf16 %v4712_v61, %v4660_v15  ;;  %6574 = vmatpush3.bf16.msra.mxu0 %v6821_v6  ;;  %v6381_v61 = vld [vmem:[%s11148_s6 + $0x258] sm:$0xff]  ;;  %v6378_v15 = vld [vmem:[%s11148_s6 + $0x240] sm:$0xff] }
 0x990   :  { %4746 = vrot.lane.b32.xlu1 %v4726_v7, %s6886_s12  ;;  %6575 = vmatprep.subr.bf16.mxu0 %v6822_v46  ;;  %v5585_v7 = vrot.slane %v10687_v42, %v11722_v22  ;;  %v11729_v29 = vld [vmem:[#allocation6_spill] sm:$0xff]  ;;  %v6383_v22 = vld [vmem:[%s11148_s6 + $0x268] sm:$0xff] }
 0x991   :  { %4748 = vrot.lane.b32.xlu0 %v4727_v27, %s6886_s12  ;;  %v5546_v54 = vrot.slane %v10687_v42, %v11729_v29  ;;  %v6384_v27 = vld [vmem:[%s11148_s6 + $0x270] sm:$0xff]  ;;  %v6362_v31 = vld [vmem:[%s11148_s6 + $0x1c0] sm:$0xff] }
 0x992   :  { %v6424_v6 = vld [vmem:[%s11151_s9 + $0x40] sm:$0xff] }
 0x993   :  { %6576 = vmatpush3.bf16.msra.mxu0 %v6822_v46  ;;  %v6427_v46 = vld [vmem:[%s11152_s10 + $0x40] sm:$0xff] }
 0x994   :  { %4750 = vrot.lane.b32.xlu1 %v4728_v30, %s6886_s12  ;;  %6577 = vmatprep.subr.bf16.mxu0 %v6823_v19  ;;  %v6377_v30 = vld [vmem:[%s11148_s6 + $0x238] sm:$0xff] }
 0x997   :  { %6578 = vmatpush3.bf16.msra.mxu0 %v6823_v19  ;;  %v6361_v19 = vld [vmem:[%s11148_s6 + $0x1b8] sm:$0xff] }
 0x998   :  { %6579 = vmatprep.subr.bf16.mxu0 %v4915_v24 }
 0x99b   :  { %6580 = vmatpush3.bf16.msra.mxu0 %v4915_v24 }
 0x9fe   :  { %v4743_v12 = vpop.permute.xlu1 %4742 }
 0x9ff   :  { %v4745_v20 = vpop.permute.xlu0 %4744 }
 0xa00   :  { %v4753_v23 = vsel %vm4752_vm0, %v4743_v12, %v4745_v20  ;;  %v6382_v12 = vld [vmem:[%s11148_s6 + $0x260] sm:$0xff]  ;;  %v11730_v20 = vld [vmem:[#allocation8_spill] sm:$0xff] }
 0xa01   :  { %6555 = vmatprep.subr.bf16.mxu1 %v4753_v23 }
 0xa02   :  { %v4747_v32 = vpop.permute.xlu1 %4746  ;;  %6556 = vmatpush3.bf16.msra.mxu1 %v4753_v23  ;;  %v5643_v23 = vrot.slane %v10687_v42, %v11730_v20  ;;  %v6417_v20 = vld [vmem:[%s11149_s7 + $0x38] sm:$0xff] }
 0xa03   :  { %v4749_v17 = vpop.permute.xlu0 %4748 }
 0xa04   :  { %v4754_v44 = vsel %vm4752_vm0, %v4747_v32, %v4749_v17  ;;  %v6380_v32 = vld [vmem:[%s11148_s6 + $0x250] sm:$0xff]  ;;  %v11731_v17 = vld [vmem:[#allocation10_spill] sm:$0xff] }
 0xa05   :  { %6557 = vmatprep.subr.bf16.mxu1 %v4754_v44 }
 0xa06   :  { %v4751_v53 = vpop.permute.xlu1 %4750  ;;  %6558 = vmatpush3.bf16.msra.mxu1 %v4754_v44  ;;  %v5701_v44 = vrot.slane %v10687_v42, %v11731_v17 }
 0xa07   :  { %6559 = vmatprep.subr.bf16.mxu1 %v4751_v53 }
 0xa0a   :  { %6560 = vmatpush3.bf16.msra.mxu1 %v4751_v53  ;;  %v6385_v53 = vld [vmem:[%s11148_s6 + $0x278] sm:$0xff] }
 0xa0d   :  { %6562 = vmatmul.mubr.msk.bf16.vlgmr.msra.gmra.mrb[72].mxu1 %vm3190_vm15, %v6816_v51  ;;  %v6422_v51 = vld [vmem:[%s11151_s9 + $0x30] sm:$0xff] }
 0xae0   :  { %v6563_v49 = vpop.f32.mrb[72].mxu1 }
 0xae1   :  { %4819 = vrot.lane.b32.xlu1 %v6563_v49, %s6870_s21  ;;  %v4798_v39 = vpop.f32.mrb[73].mxu1 }
 0xae2   :  { %v6564_v13 = vpop.f32.mrb[74].mxu1 }
 0xae3   :  { %v4801_v52 = vpop.f32.mrb[75].mxu1  ;;  %v11732_v13 = vld [vmem:[#allocation9_spill] sm:$0xff] }
 0xae4   :  { %v6729_v38 = vpack.i.bf16 %v4801_v52, %v4798_v39 }
 0xae6   :  { %6730 = vrot.lane.b32.xlu0 %v6729_v38, %s6870_s21  ;;  %v6426_v38 = vld [vmem:[%s11152_s10 + $0x38] sm:$0xff] }
 0xb53   :  { %v4820_v41 = vpop.permute.xlu1 %4819 }
 0xb54   :  { %v10627_v16 = vmax.f32 %v6563_v49, %v4820_v41  ;;  %v6386_v49 = vld [vmem:[%s11148_s6 + $0x280] sm:$0xff] }
 0xb55   :  { %v11733_v41 = vld [vmem:[#allocation11_spill] sm:$0xff] }
 0xb56   :  { %4834 = vrot.lane.b32.xlu1 %v10627_v16, %s6882_s2  ;;  %v5495_v4 = vrot.slane %v10687_v42, %v11733_v41 }
 0xb58   :  { %v6731_v56 = vpop.permute.xlu0 %6730 }
 0xb59   :  { %v6733_v10 = vunpack.i.h.bf16 %v6731_v56  ;;  %v6732_v33 = vunpack.i.l.bf16 %v6731_v56 }
 0xb5a   :  { %4978 = vperm.xlu1 %6668, %v6328_v14  }
 0xb5b   :  { %v10635_v62 = vmax.f32 %v4801_v52, %v6733_v10  ;;  %v10637_v18 = vmax.f32 %v4798_v39, %v6732_v33  ;;  %v6423_v39 = vld [vmem:[%s11151_s9 + $0x38] sm:$0xff]  ;;  %v5672_v52 = vrot.slane %v10687_v42, %v11732_v13 }
 0xb5d   :  { %v6734_v58 = vpack.i.bf16 %v10635_v62, %v10637_v18 }
 0xb5e   :  { %5000 = vperm.xlu1 %6668, %v6331_v55  }
 0xb5f   :  { %6735 = vrot.lane.b32.xlu0 %v6734_v58, %s6882_s2 }
 0xb62   :  { %5005 = vperm.xlu1 %6668, %v6332_v26  }
 0xb63   :  { %4973 = vperm.xlu0 %6667, %v6327_v1  }
 0xb66   :  { %5094 = vperm.xlu1 %6668, %v6364_v60  }
 0xb67   :  { %4995 = vperm.xlu0 %6667, %v6330_v47  }
 0xb6a   :  { %5109 = vperm.xlu1 %6668, %v6367_v59  }
 0xb6b   :  { %4983 = vperm.xlu0 %6667, %v6329_v3  }
 0xb6e   :  { %5119 = vperm.xlu1 %6668, %v6369_v11  }
 0xb6f   :  { %5089 = vperm.xlu0 %6667, %v6363_v57  }
 0xb72   :  { %5114 = vperm.xlu1 %6668, %v6368_v21  }
 0xb73   :  { %5104 = vperm.xlu0 %6667, %v6366_v50  }
 0xb76   :  { %5134 = vperm.xlu1 %6668, %v6372_v0  }
 0xb77   :  { %5099 = vperm.xlu0 %6667, %v6365_v9  }
 0xb7a   :  { %5149 = vperm.xlu1 %6668, %v6375_v40  }
 0xb7b   :  { %5124 = vperm.xlu0 %6667, %v6370_v2  }
 0xb7e   :  { %5509 = vrot.lane.b32.xlu1 %v5507_v28, %s6889_s22 }
 0xb7f   :  { %5129 = vperm.xlu0 %6667, %v6371_v43  }
 0xb82   :  { %5169 = vperm.xlu1 %6668, %v6379_v25   ;;  %v6416_v25 = vld [vmem:[%s11149_s7 + $0x30] sm:$0xff] }
 0xb83   :  { %5139 = vperm.xlu0 %6667, %v6373_v8  }
 0xb86   :  { %5144 = vperm.xlu1 %6668, %v6374_v45  }
 0xb87   :  { %5154 = vperm.xlu0 %6667, %v6376_v34   ;;  %v6420_v34 = vld [vmem:[%s11150_s8 + $0x38] sm:$0xff] }
 0xb8a   :  { %5179 = vperm.xlu1 %6668, %v6381_v61  }
 0xb8b   :  { %5164 = vperm.xlu0 %6667, %v6378_v15   ;;  %v6418_v15 = vld [vmem:[%s11149_s7 + $0x40] sm:$0xff] }
 0xb8e   :  { %5587 = vrot.lane.b32.xlu1 %v5585_v7, %s6870_s21 }
 0xb8f   :  { %5548 = vrot.lane.b32.xlu0 %v5546_v54, %s6890_s25  ;;  %v6421_v54 = vld [vmem:[%s11150_s8 + $0x40] sm:$0xff] }
 0xb92   :  { %5194 = vperm.xlu1 %6668, %v6384_v27  }
 0xb93   :  { %5159 = vperm.xlu0 %6667, %v6377_v30  }
 0xb96   :  { %5189 = vperm.xlu1 %6668, %v6383_v22  }
 0xb97   :  { %5184 = vperm.xlu0 %6667, %v6382_v12  }
 0xb9a   :  { %5645 = vrot.lane.b32.xlu1 %v5643_v23, %s11724_s26  ;;  %v6419_v23 = vld [vmem:[%s11150_s8 + $0x30] sm:$0xff] }
 0xb9b   :  { %5174 = vperm.xlu0 %6667, %v6380_v32   ;;  %v6825_v32 = vld [vmem:[%s11147_s5 + $0xd8] sm:$0xff]  }
 0xb9c   :  { %6589 = vmatprep.mubr.msk.bf16.mxu1 %vm1818_vm14, %v6825_v32  ;;  %v6828_v32 = vld [vmem:[%s11147_s5 + $0xf0] sm:$0xff]  }
 0xb9e   :  { %5703 = vrot.lane.b32.xlu1 %v5701_v44, %s6891_s20 }
 0xb9f   :  { %5199 = vperm.xlu0 %6667, %v6385_v53  }
 0xba2   :  { %5818 = vperm.xlu1 %6668, %v6422_v51  }
 0xba3   :  { %5204 = vperm.xlu0 %6667, %v6386_v49  }
 0xba6   :  { %5823 = vperm.xlu1 %6668, %v6423_v39  }
 0xba7   :  { %5674 = vrot.lane.b32.xlu0 %v5672_v52, %s6892_s27 }
 0xbaa   :  { %5845 = vperm.xlu1 %6668, %v6426_v38  }
 0xbab   :  { %5732 = vrot.lane.b32.xlu0 %v6415_v36, %s6893_s16 }
 0xbae   :  { %5074 = vperm.xlu1 %6668, %v6360_v37  }
 0xbaf   :  { %5840 = vperm.xlu0 %6667, %v6425_v63  }
 0xbb2   :  { %5084 = vperm.xlu1 %6668, %v6362_v31  }
 0xbb3   :  { %5828 = vperm.xlu0 %6667, %v6424_v6  }
 0xbb7   :  { %5850 = vperm.xlu0 %6667, %v6427_v46  }
 0xbbb   :  { %5079 = vperm.xlu0 %6667, %v6361_v19  }
 0xbbf   :  { %5497 = vrot.lane.b32.xlu0 %v5495_v4, %s6894_s23 }
 0xbc8   :  { %v4835_v48 = vpop.permute.xlu1 %4834 }
 0xbc9   :  { %v4841_v56 = vmax.f32 %v10627_v16, %v4835_v48 }
 0xbcb   :  { %v4843_v58 = vpack.c.bf16 %v4841_v56, %v4841_v56 }
 0xbd1   :  { %v6736_v5 = vpop.permute.xlu0 %6735 }
 0xbd2   :  { %v6738_v24 = vunpack.i.h.bf16 %v6736_v5  ;;  %v6737_v14 = vunpack.i.l.bf16 %v6736_v5 }
 0xbd4   :  { %v4840_v10 = vmax.f32 %v10635_v62, %v6738_v24  ;;  %v4839_v33 = vmax.f32 %v10637_v18, %v6737_v14 }
 0xbd6   :  { %v4842_v55 = vpack.c.bf16 %v4840_v10, %v4839_v33 }
 0xbd8   :  { %6581 = vmatprep.mubr.msk.bf16.mxu0 %vm4904_vm7, %v4842_v55 }
 0xbd9   :  { %v10786_v26 = vpop.permute.xlu1 %4978  ;;  %6582 = vmatmul.mubr.msk.bf16.vlgmr.msra.gmra.mrb[100].mxu0 %vm4904_vm7, %v4843_v58 }
 0xbdd   :  { %v10788_v1 = vpop.permute.xlu1 %5000 }
 0xbe1   :  { %v10790_v60 = vpop.permute.xlu1 %5005 }
 0xbe2   :  { %v4974_v47 = vpop.permute.xlu0 %4973 }
 0xbe5   :  { %v10792_v59 = vpop.permute.xlu1 %5094 }
 0xbe6   :  { %v10794_v3 = vpop.permute.xlu0 %4995 }
 0xbe9   :  { %v10796_v16 = vpop.permute.xlu1 %5109 }
 0xbea   :  { %v4984_v62 = vpop.permute.xlu0 %4983 }
 0xbed   :  { %v10798_v18 = vpop.permute.xlu1 %5119 }
 0xbee   :  { %v10800_v11 = vpop.permute.xlu0 %5089 }
 0xbf1   :  { %v10802_v57 = vpop.permute.xlu1 %5114 }
 0xbf2   :  { %v10804_v21 = vpop.permute.xlu0 %5104 }
 0xbf5   :  { %v10806_v50 = vpop.permute.xlu1 %5134 }
 0xbf6   :  { %v10808_v0 = vpop.permute.xlu0 %5099 }
 0xbf9   :  { %v10810_v9 = vpop.permute.xlu1 %5149 }
 0xbfa   :  { %v10812_v40 = vpop.permute.xlu0 %5124 }
 0xbfd   :  { %v10814_v42 = vpop.permute.xlu1 %5509 }
 0xbfe   :  { %v5512_v2 = vmul.f32 0.0, %v10814_v42  ;;  %v10817_v28 = vpop.permute.xlu0 %5129 }
 0xc00   :  { %5520 = vrot.lane.b32.xlu1 %v5512_v2, %s6870_s21 }
 0xc01   :  { %v10820_v43 = vpop.permute.xlu1 %5169 }
 0xc02   :  { %v10825_v8 = vpop.permute.xlu0 %5139 }
 0xc04   :  { %5762 = vperm.xlu1 %6668, %v6416_v25  }
 0xc05   :  { %v10827_v45 = vpop.permute.xlu1 %5144 }
 0xc06   :  { %v10832_v61 = vpop.permute.xlu0 %5154 }
 0xc08   :  { %5792 = vperm.xlu1 %6668, %v6420_v34  }
 0xc09   :  { %v10837_v7 = vpop.permute.xlu1 %5179 }
 0xc0a   :  { %v10839_v29 = vpop.permute.xlu0 %5164 }
 0xc0c   :  { %5772 = vperm.xlu1 %6668, %v6418_v15  }
 0xc0d   :  { %v10847_v22 = vpop.permute.xlu1 %5587 }
 0xc0e   :  { %v10844_v27 = vpop.permute.xlu0 %5548  ;;  %v5590_v12 = vmul.f32 0.0, %v10847_v22 }
 0xc0f   :  { %v5551_v30 = vmul.f32 0.0, %v10844_v27 }
 0xc10   :  { %5797 = vperm.xlu1 %6668, %v6421_v54  }
 0xc11   :  { %5559 = vrot.lane.b32.xlu0 %v5551_v30, %s6876_s1  ;;  %v10870_v49 = vpop.permute.xlu1 %5194 }
 0xc12   :  { %v10862_v17 = vpop.permute.xlu0 %5159 }
 0xc15   :  { %5598 = vrot.lane.b32.xlu0 %v5590_v12, %s6889_s22  ;;  %v10874_v13 = vpop.permute.xlu1 %5189 }
 0xc16   :  { %v10864_v44 = vpop.permute.xlu0 %5184 }
 0xc19   :  { %5767 = vperm.xlu0 %6667, %v6417_v20   ;;  %v10878_v38 = vpop.permute.xlu1 %5645 }
 0xc1a   :  { %v10866_v53 = vpop.permute.xlu0 %5174 }
 0xc1d   :  { %5787 = vperm.xlu0 %6667, %v6419_v23   ;;  %v10882_v37 = vpop.permute.xlu1 %5703 }
 0xc1e   :  { %v10868_v51 = vpop.permute.xlu0 %5199 }
 0xc21   :  { %v10886_v31 = vpop.permute.xlu1 %5818 }
 0xc22   :  { %v10872_v39 = vpop.permute.xlu0 %5204 }
 0xc25   :  { %v5824_v46 = vpop.permute.xlu1 %5823 }
 0xc26   :  { %v10876_v52 = vpop.permute.xlu0 %5674 }
 0xc29   :  { %v5846_v25 = vpop.permute.xlu1 %5845 }
 0xc2a   :  { %v10880_v36 = vpop.permute.xlu0 %5732 }
 0xc2e   :  { %v10884_v63 = vpop.permute.xlu0 %5840 }
 0xc32   :  { %v5829_v6 = vpop.permute.xlu0 %5828 }
 0xc36   :  { %v5851_v14 = vpop.permute.xlu0 %5850 }
 0xcac   :  { %v6583_v19 = vpop.f32.mrb[100].mxu0 }
 0xcad   :  { %v4988_v41 = vmul.f32 %v6583_v19, %v4984_v62  ;;  %v5833_v4 = vmul.f32 %v6583_v19, %v5829_v6  ;;  %v10888_v48 = vpop.f32.mrb[101].mxu0  ;;  %v6829_v6 = vld [vmem:[%s11147_s5 + $0xf8] sm:$0xff]   ;;  %v6831_v19 = vld [vmem:[%s11147_s5 + $0x108] sm:$0xff]  }
 0xcae   :  { %v4986_v5 = vmul.f32 %v4974_v47, %v10888_v48  ;;  %v6584_v24 = vpop.f32.mrb[102].mxu0 }
 0xcaf   :  { %v5010_v56 = vadd.f32 %v10790_v60, %v4988_v41  ;;  %v4954_v10 = vpop.f32.mrb[103].mxu0  ;;  %v5855_v33 = vadd.f32 %v5851_v14, %v5833_v4  ;;  %v6832_v41 = vld [vmem:[%s11147_s5 + $0x110] sm:$0xff]   ;;  %v6833_v4 = vld [vmem:[%s11147_s5 + $0x118] sm:$0xff]   ;;  %v6835_v24 = vld [vmem:[%s11147_s5 + $0x128] sm:$0xff]  }
 0xcb0   :  { %v5008_v55 = vadd.f32 %v10794_v3, %v4986_v5  ;;  %v5832_v58 = vmul.f32 %v5824_v46, %v4954_v10  ;;  %v4987_v2 = vmul.f32 %v10786_v26, %v4954_v10  ;;  %v6826_v26 = vld [vmem:[%s11147_s5 + $0xe0] sm:$0xff]   ;;  %v6836_v14 = vld [vmem:[%s11147_s5 + $0x130] sm:$0xff]  }
 0xcb1   :  { %v5013_v15 = vmax.f32 %v5010_v56, 0.0  ;;  %v5858_v54 = vmax.f32 %v5855_v33, 0.0  ;;  %v6830_v46 = vld [vmem:[%s11147_s5 + $0x100] sm:$0xff]   ;;  %v6837_v56 = vld [vmem:[%s11147_s5 + $0x138] sm:$0xff]   ;;  %v5075_v33 = vpop.permute.xlu1 %5074 }
 0xcb2   :  { %v5854_v34 = vadd.f32 %v5846_v25, %v5832_v58  ;;  %v5009_v62 = vadd.f32 %v10788_v1, %v4987_v2  ;;  %v5011_v30 = vmax.f32 %v5008_v55, 0.0  ;;  %v6827_v1 = vld [vmem:[%s11147_s5 + $0xe8] sm:$0xff]   ;;  %v6834_v5 = vld [vmem:[%s11147_s5 + $0x120] sm:$0xff]  }
 0xcb3   :  { %v5043_v60 = vpack.c.bf16 %v5013_v15, %v5013_v15  ;;  %v6838_v10 = vld [vmem:[%s11147_s5 + $0x140] ss:$0 sps:$4 sm:$0xff]   ;;  %v5080_v15 = vpop.permute.xlu0 %5079  ;;  %s6895_s5 = smov 122  }
 0xcb4   :  { %v5857_v12 = vmax.f32 %v5854_v34, 0.0  ;;  %v5012_v47 = vmax.f32 %v5009_v62, 0.0 }
 0xcb5   :  { %v5318_v3 = vsel %vm1861_vm13, %v5043_v60, 0  ;;  %v5085_v55 = vpop.permute.xlu1 %5084 }
 0xcb6   :  { %v10895_v20 = vpack.i.bf16 %v5858_v54, %v5857_v12  ;;  %v5042_v23 = vpack.c.bf16 %v5012_v47, %v5011_v30 }
 0xcb8   :  { %6585 = vmatprep.subr.bf16.mxu1 %v5042_v23 }
 0xcb9   :  { %6586 = vmatpush3.bf16.msra.mxu1 %v5042_v23 }
 0xcba   :  { %6636 = vmatprep.subr.msk.bf16.mxu1 %vm1861_vm13, %v5043_v60  ;;  %vm6093_vm13 = vcmask 64512  }
 0xcbd   :  { %6588 = vmatpush3.bf16.msra.mxu1 %v5318_v3 }
 0xcc0   :  { %6590 = vmatmul.mubr.msk.bf16.vlgmr.msra.gmra.mrb[76].mxu1 %vm1818_vm14, %v6826_v26 }
 0xcc1   :  { %6593 = vmatprep.mubr.msk.bf16.mxu1 %vm1818_vm14, %v6827_v1 }
 0xcc8   :  { %6594 = vmatmul.mubr.msk.bf16.gmra.mrb[80].mxu1 %vm1818_vm14, %v6828_v32 }
 0xcc9   :  { %6597 = vmatprep.mubr.msk.bf16.mxu1 %vm1818_vm14, %v6829_v6 }
 0xcd0   :  { %6598 = vmatmul.mubr.msk.bf16.gmra.mrb[84].mxu1 %vm1818_vm14, %v6830_v46 }
 0xcd1   :  { %6601 = vmatprep.mubr.msk.bf16.mxu1 %vm1818_vm14, %v6831_v19 }
 0xcd8   :  { %6602 = vmatmul.mubr.msk.bf16.gmra.mrb[88].mxu1 %vm1818_vm14, %v6832_v41 }
 0xcd9   :  { %6605 = vmatprep.mubr.msk.bf16.mxu1 %vm1818_vm14, %v6833_v4 }
 0xce0   :  { %6606 = vmatmul.mubr.msk.bf16.gmra.mrb[92].mxu1 %vm1818_vm14, %v6834_v5 }
 0xce1   :  { %6609 = vmatprep.mubr.msk.bf16.mxu1 %vm1818_vm14, %v6835_v24 }
 0xce8   :  { %6610 = vmatmul.mubr.msk.bf16.gmra.mrb[96].mxu1 %vm1818_vm14, %v6836_v14 }
 0xce9   :  { %6613 = vmatprep.mubr.msk.bf16.mxu1 %vm1818_vm14, %v6837_v56 }
 0xcf0   :  { %6614 = vmatmul.mubr.msk.bf16.gmra.mrb[100].mxu1 %vm1818_vm14, %v6838_v10  ;;  %vm6105_vm14 = vcmask 57344  }
 0xd93   :  { %v6591_v58 = vpop.f32.mrb[76].mxu1 }
 0xd94   :  { %v5363_v2 = vadd.f32 %v6591_v58, %v5085_v55  ;;  %v5354_v25 = vpop.f32.mrb[77].mxu1 }
 0xd95   :  { %v5355_v34 = vadd.f32 %v5354_v25, %v5075_v33  ;;  %v6592_v62 = vpop.f32.mrb[78].mxu1 }
 0xd96   :  { %v10952_v54 = vsel %vm5464_vm9, %v5363_v2, 0.0  ;;  %v5366_v30 = vadd.f32 %v6592_v62, %v10800_v11  ;;  %v5357_v12 = vpop.f32.mrb[79].mxu1 }
 0xd97   :  { %v10956_v47 = vsel %vm5464_vm9, %v5355_v34, 0.0  ;;  %v5358_v23 = vadd.f32 %v5357_v12, %v5080_v15 }
 0xd98   :  { %v5468_v60 = vsel %vm5464_vm9, %v5366_v30, 0.0 }
 0xd99   :  { %v5513_v3 = vmul.f32 %v10814_v42, %v5468_v60  ;;  %v10961_v26 = vsel %vm5464_vm9, %v5358_v23, 0.0 }
 0xd9b   :  { %5522 = vrot.lane.b32.xlu0 %v5513_v3, %s6870_s21  ;;  %v6595_v1 = vpop.f32.mrb[80].mxu1 }
 0xd9c   :  { %v5379_v32 = vadd.f32 %v6595_v1, %v10804_v21  ;;  %v5370_v6 = vpop.f32.mrb[81].mxu1 }
 0xd9d   :  { %v5371_v11 = vadd.f32 %v5370_v6, %v10792_v59  ;;  %v6596_v46 = vpop.f32.mrb[82].mxu1 }
 0xd9e   :  { %v5471_v19 = vsel %vm5464_vm9, %v5379_v32, 0.0  ;;  %v5382_v41 = vadd.f32 %v6596_v46, %v10796_v16  ;;  %v5373_v4 = vpop.f32.mrb[83].mxu1 }
 0xd9f   :  { %v5552_v5 = vmul.f32 %v10844_v27, %v5471_v19  ;;  %v5469_v24 = vsel %vm5464_vm9, %v5371_v11, 0.0  ;;  %v5374_v56 = vadd.f32 %v5373_v4, %v10808_v0 }
 0xda0   :  { %v5472_v14 = vsel %vm5464_vm9, %v5382_v41, 0.0  ;;  %v5514_v59 = vmul.f32 %v10814_v42, %v5469_v24 }
 0xda1   :  { %v5553_v10 = vmul.f32 %v10844_v27, %v5472_v14  ;;  %5561 = vrot.lane.b32.xlu1 %v5552_v5, %s6876_s1  ;;  %v5470_v16 = vsel %vm5464_vm9, %v5374_v56, 0.0 }
 0xda2   :  { %v5515_v62 = vmul.f32 %v10814_v42, %v5470_v16 }
 0xda3   :  { %5563 = vrot.lane.b32.xlu0 %v5553_v10, %s6876_s1  ;;  %v6599_v21 = vpop.f32.mrb[84].mxu1 }
 0xda4   :  { %v5395_v33 = vadd.f32 %v6599_v21, %v10812_v40  ;;  %v5386_v55 = vpop.f32.mrb[85].mxu1 }
 0xda5   :  { %v5387_v58 = vadd.f32 %v5386_v55, %v10802_v57  ;;  %v6600_v2 = vpop.f32.mrb[86].mxu1  ;;  %5524 = vrot.lane.b32.xlu1 %v5514_v59, %s6870_s21 }
 0xda6   :  { %v5475_v0 = vsel %vm5464_vm9, %v5395_v33, 0.0  ;;  %v5398_v25 = vadd.f32 %v6600_v2, %v10817_v28  ;;  %v5389_v34 = vpop.f32.mrb[87].mxu1 }
 0xda7   :  { %v5592_v15 = vmul.f32 %v10847_v22, %v5475_v0  ;;  %v5473_v30 = vsel %vm5464_vm9, %v5387_v58, 0.0  ;;  %v5390_v40 = vadd.f32 %v5389_v34, %v10798_v18 }
 0xda8   :  { %v5476_v12 = vsel %vm5464_vm9, %v5398_v25, 0.0  ;;  %v5554_v57 = vmul.f32 %v10844_v27, %v5473_v30 }
 0xda9   :  { %5602 = vrot.lane.b32.xlu0 %v5592_v15, %s6889_s22  ;;  %5526 = vrot.lane.b32.xlu1 %v5515_v62, %s6870_s21  ;;  %v5593_v23 = vmul.f32 %v10847_v22, %v5476_v12  ;;  %v5474_v60 = vsel %vm5464_vm9, %v5390_v40, 0.0 }
 0xdaa   :  { %v5591_v32 = vmul.f32 %v10847_v22, %v5474_v60 }
 0xdab   :  { %v6603_v28 = vpop.f32.mrb[88].mxu1 }
 0xdac   :  { %v5402_v42 = vpop.f32.mrb[89].mxu1  ;;  %v5411_v27 = vadd.f32 %v6603_v28, %v10827_v45 }
 0xdad   :  { %v5403_v3 = vadd.f32 %v5402_v42, %v10806_v50  ;;  %5604 = vrot.lane.b32.xlu0 %v5593_v23, %s6889_s22  ;;  %v6604_v1 = vpop.f32.mrb[90].mxu1  ;;  %5565 = vrot.lane.b32.xlu1 %v5554_v57, %s6876_s1 }
 0xdae   :  { %v5405_v18 = vpop.f32.mrb[91].mxu1  ;;  %v5414_v11 = vadd.f32 %v6604_v1, %v10810_v9  ;;  %v5479_v50 = vsel %vm5464_vm9, %v5411_v27, 0.0 }
 0xdaf   :  { %v5477_v6 = vsel %vm5464_vm9, %v5403_v3, 0.0  ;;  %v5406_v19 = vadd.f32 %v5405_v18, %v10825_v8 }
 0xdb0   :  { %v5480_v14 = vsel %vm5464_vm9, %v5414_v11, 0.0 }
 0xdb1   :  { %5625 = vrot.lane.b32.xlu0 %v5477_v6, %s6894_s23  ;;  %5600 = vrot.lane.b32.xlu1 %v5591_v32, %s6889_s22  ;;  %v5478_v56 = vsel %vm5464_vm9, %v5406_v19, 0.0 }
 0xdb3   :  { %v6607_v46 = vpop.f32.mrb[92].mxu1 }
 0xdb4   :  { %v5427_v41 = vadd.f32 %v6607_v46, %v10839_v29  ;;  %v5418_v4 = vpop.f32.mrb[93].mxu1 }
 0xdb5   :  { %v5419_v22 = vadd.f32 %v5418_v4, %v10832_v61  ;;  %v6608_v5 = vpop.f32.mrb[94].mxu1  ;;  %5629 = vrot.lane.b32.xlu1 %v5479_v50, %s6894_s23  ;;  %v5648_v61 = vmul.f32 %v10878_v38, %v5480_v14 }
 0xdb6   :  { %v5483_v45 = vsel %vm5464_vm9, %v5427_v41, 0.0  ;;  %v5421_v24 = vpop.f32.mrb[95].mxu1  ;;  %v5430_v8 = vadd.f32 %v6608_v5, %v10820_v43 }
 0xdb7   :  { %v5677_v9 = vmul.f32 %v10876_v52, %v5483_v45  ;;  %v5481_v10 = vsel %vm5464_vm9, %v5419_v22, 0.0  ;;  %v5422_v29 = vadd.f32 %v5421_v24, %v10862_v17 }
 0xdb8   :  { %v5649_v59 = vmul.f32 %v10878_v38, %v5481_v10  ;;  %v5484_v16 = vsel %vm5464_vm9, %v5430_v8, 0.0 }
 0xdb9   :  { %5683 = vrot.lane.b32.xlu0 %v5677_v9, %s6882_s2  ;;  %5627 = vrot.lane.b32.xlu1 %v5478_v56, %s6894_s23  ;;  %v5482_v33 = vsel %vm5464_vm9, %v5422_v29, 0.0  ;;  %v5678_v17 = vmul.f32 %v10876_v52, %v5484_v16 }
 0xdba   :  { %v5650_v0 = vmul.f32 %v10878_v38, %v5482_v33 }
 0xdbb   :  { %v6611_v21 = vpop.f32.mrb[96].mxu1 }
 0xdbc   :  { %v5443_v55 = vadd.f32 %v6611_v21, %v10864_v44  ;;  %v5434_v58 = vpop.f32.mrb[97].mxu1 }
 0xdbd   :  { %v6612_v2 = vpop.f32.mrb[98].mxu1  ;;  %5656 = vrot.lane.b32.xlu0 %v5649_v59, %s6895_s5  ;;  %5654 = vrot.lane.b32.xlu1 %v5648_v61, %s6895_s5  ;;  %v5435_v62 = vadd.f32 %v5434_v58, %v10866_v53 }
 0xdbe   :  { %v5437_v43 = vpop.f32.mrb[99].mxu1  ;;  %v5487_v34 = vsel %vm5464_vm9, %v5443_v55, 0.0  ;;  %v5446_v3 = vadd.f32 %v6612_v2, %v10874_v13 }
 0xdbf   :  { %v5438_v25 = vadd.f32 %v5437_v43, %v10837_v7  ;;  %v5707_v30 = vmul.f32 %v10882_v37, %v5487_v34  ;;  %v5485_v40 = vsel %vm5464_vm9, %v5435_v62, 0.0 }
 0xdc0   :  { %v5679_v28 = vmul.f32 %v10876_v52, %v5485_v40  ;;  %v5831_v52 = vmul.f32 %v10886_v31, %v10888_v48  ;;  %v5488_v32 = vsel %vm5464_vm9, %v5446_v3, 0.0  ;;  %v5521_v31 = vpop.permute.xlu1 %5520  ;;  %v5498_v48 = vpop.permute.xlu0 %5497 }
 0xdc1   :  { %v5486_v15 = vsel %vm5464_vm9, %v5438_v25, 0.0  ;;  %5658 = vrot.lane.b32.xlu0 %v5650_v0, %s6895_s5  ;;  %5685 = vrot.lane.b32.xlu1 %v5678_v17, %s6882_s2  ;;  %v5708_v6 = vmul.f32 %v10882_v37, %v5488_v32  ;;  %v5500_v61 = vmul.f32 0.0, %v5498_v48  ;;  %v5501_v59 = vmul.f32 %v5498_v48, %v10956_v47 }
 0xdc2   :  { %v5706_v44 = vmul.f32 %v10882_v37, %v5486_v15  ;;  %v5853_v13 = vadd.f32 %v10884_v63, %v5831_v52  ;;  %v5502_v43 = vmul.f32 %v5498_v48, %v10961_v26 }
 0xdc3   :  { %v6615_v12 = vpop.f32.mrb[100].mxu1 }
 0xdc4   :  { %v5450_v57 = vpop.f32.mrb[101].mxu1  ;;  %v5459_v38 = vadd.f32 %v6615_v12, %v10872_v39  ;;  %v5856_v27 = vmax.f32 %v5853_v13, 0.0  ;;  %v11056_v11 = vpop.permute.xlu1 %5762 }
 0xdc5   :  { %v5451_v7 = vadd.f32 %v5450_v57, %v10870_v49  ;;  %v6616_v23 = vpop.f32.mrb[102].mxu1  ;;  %5714 = vrot.lane.b32.xlu0 %v5707_v30, %s6887_s0  ;;  %5712 = vrot.lane.b32.xlu1 %v5706_v44, %s6887_s0 }
 0xdc6   :  { %v5453_v53 = vpop.f32.mrb[103].mxu1  ;;  %v5491_v39 = vsel %vm5464_vm9, %v5459_v38, 0.0 }
 0xdc7   :  { %v5489_v60 = vsel %vm5464_vm9, %v5451_v7, 0.0  ;;  %v5454_v42 = vadd.f32 %v5453_v53, %v10868_v51  ;;  %v5737_v51 = vmul.f32 %v10880_v36, %v5491_v39 }
 0xdc8   :  { %v5735_v1 = vmul.f32 %v10880_v36, %v5489_v60  ;;  %v11058_v46 = vpop.permute.xlu1 %5792  ;;  %v5503_v60 = vmul.f32 %v5498_v48, %v10952_v54 }
 0xdc9   :  { %v5490_v49 = vsel %vm5464_vm9, %v5454_v42, 0.0  ;;  %5687 = vrot.lane.b32.xlu0 %v5679_v28, %s6882_s2 }
 0xdca   :  { %v5736_v18 = vmul.f32 %v10880_v36, %v5490_v49  ;;  %5741 = vrot.lane.b32.xlu1 %v5735_v1, %s6888_s30  ;;  %v5560_v36 = vpop.permute.xlu0 %5559 }
 0xdcc   :  { %v11062_v63 = vpop.permute.xlu1 %5772 }
 0xdcd   :  { %5743 = vrot.lane.b32.xlu0 %v5736_v18, %s6888_s30 }
 0xdce   :  { %5745 = vrot.lane.b32.xlu1 %v5737_v51, %s6888_s30  ;;  %v11060_v50 = vpop.permute.xlu0 %5598 }
 0xdd0   :  { %v11066_v19 = vpop.permute.xlu1 %5797 }
 0xdd1   :  { %5716 = vrot.lane.b32.xlu0 %v5708_v6, %s6887_s0 }
 0xdd2   :  { %6740 = vrot.lane.b32.xlu1 %v10895_v20, %s6894_s23  ;;  %v11064_v37 = vpop.permute.xlu0 %5767 }
 0xdd5   :  { %5862 = vrot.lane.b32.xlu0 %v5856_v27, %s6894_s23 }
 0xdd6   :  { %v11068_v41 = vpop.permute.xlu0 %5787 }
 0xe0d   :  { %v5523_v20 = vpop.permute.xlu0 %5522 }
 0xe0e   :  { %v5528_v29 = vsel %vm519_vm2, %v5521_v31, %v5523_v20  ;;  %v5538_v33 = vadd.f32 %v5523_v20, %v5501_v59 }
 0xe0f   :  { %v5537_v16 = vadd.f32 %v5528_v29, %v5500_v61 }
 0xe13   :  { %v5562_v4 = vpop.permute.xlu1 %5561 }
 0xe14   :  { %v5567_v21 = vsel %vm651_vm8, %v5560_v36, %v5562_v4  ;;  %v5577_v25 = vadd.f32 %v5562_v4, %v5538_v33 }
 0xe15   :  { %v5564_v22 = vpop.permute.xlu0 %5563  ;;  %v5576_v0 = vadd.f32 %v5567_v21, %v5537_v16 }
 0xe16   :  { %v5568_v12 = vsel %vm651_vm8, %v5560_v36, %v5564_v22 }
 0xe17   :  { %v5525_v5 = vpop.permute.xlu1 %5524 }
 0xe18   :  { %v5529_v55 = vsel %vm519_vm2, %v5521_v31, %v5525_v5  ;;  %v5540_v62 = vadd.f32 %v5525_v5, %v5502_v43 }
 0xe19   :  { %v5539_v34 = vadd.f32 %v5529_v55, %v5500_v61 }
 0xe1a   :  { %v5579_v57 = vadd.f32 %v5564_v22, %v5540_v62 }
 0xe1b   :  { %v5603_v45 = vpop.permute.xlu0 %5602  ;;  %v5527_v24 = vpop.permute.xlu1 %5526  ;;  %v5578_v40 = vadd.f32 %v5568_v12, %v5539_v34 }
 0xe1c   :  { %v5608_v38 = vsel %vm5606_vm10, %v11060_v50, %v5603_v45  ;;  %v5530_v26 = vsel %vm519_vm2, %v5521_v31, %v5527_v24  ;;  %v5619_v49 = vadd.f32 %v5603_v45, %v5579_v57  ;;  %v5542_v52 = vadd.f32 %v5527_v24, %v5503_v60 }
 0xe1d   :  { %v5618_v39 = vadd.f32 %v5608_v38, %v5578_v40  ;;  %v5541_v18 = vadd.f32 %v5530_v26, %v5500_v61  ;;  %vm5903_vm2 = vcmask 39936  }
 0xe1f   :  { %v5566_v14 = vpop.permute.xlu1 %5565  ;;  %v5605_v9 = vpop.permute.xlu0 %5604 }
 0xe20   :  { %v5569_v42 = vsel %vm651_vm8, %v5560_v36, %v5566_v14  ;;  %v5581_v6 = vadd.f32 %v5566_v14, %v5542_v52  ;;  %v5609_v54 = vsel %vm5606_vm10, %v11060_v50, %v5605_v9  ;;  %vm6017_vm8 = vcmask 1044480  }
 0xe21   :  { %v5580_v13 = vadd.f32 %v5569_v42, %v5541_v18 }
 0xe22   :  { %v5621_v45 = vadd.f32 %v5605_v9, %v5581_v6 }
 0xe23   :  { %v5601_v56 = vpop.permute.xlu1 %5600  ;;  %v5626_v10 = vpop.permute.xlu0 %5625 }
 0xe24   :  { %v5607_v17 = vsel %vm5606_vm10, %v11060_v50, %v5601_v56  ;;  %v5617_v47 = vadd.f32 %v5601_v56, %v5577_v25 }
 0xe25   :  { %v5616_v15 = vadd.f32 %v5607_v17, %v5576_v0 }
 0xe26   :  { %v5635_v23 = vadd.f32 %v5626_v10, %v5617_v47 }
 0xe27   :  { %v5630_v8 = vpop.permute.xlu1 %5629  ;;  %v5634_v7 = vadd.f32 %v5626_v10, %v5616_v15  ;;  %v5620_v10 = vadd.f32 %v5609_v54, %v5580_v13  ;;  %v6840_v54 = vld [vmem:[%s11153_s11 + $0x20] ss:$0 sps:$4 sm:$0xff]  }
 0xe28   :  { %v5639_v16 = vadd.f32 %v5630_v8, %v5621_v45 }
 0xe29   :  { %v5638_v14 = vadd.f32 %v5630_v8, %v5620_v10 }
 0xe2b   :  { %v5684_v58 = vpop.permute.xlu0 %5683  ;;  %v5628_v2 = vpop.permute.xlu1 %5627 }
 0xe2c   :  { %v5636_v27 = vadd.f32 %v5628_v2, %v5618_v39  ;;  %v5637_v31 = vadd.f32 %v5628_v2, %v5619_v49 }
 0xe2f   :  { %v5657_v44 = vpop.permute.xlu0 %5656  ;;  %v5655_v30 = vpop.permute.xlu1 %5654 }
 0xe30   :  { %v5663_v3 = vadd.f32 %v5655_v30, %v5634_v7  ;;  %v5664_v1 = vadd.f32 %v5655_v30, %v5635_v23  ;;  %v5665_v22 = vadd.f32 %v5657_v44, %v5636_v27  ;;  %v5666_v5 = vadd.f32 %v5657_v44, %v5637_v31 }
 0xe32   :  { %v5692_v20 = vadd.f32 %v5684_v58, %v5663_v3  ;;  %v5693_v4 = vadd.f32 %v5684_v58, %v5664_v1  ;;  %v6839_v3 = vld [vmem:[%s11153_s11 + $0x18] sm:$0xff]  }
 0xe33   :  { %v5659_v53 = vpop.permute.xlu0 %5658  ;;  %v5686_v28 = vpop.permute.xlu1 %5685  ;;  %6623 = vmatprep.mubr.msk.bf16.mxu0 %vm3190_vm15, %v6839_v3 }
 0xe34   :  { %v5694_v29 = vadd.f32 %v5686_v28, %v5665_v22  ;;  %v5695_v24 = vadd.f32 %v5686_v28, %v5666_v5  ;;  %v5667_v50 = vadd.f32 %v5659_v53, %v5638_v14  ;;  %v5668_v17 = vadd.f32 %v5659_v53, %v5639_v16 }
 0xe37   :  { %v5715_v32 = vpop.permute.xlu0 %5714  ;;  %v5713_v51 = vpop.permute.xlu1 %5712 }
 0xe38   :  { %v5721_v48 = vadd.f32 %v5713_v51, %v5692_v20  ;;  %v5722_v36 = vadd.f32 %v5713_v51, %v5693_v4  ;;  %v5723_v33 = vadd.f32 %v5715_v32, %v5694_v29  ;;  %v5724_v55 = vadd.f32 %v5715_v32, %v5695_v24  ;;  %v6841_v29 = vld [vmem:[%s11159_s17] sm:$0xff]  }
 0xe3b   :  { %v5688_v56 = vpop.permute.xlu0 %5687 }
 0xe3c   :  { %v5742_v61 = vpop.permute.xlu1 %5741  ;;  %v5696_v62 = vadd.f32 %v5688_v56, %v5667_v50  ;;  %v5697_v15 = vadd.f32 %v5688_v56, %v5668_v17 }
 0xe3d   :  { %v5750_v59 = vadd.f32 %v5742_v61, %v5721_v48  ;;  %v5751_v21 = vadd.f32 %v5742_v61, %v5722_v36  ;;  %v6842_v61 = vld [vmem:[%s11159_s17 + $0x8] sm:$0x3f]  }
 0xe3f   :  { %v5775_v58 = vmul.f32 %v11056_v11, %v5750_v59  ;;  %v5776_v2 = vmul.f32 %v11056_v11, %v5751_v21  ;;  %v5744_v43 = vpop.permute.xlu0 %5743  ;;  %v6019_v59 = vsel %vm6017_vm8, 4294967295, %v11728_v35  ;;  %v6072_v35 = vld [vmem:[%s11734_s29] sm:$0xff] }
 0xe40   :  { %v5752_v0 = vadd.f32 %v5744_v43, %v5723_v33  ;;  %v5753_v25 = vadd.f32 %v5744_v43, %v5724_v55  ;;  %v5746_v26 = vpop.permute.xlu1 %5745  ;;  %v6020_v14 = vsel %vm6018_vm11, %v6019_v59, 0  ;;  %v6073_v33 = vld [vmem:[%s11734_s29 + $0x8] sm:$0xff] }
 0xe41   :  { %v5800_v9 = vadd.f32 %v11068_v41, %v5775_v58  ;;  %v5801_v34 = vadd.f32 %v11068_v41, %v5776_v2  ;;  %v6022_v16 = vand.u32 %v6842_v61, %v6020_v14 }
 0xe42   :  { %v5777_v47 = vmul.f32 %v11064_v37, %v5752_v0  ;;  %v5778_v8 = vmul.f32 %v11064_v37, %v5753_v25  ;;  %v6074_v0 = vld [vmem:[%s11734_s29 + $0x10] sm:$0xff] }
 0xe43   :  { %v5717_v44 = vpop.permute.xlu0 %5716  ;;  %v5806_v57 = vmax.f32 %v5800_v9, 0.0  ;;  %v5807_v38 = vmax.f32 %v5801_v34, 0.0 }
 0xe44   :  { %v5802_v30 = vadd.f32 %v11058_v46, %v5777_v47  ;;  %v5803_v11 = vadd.f32 %v11058_v46, %v5778_v8  ;;  %v5725_v12 = vadd.f32 %v5717_v44, %v5696_v62  ;;  %v5726_v40 = vadd.f32 %v5717_v44, %v5697_v15  ;;  %v6741_v39 = vpop.permute.xlu1 %6740 }
 0xe45   :  { %v6743_v52 = vunpack.i.h.bf16 %v6741_v39  ;;  %v6742_v32 = vunpack.i.l.bf16 %v6741_v39 }
 0xe46   :  { %v5808_v7 = vmax.f32 %v5802_v30, 0.0  ;;  %v5809_v23 = vmax.f32 %v5803_v11, 0.0  ;;  %v5754_v53 = vadd.f32 %v5746_v26, %v5725_v12  ;;  %v5755_v41 = vadd.f32 %v5746_v26, %v5726_v40 }
 0xe47   :  { %v5879_v6 = vpack.c.bf16 %v6743_v52, %v6742_v32 }
 0xe48   :  { %v5779_v28 = vmul.f32 %v11062_v63, %v5754_v53  ;;  %v5780_v60 = vmul.f32 %v11062_v63, %v5755_v41  ;;  %v5875_v42 = vpack.c.bf16 %v5808_v7, %v5806_v57  ;;  %v5876_v37 = vpack.c.bf16 %v5809_v23, %v5807_v38  ;;  %v5863_v63 = vpop.permute.xlu0 %5862 }
 0xe4a   :  { %v5804_v46 = vadd.f32 %v11066_v19, %v5779_v28  ;;  %v5805_v1 = vadd.f32 %v11066_v19, %v5780_v60  ;;  %5893 = vrot.lane.b32.xlu0 %v5875_v42, %s6893_s16  ;;  %5895 = vrot.lane.b32.xlu1 %v5876_v37, %s6893_s16 }
 0xe4c   :  { %v5810_v49 = vmax.f32 %v5804_v46, 0.0  ;;  %v5811_v18 = vmax.f32 %v5805_v1, 0.0 }
 0xe4e   :  { %v5877_v51 = vpack.c.bf16 %v5863_v63, %v5810_v49  ;;  %v5878_v13 = vpack.c.bf16 %v5863_v63, %v5811_v18 }
 0xe50   :  { %5897 = vrot.lane.b32.xlu0 %v5877_v51, %s6893_s16  ;;  %5899 = vrot.lane.b32.xlu1 %v5878_v13, %s6893_s16 }
 0xe54   :  { %5901 = vrot.lane.b32.xlu0 %v5879_v6, %s6893_s16 }
 0xebc   :  { %v5894_v19 = vpop.permute.xlu0 %5893  ;;  %v5896_v27 = vpop.permute.xlu1 %5895 }
 0xebd   :  { %v5904_v31 = vsel %vm5903_vm2, %v5894_v19, %v5896_v27 }
 0xebe   :  { %6617 = vmatprep.subr.bf16.mxu0 %v5904_v31 }
 0xebf   :  { %6618 = vmatpush3.bf16.msra.mxu0 %v5904_v31 }
 0xec2   :  { %v5898_v20 = vpop.permute.xlu0 %5897  ;;  %v5900_v4 = vpop.permute.xlu1 %5899 }
 0xec3   :  { %v5905_v22 = vsel %vm5903_vm2, %v5898_v20, %v5900_v4 }
 0xec4   :  { %6619 = vmatprep.subr.bf16.mxu0 %v5905_v22 }
 0xec5   :  { %6620 = vmatpush3.bf16.msra.mxu0 %v5905_v22 }
 0xec6   :  { %v5902_v5 = vpop.permute.xlu0 %5901 }
 0xec7   :  { %6621 = vmatprep.subr.bf16.mxu0 %v5902_v5 }
 0xec9   :  { %6622 = vmatpush3.bf16.msra.mxu0 %v5902_v5 }
 0xeca   :  { %6627 = vmatprep.subr.bf16.mxu0 %v6841_v29 }
 0xecc   :  { %6624 = vmatmul.mubr.msk.bf16.vlgmr.msra.gmra.mrb[104].mxu0 %vm3190_vm15, %v6840_v54 }
 0xecd   :  { %6628 = vmatpush3.bf16.msra.mxu0 %v6841_v29 }
 0xece   :  { %6629 = vmatprep.subr.bf16.mxu0 %v6022_v16 }
 0xed1   :  { %6630 = vmatpush3.bf16.msra.mxu0 %v6022_v16 }
 0xf9f   :  { %v6625_v48 = vpop.f32.mrb[104].mxu0 }
 0xfa0   :  { %5970 = vrot.lane.b32.xlu0 %v6625_v48, %s6870_s21  ;;  %v5949_v36 = vpop.f32.mrb[105].mxu0 }
 0xfa1   :  { %v6626_v56 = vpop.f32.mrb[106].mxu0 }
 0xfa2   :  { %v5952_v10 = vpop.f32.mrb[107].mxu0 }
 0xfa3   :  { %v6744_v45 = vpack.i.bf16 %v5952_v10, %v5949_v36 }
 0xfa5   :  { %6745 = vrot.lane.b32.xlu1 %v6744_v45, %s6870_s21 }
0x1012   :  { %v5971_v24 = vpop.permute.xlu0 %5970 }
0x1013   :  { %v5977_v21 = vmax.f32 %v6625_v48, %v5971_v24 }
0x1015   :  { %5985 = vrot.lane.b32.xlu0 %v5977_v21, %s6889_s22 }
0x1017   :  { %v6746_v55 = vpop.permute.xlu1 %6745 }
0x1018   :  { %v6748_v58 = vunpack.i.h.bf16 %v6746_v55  ;;  %v6747_v2 = vunpack.i.l.bf16 %v6746_v55 }
0x1019   :  { %6082 = vperm.xlu0 %6667, %v6073_v33  }
0x101a   :  { %v5976_v43 = vmax.f32 %v5952_v10, %v6748_v58  ;;  %v5975_v50 = vmax.f32 %v5949_v36, %v6747_v2 }
0x101c   :  { %v6749_v17 = vpack.i.bf16 %v5976_v43, %v5975_v50 }
0x101e   :  { %6750 = vrot.lane.b32.xlu1 %v6749_v17, %s6889_s22  ;;  %s6896_s22 = smov [#allocation2]  }
0x101f   :  { %s6113_s25 = sshll.u32 %s6896_s22, 4  ;;  %s6114_s25 = int_to_ptr.vmem [resolvable:$true] %s6113_s25 }
0x1020   :  { %s6843_s4 = scalar_lea.vmem %s6114_s25, 16  ;;  %s6847_s15 = scalar_lea.vmem %s6114_s25, 32 }
0x1021   :  { %p6844_p0 = scmp.ne.s32.totalorder %s6114_s25, %s6843_s4  ;;  %p6848_p1 = scmp.lt.s32.totalorder %s6114_s25, %s6114_s25 }
0x1022   :  { %6077 = vperm.xlu1 %6668, %v6072_v35   ;;  %p6849_p2 = scmp.lt.s32.totalorder %s6847_s15, %s6843_s4 }
0x1024   :  { %p6850_p3 = por %p6849_p2, %p6848_p1 }
0x1026   :  { %6087 = vperm.xlu1 %6668, %v6074_v0   ;;  %p6851_p4 = pnand %p6850_p3, %p6844_p0 }
0x1087   :  { %v5986_v25 = vpop.permute.xlu0 %5985 }
0x1088   :  { %v5992_v15 = vmax.f32 %v5977_v21, %v5986_v25 }
0x108a   :  { %v5994_v30 = vpack.c.bf16 %v5992_v15, %v5992_v15 }
0x1090   :  { %v6751_v9 = vpop.permute.xlu1 %6750 }
0x1091   :  { %v6753_v34 = vunpack.i.h.bf16 %v6751_v9  ;;  %v6752_v62 = vunpack.i.l.bf16 %v6751_v9 }
0x1093   :  { %v5991_v47 = vmax.f32 %v5976_v43, %v6753_v34  ;;  %v5990_v8 = vmax.f32 %v5975_v50, %v6752_v62 }
0x1095   :  { %v5993_v44 = vpack.c.bf16 %v5991_v47, %v5990_v8 }
0x1097   :  { %6631 = vmatprep.mubr.msk.bf16.mxu0 %vm6010_vm12, %v5993_v44 }
0x1098   :  { %6632 = vmatmul.mubr.msk.bf16.vlgmr.msra.gmra.mrb[108].mxu0 %vm6010_vm12, %v5994_v30  ;;  %v6083_v57 = vpop.permute.xlu0 %6082 }
0x10a1   :  { %v6078_v11 = vpop.permute.xlu1 %6077 }
0x10a5   :  { %v6088_v7 = vpop.permute.xlu1 %6087 }
0x116b   :  { %v6633_v12 = vpop.f32.mrb[108].mxu0 }
0x116c   :  { %v6058_v40 = vpop.f32.mrb[109].mxu0  ;;  %v6092_v53 = vmul.f32 %v6633_v12, %v6088_v7 }
0x116d   :  { %v6090_v38 = vmul.f32 %v6078_v11, %v6058_v40  ;;  %v6634_v26 = vpop.f32.mrb[110].mxu0 }
0x116e   :  { %v6061_v23 = vpop.f32.mrb[111].mxu0  ;;  %v6097_v37 = vsel %vm6093_vm13, %v6092_v53, 0.0 }
0x116f   :  { %v6091_v41 = vmul.f32 %v6083_v57, %v6061_v23  ;;  %v6094_v28 = vsel %vm6093_vm13, %v6090_v38, 0.0 }
0x1171   :  { %v6095_v60 = vsel %vm6093_vm13, %v6091_v41, 0.0 }
0x1172   :  { %v6096_v42 = vadd.f32 %v6095_v60, %v6094_v28 }
0x1174   :  { %v6098_v3 = vadd.f32 %v6097_v37, %v6096_v42 }
0x1176   :  { %v6099_v46 = vrot.slane %v6098_v3, 4 }
0x1178   :  { %v6100_v1 = vadd.f32 %v6099_v46, %v6098_v3 }
0x117a   :  { %v6101_v39 = vrot.slane %v6100_v1, 2 }
0x117c   :  { %v6102_v49 = vadd.f32 %v6101_v39, %v6100_v1 }
0x117e   :  { %v6103_v18 = vrot.slane %v6102_v49, 1 }
0x1180   :  { %v6104_v63 = vadd.f32 %v6103_v18, %v6102_v49 }
0x1182   :  { %6106 = vst.msk [vmem:[#allocation2] sm:$0x1] %vm6105_vm14, %v6104_v63 }
0x1183   :  { %6854 = shalt.err (!%p6851_p4)
}
0x1184   :  { %s6855_s26 = scalar_lea.hbm %s11160_s18, 16 }
0x1185   :  { %p6856_p5 = scmp.ne.s32.totalorder %s11160_s18, %s6855_s26  ;;  %p6859_p6 = scmp.lt.u32.totalorder %s6855_s26, %s11160_s18 }
0x1187   :  { %p6861_p7 = pnand %p6859_p6, %p6856_p5 }
0x1189   :  { %6864 = shalt.err (!%p6861_p7)
}
0x118a   :  { %6116 = dma.vmem_to_hbm [thread:$0]  %s6114_s25, 16, %s11160_s18, [#allocation3]  }
0x118b   :  { %6865 = dma.done.wait [#allocation3], 16  }
0x118c   :  { %6866 = vsyncadd [#allocation3], 4294967280 }
0x118d   :  { %6120 = vsyncpa [#allocation3], 1 }

</bundles_post_ra>
